<compile_context>
chip_gen: v5e
topology: v5e:2x2
jax: 0.10.0
libtpu: 0.0.40
codegen_flags: <defaults>
</compile_context>

<pallas_src>
import functools

import jax
import jax.numpy as jnp
from jax.experimental import pallas as pl
from jax.experimental.pallas import tpu as pltpu


_WPAD = 8  # sublane-aligned halo offset for the f32 y1 scratch (W axis)


# ----------------------------------------------------------------------------
# Fused Pallas kernel: whole basic block for one image per grid step
# ----------------------------------------------------------------------------
def _fused_basic_block_kernel(x_ref, w1_ref, w2_ref, s1_ref, b1_ref,
                              s2_ref, b2_ref, o_ref, y1_scr, *, abit):
    _, ho, wo, cp = o_ref.shape          # output block (1, Ho, Wo, Cpad)

    # ---- conv1 as 9 shifted MXU matmuls (bf16 operands, f32 accumulation) ----
    acc = jnp.zeros((ho * wo, cp), jnp.float32)
    for t in range(9):
        dh, dw = divmod(t, 3)
        patch = x_ref[0, pl.ds(dh, ho), pl.ds(dw, wo), :].astype(jnp.bfloat16)
        acc = acc + jnp.dot(patch.reshape(ho * wo, cp), w1_ref[t],
                            preferred_element_type=jnp.float32)

    # bn1 (scale also carries the 1/n_w weight-dequant factor) -> relu -> act_q1
    y1 = jnp.maximum(acc * s1_ref[...] + b1_ref[...], 0.0)
    if abit < 32:
        n_a = float(2 ** abit - 1)
        y1 = jnp.round(jnp.clip(y1, 0.0, 1.0) * n_a)   # integer codes 0..n_a

    # Stash the quantized activation (with a zero halo) in VMEM scratch.
    # The interior store is sublane-aligned (W offset = 8); y1 never hits HBM.
    y1_scr[...] = jnp.zeros(y1_scr.shape, y1_scr.dtype)
    y1_scr[pl.ds(1, ho), pl.ds(_WPAD, wo), :] = y1.reshape(ho, wo, cp)

    # ---- conv2 as 9 shifted MXU matmuls over the VMEM-resident y1 codes ----
    acc2 = jnp.zeros((ho * wo, cp), jnp.float32)
    for t in range(9):
        dh, dw = divmod(t, 3)
        patch = y1_scr[pl.ds(dh, ho), pl.ds(_WPAD - 1 + dw, wo), :]
        patch = patch.reshape(ho * wo, cp).astype(jnp.bfloat16)
        acc2 = acc2 + jnp.dot(patch, w2_ref[t],
                              preferred_element_type=jnp.float32)

    # bn2 (scale carries 1/(n_w*n_a)) -> act_q2 -> +identity -> relu
    y2 = acc2 * s2_ref[...] + b2_ref[...]
    if abit < 32:
        n_a = float(2 ** abit - 1)
        y2 = jnp.round(jnp.clip(y2, 0.0, 1.0) * n_a) * (1.0 / n_a)

    identity = x_ref[0, pl.ds(1, ho), pl.ds(1, wo), :].reshape(ho * wo, cp)
    o_ref[0] = jnp.maximum(y2 + identity, 0.0).reshape(ho, wo, cp)


# ----------------------------------------------------------------------------
# Plain-JAX glue: DoReFa codes, weight layout, BN folding
# ----------------------------------------------------------------------------
def _round_up(v, m):
    return (v + m - 1) // m * m


def _dorefa_weight_codes(w, wbit):
    """DoReFa weight quantization returned as integer codes (w_q = codes / n)."""
    if wbit >= 32:
        return w.astype(jnp.float32)                    # no quantization; n_w == 1
    n = float(2 ** wbit - 1)
    wt = jnp.tanh(w)
    m = jnp.maximum(2.0 * jnp.max(jnp.abs(wt)), 1e-12)  # eps guards all-zero weights
    wn = wt / m + 0.5                                   # in [0, 1]
    return 2.0 * jnp.round(wn * n) - n                  # integers in [-n, n]


def _weights_to_tap_matrices(wc, cpad):
    # (Cout, Cin, 3, 3) -> (9, Cin, Cout) -> zero-pad channels to cpad -> bf16
    cout, cin, kh, kw = wc.shape
    m = jnp.transpose(wc, (2, 3, 1, 0)).reshape(kh * kw, cin, cout)
    m = jnp.pad(m, ((0, 0), (0, cpad - cin), (0, cpad - cout)))
    return m.astype(jnp.bfloat16)


def _fold_bn(gamma, beta, mean, var, cpad, dequant_scale, eps=1e-5):
    s = gamma / jnp.sqrt(var + eps)
    b = beta - mean * s
    s = s * dequant_scale                               # fold 1/n dequant factors
    s = jnp.pad(s, (0, cpad - s.shape[0])).reshape(1, cpad)
    b = jnp.pad(b, (0, cpad - b.shape[0])).reshape(1, cpad)
    return s.astype(jnp.float32), b.astype(jnp.float32)


# ----------------------------------------------------------------------------
# quant_BasicBlock forward
# ----------------------------------------------------------------------------
def quant_basic_block_forward(x_nchw, params, *, wbit, abit, stride=1, p=1.0):
    """Forward pass of quant_BasicBlock (downsample=None).

    x_nchw: (N, Cin, H, W) float32, PyTorch layout.
    Returns: (N, planes, H, W) float32, PyTorch layout.
    """
    # TODO(synk): the `p` argument of activation_quantize_fn has no definition
    # in the provided source; standard DoReFa activation quantization is used
    # and `p` is accepted but unused.
    del p
    if stride != 1:
        raise ValueError("downsample=None requires stride == 1")

    n_batch, cin, h, w = x_nchw.shape
    planes = params["conv1_w"].shape[0]
    if cin != planes:
        raise ValueError("downsample=None requires inplanes == planes")

    cpad = _round_up(max(cin, planes), 128)             # lane-dense channels / K
    ho, wo = h, w                                       # k=3, pad=1, stride=1
    n_w = float(2 ** wbit - 1) if wbit < 32 else 1.0
    n_a = float(2 ** abit - 1) if abit < 32 else 1.0

    # NHWC, spatial zero-pad (conv padding=1), channel pad to cpad.
    x_nhwc = jnp.transpose(x_nchw, (0, 2, 3, 1)).astype(jnp.float32)
    xp = jnp.pad(x_nhwc, ((0, 0), (1, 1), (1, 1), (0, cpad - cin)))

    w1 = _weights_to_tap_matrices(
        _dorefa_weight_codes(params["conv1_w"], wbit), cpad)
    w2 = _weights_to_tap_matrices(
        _dorefa_weight_codes(params["conv2_w"], wbit), cpad)

    s1, b1 = _fold_bn(params["bn1_gamma"], params["bn1_beta"],
                      params["bn1_mean"], params["bn1_var"], cpad, 1.0 / n_w)
    s2, b2 = _fold_bn(params["bn2_gamma"], params["bn2_beta"],
                      params["bn2_mean"], params["bn2_var"], cpad,
                      1.0 / (n_w * n_a))

    hp, wp = h + 2, w + 2
    flops = 2 * (2 * n_batch * ho * wo * (9 * cpad) * cpad)   # two convs
    bytes_accessed = (xp.size * 4 + w1.size * 2 + w2.size * 2
                      + 4 * cpad * 4 + n_batch * ho * wo * cpad * 4)

    out = pl.pallas_call(
        functools.partial(_fused_basic_block_kernel, abit=abit),
        out_shape=jax.ShapeDtypeStruct((n_batch, ho, wo, cpad), jnp.float32),
        grid=(n_batch,),
        in_specs=[
            pl.BlockSpec((1, hp, wp, cpad), lambda n: (n, 0, 0, 0)),   # x (padded)
            pl.BlockSpec((9, cpad, cpad), lambda n: (0, 0, 0)),        # w1 taps
            pl.BlockSpec((9, cpad, cpad), lambda n: (0, 0, 0)),        # w2 taps
            pl.BlockSpec((1, cpad), lambda n: (0, 0)),                 # s1
            pl.BlockSpec((1, cpad), lambda n: (0, 0)),                 # b1
            pl.BlockSpec((1, cpad), lambda n: (0, 0)),                 # s2
            pl.BlockSpec((1, cpad), lambda n: (0, 0)),                 # b2
        ],
        out_specs=pl.BlockSpec((1, ho, wo, cpad), lambda n: (n, 0, 0, 0)),
        scratch_shapes=[pltpu.VMEM((ho + 2, wo + 2 * _WPAD, cpad), jnp.float32)],
        compiler_params=pltpu.CompilerParams(
            dimension_semantics=("parallel",),        # v7x: images across both TCs
            vmem_limit_bytes=64 * 1024 * 1024),
        cost_estimate=pl.CostEstimate(flops=int(flops), transcendentals=0,
                                      bytes_accessed=int(bytes_accessed)),
    )(xp, w1, w2, s1, b1, s2, b2)

    out = out[..., :planes]                            # drop lane-padding columns
    return jnp.transpose(out, (0, 3, 1, 2))            # back to NCHW


# ----------------------------------------------------------------------------
# Main
# ----------------------------------------------------------------------------
if __name__ == "__main__":
    key = jax.random.PRNGKey(0)
    ks = jax.random.split(key, 12)

    # Small shapes: batch=2, inplanes=planes=8, spatial=16, stride=1, no downsample
    N, C, H, W = 2, 8, 16, 16
    planes = 8
    wbit, abit = 4, 4

    x = jax.random.normal(ks[0], (N, C, H, W), dtype=jnp.float32)

    params = {
        "conv1_w": 0.1 * jax.random.normal(ks[1], (planes, C, 3, 3), jnp.float32),
        "conv2_w": 0.1 * jax.random.normal(ks[2], (planes, planes, 3, 3), jnp.float32),
        "bn1_gamma": 1.0 + 0.1 * jax.random.normal(ks[3], (planes,), jnp.float32),
        "bn1_beta": 0.1 * jax.random.normal(ks[4], (planes,), jnp.float32),
        "bn1_mean": 0.05 * jax.random.normal(ks[5], (planes,), jnp.float32),
        "bn1_var": jnp.abs(1.0 + 0.1 * jax.random.normal(ks[6], (planes,), jnp.float32)),
        "bn2_gamma": 1.0 + 0.1 * jax.random.normal(ks[7], (planes,), jnp.float32),
        "bn2_beta": 0.1 * jax.random.normal(ks[8], (planes,), jnp.float32),
        "bn2_mean": 0.05 * jax.random.normal(ks[9], (planes,), jnp.float32),
        "bn2_var": jnp.abs(1.0 + 0.1 * jax.random.normal(ks[10], (planes,), jnp.float32)),
    }

    fwd = jax.jit(functools.partial(quant_basic_block_forward,
                                    wbit=wbit, abit=abit, stride=1, p=1.0))
    out = jax.block_until_ready(fwd(x, params))
    assert out.shape == (N, planes, H, W), out.shape
    assert bool(jnp.all(jnp.isfinite(out)))
    print("KERNEL_OK")
</pallas_src>

<mosaic_0001>
module attributes {stable_mosaic.version = 11 : i64} {
  func.func @_fused_basic_block_kernel(%arg0: i32, %arg1: memref<1x18x18x128xf32, #tpu.memory_space<vmem>>, %arg2: memref<9x128x128xbf16, #tpu.memory_space<vmem>>, %arg3: memref<9x128x128xbf16, #tpu.memory_space<vmem>>, %arg4: memref<1x128xf32, #tpu.memory_space<vmem>>, %arg5: memref<1x128xf32, #tpu.memory_space<vmem>>, %arg6: memref<1x128xf32, #tpu.memory_space<vmem>>, %arg7: memref<1x128xf32, #tpu.memory_space<vmem>>, %arg8: memref<1x16x16x128xf32, #tpu.memory_space<vmem>>, %arg9: memref<18x32x128xf32, #tpu.memory_space<vmem>>) attributes {dimension_semantics = [#tpu.dimension_semantics<parallel>], iteration_bounds = array<i64: 2>, scalar_prefetch = 0 : i64, scratch_operands = 1 : i64, tpu.core_type = #tpu.core_type<tc>, window_params = [{transform_indices = @transform_0, window_bounds = array<i64: 1, 18, 18, 128>}, {pipeline_mode = #tpu.pipeline_mode<synchronous>, transform_indices = @transform_1, window_bounds = array<i64: 9, 128, 128>}, {pipeline_mode = #tpu.pipeline_mode<synchronous>, transform_indices = @transform_2, window_bounds = array<i64: 9, 128, 128>}, {pipeline_mode = #tpu.pipeline_mode<synchronous>, transform_indices = @transform_3, window_bounds = array<i64: 1, 128>}, {pipeline_mode = #tpu.pipeline_mode<synchronous>, transform_indices = @transform_4, window_bounds = array<i64: 1, 128>}, {pipeline_mode = #tpu.pipeline_mode<synchronous>, transform_indices = @transform_5, window_bounds = array<i64: 1, 128>}, {pipeline_mode = #tpu.pipeline_mode<synchronous>, transform_indices = @transform_6, window_bounds = array<i64: 1, 128>}, {transform_indices = @transform_7, window_bounds = array<i64: 1, 16, 16, 128>}]} {
    %cst = arith.constant 0.000000e+00 : f32
    %0 = vector.broadcast %cst : f32 to vector<256x128xf32>
    %c0 = arith.constant 0 : index
    %c0_0 = arith.constant 0 : index
    %c0_1 = arith.constant 0 : index
    %c0_2 = arith.constant 0 : index
    %1 = vector.load %arg1[%c0, %c0_0, %c0_1, %c0_2] : memref<1x18x18x128xf32, #tpu.memory_space<vmem>>, vector<1x16x16x128xf32>
    %2 = vector.shape_cast %1 : vector<1x16x16x128xf32> to vector<16x16x128xf32>
    %3 = arith.truncf %2 : vector<16x16x128xf32> to vector<16x16x128xbf16>
    %4 = vector.shape_cast %3 : vector<16x16x128xbf16> to vector<256x128xbf16>
    %c0_3 = arith.constant 0 : index
    %c0_4 = arith.constant 0 : index
    %c0_5 = arith.constant 0 : index
    %5 = vector.load %arg2[%c0_3, %c0_4, %c0_5] : memref<9x128x128xbf16, #tpu.memory_space<vmem>>, vector<1x128x128xbf16>
    %6 = vector.shape_cast %5 : vector<1x128x128xbf16> to vector<128x128xbf16>
    %cst_6 = arith.constant dense<0.000000e+00> : vector<256x128xf32>
    %7 = tpu.matmul %4, %6, %cst_6 {dimension_numbers = #tpu.dot_dimension_numbers<[1], [0], [0], [1], [0, 0, 1, 1], [], []>} : vector<256x128xbf16>, vector<128x128xbf16>, vector<256x128xf32> -> vector<256x128xf32>
    %8 = arith.addf %0, %7 : vector<256x128xf32>
    %c0_7 = arith.constant 0 : index
    %c0_8 = arith.constant 0 : index
    %c1 = arith.constant 1 : index
    %c0_9 = arith.constant 0 : index
    %9 = vector.load %arg1[%c0_7, %c0_8, %c1, %c0_9] : memref<1x18x18x128xf32, #tpu.memory_space<vmem>>, vector<1x16x16x128xf32>
    %10 = vector.shape_cast %9 : vector<1x16x16x128xf32> to vector<16x16x128xf32>
    %11 = arith.truncf %10 : vector<16x16x128xf32> to vector<16x16x128xbf16>
    %12 = vector.shape_cast %11 : vector<16x16x128xbf16> to vector<256x128xbf16>
    %c1_10 = arith.constant 1 : index
    %c0_11 = arith.constant 0 : index
    %c0_12 = arith.constant 0 : index
    %13 = vector.load %arg2[%c1_10, %c0_11, %c0_12] : memref<9x128x128xbf16, #tpu.memory_space<vmem>>, vector<1x128x128xbf16>
    %14 = vector.shape_cast %13 : vector<1x128x128xbf16> to vector<128x128xbf16>
    %cst_13 = arith.constant dense<0.000000e+00> : vector<256x128xf32>
    %15 = tpu.matmul %12, %14, %cst_13 {dimension_numbers = #tpu.dot_dimension_numbers<[1], [0], [0], [1], [0, 0, 1, 1], [], []>} : vector<256x128xbf16>, vector<128x128xbf16>, vector<256x128xf32> -> vector<256x128xf32>
    %16 = arith.addf %8, %15 : vector<256x128xf32>
    %c0_14 = arith.constant 0 : index
    %c0_15 = arith.constant 0 : index
    %c2 = arith.constant 2 : index
    %c0_16 = arith.constant 0 : index
    %17 = vector.load %arg1[%c0_14, %c0_15, %c2, %c0_16] : memref<1x18x18x128xf32, #tpu.memory_space<vmem>>, vector<1x16x16x128xf32>
    %18 = vector.shape_cast %17 : vector<1x16x16x128xf32> to vector<16x16x128xf32>
    %19 = arith.truncf %18 : vector<16x16x128xf32> to vector<16x16x128xbf16>
    %20 = vector.shape_cast %19 : vector<16x16x128xbf16> to vector<256x128xbf16>
    %c2_17 = arith.constant 2 : index
    %c0_18 = arith.constant 0 : index
    %c0_19 = arith.constant 0 : index
    %21 = vector.load %arg2[%c2_17, %c0_18, %c0_19] : memref<9x128x128xbf16, #tpu.memory_space<vmem>>, vector<1x128x128xbf16>
    %22 = vector.shape_cast %21 : vector<1x128x128xbf16> to vector<128x128xbf16>
    %cst_20 = arith.constant dense<0.000000e+00> : vector<256x128xf32>
    %23 = tpu.matmul %20, %22, %cst_20 {dimension_numbers = #tpu.dot_dimension_numbers<[1], [0], [0], [1], [0, 0, 1, 1], [], []>} : vector<256x128xbf16>, vector<128x128xbf16>, vector<256x128xf32> -> vector<256x128xf32>
    %24 = arith.addf %16, %23 : vector<256x128xf32>
    %c0_21 = arith.constant 0 : index
    %c1_22 = arith.constant 1 : index
    %c0_23 = arith.constant 0 : index
    %c0_24 = arith.constant 0 : index
    %25 = vector.load %arg1[%c0_21, %c1_22, %c0_23, %c0_24] : memref<1x18x18x128xf32, #tpu.memory_space<vmem>>, vector<1x16x16x128xf32>
    %26 = vector.shape_cast %25 : vector<1x16x16x128xf32> to vector<16x16x128xf32>
    %27 = arith.truncf %26 : vector<16x16x128xf32> to vector<16x16x128xbf16>
    %28 = vector.shape_cast %27 : vector<16x16x128xbf16> to vector<256x128xbf16>
    %c3 = arith.constant 3 : index
    %c0_25 = arith.constant 0 : index
    %c0_26 = arith.constant 0 : index
    %29 = vector.load %arg2[%c3, %c0_25, %c0_26] : memref<9x128x128xbf16, #tpu.memory_space<vmem>>, vector<1x128x128xbf16>
    %30 = vector.shape_cast %29 : vector<1x128x128xbf16> to vector<128x128xbf16>
    %cst_27 = arith.constant dense<0.000000e+00> : vector<256x128xf32>
    %31 = tpu.matmul %28, %30, %cst_27 {dimension_numbers = #tpu.dot_dimension_numbers<[1], [0], [0], [1], [0, 0, 1, 1], [], []>} : vector<256x128xbf16>, vector<128x128xbf16>, vector<256x128xf32> -> vector<256x128xf32>
    %32 = arith.addf %24, %31 : vector<256x128xf32>
    %c0_28 = arith.constant 0 : index
    %c1_29 = arith.constant 1 : index
    %c1_30 = arith.constant 1 : index
    %c0_31 = arith.constant 0 : index
    %33 = vector.load %arg1[%c0_28, %c1_29, %c1_30, %c0_31] : memref<1x18x18x128xf32, #tpu.memory_space<vmem>>, vector<1x16x16x128xf32>
    %34 = vector.shape_cast %33 : vector<1x16x16x128xf32> to vector<16x16x128xf32>
    %35 = arith.truncf %34 : vector<16x16x128xf32> to vector<16x16x128xbf16>
    %36 = vector.shape_cast %35 : vector<16x16x128xbf16> to vector<256x128xbf16>
    %c4 = arith.constant 4 : index
    %c0_32 = arith.constant 0 : index
    %c0_33 = arith.constant 0 : index
    %37 = vector.load %arg2[%c4, %c0_32, %c0_33] : memref<9x128x128xbf16, #tpu.memory_space<vmem>>, vector<1x128x128xbf16>
    %38 = vector.shape_cast %37 : vector<1x128x128xbf16> to vector<128x128xbf16>
    %cst_34 = arith.constant dense<0.000000e+00> : vector<256x128xf32>
    %39 = tpu.matmul %36, %38, %cst_34 {dimension_numbers = #tpu.dot_dimension_numbers<[1], [0], [0], [1], [0, 0, 1, 1], [], []>} : vector<256x128xbf16>, vector<128x128xbf16>, vector<256x128xf32> -> vector<256x128xf32>
    %40 = arith.addf %32, %39 : vector<256x128xf32>
    %c0_35 = arith.constant 0 : index
    %c1_36 = arith.constant 1 : index
    %c2_37 = arith.constant 2 : index
    %c0_38 = arith.constant 0 : index
    %41 = vector.load %arg1[%c0_35, %c1_36, %c2_37, %c0_38] : memref<1x18x18x128xf32, #tpu.memory_space<vmem>>, vector<1x16x16x128xf32>
    %42 = vector.shape_cast %41 : vector<1x16x16x128xf32> to vector<16x16x128xf32>
    %43 = arith.truncf %42 : vector<16x16x128xf32> to vector<16x16x128xbf16>
    %44 = vector.shape_cast %43 : vector<16x16x128xbf16> to vector<256x128xbf16>
    %c5 = arith.constant 5 : index
    %c0_39 = arith.constant 0 : index
    %c0_40 = arith.constant 0 : index
    %45 = vector.load %arg2[%c5, %c0_39, %c0_40] : memref<9x128x128xbf16, #tpu.memory_space<vmem>>, vector<1x128x128xbf16>
    %46 = vector.shape_cast %45 : vector<1x128x128xbf16> to vector<128x128xbf16>
    %cst_41 = arith.constant dense<0.000000e+00> : vector<256x128xf32>
    %47 = tpu.matmul %44, %46, %cst_41 {dimension_numbers = #tpu.dot_dimension_numbers<[1], [0], [0], [1], [0, 0, 1, 1], [], []>} : vector<256x128xbf16>, vector<128x128xbf16>, vector<256x128xf32> -> vector<256x128xf32>
    %48 = arith.addf %40, %47 : vector<256x128xf32>
    %c0_42 = arith.constant 0 : index
    %c2_43 = arith.constant 2 : index
    %c0_44 = arith.constant 0 : index
    %c0_45 = arith.constant 0 : index
    %49 = vector.load %arg1[%c0_42, %c2_43, %c0_44, %c0_45] : memref<1x18x18x128xf32, #tpu.memory_space<vmem>>, vector<1x16x16x128xf32>
    %50 = vector.shape_cast %49 : vector<1x16x16x128xf32> to vector<16x16x128xf32>
    %51 = arith.truncf %50 : vector<16x16x128xf32> to vector<16x16x128xbf16>
    %52 = vector.shape_cast %51 : vector<16x16x128xbf16> to vector<256x128xbf16>
    %c6 = arith.constant 6 : index
    %c0_46 = arith.constant 0 : index
    %c0_47 = arith.constant 0 : index
    %53 = vector.load %arg2[%c6, %c0_46, %c0_47] : memref<9x128x128xbf16, #tpu.memory_space<vmem>>, vector<1x128x128xbf16>
    %54 = vector.shape_cast %53 : vector<1x128x128xbf16> to vector<128x128xbf16>
    %cst_48 = arith.constant dense<0.000000e+00> : vector<256x128xf32>
    %55 = tpu.matmul %52, %54, %cst_48 {dimension_numbers = #tpu.dot_dimension_numbers<[1], [0], [0], [1], [0, 0, 1, 1], [], []>} : vector<256x128xbf16>, vector<128x128xbf16>, vector<256x128xf32> -> vector<256x128xf32>
    %56 = arith.addf %48, %55 : vector<256x128xf32>
    %c0_49 = arith.constant 0 : index
    %c2_50 = arith.constant 2 : index
    %c1_51 = arith.constant 1 : index
    %c0_52 = arith.constant 0 : index
    %57 = vector.load %arg1[%c0_49, %c2_50, %c1_51, %c0_52] : memref<1x18x18x128xf32, #tpu.memory_space<vmem>>, vector<1x16x16x128xf32>
    %58 = vector.shape_cast %57 : vector<1x16x16x128xf32> to vector<16x16x128xf32>
    %59 = arith.truncf %58 : vector<16x16x128xf32> to vector<16x16x128xbf16>
    %60 = vector.shape_cast %59 : vector<16x16x128xbf16> to vector<256x128xbf16>
    %c7 = arith.constant 7 : index
    %c0_53 = arith.constant 0 : index
    %c0_54 = arith.constant 0 : index
    %61 = vector.load %arg2[%c7, %c0_53, %c0_54] : memref<9x128x128xbf16, #tpu.memory_space<vmem>>, vector<1x128x128xbf16>
    %62 = vector.shape_cast %61 : vector<1x128x128xbf16> to vector<128x128xbf16>
    %cst_55 = arith.constant dense<0.000000e+00> : vector<256x128xf32>
    %63 = tpu.matmul %60, %62, %cst_55 {dimension_numbers = #tpu.dot_dimension_numbers<[1], [0], [0], [1], [0, 0, 1, 1], [], []>} : vector<256x128xbf16>, vector<128x128xbf16>, vector<256x128xf32> -> vector<256x128xf32>
    %64 = arith.addf %56, %63 : vector<256x128xf32>
    %c0_56 = arith.constant 0 : index
    %c2_57 = arith.constant 2 : index
    %c2_58 = arith.constant 2 : index
    %c0_59 = arith.constant 0 : index
    %65 = vector.load %arg1[%c0_56, %c2_57, %c2_58, %c0_59] : memref<1x18x18x128xf32, #tpu.memory_space<vmem>>, vector<1x16x16x128xf32>
    %66 = vector.shape_cast %65 : vector<1x16x16x128xf32> to vector<16x16x128xf32>
    %67 = arith.truncf %66 : vector<16x16x128xf32> to vector<16x16x128xbf16>
    %68 = vector.shape_cast %67 : vector<16x16x128xbf16> to vector<256x128xbf16>
    %c8 = arith.constant 8 : index
    %c0_60 = arith.constant 0 : index
    %c0_61 = arith.constant 0 : index
    %69 = vector.load %arg2[%c8, %c0_60, %c0_61] : memref<9x128x128xbf16, #tpu.memory_space<vmem>>, vector<1x128x128xbf16>
    %70 = vector.shape_cast %69 : vector<1x128x128xbf16> to vector<128x128xbf16>
    %cst_62 = arith.constant dense<0.000000e+00> : vector<256x128xf32>
    %71 = tpu.matmul %68, %70, %cst_62 {dimension_numbers = #tpu.dot_dimension_numbers<[1], [0], [0], [1], [0, 0, 1, 1], [], []>} : vector<256x128xbf16>, vector<128x128xbf16>, vector<256x128xf32> -> vector<256x128xf32>
    %72 = arith.addf %64, %71 : vector<256x128xf32>
    %c0_63 = arith.constant 0 : index
    %c0_64 = arith.constant 0 : index
    %73 = vector.load %arg4[%c0_63, %c0_64] : memref<1x128xf32, #tpu.memory_space<vmem>>, vector<1x128xf32>
    %74 = vector.broadcast %73 : vector<1x128xf32> to vector<256x128xf32>
    %75 = arith.mulf %72, %74 : vector<256x128xf32>
    %c0_65 = arith.constant 0 : index
    %c0_66 = arith.constant 0 : index
    %76 = vector.load %arg5[%c0_65, %c0_66] : memref<1x128xf32, #tpu.memory_space<vmem>>, vector<1x128xf32>
    %77 = vector.broadcast %76 : vector<1x128xf32> to vector<256x128xf32>
    %78 = arith.addf %75, %77 : vector<256x128xf32>
    %cst_67 = arith.constant 0.000000e+00 : f32
    %79 = vector.broadcast %cst_67 : f32 to vector<256x128xf32>
    %80 = arith.maximumf %78, %79 : vector<256x128xf32>
    %cst_68 = arith.constant 0.000000e+00 : f32
    %cst_69 = arith.constant 1.000000e+00 : f32
    %81 = vector.broadcast %cst_68 : f32 to vector<256x128xf32>
    %82 = arith.maximumf %81, %80 : vector<256x128xf32>
    %83 = vector.broadcast %cst_69 : f32 to vector<256x128xf32>
    %84 = arith.minimumf %83, %82 : vector<256x128xf32>
    %cst_70 = arith.constant 1.500000e+01 : f32
    %85 = vector.broadcast %cst_70 : f32 to vector<256x128xf32>
    %86 = arith.mulf %84, %85 : vector<256x128xf32>
    %87 = math.roundeven %86 : vector<256x128xf32>
    %cst_71 = arith.constant 0.000000e+00 : f32
    %88 = vector.broadcast %cst_71 : f32 to vector<18x32x128xf32>
    %c0_72 = arith.constant 0 : index
    %c0_73 = arith.constant 0 : index
    %c0_74 = arith.constant 0 : index
    %89 = vector.load %arg9[%c0_72, %c0_73, %c0_74] : memref<18x32x128xf32, #tpu.memory_space<vmem>>, vector<18x32x128xf32>
    tpu.vector_store %arg9[%c0_72, %c0_73, %c0_74], %88 {strides = array<i32>} : memref<18x32x128xf32, #tpu.memory_space<vmem>>, vector<18x32x128xf32>,
    %90 = vector.shape_cast %87 : vector<256x128xf32> to vector<16x16x128xf32>
    %c1_75 = arith.constant 1 : index
    %c8_76 = arith.constant 8 : index
    %c0_77 = arith.constant 0 : index
    %91 = vector.load %arg9[%c1_75, %c8_76, %c0_77] : memref<18x32x128xf32, #tpu.memory_space<vmem>>, vector<16x16x128xf32>
    tpu.vector_store %arg9[%c1_75, %c8_76, %c0_77], %90 {strides = array<i32>} : memref<18x32x128xf32, #tpu.memory_space<vmem>>, vector<16x16x128xf32>,
    %cst_78 = arith.constant 0.000000e+00 : f32
    %92 = vector.broadcast %cst_78 : f32 to vector<256x128xf32>
    %c0_79 = arith.constant 0 : index
    %c7_80 = arith.constant 7 : index
    %c0_81 = arith.constant 0 : index
    %93 = vector.load %arg9[%c0_79, %c7_80, %c0_81] : memref<18x32x128xf32, #tpu.memory_space<vmem>>, vector<16x16x128xf32>
    %94 = vector.shape_cast %93 : vector<16x16x128xf32> to vector<256x128xf32>
    %95 = arith.truncf %94 : vector<256x128xf32> to vector<256x128xbf16>
    %c0_82 = arith.constant 0 : index
    %c0_83 = arith.constant 0 : index
    %c0_84 = arith.constant 0 : index
    %96 = vector.load %arg3[%c0_82, %c0_83, %c0_84] : memref<9x128x128xbf16, #tpu.memory_space<vmem>>, vector<1x128x128xbf16>
    %97 = vector.shape_cast %96 : vector<1x128x128xbf16> to vector<128x128xbf16>
    %cst_85 = arith.constant dense<0.000000e+00> : vector<256x128xf32>
    %98 = tpu.matmul %95, %97, %cst_85 {dimension_numbers = #tpu.dot_dimension_numbers<[1], [0], [0], [1], [0, 0, 1, 1], [], []>} : vector<256x128xbf16>, vector<128x128xbf16>, vector<256x128xf32> -> vector<256x128xf32>
    %99 = arith.addf %92, %98 : vector<256x128xf32>
    %c0_86 = arith.constant 0 : index
    %c8_87 = arith.constant 8 : index
    %c0_88 = arith.constant 0 : index
    %100 = vector.load %arg9[%c0_86, %c8_87, %c0_88] : memref<18x32x128xf32, #tpu.memory_space<vmem>>, vector<16x16x128xf32>
    %101 = vector.shape_cast %100 : vector<16x16x128xf32> to vector<256x128xf32>
    %102 = arith.truncf %101 : vector<256x128xf32> to vector<256x128xbf16>
    %c1_89 = arith.constant 1 : index
    %c0_90 = arith.constant 0 : index
    %c0_91 = arith.constant 0 : index
    %103 = vector.load %arg3[%c1_89, %c0_90, %c0_91] : memref<9x128x128xbf16, #tpu.memory_space<vmem>>, vector<1x128x128xbf16>
    %104 = vector.shape_cast %103 : vector<1x128x128xbf16> to vector<128x128xbf16>
    %cst_92 = arith.constant dense<0.000000e+00> : vector<256x128xf32>
    %105 = tpu.matmul %102, %104, %cst_92 {dimension_numbers = #tpu.dot_dimension_numbers<[1], [0], [0], [1], [0, 0, 1, 1], [], []>} : vector<256x128xbf16>, vector<128x128xbf16>, vector<256x128xf32> -> vector<256x128xf32>
    %106 = arith.addf %99, %105 : vector<256x128xf32>
    %c0_93 = arith.constant 0 : index
    %c9 = arith.constant 9 : index
    %c0_94 = arith.constant 0 : index
    %107 = vector.load %arg9[%c0_93, %c9, %c0_94] : memref<18x32x128xf32, #tpu.memory_space<vmem>>, vector<16x16x128xf32>
    %108 = vector.shape_cast %107 : vector<16x16x128xf32> to vector<256x128xf32>
    %109 = arith.truncf %108 : vector<256x128xf32> to vector<256x128xbf16>
    %c2_95 = arith.constant 2 : index
    %c0_96 = arith.constant 0 : index
    %c0_97 = arith.constant 0 : index
    %110 = vector.load %arg3[%c2_95, %c0_96, %c0_97] : memref<9x128x128xbf16, #tpu.memory_space<vmem>>, vector<1x128x128xbf16>
    %111 = vector.shape_cast %110 : vector<1x128x128xbf16> to vector<128x128xbf16>
    %cst_98 = arith.constant dense<0.000000e+00> : vector<256x128xf32>
    %112 = tpu.matmul %109, %111, %cst_98 {dimension_numbers = #tpu.dot_dimension_numbers<[1], [0], [0], [1], [0, 0, 1, 1], [], []>} : vector<256x128xbf16>, vector<128x128xbf16>, vector<256x128xf32> -> vector<256x128xf32>
    %113 = arith.addf %106, %112 : vector<256x128xf32>
    %c1_99 = arith.constant 1 : index
    %c7_100 = arith.constant 7 : index
    %c0_101 = arith.constant 0 : index
    %114 = vector.load %arg9[%c1_99, %c7_100, %c0_101] : memref<18x32x128xf32, #tpu.memory_space<vmem>>, vector<16x16x128xf32>
    %115 = vector.shape_cast %114 : vector<16x16x128xf32> to vector<256x128xf32>
    %116 = arith.truncf %115 : vector<256x128xf32> to vector<256x128xbf16>
    %c3_102 = arith.constant 3 : index
    %c0_103 = arith.constant 0 : index
    %c0_104 = arith.constant 0 : index
    %117 = vector.load %arg3[%c3_102, %c0_103, %c0_104] : memref<9x128x128xbf16, #tpu.memory_space<vmem>>, vector<1x128x128xbf16>
    %118 = vector.shape_cast %117 : vector<1x128x128xbf16> to vector<128x128xbf16>
    %cst_105 = arith.constant dense<0.000000e+00> : vector<256x128xf32>
    %119 = tpu.matmul %116, %118, %cst_105 {dimension_numbers = #tpu.dot_dimension_numbers<[1], [0], [0], [1], [0, 0, 1, 1], [], []>} : vector<256x128xbf16>, vector<128x128xbf16>, vector<256x128xf32> -> vector<256x128xf32>
    %120 = arith.addf %113, %119 : vector<256x128xf32>
    %c1_106 = arith.constant 1 : index
    %c8_107 = arith.constant 8 : index
    %c0_108 = arith.constant 0 : index
    %121 = vector.load %arg9[%c1_106, %c8_107, %c0_108] : memref<18x32x128xf32, #tpu.memory_space<vmem>>, vector<16x16x128xf32>
    %122 = vector.shape_cast %121 : vector<16x16x128xf32> to vector<256x128xf32>
    %123 = arith.truncf %122 : vector<256x128xf32> to vector<256x128xbf16>
    %c4_109 = arith.constant 4 : index
    %c0_110 = arith.constant 0 : index
    %c0_111 = arith.constant 0 : index
    %124 = vector.load %arg3[%c4_109, %c0_110, %c0_111] : memref<9x128x128xbf16, #tpu.memory_space<vmem>>, vector<1x128x128xbf16>
    %125 = vector.shape_cast %124 : vector<1x128x128xbf16> to vector<128x128xbf16>
    %cst_112 = arith.constant dense<0.000000e+00> : vector<256x128xf32>
    %126 = tpu.matmul %123, %125, %cst_112 {dimension_numbers = #tpu.dot_dimension_numbers<[1], [0], [0], [1], [0, 0, 1, 1], [], []>} : vector<256x128xbf16>, vector<128x128xbf16>, vector<256x128xf32> -> vector<256x128xf32>
    %127 = arith.addf %120, %126 : vector<256x128xf32>
    %c1_113 = arith.constant 1 : index
    %c9_114 = arith.constant 9 : index
    %c0_115 = arith.constant 0 : index
    %128 = vector.load %arg9[%c1_113, %c9_114, %c0_115] : memref<18x32x128xf32, #tpu.memory_space<vmem>>, vector<16x16x128xf32>
    %129 = vector.shape_cast %128 : vector<16x16x128xf32> to vector<256x128xf32>
    %130 = arith.truncf %129 : vector<256x128xf32> to vector<256x128xbf16>
    %c5_116 = arith.constant 5 : index
    %c0_117 = arith.constant 0 : index
    %c0_118 = arith.constant 0 : index
    %131 = vector.load %arg3[%c5_116, %c0_117, %c0_118] : memref<9x128x128xbf16, #tpu.memory_space<vmem>>, vector<1x128x128xbf16>
    %132 = vector.shape_cast %131 : vector<1x128x128xbf16> to vector<128x128xbf16>
    %cst_119 = arith.constant dense<0.000000e+00> : vector<256x128xf32>
    %133 = tpu.matmul %130, %132, %cst_119 {dimension_numbers = #tpu.dot_dimension_numbers<[1], [0], [0], [1], [0, 0, 1, 1], [], []>} : vector<256x128xbf16>, vector<128x128xbf16>, vector<256x128xf32> -> vector<256x128xf32>
    %134 = arith.addf %127, %133 : vector<256x128xf32>
    %c2_120 = arith.constant 2 : index
    %c7_121 = arith.constant 7 : index
    %c0_122 = arith.constant 0 : index
    %135 = vector.load %arg9[%c2_120, %c7_121, %c0_122] : memref<18x32x128xf32, #tpu.memory_space<vmem>>, vector<16x16x128xf32>
    %136 = vector.shape_cast %135 : vector<16x16x128xf32> to vector<256x128xf32>
    %137 = arith.truncf %136 : vector<256x128xf32> to vector<256x128xbf16>
    %c6_123 = arith.constant 6 : index
    %c0_124 = arith.constant 0 : index
    %c0_125 = arith.constant 0 : index
    %138 = vector.load %arg3[%c6_123, %c0_124, %c0_125] : memref<9x128x128xbf16, #tpu.memory_space<vmem>>, vector<1x128x128xbf16>
    %139 = vector.shape_cast %138 : vector<1x128x128xbf16> to vector<128x128xbf16>
    %cst_126 = arith.constant dense<0.000000e+00> : vector<256x128xf32>
    %140 = tpu.matmul %137, %139, %cst_126 {dimension_numbers = #tpu.dot_dimension_numbers<[1], [0], [0], [1], [0, 0, 1, 1], [], []>} : vector<256x128xbf16>, vector<128x128xbf16>, vector<256x128xf32> -> vector<256x128xf32>
    %141 = arith.addf %134, %140 : vector<256x128xf32>
    %c2_127 = arith.constant 2 : index
    %c8_128 = arith.constant 8 : index
    %c0_129 = arith.constant 0 : index
    %142 = vector.load %arg9[%c2_127, %c8_128, %c0_129] : memref<18x32x128xf32, #tpu.memory_space<vmem>>, vector<16x16x128xf32>
    %143 = vector.shape_cast %142 : vector<16x16x128xf32> to vector<256x128xf32>
    %144 = arith.truncf %143 : vector<256x128xf32> to vector<256x128xbf16>
    %c7_130 = arith.constant 7 : index
    %c0_131 = arith.constant 0 : index
    %c0_132 = arith.constant 0 : index
    %145 = vector.load %arg3[%c7_130, %c0_131, %c0_132] : memref<9x128x128xbf16, #tpu.memory_space<vmem>>, vector<1x128x128xbf16>
    %146 = vector.shape_cast %145 : vector<1x128x128xbf16> to vector<128x128xbf16>
    %cst_133 = arith.constant dense<0.000000e+00> : vector<256x128xf32>
    %147 = tpu.matmul %144, %146, %cst_133 {dimension_numbers = #tpu.dot_dimension_numbers<[1], [0], [0], [1], [0, 0, 1, 1], [], []>} : vector<256x128xbf16>, vector<128x128xbf16>, vector<256x128xf32> -> vector<256x128xf32>
    %148 = arith.addf %141, %147 : vector<256x128xf32>
    %c2_134 = arith.constant 2 : index
    %c9_135 = arith.constant 9 : index
    %c0_136 = arith.constant 0 : index
    %149 = vector.load %arg9[%c2_134, %c9_135, %c0_136] : memref<18x32x128xf32, #tpu.memory_space<vmem>>, vector<16x16x128xf32>
    %150 = vector.shape_cast %149 : vector<16x16x128xf32> to vector<256x128xf32>
    %151 = arith.truncf %150 : vector<256x128xf32> to vector<256x128xbf16>
    %c8_137 = arith.constant 8 : index
    %c0_138 = arith.constant 0 : index
    %c0_139 = arith.constant 0 : index
    %152 = vector.load %arg3[%c8_137, %c0_138, %c0_139] : memref<9x128x128xbf16, #tpu.memory_space<vmem>>, vector<1x128x128xbf16>
    %153 = vector.shape_cast %152 : vector<1x128x128xbf16> to vector<128x128xbf16>
    %cst_140 = arith.constant dense<0.000000e+00> : vector<256x128xf32>
    %154 = tpu.matmul %151, %153, %cst_140 {dimension_numbers = #tpu.dot_dimension_numbers<[1], [0], [0], [1], [0, 0, 1, 1], [], []>} : vector<256x128xbf16>, vector<128x128xbf16>, vector<256x128xf32> -> vector<256x128xf32>
    %155 = arith.addf %148, %154 : vector<256x128xf32>
    %c0_141 = arith.constant 0 : index
    %c0_142 = arith.constant 0 : index
    %156 = vector.load %arg6[%c0_141, %c0_142] : memref<1x128xf32, #tpu.memory_space<vmem>>, vector<1x128xf32>
    %157 = vector.broadcast %156 : vector<1x128xf32> to vector<256x128xf32>
    %158 = arith.mulf %155, %157 : vector<256x128xf32>
    %c0_143 = arith.constant 0 : index
    %c0_144 = arith.constant 0 : index
    %159 = vector.load %arg7[%c0_143, %c0_144] : memref<1x128xf32, #tpu.memory_space<vmem>>, vector<1x128xf32>
    %160 = vector.broadcast %159 : vector<1x128xf32> to vector<256x128xf32>
    %161 = arith.addf %158, %160 : vector<256x128xf32>
    %cst_145 = arith.constant 0.000000e+00 : f32
    %cst_146 = arith.constant 1.000000e+00 : f32
    %162 = vector.broadcast %cst_145 : f32 to vector<256x128xf32>
    %163 = arith.maximumf %162, %161 : vector<256x128xf32>
    %164 = vector.broadcast %cst_146 : f32 to vector<256x128xf32>
    %165 = arith.minimumf %164, %163 : vector<256x128xf32>
    %cst_147 = arith.constant 1.500000e+01 : f32
    %166 = vector.broadcast %cst_147 : f32 to vector<256x128xf32>
    %167 = arith.mulf %165, %166 : vector<256x128xf32>
    %168 = math.roundeven %167 : vector<256x128xf32>
    %cst_148 = arith.constant 0.0666666701 : f32
    %169 = vector.broadcast %cst_148 : f32 to vector<256x128xf32>
    %170 = arith.mulf %168, %169 : vector<256x128xf32>
    %c0_149 = arith.constant 0 : index
    %c1_150 = arith.constant 1 : index
    %c1_151 = arith.constant 1 : index
    %c0_152 = arith.constant 0 : index
    %171 = vector.load %arg1[%c0_149, %c1_150, %c1_151, %c0_152] : memref<1x18x18x128xf32, #tpu.memory_space<vmem>>, vector<1x16x16x128xf32>
    %172 = vector.shape_cast %171 : vector<1x16x16x128xf32> to vector<16x16x128xf32>
    %173 = vector.shape_cast %172 : vector<16x16x128xf32> to vector<256x128xf32>
    %174 = arith.addf %170, %173 : vector<256x128xf32>
    %cst_153 = arith.constant 0.000000e+00 : f32
    %175 = vector.broadcast %cst_153 : f32 to vector<256x128xf32>
    %176 = arith.maximumf %174, %175 : vector<256x128xf32>
    %177 = vector.shape_cast %176 : vector<256x128xf32> to vector<16x16x128xf32>
    %c0_154 = arith.constant 0 : index
    %c0_155 = arith.constant 0 : index
    %c0_156 = arith.constant 0 : index
    %c0_157 = arith.constant 0 : index
    %178 = vector.load %arg8[%c0_154, %c0_155, %c0_156, %c0_157] : memref<1x16x16x128xf32, #tpu.memory_space<vmem>>, vector<1x16x16x128xf32>
    %179 = vector.shape_cast %178 : vector<1x16x16x128xf32> to vector<16x16x128xf32>
    %180 = vector.shape_cast %177 : vector<16x16x128xf32> to vector<1x16x16x128xf32>
    tpu.vector_store %arg8[%c0_154, %c0_155, %c0_156, %c0_157], %180 {strides = array<i32>} : memref<1x16x16x128xf32, #tpu.memory_space<vmem>>, vector<1x16x16x128xf32>,
    return
  }
  func.func @transform_0(%arg0: i32) -> (i32, i32, i32, i32) {
    %c0_i32 = arith.constant 0 : i32
    %c0_i32_0 = arith.constant 0 : i32
    %c0_i32_1 = arith.constant 0 : i32
    %c0_i32_2 = arith.constant 0 : i32
    return %arg0, %c0_i32, %c0_i32_0, %c0_i32_1 : i32, i32, i32, i32
  }
  func.func @transform_1(%arg0: i32) -> (i32, i32, i32) {
    %c0_i32 = arith.constant 0 : i32
    %c0_i32_0 = arith.constant 0 : i32
    %c0_i32_1 = arith.constant 0 : i32
    %c0_i32_2 = arith.constant 0 : i32
    return %c0_i32, %c0_i32_0, %c0_i32_1 : i32, i32, i32
  }
  func.func @transform_2(%arg0: i32) -> (i32, i32, i32) {
    %c0_i32 = arith.constant 0 : i32
    %c0_i32_0 = arith.constant 0 : i32
    %c0_i32_1 = arith.constant 0 : i32
    %c0_i32_2 = arith.constant 0 : i32
    return %c0_i32, %c0_i32_0, %c0_i32_1 : i32, i32, i32
  }
  func.func @transform_3(%arg0: i32) -> (i32, i32) {
    %c0_i32 = arith.constant 0 : i32
    %c0_i32_0 = arith.constant 0 : i32
    %c0_i32_1 = arith.constant 0 : i32
    return %c0_i32, %c0_i32_0 : i32, i32
  }
  func.func @transform_4(%arg0: i32) -> (i32, i32) {
    %c0_i32 = arith.constant 0 : i32
    %c0_i32_0 = arith.constant 0 : i32
    %c0_i32_1 = arith.constant 0 : i32
    return %c0_i32, %c0_i32_0 : i32, i32
  }
  func.func @transform_5(%arg0: i32) -> (i32, i32) {
    %c0_i32 = arith.constant 0 : i32
    %c0_i32_0 = arith.constant 0 : i32
    %c0_i32_1 = arith.constant 0 : i32
    return %c0_i32, %c0_i32_0 : i32, i32
  }
  func.func @transform_6(%arg0: i32) -> (i32, i32) {
    %c0_i32 = arith.constant 0 : i32
    %c0_i32_0 = arith.constant 0 : i32
    %c0_i32_1 = arith.constant 0 : i32
    return %c0_i32, %c0_i32_0 : i32, i32
  }
  func.func @transform_7(%arg0: i32) -> (i32, i32, i32, i32) {
    %c0_i32 = arith.constant 0 : i32
    %c0_i32_0 = arith.constant 0 : i32
    %c0_i32_1 = arith.constant 0 : i32
    %c0_i32_2 = arith.constant 0 : i32
    return %arg0, %c0_i32, %c0_i32_0, %c0_i32_1 : i32, i32, i32, i32
  }
}

</mosaic_0001>

<bundles_post_ra>
// kernel: quant_basic_block_forward.1
= control target key start
LH: loop header
LB: loop body
LE: loop exit
PB: predicated region body
PF: predicated region fallthrough
CT: control target
= control target key end

     0   :  { %s7932_s24 = smov 0   ;;  %s9780_s0 = inlined_call_operand.vmem [shape: f32[2,18,18,128], index: 0, kind: input, shape index: {}]   ;;  %s9781_s1 = inlined_call_operand.vmem [shape: bf16[9,128,128], index: 1, kind: input, shape index: {}]   ;;  %s9782_s2 = inlined_call_operand.vmem [shape: bf16[9,128,128], index: 2, kind: input, shape index: {}]   ;;  %s9783_s3 = inlined_call_operand.vmem [shape: f32[1,128], index: 3, kind: input, shape index: {}]   ;;  %s9784_s4 = inlined_call_operand.vmem [shape: f32[1,128], index: 4, kind: input, shape index: {}]   ;;  %s9785_s5 = inlined_call_operand.vmem [shape: f32[1,128], index: 5, kind: input, shape index: {}]   ;;  %s9786_s6 = inlined_call_operand.vmem [shape: f32[1,128], index: 6, kind: input, shape index: {}]   ;;  %s9787_s7 = inlined_call_operand.vmem [shape: f32[2,16,16,128], index: 7, kind: output, shape index: {}]  }
   0x1 LB: > { %s6124_s25 = sadd.s32 4294967295, %s7888_s24   ;;  %p6128_p0 = scmp.ge.s32.totalorder %s7888_s24, 1  ;;  %s7888_s24 = sphi %s7932_s24, %s17_s24  }
   0x2   : > { %p237_p1 = scmp.lt.s32.totalorder %s7888_s24, 3 }
   0x4   : > { %p238_p2 = pnand %p6128_p0, %p237_p1 }
   0x6   : > { %241 = sbr.rel (%p238_p2) target bundleno = 1494 (0x5d6), region = 48 }
   0xb   : > { %v7206_v0 = vld [vmem:[%s9781_s1 + $0x78] sm:$0xff]  ;;  %v7205_v2 = vld [vmem:[%s9781_s1 + $0x70] sm:$0xff]  ;;  %p269_p3 = scmp.lt.s32.totalorder %s6124_s25, 1  ;;  %v7204_v4 = vld [vmem:[%s9781_s1 + $0x68] sm:$0xff] }
   0xc   : > { %v7198_v1 = vld [vmem:[%s9781_s1 + $0x38] sm:$0xff]  ;;  %584 = vmatpush.bf16.msra.mxu0 %v7206_v0  ;;  %7335 = vmatpush.bf16.msra.mxu2 %v7206_v0  ;;  %v7197_v3 = vld [vmem:[%s9781_s1 + $0x30] sm:$0xff]  ;;  %v7196_v5 = vld [vmem:[%s9781_s1 + $0x28] sm:$0xff] }
   0xd   : > { %7343 = vmatpush.bf16.msra.mxu3 %v7198_v1  ;;  %817 = vmatpush.bf16.msra.mxu1 %v7198_v1  ;;  %s9807_s25 = smov (!%p269_p3, %s6124_s25), 1  ;;  %v7203_v6 = vld [vmem:[%s9781_s1 + $0x60] sm:$0xff]  ;;  %v7202_v8 = vld [vmem:[%s9781_s1 + $0x58] sm:$0xff]  ;;  %v7201_v10 = vld [vmem:[%s9781_s1 + $0x50] sm:$0xff] }
   0xe   : > { %s7351_s17 = smul.u32 432, %s9807_s25  ;;  %v7195_v7 = vld [vmem:[%s9781_s1 + $0x20] sm:$0xff]  ;;  %v7194_v9 = vld [vmem:[%s9781_s1 + $0x18] sm:$0xff]  ;;  %v7193_v11 = vld [vmem:[%s9781_s1 + $0x10] sm:$0xff]  ;;  %s7190_s29 = sshll.u32 %s9807_s25, 8 }
   0xf   : > { %v7200_v25 = vld [vmem:[%s9781_s1 + $0x48] sm:$0xff]  ;;  %v7199_v34 = vld [vmem:[%s9781_s1 + $0x40] sm:$0xff]  ;;  %v7214_v40 = vld [vmem:[%s9781_s1 + $0xb8] sm:$0xff]  ;;  %s9487_s9 = scalar_lea.vmem %s9787_s7, %s7190_s29 }
  0x10   : > { %585 = vmatpush.bf16.msra.mxu0 %v7205_v2  ;;  %7336 = vmatpush.bf16.msra.mxu2 %v7205_v2  ;;  %s7973_s26 = scalar_lea.vmem %s9780_s0, %s7351_s17  ;;  %v7192_v29 = vld [vmem:[%s9781_s1 + $0x8] sm:$0xff]  ;;  %v7191_v39 = vld [vmem:[%s9781_s1] sm:$0xff]  ;;  %v7222_v41 = vld [vmem:[%s9781_s1 + $0xf8] sm:$0xff] }
  0x11   : > { %7344 = vmatpush.bf16.msra.mxu3 %v7197_v3  ;;  %818 = vmatpush.bf16.msra.mxu1 %v7197_v3  ;;  %v359_v12 = vld [vmem:[%s7973_s26 + $0x1] sm:$0xff]  ;;  %v360_v13 = vld [vmem:[%s7973_s26 + $0x9] sm:$0xff]  ;;  %v7230_v46 = vld [vmem:[%s9781_s1 + $0x138] sm:$0xff] }
  0x12   : > { %v375_v14 = vld [vmem:[%s7973_s26 + $0xc1] sm:$0xff]  ;;  %v376_v15 = vld [vmem:[%s7973_s26 + $0xc9] sm:$0xff]  ;;  %v391_v20 = vpack.c.bf16 %v359_v12, %v359_v12  ;;  %v392_v21 = vpack.c.bf16 %v360_v13, %v360_v13  ;;  %v361_v49 = vld [vmem:[%s7973_s26 + $0x19] sm:$0xff] }
  0x13   : > { %v295_v16 = vld [vmem:[%s7973_s26 + $0xc0] sm:$0xff]  ;;  %v296_v17 = vld [vmem:[%s7973_s26 + $0xc8] sm:$0xff]  ;;  %v407_v22 = vpack.c.bf16 %v375_v14, %v375_v14  ;;  %v408_v23 = vpack.c.bf16 %v376_v15, %v376_v15  ;;  %v7213_v47 = vld [vmem:[%s9781_s1 + $0xb0] sm:$0xff]  ;;  %v393_v60 = vpack.c.bf16 %v361_v49, %v361_v49 }
  0x14   : > { %586 = vmatpush.bf16.msra.mxu0 %v7204_v4  ;;  %7337 = vmatpush.bf16.msra.mxu2 %v7204_v4  ;;  %v279_v18 = vld [vmem:[%s7973_s26] sm:$0xff]  ;;  %v280_v19 = vld [vmem:[%s7973_s26 + $0x8] sm:$0xff]  ;;  %v327_v24 = vpack.c.bf16 %v295_v16, %v295_v16  ;;  %v328_v26 = vpack.c.bf16 %v296_v17, %v296_v17  ;;  %v472_v30 = vunpack.c.l.b16 %v391_v20  ;;  %v473_v31 = vunpack.c.l.b16 %v392_v21  ;;  %v7221_v48 = vld [vmem:[%s9781_s1 + $0xf0] sm:$0xff] }
  0x15   : > { %7345 = vmatpush.bf16.msra.mxu3 %v7196_v5  ;;  %819 = vmatpush.bf16.msra.mxu1 %v7196_v5  ;;  %v311_v27 = vpack.c.bf16 %v279_v18, %v279_v18  ;;  %v312_v28 = vpack.c.bf16 %v280_v19, %v280_v19  ;;  %v488_v32 = vunpack.c.l.b16 %v407_v22  ;;  %v489_v33 = vunpack.c.l.b16 %v408_v23  ;;  %v362_v50 = vld [vmem:[%s7973_s26 + $0x21] sm:$0xff]  ;;  %v377_v51 = vld [vmem:[%s7973_s26 + $0xd9] sm:$0xff]  ;;  %v7229_v57 = vld [vmem:[%s9781_s1 + $0x130] sm:$0xff] }
  0x16   : > { %v721_v35 = vunpack.c.l.b16 %v327_v24  ;;  %v722_v36 = vunpack.c.l.b16 %v328_v26  ;;  %v504_v42 = vpack.c.b16 %v473_v31, %v472_v30  ;;  %v378_v52 = vld [vmem:[%s7973_s26 + $0xe1] sm:$0xff]  ;;  %v297_v53 = vld [vmem:[%s7973_s26 + $0xd8] sm:$0xff]  ;;  %v394_v61 = vpack.c.bf16 %v362_v50, %v362_v50  ;;  %v299_v21 = vld [vmem:[%s7973_s26 + $0xf0] sm:$0xff] }
  0x17   : > { %v705_v37 = vunpack.c.l.b16 %v311_v27  ;;  %v706_v38 = vunpack.c.l.b16 %v312_v28  ;;  %v512_v43 = vpack.c.b16 %v489_v33, %v488_v32  ;;  %v298_v54 = vld [vmem:[%s7973_s26 + $0xe0] sm:$0xff]  ;;  %v281_v55 = vld [vmem:[%s7973_s26 + $0x18] sm:$0xff]  ;;  %v7212_v58 = vld [vmem:[%s9781_s1 + $0xa8] sm:$0xff]  ;;  %v409_v62 = vpack.c.bf16 %v377_v51, %v377_v51 }
  0x18   : > { %587 = vmatpush.bf16.msra.mxu0 %v7203_v6  ;;  %7338 = vmatpush.bf16.msra.mxu2 %v7203_v6  ;;  %v745_v44 = vpack.c.b16 %v722_v36, %v721_v35  ;;  %v282_v56 = vld [vmem:[%s7973_s26 + $0x20] sm:$0xff]  ;;  %v7220_v59 = vld [vmem:[%s9781_s1 + $0xe8] sm:$0xff]  ;;  %v410_v63 = vpack.c.bf16 %v378_v52, %v378_v52  ;;  %v329_v0 = vpack.c.bf16 %v297_v53, %v297_v53  ;;  %v474_v5 = vunpack.c.l.b16 %v393_v60  ;;  %v363_v17 = vld [vmem:[%s7973_s26 + $0x31] sm:$0xff] }
  0x19   : > { %7346 = vmatpush.bf16.msra.mxu3 %v7195_v7  ;;  %820 = vmatpush.bf16.msra.mxu1 %v7195_v7  ;;  %v737_v45 = vpack.c.b16 %v706_v38, %v705_v37  ;;  %v330_v1 = vpack.c.bf16 %v298_v54, %v298_v54  ;;  %v313_v2 = vpack.c.bf16 %v281_v55, %v281_v55  ;;  %v7228_v4 = vld [vmem:[%s9781_s1 + $0x128] sm:$0xff]  ;;  %v475_v6 = vunpack.c.l.b16 %v394_v61  ;;  %v364_v18 = vld [vmem:[%s7973_s26 + $0x39] sm:$0xff]  ;;  %v379_v19 = vld [vmem:[%s7973_s26 + $0xf1] sm:$0xff] }
  0x1a   : > { %v314_v3 = vpack.c.bf16 %v282_v56, %v282_v56  ;;  %v490_v7 = vunpack.c.l.b16 %v409_v62  ;;  %v380_v20 = vld [vmem:[%s7973_s26 + $0xf9] sm:$0xff]  ;;  %v283_v26 = vld [vmem:[%s7973_s26 + $0x30] sm:$0xff]  ;;  %v395_v28 = vpack.c.bf16 %v363_v17, %v363_v17  ;;  %v411_v30 = vpack.c.bf16 %v379_v19, %v379_v19  ;;  %v301_v52 = vld [vmem:[%s7973_s26 + $0x108] sm:$0xff] }
  0x1b   : > { %v8039_v13 = vpack.c.b16 %v475_v6, %v474_v5  ;;  %v7211_v22 = vld [vmem:[%s9781_s1 + $0xa0] sm:$0xff]  ;;  %v284_v27 = vld [vmem:[%s7973_s26 + $0x38] sm:$0xff]  ;;  %v412_v31 = vpack.c.bf16 %v380_v20, %v380_v20  ;;  %v331_v32 = vpack.c.bf16 %v299_v21, %v299_v21  ;;  %v381_v50 = vld [vmem:[%s7973_s26 + $0x109] sm:$0xff] }
  0x1c   : > { %588 = vmatpush.bf16.msra.mxu0 %v7202_v8  ;;  %7339 = vmatpush.bf16.msra.mxu2 %v7202_v8  ;;  %v491_v8 = vunpack.c.l.b16 %v410_v63  ;;  %v708_v12 = vunpack.c.l.b16 %v314_v3  ;;  %v7219_v23 = vld [vmem:[%s9781_s1 + $0xe0] sm:$0xff]  ;;  %v316_v35 = vpack.c.bf16 %v284_v27, %v284_v27  ;;  %v476_v36 = vunpack.c.l.b16 %v395_v28  ;;  %v366_v49 = vld [vmem:[%s7973_s26 + $0x51] sm:$0xff]  ;;  %v384_v20 = vld [vmem:[%s7973_s26 + $0x129] sm:$0xff] }
  0x1d   : > { %7347 = vmatpush.bf16.msra.mxu3 %v7194_v9  ;;  %821 = vmatpush.bf16.msra.mxu1 %v7194_v9  ;;  %v723_v9 = vunpack.c.l.b16 %v329_v0  ;;  %v7227_v24 = vld [vmem:[%s9781_s1 + $0x120] sm:$0xff]  ;;  %v492_v38 = vunpack.c.l.b16 %v411_v30  ;;  %v382_v51 = vld [vmem:[%s7973_s26 + $0x111] sm:$0xff]  ;;  %v398_v60 = vpack.c.bf16 %v366_v49, %v366_v49  ;;  %v413_v61 = vpack.c.bf16 %v381_v50, %v381_v50  ;;  %v288_v27 = vld [vmem:[%s7973_s26 + $0x68] sm:$0xff] }
  0x1e   : > { %v513_v14 = vpack.c.b16 %v491_v8, %v490_v7  ;;  %v7210_v53 = vld [vmem:[%s9781_s1 + $0x98] sm:$0xff]  ;;  %v302_v56 = vld [vmem:[%s7973_s26 + $0x110] sm:$0xff]  ;;  %v414_v62 = vpack.c.bf16 %v382_v51, %v382_v51  ;;  %v333_v63 = vpack.c.bf16 %v301_v52, %v301_v52  ;;  %v367_v17 = vld [vmem:[%s7973_s26 + $0x61] sm:$0xff] }
  0x1f   : > { %v7218_v54 = vld [vmem:[%s9781_s1 + $0xd8] sm:$0xff]  ;;  %v334_v0 = vpack.c.bf16 %v302_v56, %v302_v56  ;;  %v494_v5 = vunpack.c.l.b16 %v413_v61  ;;  %v383_v19 = vld [vmem:[%s7973_s26 + $0x121] sm:$0xff]  ;;  %v399_v28 = vpack.c.bf16 %v367_v17, %v367_v17 }
  0x20   : > { %589 = vmatpush.bf16.msra.mxu0 %v7201_v10  ;;  %7340 = vmatpush.bf16.msra.mxu2 %v7201_v10  ;;  %v724_v10 = vunpack.c.l.b16 %v330_v1  ;;  %v7226_v55 = vld [vmem:[%s9781_s1 + $0x118] sm:$0xff]  ;;  %v495_v6 = vunpack.c.l.b16 %v414_v62  ;;  %v727_v7 = vunpack.c.l.b16 %v333_v63  ;;  %v303_v21 = vld [vmem:[%s7973_s26 + $0x120] sm:$0xff]  ;;  %v415_v30 = vpack.c.bf16 %v383_v19, %v383_v19  ;;  %v7208_v56 = vld [vmem:[%s9781_s1 + $0x88] sm:$0xff] }
  0x21   : > { %7348 = vmatpush.bf16.msra.mxu3 %v7193_v11  ;;  %822 = vmatpush.bf16.msra.mxu1 %v7193_v11  ;;  %v707_v11 = vunpack.c.l.b16 %v313_v2  ;;  %v728_v8 = vunpack.c.l.b16 %v334_v0  ;;  %v369_v50 = vld [vmem:[%s7973_s26 + $0x79] sm:$0xff]  ;;  %v370_v51 = vld [vmem:[%s7973_s26 + $0x81] sm:$0xff] }
  0x22   : > { %v746_v15 = vpack.c.b16 %v724_v10, %v723_v9  ;;  %v385_v52 = vld [vmem:[%s7973_s26 + $0x139] sm:$0xff]  ;;  %v401_v62 = vpack.c.bf16 %v369_v50, %v369_v50  ;;  %v402_v63 = vpack.c.bf16 %v370_v51, %v370_v51 }
  0x23   : > { %v8041_v16 = vpack.c.b16 %v708_v12, %v707_v11  ;;  %v515_v12 = vpack.c.b16 %v495_v6, %v494_v5  ;;  %v7238_v61 = vld [vmem:[%s9781_s1 + $0x178] sm:$0xff]  ;;  %v417_v0 = vpack.c.bf16 %v385_v52, %v385_v52 }
  0x24   : > { %590 = vmatpush.bf16.msra.mxu0 %v7200_v25  ;;  %7341 = vmatpush.bf16.msra.mxu2 %v7200_v25  ;;  %v300_v25 = vld [vmem:[%s7973_s26 + $0xf8] sm:$0xff]  ;;  %v482_v6 = vunpack.c.l.b16 %v401_v62 }
  0x25   : > { %7349 = vmatpush.bf16.msra.mxu3 %v7192_v29  ;;  %823 = vmatpush.bf16.msra.mxu1 %v7192_v29  ;;  %v396_v29 = vpack.c.bf16 %v364_v18, %v364_v18  ;;  %v332_v33 = vpack.c.bf16 %v300_v25, %v300_v25  ;;  %v368_v18 = vld [vmem:[%s7973_s26 + $0x69] sm:$0xff]  ;;  %v374_v62 = vld [vmem:[%s7973_s26 + $0xb1] sm:$0xff] }
  0x26   : > { %v304_v25 = vld [vmem:[%s7973_s26 + $0x128] sm:$0xff] }
  0x27   : > { %v477_v37 = vunpack.c.l.b16 %v396_v29  ;;  %v400_v29 = vpack.c.bf16 %v368_v18, %v368_v18 }
  0x28   : > { %591 = vmatpush.bf16.msra.mxu0 %v7199_v34  ;;  %7342 = vmatpush.bf16.msra.mxu2 %v7199_v34  ;;  %v315_v34 = vpack.c.bf16 %v283_v26, %v283_v26  ;;  %v287_v26 = vld [vmem:[%s7973_s26 + $0x60] sm:$0xff] }
  0x29   : > { %7350 = vmatpush.bf16.msra.mxu3 %v7191_v39  ;;  %824 = vmatpush.bf16.msra.mxu1 %v7191_v39  ;;  %v493_v39 = vunpack.c.l.b16 %v412_v31  ;;  %v416_v31 = vpack.c.bf16 %v384_v20, %v384_v20 }
  0x2b   : > { %592 = vmatmul.bf16.vlgmr.msra.gmra.mxu0 %v504_v42  ;;  %632 = vmatmul.bf16.vlgmr.msra.gmra.mxu2 %v512_v43  ;;  %v709_v42 = vunpack.c.l.b16 %v315_v34  ;;  %v710_v43 = vunpack.c.l.b16 %v316_v35  ;;  %v319_v34 = vpack.c.bf16 %v287_v26, %v287_v26  ;;  %v320_v35 = vpack.c.bf16 %v288_v27, %v288_v27  ;;  %v307_v26 = vld [vmem:[%s7973_s26 + $0x150] sm:$0xff]  ;;  %v308_v27 = vld [vmem:[%s7973_s26 + $0x158] sm:$0xff] }
  0x2c   : > { %1131 = vmatpush.bf16.msrb.mxu2 %v7214_v40  ;;  %865 = vmatmul.bf16.vlgmr.msra.gmra.mxu3 %v745_v44  ;;  %v725_v40 = vunpack.c.l.b16 %v331_v32  ;;  %v8062_v44 = vpack.c.b16 %v477_v37, %v476_v36  ;;  %v335_v32 = vpack.c.bf16 %v303_v21, %v303_v21  ;;  %v480_v36 = vunpack.c.l.b16 %v399_v28  ;;  %v7237_v28 = vld [vmem:[%s9781_s1 + $0x170] sm:$0xff] }
  0x2d   : > { %1478 = vmatpush.bf16.msrb.mxu3 %v7222_v41  ;;  %825 = vmatmul.bf16.vlgmr.msra.gmra.mxu1 %v737_v45  ;;  %v726_v41 = vunpack.c.l.b16 %v332_v33  ;;  %v514_v45 = vpack.c.b16 %v493_v39, %v492_v38  ;;  %v336_v33 = vpack.c.bf16 %v304_v25, %v304_v25  ;;  %v481_v37 = vunpack.c.l.b16 %v400_v29  ;;  %v388_v25 = vld [vmem:[%s7973_s26 + $0x159] sm:$0xff]  ;;  %v291_v29 = vld [vmem:[%s7973_s26 + $0x90] sm:$0xff] }
  0x2e   : > { %1824 = vmatpush.bf16.msrb.mxu0 %v7230_v46  ;;  %v496_v38 = vunpack.c.l.b16 %v415_v30  ;;  %v497_v39 = vunpack.c.l.b16 %v416_v31  ;;  %2170 = vmatpush.bf16.msrb.mxu1 %v7238_v61  ;;  %v7207_v30 = vld [vmem:[%s9781_s1 + $0x80] sm:$0xff]  ;;  %v373_v61 = vld [vmem:[%s7973_s26 + $0xa9] sm:$0xff] }
  0x2f   : > { %v747_v46 = vpack.c.b16 %v726_v41, %v725_v40  ;;  %v729_v40 = vunpack.c.l.b16 %v335_v32  ;;  %v730_v41 = vunpack.c.l.b16 %v336_v33  ;;  %v7215_v31 = vld [vmem:[%s9781_s1 + $0xc0] sm:$0xff]  ;;  %v292_v32 = vld [vmem:[%s7973_s26 + $0x98] sm:$0xff]  ;;  %v7236_v33 = vld [vmem:[%s9781_s1 + $0x168] sm:$0xff] }
  0x30   : > { %1132 = vmatpush.bf16.msrb.mxu2 %v7213_v47  ;;  %v8064_v47 = vpack.c.b16 %v710_v43, %v709_v42  ;;  %v713_v42 = vunpack.c.l.b16 %v319_v34  ;;  %v714_v43 = vunpack.c.l.b16 %v320_v35  ;;  %v7223_v34 = vld [vmem:[%s9781_s1 + $0x100] sm:$0xff] }
  0x31   : > { %1479 = vmatpush.bf16.msrb.mxu3 %v7221_v48  ;;  %v365_v48 = vld [vmem:[%s7973_s26 + $0x49] sm:$0xff] }
  0x32   : > { %1825 = vmatpush.bf16.msrb.mxu0 %v7229_v57  ;;  %v285_v57 = vld [vmem:[%s7973_s26 + $0x48] sm:$0xff]  ;;  %v8110_v49 = vpack.c.b16 %v714_v43, %v713_v42  ;;  %2171 = vmatpush.bf16.msrb.mxu1 %v7237_v28  ;;  %v324_v42 = vpack.c.bf16 %v292_v32, %v292_v32  ;;  %v7235_v43 = vld [vmem:[%s9781_s1 + $0x160] sm:$0xff] }
  0x33   : > { %v317_v1 = vpack.c.bf16 %v285_v57, %v285_v57  ;;  %v7216_v57 = vld [vmem:[%s9781_s1 + $0xc8] sm:$0xff] }
  0x34   : > { %1133 = vmatpush.bf16.msrb.mxu2 %v7212_v58  ;;  %v286_v58 = vld [vmem:[%s7973_s26 + $0x50] sm:$0xff] }
  0x35   : > { %1480 = vmatpush.bf16.msrb.mxu3 %v7220_v59  ;;  %v397_v59 = vpack.c.bf16 %v365_v48, %v365_v48  ;;  %v318_v2 = vpack.c.bf16 %v286_v58, %v286_v58  ;;  %v711_v9 = vunpack.c.l.b16 %v317_v1  ;;  %v749_v48 = vpack.c.b16 %v730_v41, %v729_v40  ;;  %v7224_v58 = vld [vmem:[%s9781_s1 + $0x108] sm:$0xff] }
  0x36   : > { %1826 = vmatpush.bf16.msrb.mxu0 %v7228_v4  ;;  %v479_v4 = vunpack.c.l.b16 %v398_v60  ;;  %v290_v60 = vld [vmem:[%s7973_s26 + $0x80] sm:$0xff]  ;;  %v340_v40 = vpack.c.bf16 %v308_v27, %v308_v27  ;;  %v323_v41 = vpack.c.bf16 %v291_v29, %v291_v29  ;;  %2172 = vmatpush.bf16.msrb.mxu1 %v7236_v33 }
  0x37   : > { %v478_v3 = vunpack.c.l.b16 %v397_v59  ;;  %v712_v10 = vunpack.c.l.b16 %v318_v2  ;;  %v289_v59 = vld [vmem:[%s7973_s26 + $0x78] sm:$0xff]  ;;  %v322_v5 = vpack.c.bf16 %v290_v60, %v290_v60 }
  0x38   : > { %1134 = vmatpush.bf16.msrb.mxu2 %v7211_v22  ;;  %v7209_v22 = vld [vmem:[%s9781_s1 + $0x90] sm:$0xff] }
  0x39   : > { %1481 = vmatpush.bf16.msrb.mxu3 %v7219_v23  ;;  %v8085_v11 = vpack.c.b16 %v479_v4, %v478_v3  ;;  %v7217_v23 = vld [vmem:[%s9781_s1 + $0xd0] sm:$0xff]  ;;  %v321_v4 = vpack.c.bf16 %v289_v59, %v289_v59  ;;  %v716_v17 = vunpack.c.l.b16 %v322_v5 }
  0x3a   : > { %1827 = vmatpush.bf16.msrb.mxu0 %v7227_v24  ;;  %v7225_v24 = vld [vmem:[%s9781_s1 + $0x110] sm:$0xff]  ;;  %2173 = vmatpush.bf16.msrb.mxu1 %v7235_v43 }
  0x3b   : > { %597 = vmatmul.bf16.gmra.mxu0 %v8039_v13  ;;  %637 = vmatmul.bf16.gmra.mxu2 %v513_v14  ;;  %v748_v14 = vpack.c.b16 %v728_v8, %v727_v7  ;;  %v483_v7 = vunpack.c.l.b16 %v402_v63  ;;  %v498_v8 = vunpack.c.l.b16 %v417_v0  ;;  %v389_v63 = vld [vmem:[%s7973_s26 + $0x169] sm:$0xff]  ;;  %v390_v0 = vld [vmem:[%s7973_s26 + $0x171] sm:$0xff] }
  0x3c   : > { %870 = vmatmul.bf16.gmra.mxu3 %v746_v15  ;;  %1135 = vmatpush.bf16.msrb.mxu2 %v7210_v53  ;;  %v8087_v15 = vpack.c.b16 %v712_v10, %v711_v9  ;;  %v386_v53 = vld [vmem:[%s7973_s26 + $0x141] sm:$0xff]  ;;  %v310_v5 = vld [vmem:[%s7973_s26 + $0x170] sm:$0xff] }
  0x3d   : > { %830 = vmatmul.bf16.gmra.mxu1 %v8041_v16  ;;  %1482 = vmatpush.bf16.msrb.mxu3 %v7218_v54  ;;  %v305_v54 = vld [vmem:[%s7973_s26 + $0x138] sm:$0xff]  ;;  %v418_v1 = vpack.c.bf16 %v386_v53, %v386_v53  ;;  %v8134_v18 = vpack.c.b16 %v483_v7, %v482_v6  ;;  %v734_v53 = vunpack.c.l.b16 %v340_v40  ;;  %v293_v6 = vld [vmem:[%s7973_s26 + $0xa8] sm:$0xff]  ;;  %v294_v7 = vld [vmem:[%s7973_s26 + $0xb0] sm:$0xff] }
  0x3e   : > { %1828 = vmatpush.bf16.msrb.mxu0 %v7226_v55  ;;  %v306_v55 = vld [vmem:[%s7973_s26 + $0x140] sm:$0xff]  ;;  %v337_v2 = vpack.c.bf16 %v305_v54, %v305_v54  ;;  %v717_v54 = vunpack.c.l.b16 %v323_v41 }
  0x3f   : > { %v338_v3 = vpack.c.bf16 %v306_v55, %v306_v55  ;;  %v499_v9 = vunpack.c.l.b16 %v418_v1  ;;  %v718_v55 = vunpack.c.l.b16 %v324_v42  ;;  %v7233_v1 = vld [vmem:[%s9781_s1 + $0x150] sm:$0xff]  ;;  %v6421_v40 = vld [vmem:[%s7973_s26 + $0x22] sm:$0xff] }
  0x40   : > { %1136 = vmatpush.bf16.msrb.mxu2 %v7209_v22  ;;  %v731_v10 = vunpack.c.l.b16 %v337_v2  ;;  %v371_v22 = vld [vmem:[%s7973_s26 + $0x91] sm:$0xff]  ;;  %v309_v2 = vld [vmem:[%s7973_s26 + $0x168] sm:$0xff] }
  0x41   : > { %1483 = vmatpush.bf16.msrb.mxu3 %v7217_v23  ;;  %v517_v19 = vpack.c.b16 %v499_v9, %v498_v8  ;;  %v372_v23 = vld [vmem:[%s7973_s26 + $0x99] sm:$0xff]  ;;  %v403_v35 = vpack.c.bf16 %v371_v22, %v371_v22  ;;  %v8171_v60 = vpack.c.b16 %v718_v55, %v717_v54  ;;  %v405_v8 = vpack.c.bf16 %v373_v61, %v373_v61  ;;  %v7253_v61 = vld [vmem:[%s9781_s1 + $0x1f0] sm:$0xff] }
  0x42   : > { %1829 = vmatpush.bf16.msrb.mxu0 %v7225_v24  ;;  %v387_v24 = vld [vmem:[%s7973_s26 + $0x151] sm:$0xff]  ;;  %v406_v9 = vpack.c.bf16 %v374_v62, %v374_v62  ;;  %v326_v22 = vpack.c.bf16 %v294_v7, %v294_v7 }
  0x43   : > { %v6422_v62 = vld [vmem:[%s7973_s26 + $0x32] sm:$0xff] }
  0x44   : > { %1137 = vmatpush.bf16.msrb.mxu2 %v7208_v56  ;;  %v720_v32 = vunpack.c.l.b16 %v326_v22  ;;  %v6424_v22 = vld [vmem:[%s7973_s26 + $0x4a] sm:$0xff] }
  0x45   : > { %1484 = vmatpush.bf16.msrb.mxu3 %v7216_v57 }
  0x46   : > { %1830 = vmatpush.bf16.msrb.mxu0 %v7224_v58  ;;  %v7234_v58 = vld [vmem:[%s9781_s1 + $0x158] sm:$0xff] }
  0x47   : > { %2174 = vmatpush.bf16.msrb.mxu1 %v7234_v58 }
  0x48   : > { %1138 = vmatpush.bf16.msrb.mxu2 %v7207_v30 }
  0x49   : > { %1485 = vmatpush.bf16.msrb.mxu3 %v7215_v31 }
  0x4a   : > { %1831 = vmatpush.bf16.msrb.mxu0 %v7223_v34 }
  0x4b   : > { %602 = vmatmul.bf16.gmra.mxu0 %v8062_v44  ;;  %642 = vmatmul.bf16.gmra.mxu2 %v514_v45  ;;  %v8108_v45 = vpack.c.b16 %v481_v37, %v480_v36  ;;  %v404_v36 = vpack.c.bf16 %v372_v23, %v372_v23  ;;  %v419_v37 = vpack.c.bf16 %v387_v24, %v387_v24  ;;  %v7231_v23 = vld [vmem:[%s9781_s1 + $0x140] sm:$0xff]  ;;  %v7262_v24 = vld [vmem:[%s9781_s1 + $0x238] sm:$0xff] }
  0x4c   : > { %875 = vmatmul.bf16.gmra.mxu3 %v747_v46  ;;  %v516_v46 = vpack.c.b16 %v497_v39, %v496_v38  ;;  %v420_v38 = vpack.c.bf16 %v388_v25, %v388_v25  ;;  %v339_v39 = vpack.c.bf16 %v307_v26, %v307_v26  ;;  %2175 = vmatpush.bf16.msrb.mxu1 %v7233_v1  ;;  %v486_v25 = vunpack.c.l.b16 %v405_v8 }
  0x4d   : > { %835 = vmatmul.bf16.gmra.mxu1 %v8064_v47  ;;  %v500_v50 = vunpack.c.l.b16 %v419_v37  ;;  %v487_v26 = vunpack.c.l.b16 %v406_v9  ;;  %v906_v37 = vld [vmem:[%s7973_s26 + $0x2] sm:$0xff] }
  0x4e   : > { %v501_v51 = vunpack.c.l.b16 %v420_v38  ;;  %v733_v52 = vunpack.c.l.b16 %v339_v39  ;;  %3209 = vmatpush.bf16.msra.mxu0 %v7262_v24  ;;  %v907_v38 = vld [vmem:[%s7973_s26 + $0xa] sm:$0xff]  ;;  %v6420_v39 = vld [vmem:[%s7973_s26 + $0x1a] sm:$0xff]  ;;  %v938_v41 = vpack.c.bf16 %v906_v37, %v906_v37 }
  0x4f   : > { %v8201_v33 = vpack.c.b16 %v487_v26, %v486_v25  ;;  %v939_v42 = vpack.c.bf16 %v907_v38, %v907_v38  ;;  %v1977_v43 = vpack.c.bf16 %v6420_v39, %v6420_v39 }
  0x50   : > { %v518_v57 = vpack.c.b16 %v501_v51, %v500_v50  ;;  %v751_v59 = vpack.c.b16 %v734_v53, %v733_v52 }
  0x51   : > { %v1020_v50 = vunpack.c.l.b16 %v939_v42  ;;  %v2058_v51 = vunpack.c.l.b16 %v1977_v43  ;;  %v7252_v42 = vld [vmem:[%s9781_s1 + $0x1e8] sm:$0xff] }
  0x52   : > { %v6426_v43 = vld [vmem:[%s7973_s26 + $0x62] sm:$0xff] }
  0x5b   : > { %607 = vmatmul.bf16.gmra.mxu0 %v8085_v11  ;;  %647 = vmatmul.bf16.gmra.mxu2 %v515_v12  ;;  %v732_v12 = vunpack.c.l.b16 %v338_v3  ;;  %v7246_v3 = vld [vmem:[%s9781_s1 + $0x1b8] sm:$0xff] }
  0x5c   : > { %880 = vmatmul.bf16.gmra.mxu3 %v748_v14  ;;  %v715_v14 = vunpack.c.l.b16 %v321_v4  ;;  %v7254_v4 = vld [vmem:[%s9781_s1 + $0x1f8] sm:$0xff]  ;;  %2517 = vmatpush.bf16.msra.mxu2 %v7246_v3  ;;  %v1979_v3 = vpack.c.bf16 %v6422_v62, %v6422_v62 }
  0x5d   : > { %840 = vmatmul.bf16.gmra.mxu1 %v8087_v15  ;;  %v750_v20 = vpack.c.b16 %v732_v12, %v731_v10  ;;  %2863 = vmatpush.bf16.msra.mxu3 %v7254_v4  ;;  %v421_v10 = vpack.c.bf16 %v389_v63, %v389_v63  ;;  %v422_v12 = vpack.c.bf16 %v390_v0, %v390_v0  ;;  %v6423_v63 = vld [vmem:[%s7973_s26 + $0x3a] sm:$0xff] }
  0x5e   : > { %v8136_v21 = vpack.c.b16 %v716_v17, %v715_v14  ;;  %v7232_v14 = vld [vmem:[%s9781_s1 + $0x148] sm:$0xff]  ;;  %v341_v17 = vpack.c.bf16 %v309_v2, %v309_v2  ;;  %v2060_v7 = vunpack.c.l.b16 %v1979_v3 }
  0x5f   : > { %2176 = vmatpush.bf16.msrb.mxu1 %v7232_v14  ;;  %v502_v27 = vunpack.c.l.b16 %v421_v10  ;;  %v503_v28 = vunpack.c.l.b16 %v422_v12 }
  0x60   : > { %v735_v29 = vunpack.c.l.b16 %v341_v17 }
  0x61   : > { %v519_v34 = vpack.c.b16 %v503_v28, %v502_v27  ;;  %2864 = vmatpush.bf16.msra.mxu3 %v7253_v61  ;;  %v1981_v28 = vpack.c.bf16 %v6424_v22, %v6424_v22 }
  0x63   : > { %2177 = vmatpush.bf16.msrb.mxu1 %v7231_v23  ;;  %v6425_v23 = vld [vmem:[%s7973_s26 + $0x52] sm:$0xff] }
  0x65   : > { %2865 = vmatpush.bf16.msra.mxu3 %v7252_v42 }
  0x6b   : > { %612 = vmatmul.bf16.gmra.mxu0 %v8108_v45  ;;  %652 = vmatmul.bf16.gmra.mxu2 %v516_v46  ;;  %v484_v46 = vunpack.c.l.b16 %v403_v35 }
  0x6c   : > { %885 = vmatmul.bf16.gmra.mxu3 %v749_v48  ;;  %v485_v48 = vunpack.c.l.b16 %v404_v36 }
  0x6d   : > { %845 = vmatmul.bf16.gmra.mxu1 %v8110_v49 }
  0x6e   : > { %v8166_v56 = vpack.c.b16 %v485_v48, %v484_v46  ;;  %v1978_v46 = vpack.c.bf16 %v6421_v40, %v6421_v40  ;;  %v1019_v48 = vunpack.c.l.b16 %v938_v41  ;;  %v7244_v41 = vld [vmem:[%s9781_s1 + $0x1a8] sm:$0xff] }
  0x70   : > { %v2059_v52 = vunpack.c.l.b16 %v1978_v46  ;;  %v1051_v53 = vpack.c.b16 %v1020_v50, %v1019_v48  ;;  %v6427_v46 = vld [vmem:[%s7973_s26 + $0x6a] sm:$0xff] }
  0x72   : > { %v2090_v55 = vpack.c.b16 %v2059_v52, %v2058_v51  ;;  %v1983_v52 = vpack.c.bf16 %v6426_v43, %v6426_v43  ;;  %v7259_v43 = vld [vmem:[%s9781_s1 + $0x220] sm:$0xff] }
  0x7b   : > { %617 = vmatmul.bf16.gmra.mxu0 %v8134_v18  ;;  %657 = vmatmul.bf16.gmra.mxu2 %v517_v19  ;;  %v342_v19 = vpack.c.bf16 %v310_v5, %v310_v5 }
  0x7c   : > { %890 = vmatmul.bf16.gmra.mxu3 %v750_v20  ;;  %v325_v20 = vpack.c.bf16 %v293_v6, %v293_v6  ;;  %v7261_v6 = vld [vmem:[%s9781_s1 + $0x230] sm:$0xff] }
  0x7d   : > { %850 = vmatmul.bf16.gmra.mxu1 %v8136_v21  ;;  %v736_v30 = vunpack.c.l.b16 %v342_v19  ;;  %3210 = vmatpush.bf16.msra.mxu0 %v7261_v6 }
  0x7e   : > { %v719_v31 = vunpack.c.l.b16 %v325_v20 }
  0x7f   : > { %v752_v35 = vpack.c.b16 %v736_v30, %v735_v29  ;;  %v1982_v29 = vpack.c.bf16 %v6425_v23, %v6425_v23 }
  0x80   : > { %v8203_v36 = vpack.c.b16 %v720_v32, %v719_v31  ;;  %v2062_v32 = vunpack.c.l.b16 %v1981_v28 }
  0x8b   : > { %622 = vmatmul.bf16.gmra.mxu0 %v8166_v56  ;;  %662 = vmatmul.bf16.gmra.mxu2 %v518_v57 }
  0x8c   : > { %895 = vmatmul.bf16.gmra.mxu3 %v751_v59  ;;  %v7245_v59 = vld [vmem:[%s9781_s1 + $0x1b0] sm:$0xff] }
  0x8d   : > { %855 = vmatmul.bf16.gmra.mxu1 %v8171_v60  ;;  %2518 = vmatpush.bf16.msra.mxu2 %v7245_v59 }
  0x91   : > { %2519 = vmatpush.bf16.msra.mxu2 %v7244_v41 }
  0x9b   : > { %627 = vmatmul.bf16.gmra.mxu0 %v8201_v33  ;;  %667 = vmatmul.bf16.gmra.mxu2 %v519_v34  ;;  %v2063_v34 = vunpack.c.l.b16 %v1982_v29 }
  0x9c   : > { %900 = vmatmul.bf16.gmra.mxu3 %v752_v35 }
  0x9d   : > { %860 = vmatmul.bf16.gmra.mxu1 %v8203_v36  ;;  %v2092_v38 = vpack.c.b16 %v2063_v34, %v2062_v32  ;;  %v7251_v32 = vld [vmem:[%s9781_s1 + $0x1e0] sm:$0xff]  ;;  %v6430_v34 = vld [vmem:[%s7973_s26 + $0x92] sm:$0xff] }
  0x9e   : > { %2866 = vmatpush.bf16.msra.mxu3 %v7251_v32  ;;  %v6275_v32 = vld [vmem:[%s7973_s26 + $0xc8] sm:$0xff] }
  0xa8   : > { %v593_v54 = vpop.f32.mrf.mxu0 }
  0xaa   : > { %v826_v57 = vpop.f32.mrf.mxu1 }
  0xab   : > { %v8211_v58 = vadd.f32 %v826_v57, %v593_v54  ;;  %1139 = vmatmul.bf16.vlgmr.msrb.gmra.mxu2 %v1051_v53  ;;  %1832 = vmatmul.bf16.vlgmr.msrb.gmra.mxu0 %v8039_v13  ;;  %v2064_v57 = vunpack.c.l.b16 %v1983_v52 }
  0xac   : > { %1486 = vmatmul.bf16.vlgmr.msrb.gmra.mxu3 %v8041_v16  ;;  %v1980_v16 = vpack.c.bf16 %v6423_v63, %v6423_v63 }
  0xad   : > { %2178 = vmatmul.bf16.vlgmr.msrb.gmra.mxu1 %v2090_v55 }
  0xae   : > { %v633_v0 = vpop.f32.mrf.mxu2  ;;  %v2061_v8 = vunpack.c.l.b16 %v1980_v16  ;;  %v6428_v16 = vld [vmem:[%s7973_s26 + $0x7a] sm:$0xff] }
  0xaf   : > { %v866_v1 = vpop.f32.mrf.mxu3 }
  0xb0   : > { %v8223_v2 = vadd.f32 %v866_v1, %v633_v0  ;;  %v595_v13 = vpop.f32.mrf.mxu0  ;;  %v2091_v17 = vpack.c.b16 %v2061_v8, %v2060_v7 }
  0xb2   : > { %v828_v4 = vpop.f32.mrf.mxu1 }
  0xb3   : > { %v8225_v5 = vadd.f32 %v828_v4, %v595_v13  ;;  %v6429_v4 = vld [vmem:[%s7973_s26 + $0x82] sm:$0xff] }
  0xb6   : > { %v635_v9 = vpop.f32.mrf.mxu2 }
  0xb7   : > { %v868_v10 = vpop.f32.mrf.mxu3 }
  0xb8   : > { %v8230_v12 = vadd.f32 %v868_v10, %v635_v9  ;;  %v598_v14 = vpop.f32.mrf.mxu0  ;;  %v1985_v10 = vpack.c.bf16 %v6428_v16, %v6428_v16 }
  0xba   : > { %v831_v19 = vpop.f32.mrf.mxu1  ;;  %v2066_v22 = vunpack.c.l.b16 %v1985_v10 }
  0xbb   : > { %v8232_v20 = vadd.f32 %v831_v19, %v598_v14  ;;  %1144 = vmatmul.bf16.gmra.mxu2 %v2090_v55  ;;  %1837 = vmatmul.bf16.gmra.mxu0 %v8062_v44  ;;  %v7260_v55 = vld [vmem:[%s9781_s1 + $0x228] sm:$0xff]  ;;  %v1986_v14 = vpack.c.bf16 %v6429_v4, %v6429_v4 }
  0xbc   : > { %1491 = vmatmul.bf16.gmra.mxu3 %v8064_v47  ;;  %3211 = vmatpush.bf16.msra.mxu0 %v7260_v55 }
  0xbd   : > { %2183 = vmatmul.bf16.gmra.mxu1 %v2091_v17  ;;  %v2067_v23 = vunpack.c.l.b16 %v1986_v14 }
  0xbe   : > { %v638_v24 = vpop.f32.mrf.mxu2 }
  0xbf   : > { %v871_v25 = vpop.f32.mrf.mxu3 }
  0xc0   : > { %v8238_v26 = vadd.f32 %v871_v25, %v638_v24  ;;  %v600_v27 = vpop.f32.mrf.mxu0  ;;  %3212 = vmatpush.bf16.msra.mxu0 %v7259_v43 }
  0xc2   : > { %v833_v30 = vpop.f32.mrf.mxu1 }
  0xc3   : > { %v8240_v31 = vadd.f32 %v833_v30, %v600_v27  ;;  %v2094_v27 = vpack.c.b16 %v2067_v23, %v2066_v22  ;;  %v7243_v30 = vld [vmem:[%s9781_s1 + $0x1a0] sm:$0xff] }
  0xc4   : > { %2520 = vmatpush.bf16.msra.mxu2 %v7243_v30  ;;  %v7250_v30 = vld [vmem:[%s9781_s1 + $0x1d8] sm:$0xff] }
  0xc5   : > { %2867 = vmatpush.bf16.msra.mxu3 %v7250_v30 }
  0xc6   : > { %v640_v44 = vpop.f32.mrf.mxu2 }
  0xc7   : > { %v873_v35 = vpop.f32.mrf.mxu3 }
  0xc8   : > { %v8242_v47 = vadd.f32 %v873_v35, %v640_v44  ;;  %v603_v37 = vpop.f32.mrf.mxu0  ;;  %v6431_v44 = vld [vmem:[%s7973_s26 + $0x9a] sm:$0xff] }
  0xca   : > { %v836_v39 = vpop.f32.mrf.mxu1 }
  0xcb   : > { %v8244_v40 = vadd.f32 %v836_v39, %v603_v37  ;;  %1149 = vmatmul.bf16.gmra.mxu2 %v2091_v17  ;;  %1842 = vmatmul.bf16.gmra.mxu0 %v8085_v11  ;;  %v1987_v39 = vpack.c.bf16 %v6430_v34, %v6430_v34  ;;  %v6434_v34 = vld [vmem:[%s7973_s26 + $0xc2] sm:$0xff] }
  0xcc   : > { %1496 = vmatmul.bf16.gmra.mxu3 %v8087_v15  ;;  %v1984_v15 = vpack.c.bf16 %v6427_v46, %v6427_v46  ;;  %v1991_v43 = vpack.c.bf16 %v6434_v34, %v6434_v34 }
  0xcd   : > { %2188 = vmatmul.bf16.gmra.mxu1 %v2092_v38  ;;  %v2068_v46 = vunpack.c.l.b16 %v1987_v39 }
  0xce   : > { %v643_v48 = vpop.f32.mrf.mxu2  ;;  %v2065_v59 = vunpack.c.l.b16 %v1984_v15 }
  0xcf   : > { %v876_v50 = vpop.f32.mrf.mxu3 }
  0xd0   : > { %v8256_v51 = vadd.f32 %v876_v50, %v643_v48  ;;  %v605_v11 = vpop.f32.mrf.mxu0  ;;  %v2093_v1 = vpack.c.b16 %v2065_v59, %v2064_v57  ;;  %v6432_v59 = vld [vmem:[%s7973_s26 + $0xaa] sm:$0xff] }
  0xd1   : > { %v1989_v16 = vpack.c.bf16 %v6432_v59, %v6432_v59  ;;  %v2072_v59 = vunpack.c.l.b16 %v1991_v43 }
  0xd2   : > { %v838_v53 = vpop.f32.mrf.mxu1 }
  0xd3   : > { %v8258_v54 = vadd.f32 %v838_v53, %v605_v11 }
  0xd6   : > { %v645_v61 = vpop.f32.mrf.mxu2 }
  0xd7   : > { %v878_v62 = vpop.f32.mrf.mxu3 }
  0xd8   : > { %v8263_v63 = vadd.f32 %v878_v62, %v645_v61  ;;  %v608_v0 = vpop.f32.mrf.mxu0  ;;  %v6433_v61 = vld [vmem:[%s7973_s26 + $0xb2] sm:$0xff] }
  0xd9   : > { %v1990_v4 = vpack.c.bf16 %v6433_v61, %v6433_v61 }
  0xda   : > { %v841_v13 = vpop.f32.mrf.mxu1 }
  0xdb   : > { %v8265_v3 = vadd.f32 %v841_v13, %v608_v0  ;;  %1154 = vmatmul.bf16.gmra.mxu2 %v2092_v38  ;;  %1847 = vmatmul.bf16.gmra.mxu0 %v8108_v45 }
  0xdc   : > { %1501 = vmatmul.bf16.gmra.mxu3 %v8110_v49 }
  0xdd   : > { %2193 = vmatmul.bf16.gmra.mxu1 %v2093_v1 }
  0xde   : > { %v648_v6 = vpop.f32.mrf.mxu2 }
  0xdf   : > { %v881_v7 = vpop.f32.mrf.mxu3 }
  0xe0   : > { %v8271_v8 = vadd.f32 %v881_v7, %v648_v6  ;;  %v610_v9 = vpop.f32.mrf.mxu0 }
  0xe2   : > { %v843_v17 = vpop.f32.mrf.mxu1 }
  0xe3   : > { %v8273_v19 = vadd.f32 %v843_v17, %v610_v9  ;;  %v2070_v9 = vunpack.c.l.b16 %v1989_v16 }
  0xe6   : > { %v650_v45 = vpop.f32.mrf.mxu2 }
  0xe7   : > { %v883_v24 = vpop.f32.mrf.mxu3 }
  0xe8   : > { %v8275_v49 = vadd.f32 %v883_v24, %v650_v45  ;;  %v613_v25 = vpop.f32.mrf.mxu0  ;;  %v6274_v24 = vld [vmem:[%s7973_s26 + $0xc0] sm:$0xff] }
  0xea   : > { %v846_v28 = vpop.f32.mrf.mxu1 }
  0xeb   : > { %v8277_v29 = vadd.f32 %v846_v28, %v613_v25  ;;  %1159 = vmatmul.bf16.gmra.mxu2 %v2093_v1  ;;  %1852 = vmatmul.bf16.gmra.mxu0 %v8134_v18  ;;  %v6354_v25 = vld [vmem:[%s7973_s26 + $0xc1] sm:$0xff]  ;;  %v7242_v28 = vld [vmem:[%s9781_s1 + $0x198] sm:$0xff] }
  0xec   : > { %1506 = vmatmul.bf16.gmra.mxu3 %v8136_v21  ;;  %v1988_v21 = vpack.c.bf16 %v6431_v44, %v6431_v44  ;;  %v6435_v44 = vld [vmem:[%s7973_s26 + $0xca] sm:$0xff]  ;;  %2521 = vmatpush.bf16.msra.mxu2 %v7242_v28  ;;  %v6437_v28 = vld [vmem:[%s7973_s26 + $0xe2] sm:$0xff] }
  0xed   : > { %2198 = vmatmul.bf16.gmra.mxu1 %v2094_v27 }
  0xee   : > { %v653_v35 = vpop.f32.mrf.mxu2  ;;  %v2069_v48 = vunpack.c.l.b16 %v1988_v21 }
  0xef   : > { %v886_v37 = vpop.f32.mrf.mxu3 }
  0xf0   : > { %v8289_v38 = vadd.f32 %v886_v37, %v653_v35  ;;  %v615_v18 = vpop.f32.mrf.mxu0  ;;  %v2095_v53 = vpack.c.b16 %v2069_v48, %v2068_v46  ;;  %v1299_v37 = vpack.c.bf16 %v6274_v24, %v6274_v24  ;;  %v1992_v46 = vpack.c.bf16 %v6435_v44, %v6435_v44  ;;  %v6357_v24 = vld [vmem:[%s7973_s26 + $0xe1] sm:$0xff] }
  0xf2   : > { %v848_v41 = vpop.f32.mrf.mxu1  ;;  %v2073_v61 = vunpack.c.l.b16 %v1992_v46 }
  0xf3   : > { %v8291_v42 = vadd.f32 %v848_v41, %v615_v18  ;;  %v1645_v18 = vpack.c.bf16 %v6354_v25, %v6354_v25  ;;  %v1300_v41 = vpack.c.bf16 %v6275_v32, %v6275_v32  ;;  %v6277_v25 = vld [vmem:[%s7973_s26 + $0xe0] sm:$0xff] }
  0xf6   : > { %v655_v50 = vpop.f32.mrf.mxu2 }
  0xf7   : > { %v888_v11 = vpop.f32.mrf.mxu3 }
  0xf8   : > { %v8296_v52 = vadd.f32 %v888_v11, %v655_v50  ;;  %v618_v15 = vpop.f32.mrf.mxu0  ;;  %v1726_v11 = vunpack.c.l.b16 %v1645_v18  ;;  %v1302_v18 = vpack.c.bf16 %v6277_v25, %v6277_v25  ;;  %v7241_v25 = vld [vmem:[%s9781_s1 + $0x190] sm:$0xff] }
  0xf9   : > { %2522 = vmatpush.bf16.msra.mxu2 %v7241_v25 }
  0xfa   : > { %v851_v55 = vpop.f32.mrf.mxu1 }
  0xfb   : > { %v8298_v57 = vadd.f32 %v851_v55, %v618_v15  ;;  %1164 = vmatmul.bf16.gmra.mxu2 %v2094_v27  ;;  %1857 = vmatmul.bf16.gmra.mxu0 %v8166_v56  ;;  %v2071_v56 = vunpack.c.l.b16 %v1990_v4  ;;  %v6355_v27 = vld [vmem:[%s7973_s26 + $0xc9] sm:$0xff]  ;;  %v1381_v55 = vunpack.c.l.b16 %v1300_v41 }
  0xfc   : > { %1511 = vmatmul.bf16.gmra.mxu3 %v8171_v60 }
  0xfd   : > { %2203 = vmatmul.bf16.gmra.mxu1 %v2095_v53  ;;  %v2096_v22 = vpack.c.b16 %v2071_v56, %v2070_v9  ;;  %v2097_v56 = vpack.c.b16 %v2073_v61, %v2072_v59 }
  0xfe   : > { %v658_v62 = vpop.f32.mrf.mxu2 }
  0xff   : > { %v891_v0 = vpop.f32.mrf.mxu3 }
 0x100   : > { %v8304_v1 = vadd.f32 %v891_v0, %v658_v62  ;;  %v620_v13 = vpop.f32.mrf.mxu0  ;;  %v7258_v62 = vld [vmem:[%s9781_s1 + $0x218] sm:$0xff] }
 0x101   : > { %3213 = vmatpush.bf16.msra.mxu0 %v7258_v62 }
 0x102   : > { %v853_v6 = vpop.f32.mrf.mxu1 }
 0x103   : > { %v8306_v7 = vadd.f32 %v853_v6, %v620_v13 }
 0x106   : > { %v660_v10 = vpop.f32.mrf.mxu2 }
 0x107   : > { %v893_v60 = vpop.f32.mrf.mxu3 }
 0x108   : > { %v8308_v14 = vadd.f32 %v893_v60, %v660_v10  ;;  %v623_v17 = vpop.f32.mrf.mxu0 }
 0x10a   : > { %v856_v23 = vpop.f32.mrf.mxu1 }
 0x10b   : > { %v8310_v45 = vadd.f32 %v856_v23, %v623_v17  ;;  %1169 = vmatmul.bf16.gmra.mxu2 %v2095_v53  ;;  %1862 = vmatmul.bf16.gmra.mxu0 %v8201_v33  ;;  %v1380_v53 = vunpack.c.l.b16 %v1299_v37  ;;  %v6276_v17 = vld [vmem:[%s7973_s26 + $0xd8] sm:$0xff] }
 0x10c   : > { %1516 = vmatmul.bf16.gmra.mxu3 %v8203_v36  ;;  %v1646_v36 = vpack.c.bf16 %v6355_v27, %v6355_v27  ;;  %v6356_v23 = vld [vmem:[%s7973_s26 + $0xd9] sm:$0xff]  ;;  %v1301_v34 = vpack.c.bf16 %v6276_v17, %v6276_v17  ;;  %v6358_v17 = vld [vmem:[%s7973_s26 + $0xf1] sm:$0xff] }
 0x10d   : > { %2208 = vmatmul.bf16.gmra.mxu1 %v2096_v22  ;;  %v1405_v9 = vpack.c.b16 %v1381_v55, %v1380_v53  ;;  %v6436_v27 = vld [vmem:[%s7973_s26 + $0xda] sm:$0xff]  ;;  %v1647_v44 = vpack.c.bf16 %v6356_v23, %v6356_v23 }
 0x10e   : > { %v663_v35 = vpop.f32.mrf.mxu2  ;;  %v1727_v15 = vunpack.c.l.b16 %v1646_v36  ;;  %v1993_v36 = vpack.c.bf16 %v6436_v27, %v6436_v27  ;;  %v6359_v23 = vld [vmem:[%s7973_s26 + $0xf9] sm:$0xff] }
 0x10f   : > { %v896_v33 = vpop.f32.mrf.mxu3  ;;  %v1728_v43 = vunpack.c.l.b16 %v1647_v44  ;;  %v6439_v27 = vld [vmem:[%s7973_s26 + $0xfa] sm:$0xff]  ;;  %v1649_v44 = vpack.c.bf16 %v6358_v17, %v6358_v17 }
 0x110   : > { %v8326_v39 = vadd.f32 %v896_v33, %v663_v35  ;;  %v625_v21 = vpop.f32.mrf.mxu0  ;;  %v1751_v16 = vpack.c.b16 %v1727_v15, %v1726_v11  ;;  %v1648_v35 = vpack.c.bf16 %v6357_v24, %v6357_v24  ;;  %v1383_v11 = vunpack.c.l.b16 %v1302_v18  ;;  %v6438_v24 = vld [vmem:[%s7973_s26 + $0xf2] sm:$0xff] }
 0x111   : > { %v2074_v15 = vunpack.c.l.b16 %v1993_v36 }
 0x112   : > { %v858_v48 = vpop.f32.mrf.mxu1  ;;  %v1729_v46 = vunpack.c.l.b16 %v1648_v35  ;;  %v1650_v35 = vpack.c.bf16 %v6359_v23, %v6359_v23 }
 0x113   : > { %v8328_v50 = vadd.f32 %v858_v48, %v625_v21  ;;  %v1382_v48 = vunpack.c.l.b16 %v1301_v34 }
 0x114   : > { %v1752_v61 = vpack.c.b16 %v1729_v46, %v1728_v43 }
 0x116   : > { %v665_v0 = vpop.f32.mrf.mxu2 }
 0x117   : > { %v898_v13 = vpop.f32.mrf.mxu3 }
 0x118   : > { %v8333_v4 = vadd.f32 %v898_v13, %v665_v0  ;;  %v628_v6 = vpop.f32.mrf.mxu0  ;;  %v1406_v13 = vpack.c.b16 %v1383_v11, %v1382_v48  ;;  %v1730_v11 = vunpack.c.l.b16 %v1649_v44  ;;  %v6440_v44 = vld [vmem:[%s7973_s26 + $0x10a] sm:$0xff] }
 0x11a   : > { %v861_v10 = vpop.f32.mrf.mxu1 }
 0x11b   : > { %v8335_v60 = vadd.f32 %v861_v10, %v628_v6  ;;  %1174 = vmatmul.bf16.gmra.mxu2 %v2096_v22  ;;  %1867 = vmatmul.bf16.gmra.mxu0 %v1751_v16  ;;  %v1994_v22 = vpack.c.bf16 %v6437_v28, %v6437_v28  ;;  %v6279_v10 = vld [vmem:[%s7973_s26 + $0xf8] sm:$0xff] }
 0x11c   : > { %1521 = vmatmul.bf16.gmra.mxu3 %v1405_v9  ;;  %v6278_v9 = vld [vmem:[%s7973_s26 + $0xf0] sm:$0xff]  ;;  %v7278_v28 = vld [vmem:[%s9782_s2 + $0x78] sm:$0xff]  ;;  %v1304_v36 = vpack.c.bf16 %v6279_v10, %v6279_v10 }
 0x11d   : > { %2213 = vmatmul.bf16.gmra.mxu1 %v2097_v56  ;;  %v2075_v53 = vunpack.c.l.b16 %v1994_v22  ;;  %v1303_v18 = vpack.c.bf16 %v6278_v9, %v6278_v9  ;;  %v1995_v22 = vpack.c.bf16 %v6438_v24, %v6438_v24 }
 0x11e   : > { %v668_v30 = vpop.f32.mrf.mxu2  ;;  %3844 = vmatpush.bf16.msra.mxu1 %v7278_v28 }
 0x11f   : > { %v901_v32 = vpop.f32.mrf.mxu3  ;;  %v2098_v16 = vpack.c.b16 %v2075_v53, %v2074_v15  ;;  %v1731_v15 = vunpack.c.l.b16 %v1650_v35  ;;  %v1384_v53 = vunpack.c.l.b16 %v1303_v18  ;;  %v6441_v35 = vld [vmem:[%s7973_s26 + $0x112] sm:$0xff] }
 0x120   : > { %v8343_v33 = vadd.f32 %v901_v32, %v668_v30  ;;  %v630_v37 = vpop.f32.mrf.mxu0 }
 0x122   : > { %v863_v21 = vpop.f32.mrf.mxu1 }
 0x123   : > { %v8345_v41 = vadd.f32 %v863_v21, %v630_v37  ;;  %v1996_v21 = vpack.c.bf16 %v6439_v27, %v6439_v27 }
 0x126   : > { %v670_v55 = vpop.f32.mrf.mxu2 }
 0x127   : > { %v903_v59 = vpop.f32.mrf.mxu3 }
 0x128   : > { %v8347_v62 = vadd.f32 %v903_v59, %v670_v55  ;;  %v1833_v0 = vpop.f32.mrf.mxu0  ;;  %v1385_v55 = vunpack.c.l.b16 %v1304_v36  ;;  %v2076_v59 = vunpack.c.l.b16 %v1995_v22 }
 0x12a   : > { %v2179_v6 = vpop.f32.mrf.mxu1  ;;  %v1407_v24 = vpack.c.b16 %v1385_v55, %v1384_v53 }
 0x12b   : > { %1179 = vmatmul.bf16.gmra.mxu2 %v2097_v56  ;;  %1872 = vmatmul.bf16.gmra.mxu0 %v1752_v61  ;;  %v7249_v56 = vld [vmem:[%s9781_s1 + $0x1d0] sm:$0xff]  ;;  %v2077_v61 = vunpack.c.l.b16 %v1996_v21 }
 0x12c   : > { %1526 = vmatmul.bf16.gmra.mxu3 %v1406_v13  ;;  %v7257_v13 = vld [vmem:[%s9781_s1 + $0x210] sm:$0xff] }
 0x12d   : > { %2218 = vmatmul.bf16.gmra.mxu1 %v2098_v16  ;;  %2868 = vmatpush.bf16.msra.mxu3 %v7249_v56  ;;  %v6280_v56 = vld [vmem:[%s7973_s26 + $0x108] sm:$0xff] }
 0x12e   : > { %v1140_v30 = vpop.f32.mrf.mxu2  ;;  %3214 = vmatpush.bf16.msra.mxu0 %v7257_v13 }
 0x12f   : > { %v1220_v32 = vadd.f32 %v1140_v30, %v8211_v58  ;;  %v1487_v34 = vpop.f32.mrf.mxu3  ;;  %v6360_v30 = vld [vmem:[%s7973_s26 + $0x109] sm:$0xff] }
 0x130   : > { %v1835_v37 = vpop.f32.mrf.mxu0  ;;  %v1651_v21 = vpack.c.bf16 %v6360_v30, %v6360_v30 }
 0x131   : > { %v1567_v43 = vadd.f32 %v1487_v34, %v1220_v32  ;;  %v6281_v34 = vld [vmem:[%s7973_s26 + $0x110] sm:$0xff] }
 0x132   : > { %v2181_v46 = vpop.f32.mrf.mxu1 }
 0x133   : > { %v1913_v48 = vadd.f32 %v1833_v0, %v1567_v43  ;;  %v1753_v0 = vpack.c.b16 %v1731_v15, %v1730_v11  ;;  %v1306_v11 = vpack.c.bf16 %v6281_v34, %v6281_v34  ;;  %v1998_v15 = vpack.c.bf16 %v6441_v35, %v6441_v35  ;;  %v6282_v35 = vld [vmem:[%s7973_s26 + $0x120] sm:$0xff] }
 0x135   : > { %v8365_v58 = vadd.f32 %v2179_v6, %v1913_v48  ;;  %v2099_v6 = vpack.c.b16 %v2077_v61, %v2076_v59  ;;  %v1732_v61 = vunpack.c.l.b16 %v1651_v21 }
 0x136   : > { %v1142_v9 = vpop.f32.mrf.mxu2 }
 0x137   : > { %v1221_v10 = vadd.f32 %v1142_v9, %v8225_v5  ;;  %v1489_v17 = vpop.f32.mrf.mxu3  ;;  %v6361_v5 = vld [vmem:[%s7973_s26 + $0x111] sm:$0xff]  ;;  %v1387_v9 = vunpack.c.l.b16 %v1306_v11 }
 0x138   : > { %v1838_v23 = vpop.f32.mrf.mxu0  ;;  %v1652_v43 = vpack.c.bf16 %v6361_v5, %v6361_v5 }
 0x139   : > { %v1568_v25 = vadd.f32 %v1489_v17, %v1221_v10  ;;  %v2079_v17 = vunpack.c.l.b16 %v1998_v15 }
 0x13a   : > { %v2184_v27 = vpop.f32.mrf.mxu1 }
 0x13b   : > { %1184 = vmatmul.bf16.gmra.mxu2 %v2098_v16  ;;  %1877 = vmatmul.bf16.gmra.mxu0 %v1753_v0  ;;  %v1914_v28 = vadd.f32 %v1835_v37, %v1568_v25  ;;  %v1305_v16 = vpack.c.bf16 %v6280_v56, %v6280_v56  ;;  %v1997_v37 = vpack.c.bf16 %v6440_v44, %v6440_v44 }
 0x13c   : > { %1531 = vmatmul.bf16.gmra.mxu3 %v1407_v24 }
 0x13d   : > { %2223 = vmatmul.bf16.gmra.mxu1 %v2099_v6  ;;  %v8374_v32 = vadd.f32 %v2181_v46, %v1914_v28  ;;  %v1733_v46 = vunpack.c.l.b16 %v1652_v43  ;;  %v1386_v13 = vunpack.c.l.b16 %v1305_v16  ;;  %v2078_v10 = vunpack.c.l.b16 %v1997_v37  ;;  %v6443_v43 = vld [vmem:[%s7973_s26 + $0x12a] sm:$0xff] }
 0x13e   : > { %v1145_v18 = vpop.f32.mrf.mxu2 }
 0x13f   : > { %v1222_v36 = vadd.f32 %v1145_v18, %v8232_v20  ;;  %v1492_v22 = vpop.f32.mrf.mxu3  ;;  %v1754_v28 = vpack.c.b16 %v1733_v46, %v1732_v61  ;;  %v2100_v30 = vpack.c.b16 %v2079_v17, %v2078_v10  ;;  %v6283_v18 = vld [vmem:[%s7973_s26 + $0x128] sm:$0xff] }
 0x140   : > { %v1840_v48 = vpop.f32.mrf.mxu0  ;;  %v1308_v61 = vpack.c.bf16 %v6283_v18, %v6283_v18 }
 0x141   : > { %v1569_v53 = vadd.f32 %v1492_v22, %v1222_v36  ;;  %v6363_v36 = vld [vmem:[%s7973_s26 + $0x129] sm:$0xff] }
 0x142   : > { %v2186_v55 = vpop.f32.mrf.mxu1  ;;  %v7240_v22 = vld [vmem:[%s9781_s1 + $0x188] sm:$0xff] }
 0x143   : > { %v1915_v59 = vadd.f32 %v1838_v23, %v1569_v53  ;;  %v1408_v23 = vpack.c.b16 %v1387_v9, %v1386_v13  ;;  %2523 = vmatpush.bf16.msra.mxu2 %v7240_v22  ;;  %v1654_v53 = vpack.c.bf16 %v6363_v36, %v6363_v36  ;;  %v2000_v13 = vpack.c.bf16 %v6443_v43, %v6443_v43 }
 0x145   : > { %v8380_v20 = vadd.f32 %v2184_v27, %v1915_v59  ;;  %v6362_v27 = vld [vmem:[%s7973_s26 + $0x121] sm:$0xff]  ;;  %v1307_v59 = vpack.c.bf16 %v6282_v35, %v6282_v35 }
 0x146   : > { %v1147_v0 = vpop.f32.mrf.mxu2  ;;  %v1653_v15 = vpack.c.bf16 %v6362_v27, %v6362_v27 }
 0x147   : > { %v1223_v24 = vadd.f32 %v1147_v0, %v8240_v31  ;;  %v1494_v25 = vpop.f32.mrf.mxu3  ;;  %v6442_v31 = vld [vmem:[%s7973_s26 + $0x122] sm:$0xff] }
 0x148   : > { %v1843_v56 = vpop.f32.mrf.mxu0  ;;  %v1999_v46 = vpack.c.bf16 %v6442_v31, %v6442_v31  ;;  %v1734_v0 = vunpack.c.l.b16 %v1653_v15  ;;  %v6444_v15 = vld [vmem:[%s7973_s26 + $0x13a] sm:$0xff] }
 0x149   : > { %v1570_v5 = vadd.f32 %v1494_v25, %v1223_v24  ;;  %v1735_v24 = vunpack.c.l.b16 %v1654_v53  ;;  %v1388_v25 = vunpack.c.l.b16 %v1307_v59  ;;  %v6445_v53 = vld [vmem:[%s7973_s26 + $0x142] sm:$0xff] }
 0x14a   : > { %v2189_v34 = vpop.f32.mrf.mxu1 }
 0x14b   : > { %1189 = vmatmul.bf16.gmra.mxu2 %v2099_v6  ;;  %1882 = vmatmul.bf16.gmra.mxu0 %v1754_v28  ;;  %v1916_v44 = vadd.f32 %v1840_v48, %v1570_v5  ;;  %v7277_v6 = vld [vmem:[%s9782_s2 + $0x70] sm:$0xff]  ;;  %v7248_v48 = vld [vmem:[%s9781_s1 + $0x1c8] sm:$0xff]  ;;  %v1389_v28 = vunpack.c.l.b16 %v1308_v61  ;;  %v2081_v5 = vunpack.c.l.b16 %v2000_v13 }
 0x14c   : > { %1536 = vmatmul.bf16.gmra.mxu3 %v1408_v23  ;;  %3845 = vmatpush.bf16.msra.mxu1 %v7277_v6  ;;  %v2080_v23 = vunpack.c.l.b16 %v1999_v46 }
 0x14d   : > { %2228 = vmatmul.bf16.gmra.mxu1 %v2100_v30  ;;  %v8391_v21 = vadd.f32 %v2186_v55, %v1916_v44  ;;  %2869 = vmatpush.bf16.msra.mxu3 %v7248_v48  ;;  %v7256_v44 = vld [vmem:[%s9781_s1 + $0x208] sm:$0xff]  ;;  %v1409_v31 = vpack.c.b16 %v1389_v28, %v1388_v25  ;;  %v6284_v48 = vld [vmem:[%s7973_s26 + $0x138] sm:$0xff] }
 0x14e   : > { %v1150_v16 = vpop.f32.mrf.mxu2  ;;  %3215 = vmatpush.bf16.msra.mxu0 %v7256_v44 }
 0x14f   : > { %v1224_v11 = vadd.f32 %v1150_v16, %v8244_v40  ;;  %v1497_v37 = vpop.f32.mrf.mxu3  ;;  %v6364_v16 = vld [vmem:[%s7973_s26 + $0x139] sm:$0xff] }
 0x150   : > { %v1845_v55 = vpop.f32.mrf.mxu0  ;;  %v1655_v13 = vpack.c.bf16 %v6364_v16, %v6364_v16 }
 0x151   : > { %v1571_v9 = vadd.f32 %v1497_v37, %v1224_v11  ;;  %v6285_v37 = vld [vmem:[%s7973_s26 + $0x140] sm:$0xff] }
 0x152   : > { %v2191_v10 = vpop.f32.mrf.mxu1 }
 0x153   : > { %v1917_v17 = vadd.f32 %v1843_v56, %v1571_v9  ;;  %v1755_v56 = vpack.c.b16 %v1735_v24, %v1734_v0  ;;  %v1310_v0 = vpack.c.bf16 %v6285_v37, %v6285_v37  ;;  %v2002_v24 = vpack.c.bf16 %v6445_v53, %v6445_v53  ;;  %v6286_v53 = vld [vmem:[%s7973_s26 + $0x150] sm:$0xff] }
 0x155   : > { %v8401_v40 = vadd.f32 %v2189_v34, %v1917_v17  ;;  %v2101_v34 = vpack.c.b16 %v2081_v5, %v2080_v23  ;;  %v1736_v5 = vunpack.c.l.b16 %v1655_v13 }
 0x156   : > { %v1152_v35 = vpop.f32.mrf.mxu2 }
 0x157   : > { %v1225_v18 = vadd.f32 %v1152_v35, %v8258_v54  ;;  %v1499_v27 = vpop.f32.mrf.mxu3  ;;  %v6365_v54 = vld [vmem:[%s7973_s26 + $0x141] sm:$0xff]  ;;  %v1391_v35 = vunpack.c.l.b16 %v1310_v0 }
 0x158   : > { %v1848_v36 = vpop.f32.mrf.mxu0  ;;  %v1656_v9 = vpack.c.bf16 %v6365_v54, %v6365_v54 }
 0x159   : > { %v1572_v22 = vadd.f32 %v1499_v27, %v1225_v18  ;;  %v2083_v27 = vunpack.c.l.b16 %v2002_v24 }
 0x15a   : > { %v2194_v43 = vpop.f32.mrf.mxu1 }
 0x15b   : > { %1194 = vmatmul.bf16.gmra.mxu2 %v2100_v30  ;;  %1887 = vmatmul.bf16.gmra.mxu0 %v1755_v56  ;;  %v1918_v6 = vadd.f32 %v1845_v55, %v1572_v22  ;;  %v1309_v30 = vpack.c.bf16 %v6284_v48, %v6284_v48  ;;  %v2001_v55 = vpack.c.bf16 %v6444_v15, %v6444_v15 }
 0x15c   : > { %1541 = vmatmul.bf16.gmra.mxu3 %v1409_v31 }
 0x15d   : > { %2233 = vmatmul.bf16.gmra.mxu1 %v2101_v34  ;;  %v8410_v11 = vadd.f32 %v2191_v10, %v1918_v6  ;;  %v1737_v10 = vunpack.c.l.b16 %v1656_v9  ;;  %v1390_v44 = vunpack.c.l.b16 %v1309_v30  ;;  %v2082_v18 = vunpack.c.l.b16 %v2001_v55  ;;  %v6447_v9 = vld [vmem:[%s7973_s26 + $0x15a] sm:$0xff] }
 0x15e   : > { %v1155_v59 = vpop.f32.mrf.mxu2 }
 0x15f   : > { %v1226_v61 = vadd.f32 %v1155_v59, %v8265_v3  ;;  %v1502_v46 = vpop.f32.mrf.mxu3  ;;  %v1756_v6 = vpack.c.b16 %v1737_v10, %v1736_v5  ;;  %v2102_v16 = vpack.c.b16 %v2083_v27, %v2082_v18  ;;  %v6287_v59 = vld [vmem:[%s7973_s26 + $0x158] sm:$0xff] }
 0x160   : > { %v1850_v17 = vpop.f32.mrf.mxu0  ;;  %v1312_v5 = vpack.c.bf16 %v6287_v59, %v6287_v59 }
 0x161   : > { %v1573_v25 = vadd.f32 %v1502_v46, %v1226_v61  ;;  %v6367_v61 = vld [vmem:[%s7973_s26 + $0x159] sm:$0xff] }
 0x162   : > { %v2196_v28 = vpop.f32.mrf.mxu1  ;;  %v7239_v46 = vld [vmem:[%s9781_s1 + $0x180] sm:$0xff] }
 0x163   : > { %v1919_v23 = vadd.f32 %v1848_v36, %v1573_v25  ;;  %v1410_v36 = vpack.c.b16 %v1391_v35, %v1390_v44  ;;  %2524 = vmatpush.bf16.msra.mxu2 %v7239_v46  ;;  %v1658_v25 = vpack.c.bf16 %v6367_v61, %v6367_v61  ;;  %v2004_v44 = vpack.c.bf16 %v6447_v9, %v6447_v9 }
 0x165   : > { %v8416_v3 = vadd.f32 %v2194_v43, %v1919_v23  ;;  %v6366_v43 = vld [vmem:[%s7973_s26 + $0x151] sm:$0xff]  ;;  %v1311_v23 = vpack.c.bf16 %v6286_v53, %v6286_v53 }
 0x166   : > { %v1157_v56 = vpop.f32.mrf.mxu2  ;;  %v1657_v24 = vpack.c.bf16 %v6366_v43, %v6366_v43 }
 0x167   : > { %v1227_v31 = vadd.f32 %v1157_v56, %v8273_v19  ;;  %v1504_v22 = vpop.f32.mrf.mxu3  ;;  %v6446_v19 = vld [vmem:[%s7973_s26 + $0x152] sm:$0xff] }
 0x168   : > { %v1853_v48 = vpop.f32.mrf.mxu0  ;;  %v2003_v10 = vpack.c.bf16 %v6446_v19, %v6446_v19  ;;  %v1738_v56 = vunpack.c.l.b16 %v1657_v24  ;;  %v6449_v24 = vld [vmem:[%s7973_s26 + $0x172] sm:$0xff] }
 0x169   : > { %v1574_v54 = vadd.f32 %v1504_v22, %v1227_v31  ;;  %v1739_v31 = vunpack.c.l.b16 %v1658_v25  ;;  %v1392_v22 = vunpack.c.l.b16 %v1311_v23 }
 0x16a   : > { %v2199_v37 = vpop.f32.mrf.mxu1 }
 0x16b   : > { %1199 = vmatmul.bf16.gmra.mxu2 %v2101_v34  ;;  %1892 = vmatmul.bf16.gmra.mxu0 %v1756_v6  ;;  %v1920_v15 = vadd.f32 %v1850_v17, %v1574_v54  ;;  %v7276_v34 = vld [vmem:[%s9782_s2 + $0x68] sm:$0xff]  ;;  %v7247_v17 = vld [vmem:[%s9781_s1 + $0x1c0] sm:$0xff]  ;;  %v1393_v6 = vunpack.c.l.b16 %v1312_v5 }
 0x16c   : > { %1546 = vmatmul.bf16.gmra.mxu3 %v1410_v36  ;;  %3846 = vmatpush.bf16.msra.mxu1 %v7276_v34  ;;  %v2084_v36 = vunpack.c.l.b16 %v2003_v10 }
 0x16d   : > { %2238 = vmatmul.bf16.gmra.mxu1 %v2102_v16  ;;  %v8427_v13 = vadd.f32 %v2196_v28, %v1920_v15  ;;  %2870 = vmatpush.bf16.msra.mxu3 %v7247_v17  ;;  %v7255_v15 = vld [vmem:[%s9781_s1 + $0x200] sm:$0xff]  ;;  %v1411_v19 = vpack.c.b16 %v1393_v6, %v1392_v22  ;;  %v6288_v17 = vld [vmem:[%s7973_s26 + $0x168] sm:$0xff] }
 0x16e   : > { %v1160_v30 = vpop.f32.mrf.mxu2  ;;  %3216 = vmatpush.bf16.msra.mxu0 %v7255_v15 }
 0x16f   : > { %v1228_v0 = vadd.f32 %v1160_v30, %v8277_v29  ;;  %v1507_v55 = vpop.f32.mrf.mxu3  ;;  %v2085_v29 = vunpack.c.l.b16 %v2004_v44  ;;  %v6369_v30 = vld [vmem:[%s7973_s26 + $0x171] sm:$0xff] }
 0x170   : > { %v1855_v28 = vpop.f32.mrf.mxu0  ;;  %v1660_v44 = vpack.c.bf16 %v6369_v30, %v6369_v30 }
 0x171   : > { %v1575_v35 = vadd.f32 %v1507_v55, %v1228_v0  ;;  %v6289_v0 = vld [vmem:[%s7973_s26 + $0x170] sm:$0xff] }
 0x172   : > { %v8437_v18 = vpop.f32.mrf.mxu1  ;;  %v6448_v55 = vld [vmem:[%s7973_s26 + $0x16a] sm:$0xff] }
 0x173   : > { %v1921_v27 = vadd.f32 %v1853_v48, %v1575_v35  ;;  %v1757_v48 = vpack.c.b16 %v1739_v31, %v1738_v56  ;;  %v2005_v56 = vpack.c.bf16 %v6448_v55, %v6448_v55 }
 0x175   : > { %v8439_v54 = vadd.f32 %v2199_v37, %v1921_v27  ;;  %v2103_v37 = vpack.c.b16 %v2085_v29, %v2084_v36  ;;  %v1313_v27 = vpack.c.bf16 %v6288_v17, %v6288_v17  ;;  %v1741_v29 = vunpack.c.l.b16 %v1660_v44  ;;  %v7275_v44 = vld [vmem:[%s9782_s2 + $0x60] sm:$0xff] }
 0x176   : > { %v1162_v53 = vpop.f32.mrf.mxu2  ;;  %3847 = vmatpush.bf16.msra.mxu1 %v7275_v44 }
 0x177   : > { %v1229_v59 = vadd.f32 %v1162_v53, %v8291_v42  ;;  %v1509_v43 = vpop.f32.mrf.mxu3  ;;  %v6368_v42 = vld [vmem:[%s7973_s26 + $0x169] sm:$0xff]  ;;  %v1394_v15 = vunpack.c.l.b16 %v1313_v27 }
 0x178   : > { %v1858_v61 = vpop.f32.mrf.mxu0  ;;  %v1659_v10 = vpack.c.bf16 %v6368_v42, %v6368_v42 }
 0x179   : > { %v1576_v46 = vadd.f32 %v1509_v43, %v1229_v59  ;;  %v2086_v59 = vunpack.c.l.b16 %v2005_v56 }
 0x17a   : > { %v2204_v9 = vpop.f32.mrf.mxu1  ;;  %v1740_v36 = vunpack.c.l.b16 %v1659_v10  ;;  %v6451_v10 = vld [vmem:[%s7973_s26 + $0x18a] sm:$0xff] }
 0x17b   : > { %1204 = vmatmul.bf16.gmra.mxu2 %v2102_v16  ;;  %1897 = vmatmul.bf16.gmra.mxu0 %v1757_v48  ;;  %v8445_v34 = vadd.f32 %v1855_v28, %v1576_v46  ;;  %v1314_v16 = vpack.c.bf16 %v6289_v0, %v6289_v0  ;;  %v2006_v28 = vpack.c.bf16 %v6449_v24, %v6449_v24 }
 0x17c   : > { %1551 = vmatmul.bf16.gmra.mxu3 %v1411_v19  ;;  %v1758_v17 = vpack.c.b16 %v1741_v29, %v1740_v36  ;;  %v2008_v29 = vpack.c.bf16 %v6451_v10, %v6451_v10 }
 0x17d   : > { %2243 = vmatmul.bf16.gmra.mxu1 %v2103_v37  ;;  %v1395_v53 = vunpack.c.l.b16 %v1314_v16  ;;  %v2087_v43 = vunpack.c.l.b16 %v2006_v28 }
 0x17e   : > { %v1165_v25 = vpop.f32.mrf.mxu2 }
 0x17f   : > { %v1230_v23 = vadd.f32 %v1165_v25, %v8298_v57  ;;  %v1512_v5 = vpop.f32.mrf.mxu3  ;;  %v1412_v42 = vpack.c.b16 %v1395_v53, %v1394_v15  ;;  %v2104_v30 = vpack.c.b16 %v2087_v43, %v2086_v59  ;;  %v6291_v25 = vld [vmem:[%s7973_s26 + $0x188] sm:$0xff] }
 0x180   : > { %v1860_v35 = vpop.f32.mrf.mxu0 }
 0x181   : > { %v1577_v31 = vadd.f32 %v1512_v5, %v1230_v23  ;;  %v6370_v23 = vld [vmem:[%s7973_s26 + $0x181] sm:$0xff] }
 0x182   : > { %v8454_v22 = vpop.f32.mrf.mxu1  ;;  %v6450_v5 = vld [vmem:[%s7973_s26 + $0x182] sm:$0xff] }
 0x183   : > { %v1923_v6 = vadd.f32 %v1858_v61, %v1577_v31  ;;  %v2007_v36 = vpack.c.bf16 %v6450_v5, %v6450_v5 }
 0x185   : > { %v8456_v57 = vadd.f32 %v2204_v9, %v1923_v6  ;;  %v6290_v9 = vld [vmem:[%s7973_s26 + $0x180] sm:$0xff]  ;;  %v1316_v6 = vpack.c.bf16 %v6291_v25, %v6291_v25 }
 0x186   : > { %v1167_v48 = vpop.f32.mrf.mxu2  ;;  %v1315_v31 = vpack.c.bf16 %v6290_v9, %v6290_v9 }
 0x187   : > { %v1231_v19 = vadd.f32 %v1167_v48, %v8306_v7  ;;  %v1514_v46 = vpop.f32.mrf.mxu3  ;;  %v6371_v7 = vld [vmem:[%s7973_s26 + $0x189] sm:$0xff] }
 0x188   : > { %v1863_v61 = vpop.f32.mrf.mxu0  ;;  %v1662_v28 = vpack.c.bf16 %v6371_v7, %v6371_v7 }
 0x189   : > { %v1578_v0 = vadd.f32 %v1514_v46, %v1231_v19  ;;  %v1396_v19 = vunpack.c.l.b16 %v1315_v31  ;;  %v1397_v46 = vunpack.c.l.b16 %v1316_v6 }
 0x18a   : > { %v2209_v55 = vpop.f32.mrf.mxu1  ;;  %v1743_v48 = vunpack.c.l.b16 %v1662_v28  ;;  %v6581_v28 = vld [vmem:[%s7973_s26 + $0x39] sm:$0xff] }
 0x18b   : > { %1209 = vmatmul.bf16.gmra.mxu2 %v2103_v37  ;;  %1902 = vmatmul.bf16.gmra.mxu0 %v1758_v17  ;;  %v8459_v24 = vadd.f32 %v1860_v35, %v1578_v0  ;;  %v1661_v37 = vpack.c.bf16 %v6370_v23, %v6370_v23  ;;  %v2088_v17 = vunpack.c.l.b16 %v2007_v36  ;;  %v1413_v7 = vpack.c.b16 %v1397_v46, %v1396_v19 }
 0x18c   : > { %1556 = vmatmul.bf16.gmra.mxu3 %v1412_v42 }
 0x18d   : > { %2248 = vmatmul.bf16.gmra.mxu1 %v2104_v30  ;;  %v1742_v43 = vunpack.c.l.b16 %v1661_v37  ;;  %v6580_v37 = vld [vmem:[%s7973_s26 + $0x31] sm:$0xff] }
 0x18e   : > { %v1170_v27 = vpop.f32.mrf.mxu2 }
 0x18f   : > { %v1232_v16 = vadd.f32 %v1170_v27, %v8310_v45  ;;  %v1517_v56 = vpop.f32.mrf.mxu3  ;;  %v2089_v45 = vunpack.c.l.b16 %v2008_v29  ;;  %v1759_v23 = vpack.c.b16 %v1743_v48, %v1742_v43  ;;  %v2670_v48 = vpack.c.bf16 %v6580_v37, %v6580_v37 }
 0x190   : > { %v1865_v35 = vpop.f32.mrf.mxu0 }
 0x191   : > { %v1579_v15 = vadd.f32 %v1517_v56, %v1232_v16  ;;  %v2105_v5 = vpack.c.b16 %v2089_v45, %v2088_v17  ;;  %v6501_v16 = vld [vmem:[%s7973_s26 + $0x38] sm:$0xff] }
 0x192   : > { %v8471_v53 = vpop.f32.mrf.mxu1  ;;  %v6660_v56 = vld [vmem:[%s7973_s26 + $0x32] sm:$0xff] }
 0x193   : > { %v1925_v59 = vadd.f32 %v1863_v61, %v1579_v15  ;;  %v2325_v15 = vpack.c.bf16 %v6501_v16, %v6501_v16 }
 0x195   : > { %v8473_v42 = vadd.f32 %v2209_v55, %v1925_v59  ;;  %v6500_v55 = vld [vmem:[%s7973_s26 + $0x30] sm:$0xff]  ;;  %v3016_v59 = vpack.c.bf16 %v6660_v56, %v6660_v56 }
 0x196   : > { %v1172_v0 = vpop.f32.mrf.mxu2  ;;  %v2324_v6 = vpack.c.bf16 %v6500_v55, %v6500_v55 }
 0x197   : > { %v1233_v9 = vadd.f32 %v1172_v0, %v8328_v50  ;;  %v1519_v25 = vpop.f32.mrf.mxu3  ;;  %v6661_v50 = vld [vmem:[%s7973_s26 + $0x3a] sm:$0xff]  ;;  %v2406_v0 = vunpack.c.l.b16 %v2325_v15  ;;  %v6582_v15 = vld [vmem:[%s7973_s26 + $0x49] sm:$0xff] }
 0x198   : > { %v1868_v61 = vpop.f32.mrf.mxu0  ;;  %v3017_v43 = vpack.c.bf16 %v6661_v50, %v6661_v50  ;;  %v2405_v17 = vunpack.c.l.b16 %v2324_v6  ;;  %v6503_v6 = vld [vmem:[%s7973_s26 + $0x50] sm:$0xff] }
 0x199   : > { %v1580_v10 = vadd.f32 %v1519_v25, %v1233_v9  ;;  %v3097_v9 = vunpack.c.l.b16 %v3016_v59  ;;  %v7274_v59 = vld [vmem:[%s9782_s2 + $0x58] sm:$0xff] }
 0x19a   : > { %v2214_v44 = vpop.f32.mrf.mxu1  ;;  %v3098_v25 = vunpack.c.l.b16 %v3017_v43  ;;  %v2437_v16 = vpack.c.b16 %v2406_v0, %v2405_v17  ;;  %v2327_v17 = vpack.c.bf16 %v6503_v6, %v6503_v6  ;;  %3848 = vmatpush.bf16.msra.mxu1 %v7274_v59 }
 0x19b   : > { %1214 = vmatmul.bf16.gmra.mxu2 %v2104_v30  ;;  %1907 = vmatmul.bf16.gmra.mxu0 %v1759_v23  ;;  %v8476_v27 = vadd.f32 %v1865_v35, %v1580_v10  ;;  %v2671_v35 = vpack.c.bf16 %v6581_v28, %v6581_v28  ;;  %v2751_v23 = vunpack.c.l.b16 %v2670_v48 }
 0x19c   : > { %1561 = vmatmul.bf16.gmra.mxu3 %v1413_v7  ;;  %v3129_v56 = vpack.c.b16 %v3098_v25, %v3097_v9  ;;  %v2672_v9 = vpack.c.bf16 %v6582_v15, %v6582_v15 }
 0x19d   : > { %2253 = vmatmul.bf16.gmra.mxu1 %v2105_v5  ;;  %v2752_v7 = vunpack.c.l.b16 %v2671_v35 }
 0x19e   : > { %v1175_v31 = vpop.f32.mrf.mxu2 }
 0x19f   : > { %v1234_v36 = vadd.f32 %v1175_v31, %v8335_v60  ;;  %v1522_v29 = vpop.f32.mrf.mxu3  ;;  %v2783_v50 = vpack.c.b16 %v2752_v7, %v2751_v23 }
 0x1a0   : > { %v1870_v30 = vpop.f32.mrf.mxu0 }
 0x1a1   : > { %v1581_v19 = vadd.f32 %v1522_v29, %v1234_v36  ;;  %v6662_v36 = vld [vmem:[%s7973_s26 + $0x4a] sm:$0xff]  ;;  %v6663_v29 = vld [vmem:[%s7973_s26 + $0x52] sm:$0xff] }
 0x1a2   : > { %v8485_v46 = vpop.f32.mrf.mxu1 }
 0x1a3   : > { %v1927_v45 = vadd.f32 %v1868_v61, %v1581_v19 }
 0x1a5   : > { %v8487_v60 = vadd.f32 %v2214_v44, %v1927_v45  ;;  %v6502_v44 = vld [vmem:[%s7973_s26 + $0x48] sm:$0xff]  ;;  %v3018_v45 = vpack.c.bf16 %v6662_v36, %v6662_v36 }
 0x1a6   : > { %v1177_v5 = vpop.f32.mrf.mxu2  ;;  %v2326_v48 = vpack.c.bf16 %v6502_v44, %v6502_v44 }
 0x1a7   : > { %v1235_v10 = vadd.f32 %v1177_v5, %v8345_v41  ;;  %v1524_v55 = vpop.f32.mrf.mxu3  ;;  %v6583_v41 = vld [vmem:[%s7973_s26 + $0x51] sm:$0xff] }
 0x1a8   : > { %v1873_v61 = vpop.f32.mrf.mxu0  ;;  %v2673_v25 = vpack.c.bf16 %v6583_v41, %v6583_v41  ;;  %v2407_v5 = vunpack.c.l.b16 %v2326_v48 }
 0x1a9   : > { %v1582_v37 = vadd.f32 %v1524_v55, %v1235_v10  ;;  %v2408_v55 = vunpack.c.l.b16 %v2327_v17  ;;  %v6665_v17 = vld [vmem:[%s7973_s26 + $0x6a] sm:$0xff] }
 0x1aa   : > { %v2219_v28 = vpop.f32.mrf.mxu1 }
 0x1ab   : > { %2525 = vmatmul.bf16.vlgmr.msra.gmra.mxu2 %v2437_v16  ;;  %3217 = vmatmul.bf16.vlgmr.msra.gmra.mxu0 %v3129_v56  ;;  %v8490_v31 = vadd.f32 %v1870_v30, %v1582_v37  ;;  %v3019_v30 = vpack.c.bf16 %v6663_v29, %v6663_v29  ;;  %v3099_v16 = vunpack.c.l.b16 %v3018_v45  ;;  %v2754_v37 = vunpack.c.l.b16 %v2673_v25  ;;  %v6584_v45 = vld [vmem:[%s7973_s26 + $0x61] sm:$0xff] }
 0x1ac   : > { %2871 = vmatmul.bf16.vlgmr.msra.gmra.mxu3 %v2783_v50  ;;  %v2753_v50 = vunpack.c.l.b16 %v2672_v9  ;;  %v2438_v29 = vpack.c.b16 %v2408_v55, %v2407_v5  ;;  %v3021_v55 = vpack.c.bf16 %v6665_v17, %v6665_v17 }
 0x1ad   : > { %v3100_v56 = vunpack.c.l.b16 %v3019_v30 }
 0x1ae   : > { %v1180_v43 = vpop.f32.mrf.mxu2  ;;  %v2784_v41 = vpack.c.b16 %v2754_v37, %v2753_v50 }
 0x1af   : > { %v1236_v35 = vadd.f32 %v1180_v43, %v8223_v2  ;;  %v1527_v19 = vpop.f32.mrf.mxu3  ;;  %v3130_v15 = vpack.c.b16 %v3100_v56, %v3099_v16  ;;  %v2674_v56 = vpack.c.bf16 %v6584_v45, %v6584_v45 }
 0x1b0   : > { %v1875_v0 = vpop.f32.mrf.mxu0 }
 0x1b1   : > { %v1583_v23 = vadd.f32 %v1527_v19, %v1236_v35  ;;  %v6505_v35 = vld [vmem:[%s7973_s26 + $0x68] sm:$0xff] }
 0x1b2   : > { %v8502_v7 = vpop.f32.mrf.mxu1  ;;  %v6664_v19 = vld [vmem:[%s7973_s26 + $0x62] sm:$0xff]  ;;  %v2329_v5 = vpack.c.bf16 %v6505_v35, %v6505_v35 }
 0x1b3   : > { %v1929_v10 = vadd.f32 %v1873_v61, %v1583_v23 }
 0x1b5   : > { %v8504_v2 = vadd.f32 %v2219_v28, %v1929_v10  ;;  %v6504_v28 = vld [vmem:[%s7973_s26 + $0x60] sm:$0xff]  ;;  %v3020_v10 = vpack.c.bf16 %v6664_v19, %v6664_v19 }
 0x1b6   : > { %v1182_v44 = vpop.f32.mrf.mxu2  ;;  %v2328_v9 = vpack.c.bf16 %v6504_v28, %v6504_v28 }
 0x1b7   : > { %v1237_v6 = vadd.f32 %v1182_v44, %v8230_v12  ;;  %v1529_v36 = vpop.f32.mrf.mxu3  ;;  %v6585_v12 = vld [vmem:[%s7973_s26 + $0x69] sm:$0xff] }
 0x1b8   : > { %v1878_v61 = vpop.f32.mrf.mxu0  ;;  %v2675_v50 = vpack.c.bf16 %v6585_v12, %v6585_v12  ;;  %v2409_v44 = vunpack.c.l.b16 %v2328_v9 }
 0x1b9   : > { %v1584_v59 = vadd.f32 %v1529_v36, %v1237_v6  ;;  %v2410_v36 = vunpack.c.l.b16 %v2329_v5  ;;  %v6666_v5 = vld [vmem:[%s7973_s26 + $0x7a] sm:$0xff] }
 0x1ba   : > { %v2224_v43 = vpop.f32.mrf.mxu1 }
 0x1bb   : > { %2530 = vmatmul.bf16.gmra.mxu2 %v2438_v29  ;;  %3222 = vmatmul.bf16.gmra.mxu0 %v3130_v15  ;;  %v8507_v48 = vadd.f32 %v1875_v0, %v1584_v59  ;;  %v3101_v29 = vunpack.c.l.b16 %v3020_v10  ;;  %v3102_v15 = vunpack.c.l.b16 %v3021_v55  ;;  %v2756_v59 = vunpack.c.l.b16 %v2675_v50  ;;  %v6667_v10 = vld [vmem:[%s7973_s26 + $0x82] sm:$0xff]  ;;  %v6586_v55 = vld [vmem:[%s7973_s26 + $0x79] sm:$0xff] }
 0x1bc   : > { %2876 = vmatmul.bf16.gmra.mxu3 %v2784_v41  ;;  %v2755_v41 = vunpack.c.l.b16 %v2674_v56  ;;  %v2439_v17 = vpack.c.b16 %v2410_v36, %v2409_v44  ;;  %v7273_v56 = vld [vmem:[%s9782_s2 + $0x50] sm:$0xff] }
 0x1bd   : > { %v3131_v45 = vpack.c.b16 %v3102_v15, %v3101_v29  ;;  %v3022_v29 = vpack.c.bf16 %v6666_v5, %v6666_v5  ;;  %3849 = vmatpush.bf16.msra.mxu1 %v7273_v56 }
 0x1be   : > { %v1185_v30 = vpop.f32.mrf.mxu2  ;;  %v2785_v12 = vpack.c.b16 %v2756_v59, %v2755_v41  ;;  %v2676_v41 = vpack.c.bf16 %v6586_v55, %v6586_v55 }
 0x1bf   : > { %v1238_v25 = vadd.f32 %v1185_v30, %v8238_v26  ;;  %v1532_v23 = vpop.f32.mrf.mxu3 }
 0x1c0   : > { %v1880_v16 = vpop.f32.mrf.mxu0 }
 0x1c1   : > { %v1585_v0 = vadd.f32 %v1532_v23, %v1238_v25  ;;  %v6507_v23 = vld [vmem:[%s7973_s26 + $0x80] sm:$0xff] }
 0x1c2   : > { %v8516_v37 = vpop.f32.mrf.mxu1  ;;  %v2331_v36 = vpack.c.bf16 %v6507_v23, %v6507_v23 }
 0x1c3   : > { %9788 = vst [vmem:[#allocation3_spill] sm:$0xff] %v8516_v37  ;;  %v1931_v6 = vadd.f32 %v1878_v61, %v1585_v0 }
 0x1c5   : > { %v8518_v26 = vadd.f32 %v2224_v43, %v1931_v6  ;;  %v6506_v43 = vld [vmem:[%s7973_s26 + $0x78] sm:$0xff] }
 0x1c6   : > { %v1187_v28 = vpop.f32.mrf.mxu2  ;;  %v2330_v0 = vpack.c.bf16 %v6506_v43, %v6506_v43  ;;  %v2757_v43 = vunpack.c.l.b16 %v2676_v41 }
 0x1c7   : > { %v1239_v35 = vadd.f32 %v1187_v28, %v8242_v47  ;;  %v1534_v19 = vpop.f32.mrf.mxu3  ;;  %v6587_v47 = vld [vmem:[%s7973_s26 + $0x81] sm:$0xff] }
 0x1c8   : > { %v1883_v61 = vpop.f32.mrf.mxu0  ;;  %v2677_v59 = vpack.c.bf16 %v6587_v47, %v6587_v47 }
 0x1c9   : > { %v1586_v30 = vadd.f32 %v1534_v19, %v1239_v35  ;;  %v2411_v19 = vunpack.c.l.b16 %v2330_v0 }
 0x1ca   : > { %v2229_v9 = vpop.f32.mrf.mxu1  ;;  %v2758_v37 = vunpack.c.l.b16 %v2677_v59 }
 0x1cb   : > { %2535 = vmatmul.bf16.gmra.mxu2 %v2439_v17  ;;  %3227 = vmatmul.bf16.gmra.mxu0 %v3131_v45  ;;  %v8521_v25 = vadd.f32 %v1880_v16, %v1586_v30  ;;  %v3023_v16 = vpack.c.bf16 %v6667_v10, %v6667_v10  ;;  %v2412_v45 = vunpack.c.l.b16 %v2331_v36  ;;  %v6668_v36 = vld [vmem:[%s7973_s26 + $0x92] sm:$0xff] }
 0x1cc   : > { %2881 = vmatmul.bf16.gmra.mxu3 %v2785_v12  ;;  %v3103_v12 = vunpack.c.l.b16 %v3022_v29  ;;  %v2786_v56 = vpack.c.b16 %v2758_v37, %v2757_v43  ;;  %v6669_v29 = vld [vmem:[%s7973_s26 + $0x9a] sm:$0xff]  ;;  %v3024_v37 = vpack.c.bf16 %v6668_v36, %v6668_v36 }
 0x1cd   : > { %v3104_v30 = vunpack.c.l.b16 %v3023_v16  ;;  %v2440_v55 = vpack.c.b16 %v2412_v45, %v2411_v19  ;;  %v6588_v16 = vld [vmem:[%s7973_s26 + $0x91] sm:$0xff]  ;;  %v3025_v45 = vpack.c.bf16 %v6669_v29, %v6669_v29 }
 0x1ce   : > { %v1190_v50 = vpop.f32.mrf.mxu2 }
 0x1cf   : > { %v1240_v44 = vadd.f32 %v1190_v50, %v8256_v51  ;;  %v1537_v6 = vpop.f32.mrf.mxu3  ;;  %v3132_v47 = vpack.c.b16 %v3104_v30, %v3103_v12  ;;  %v2678_v30 = vpack.c.bf16 %v6588_v16, %v6588_v16 }
 0x1d0   : > { %v1885_v15 = vpop.f32.mrf.mxu0 }
 0x1d1   : > { %v1587_v28 = vadd.f32 %v1537_v6, %v1240_v44  ;;  %v6509_v6 = vld [vmem:[%s7973_s26 + $0x98] sm:$0xff] }
 0x1d2   : > { %v8533_v35 = vpop.f32.mrf.mxu1 }
 0x1d3   : > { %v1933_v17 = vadd.f32 %v1883_v61, %v1587_v28 }
 0x1d5   : > { %v8535_v51 = vadd.f32 %v2229_v9, %v1933_v17  ;;  %v6508_v9 = vld [vmem:[%s7973_s26 + $0x90] sm:$0xff]  ;;  %v2333_v17 = vpack.c.bf16 %v6509_v6, %v6509_v6 }
 0x1d6   : > { %v1192_v23 = vpop.f32.mrf.mxu2  ;;  %v2332_v59 = vpack.c.bf16 %v6508_v9, %v6508_v9 }
 0x1d7   : > { %v1241_v5 = vadd.f32 %v1192_v23, %v8263_v63  ;;  %v1539_v10 = vpop.f32.mrf.mxu3  ;;  %v6589_v63 = vld [vmem:[%s7973_s26 + $0x99] sm:$0xff] }
 0x1d8   : > { %v1888_v61 = vpop.f32.mrf.mxu0  ;;  %v2679_v43 = vpack.c.bf16 %v6589_v63, %v6589_v63 }
 0x1d9   : > { %v1588_v50 = vadd.f32 %v1539_v10, %v1241_v5  ;;  %v2413_v5 = vunpack.c.l.b16 %v2332_v59 }
 0x1da   : > { %v2234_v0 = vpop.f32.mrf.mxu1  ;;  %v2760_v9 = vunpack.c.l.b16 %v2679_v43  ;;  %v7272_v43 = vld [vmem:[%s9782_s2 + $0x48] sm:$0xff] }
 0x1db   : > { %2540 = vmatmul.bf16.gmra.mxu2 %v2440_v55  ;;  %3232 = vmatmul.bf16.gmra.mxu0 %v3132_v47  ;;  %v8538_v44 = vadd.f32 %v1885_v15, %v1588_v50  ;;  %v2414_v55 = vunpack.c.l.b16 %v2333_v17  ;;  %v3105_v47 = vunpack.c.l.b16 %v3024_v37  ;;  %v2759_v50 = vunpack.c.l.b16 %v2678_v30  ;;  %v6511_v17 = vld [vmem:[%s7973_s26 + $0xb0] sm:$0xff] }
 0x1dc   : > { %2886 = vmatmul.bf16.gmra.mxu3 %v2786_v56  ;;  %v3106_v56 = vunpack.c.l.b16 %v3025_v45  ;;  %v6670_v37 = vld [vmem:[%s7973_s26 + $0xaa] sm:$0xff]  ;;  %v6671_v45 = vld [vmem:[%s7973_s26 + $0xb2] sm:$0xff]  ;;  %3850 = vmatpush.bf16.msra.mxu1 %v7272_v43 }
 0x1dd   : > { %v2441_v16 = vpack.c.b16 %v2414_v55, %v2413_v5  ;;  %v6590_v30 = vld [vmem:[%s7973_s26 + $0xa9] sm:$0xff] }
 0x1de   : > { %v1195_v41 = vpop.f32.mrf.mxu2  ;;  %v3133_v63 = vpack.c.b16 %v3106_v56, %v3105_v47  ;;  %v2335_v47 = vpack.c.bf16 %v6511_v17, %v6511_v17  ;;  %v3026_v56 = vpack.c.bf16 %v6670_v37, %v6670_v37 }
 0x1df   : > { %v1242_v28 = vadd.f32 %v1195_v41, %v8271_v8  ;;  %v1542_v19 = vpop.f32.mrf.mxu3  ;;  %v2787_v41 = vpack.c.b16 %v2760_v9, %v2759_v50  ;;  %v2680_v9 = vpack.c.bf16 %v6590_v30, %v6590_v30 }
 0x1e0   : > { %v1890_v12 = vpop.f32.mrf.mxu0 }
 0x1e1   : > { %v1589_v15 = vadd.f32 %v1542_v19, %v1242_v28 }
 0x1e2   : > { %v8547_v23 = vpop.f32.mrf.mxu1 }
 0x1e3   : > { %9789 = vst [vmem:[#allocation4_spill] sm:$0xff] %v8547_v23  ;;  %v1935_v10 = vadd.f32 %v1888_v61, %v1589_v15 }
 0x1e5   : > { %v8549_v8 = vadd.f32 %v2234_v0, %v1935_v10  ;;  %v6510_v0 = vld [vmem:[%s7973_s26 + $0xa8] sm:$0xff] }
 0x1e6   : > { %v1197_v6 = vpop.f32.mrf.mxu2  ;;  %v2334_v5 = vpack.c.bf16 %v6510_v0, %v6510_v0  ;;  %v2761_v0 = vunpack.c.l.b16 %v2680_v9 }
 0x1e7   : > { %v1243_v36 = vadd.f32 %v1197_v6, %v8275_v49  ;;  %v1544_v29 = vpop.f32.mrf.mxu3  ;;  %v6591_v49 = vld [vmem:[%s7973_s26 + $0xb1] sm:$0xff] }
 0x1e8   : > { %v1893_v61 = vpop.f32.mrf.mxu0  ;;  %v2681_v6 = vpack.c.bf16 %v6591_v49, %v6591_v49 }
 0x1e9   : > { %v1590_v59 = vadd.f32 %v1544_v29, %v1243_v36 }
 0x1ea   : > { %v2239_v28 = vpop.f32.mrf.mxu1 }
 0x1eb   : > { %2545 = vmatmul.bf16.gmra.mxu2 %v2441_v16  ;;  %3237 = vmatmul.bf16.gmra.mxu0 %v3133_v63  ;;  %v8552_v19 = vadd.f32 %v1890_v12, %v1590_v59  ;;  %v3027_v12 = vpack.c.bf16 %v6671_v45, %v6671_v45  ;;  %v2415_v16 = vunpack.c.l.b16 %v2334_v5  ;;  %v3107_v59 = vunpack.c.l.b16 %v3026_v56  ;;  %v6673_v56 = vld [vmem:[%s7973_s26 + $0xca] sm:$0xff] }
 0x1ec   : > { %2891 = vmatmul.bf16.gmra.mxu3 %v2787_v41  ;;  %v2416_v41 = vunpack.c.l.b16 %v2335_v47  ;;  %v6672_v47 = vld [vmem:[%s7973_s26 + $0xc2] sm:$0xff] }
 0x1ed   : > { %9790 = vst [vmem:[#allocation5_spill] sm:$0xff] %v8552_v19  ;;  %v3108_v23 = vunpack.c.l.b16 %v3027_v12  ;;  %v2762_v19 = vunpack.c.l.b16 %v2681_v6  ;;  %v6592_v12 = vld [vmem:[%s7973_s26 + $0xc1] sm:$0xff] }
 0x1ee   : > { %v1200_v15 = vpop.f32.mrf.mxu2  ;;  %v2442_v30 = vpack.c.b16 %v2416_v41, %v2415_v16 }
 0x1ef   : > { %v1244_v10 = vadd.f32 %v1200_v15, %v8289_v38  ;;  %v1547_v55 = vpop.f32.mrf.mxu3  ;;  %v3134_v49 = vpack.c.b16 %v3108_v23, %v3107_v59  ;;  %v2788_v43 = vpack.c.b16 %v2762_v19, %v2761_v0  ;;  %v3028_v19 = vpack.c.bf16 %v6672_v47, %v6672_v47 }
 0x1f0   : > { %v1895_v50 = vpop.f32.mrf.mxu0  ;;  %v2682_v59 = vpack.c.bf16 %v6592_v12, %v6592_v12 }
 0x1f1   : > { %v1591_v36 = vadd.f32 %v1547_v55, %v1244_v10  ;;  %v6513_v55 = vld [vmem:[%s7973_s26 + $0xc8] sm:$0xff] }
 0x1f2   : > { %v8564_v29 = vpop.f32.mrf.mxu1  ;;  %v2337_v16 = vpack.c.bf16 %v6513_v55, %v6513_v55 }
 0x1f3   : > { %v1937_v63 = vadd.f32 %v1893_v61, %v1591_v36 }
 0x1f5   : > { %v8566_v38 = vadd.f32 %v2239_v28, %v1937_v63  ;;  %v6512_v28 = vld [vmem:[%s7973_s26 + $0xc0] sm:$0xff]  ;;  %v3029_v63 = vpack.c.bf16 %v6673_v56, %v6673_v56 }
 0x1f6   : > { %v1202_v17 = vpop.f32.mrf.mxu2  ;;  %v2336_v6 = vpack.c.bf16 %v6512_v28, %v6512_v28 }
 0x1f7   : > { %v1245_v37 = vadd.f32 %v1202_v17, %v8296_v52  ;;  %v1549_v45 = vpop.f32.mrf.mxu3  ;;  %v6593_v52 = vld [vmem:[%s7973_s26 + $0xc9] sm:$0xff] }
 0x1f8   : > { %v1898_v61 = vpop.f32.mrf.mxu0  ;;  %v2683_v0 = vpack.c.bf16 %v6593_v52, %v6593_v52  ;;  %v2417_v17 = vunpack.c.l.b16 %v2336_v6 }
 0x1f9   : > { %v1592_v15 = vadd.f32 %v1549_v45, %v1245_v37  ;;  %v2418_v45 = vunpack.c.l.b16 %v2337_v16  ;;  %v6674_v16 = vld [vmem:[%s7973_s26 + $0xda] sm:$0xff] }
 0x1fa   : > { %v2244_v5 = vpop.f32.mrf.mxu1 }
 0x1fb   : > { %2550 = vmatmul.bf16.gmra.mxu2 %v2442_v30  ;;  %3242 = vmatmul.bf16.gmra.mxu0 %v3134_v49  ;;  %v8569_v10 = vadd.f32 %v1895_v50, %v1592_v15  ;;  %v3109_v30 = vunpack.c.l.b16 %v3028_v19  ;;  %v3110_v49 = vunpack.c.l.b16 %v3029_v63  ;;  %v2764_v15 = vunpack.c.l.b16 %v2683_v0  ;;  %v6675_v19 = vld [vmem:[%s7973_s26 + $0xe2] sm:$0xff]  ;;  %v6594_v63 = vld [vmem:[%s7973_s26 + $0xd9] sm:$0xff] }
 0x1fc   : > { %2896 = vmatmul.bf16.gmra.mxu3 %v2788_v43  ;;  %v2763_v43 = vunpack.c.l.b16 %v2682_v59  ;;  %v6595_v59 = vld [vmem:[%s7973_s26 + $0xe1] sm:$0xff] }
 0x1fd   : > { %v3135_v12 = vpack.c.b16 %v3110_v49, %v3109_v30  ;;  %v3031_v49 = vpack.c.bf16 %v6675_v19, %v6675_v19 }
 0x1fe   : > { %v1205_v9 = vpop.f32.mrf.mxu2 }
 0x1ff   : > { %v1246_v36 = vadd.f32 %v1205_v9, %v8304_v1  ;;  %v1552_v23 = vpop.f32.mrf.mxu3  ;;  %v2789_v9 = vpack.c.b16 %v2764_v15, %v2763_v43  ;;  %v2684_v15 = vpack.c.bf16 %v6594_v63, %v6594_v63 }
 0x200   : > { %v1900_v41 = vpop.f32.mrf.mxu0 }
 0x201   : > { %v1593_v50 = vadd.f32 %v1552_v23, %v1246_v36  ;;  %v6514_v23 = vld [vmem:[%s7973_s26 + $0xd8] sm:$0xff] }
 0x202   : > { %v8578_v28 = vpop.f32.mrf.mxu1 }
 0x203   : > { %v1939_v37 = vadd.f32 %v1898_v61, %v1593_v50  ;;  %9791 = vst [vmem:[#allocation6_spill] sm:$0xff] %v8578_v28  ;;  %v2443_v61 = vpack.c.b16 %v2418_v45, %v2417_v17  ;;  %v2338_v17 = vpack.c.bf16 %v6514_v23, %v6514_v23  ;;  %v2765_v28 = vunpack.c.l.b16 %v2684_v15 }
 0x205   : > { %v8580_v1 = vadd.f32 %v2244_v5, %v1939_v37  ;;  %v6515_v5 = vld [vmem:[%s7973_s26 + $0xe0] sm:$0xff] }
 0x206   : > { %v1207_v55 = vpop.f32.mrf.mxu2  ;;  %v2339_v30 = vpack.c.bf16 %v6515_v5, %v6515_v5 }
 0x207   : > { %v1247_v47 = vadd.f32 %v1207_v55, %v8308_v14  ;;  %v1554_v56 = vpop.f32.mrf.mxu3  ;;  %v7271_v14 = vld [vmem:[%s9782_s2 + $0x40] sm:$0xff]  ;;  %v2685_v55 = vpack.c.bf16 %v6595_v59, %v6595_v59 }
 0x208   : > { %v1903_v52 = vpop.f32.mrf.mxu0  ;;  %3851 = vmatpush.bf16.msra.mxu1 %v7271_v14 }
 0x209   : > { %v1594_v6 = vadd.f32 %v1554_v56, %v1247_v47  ;;  %v2419_v56 = vunpack.c.l.b16 %v2338_v17  ;;  %v6516_v17 = vld [vmem:[%s7973_s26 + $0xf0] sm:$0xff] }
 0x20a   : > { %v2249_v50 = vpop.f32.mrf.mxu1  ;;  %v2340_v15 = vpack.c.bf16 %v6516_v17, %v6516_v17 }
 0x20b   : > { %2555 = vmatmul.bf16.gmra.mxu2 %v2443_v61  ;;  %3247 = vmatmul.bf16.gmra.mxu0 %v3135_v12  ;;  %v8583_v36 = vadd.f32 %v1900_v41, %v1594_v6  ;;  %v3030_v41 = vpack.c.bf16 %v6674_v16, %v6674_v16  ;;  %v2420_v12 = vunpack.c.l.b16 %v2339_v30  ;;  %v3112_v6 = vunpack.c.l.b16 %v3031_v49  ;;  %v6677_v30 = vld [vmem:[%s7973_s26 + $0xfa] sm:$0xff] }
 0x20c   : > { %2901 = vmatmul.bf16.gmra.mxu3 %v2789_v9  ;;  %v6597_v49 = vld [vmem:[%s7973_s26 + $0xf9] sm:$0xff] }
 0x20d   : > { %9792 = vst [vmem:[#allocation7_spill] sm:$0xff] %v8583_v36  ;;  %v3111_v9 = vunpack.c.l.b16 %v3030_v41  ;;  %v2766_v36 = vunpack.c.l.b16 %v2685_v55  ;;  %v2444_v19 = vpack.c.b16 %v2420_v12, %v2419_v56  ;;  %v6596_v41 = vld [vmem:[%s7973_s26 + $0xf1] sm:$0xff] }
 0x20e   : > { %v1210_v0 = vpop.f32.mrf.mxu2 }
 0x20f   : > { %v1248_v37 = vadd.f32 %v1210_v0, %v8326_v39  ;;  %v1557_v45 = vpop.f32.mrf.mxu3  ;;  %v3136_v63 = vpack.c.b16 %v3112_v6, %v3111_v9  ;;  %v2686_v9 = vpack.c.bf16 %v6596_v41, %v6596_v41  ;;  %v2687_v6 = vpack.c.bf16 %v6597_v49, %v6597_v49 }
 0x210   : > { %v1905_v43 = vpop.f32.mrf.mxu0 }
 0x211   : > { %v1595_v47 = vadd.f32 %v1557_v45, %v1248_v37  ;;  %v7890_v37 = vmov 0.0   ;;  %v6676_v45 = vld [vmem:[%s7973_s26 + $0xf2] sm:$0xff]  ;;  %v2768_v17 = vunpack.c.l.b16 %v2687_v6 }
 0x212   : > { %v8598_v14 = vpop.f32.mrf.mxu1  ;;  %3562 = vst [vmem:[#allocation2] sm:$0xff] %v7890_v37  ;;  %v3032_v56 = vpack.c.bf16 %v6676_v45, %v6676_v45 }
 0x213   : > { %v1941_v61 = vadd.f32 %v1903_v52, %v1595_v47  ;;  %v2790_v52 = vpack.c.b16 %v2766_v36, %v2765_v28  ;;  %9793 = vst [vmem:[#allocation8_spill] sm:$0xff] %v8598_v14  ;;  %v7891_v28 = vmov 0.0|0.0  }
 0x214   : > { %3563 = vst [vmem:[#allocation2 + $0x8] sm:$0xff] %v7890_v37  ;;  %3852 = vmatmul.bf16.vlgmr.msra.gmra.mxu1 %v7891_v28 }
 0x215   : > { %v8595_v23 = vadd.f32 %v2249_v50, %v1941_v61  ;;  %3564 = vst [vmem:[#allocation2 + $0x10] sm:$0xff] %v7890_v37  ;;  %v3033_v61 = vpack.c.bf16 %v6677_v30, %v6677_v30 }
 0x216   : > { %v1212_v39 = vpop.f32.mrf.mxu2  ;;  %3565 = vst [vmem:[#allocation2 + $0x18] sm:$0xff] %v7890_v37 }
 0x217   : > { %v1249_v5 = vadd.f32 %v1212_v39, %v8333_v4  ;;  %v1559_v16 = vpop.f32.mrf.mxu3  ;;  %v6517_v4 = vld [vmem:[%s7973_s26 + $0xf8] sm:$0xff]  ;;  %3566 = vst [vmem:[#allocation2 + $0x20] sm:$0xff] %v7890_v37 }
 0x218   : > { %v1908_v59 = vpop.f32.mrf.mxu0  ;;  %v2341_v47 = vpack.c.bf16 %v6517_v4, %v6517_v4  ;;  %3569 = vst [vmem:[#allocation2 + $0x38] sm:$0xff] %v7890_v37 }
 0x219   : > { %v1596_v0 = vadd.f32 %v1559_v16, %v1249_v5  ;;  %3570 = vst [vmem:[#allocation2 + $0x40] sm:$0xff] %v7890_v37  ;;  %v2421_v16 = vunpack.c.l.b16 %v2340_v15 }
 0x21a   : > { %v2254_v5 = vpop.f32.mrf.mxu1  ;;  %3573 = vst [vmem:[#allocation2 + $0x58] sm:$0xff] %v7890_v37 }
 0x21b   : > { %2560 = vmatmul.bf16.gmra.mxu2 %v2444_v19  ;;  %3252 = vmatmul.bf16.gmra.mxu0 %v3136_v63  ;;  %v8600_v50 = vadd.f32 %v1905_v43, %v1596_v0  ;;  %v3113_v63 = vunpack.c.l.b16 %v3032_v56  ;;  %3574 = vst [vmem:[#allocation2 + $0x60] sm:$0xff] %v7890_v37  ;;  %v2767_v0 = vunpack.c.l.b16 %v2686_v9  ;;  %v6679_v56 = vld [vmem:[%s7973_s26 + $0x112] sm:$0xff] }
 0x21c   : > { %2906 = vmatmul.bf16.gmra.mxu3 %v2790_v52  ;;  %v3114_v52 = vunpack.c.l.b16 %v3033_v61  ;;  %3577 = vst [vmem:[#allocation2 + $0x78] sm:$0xff] %v7890_v37  ;;  %v6598_v61 = vld [vmem:[%s7973_s26 + $0x109] sm:$0xff]  ;;  %v6599_v9 = vld [vmem:[%s7973_s26 + $0x111] sm:$0xff] }
 0x21d   : > { %3578 = vst [vmem:[#allocation2 + $0x80] sm:$0xff] %v7890_v37 }
 0x21e   : > { %v1215_v36 = vpop.f32.mrf.mxu2  ;;  %3581 = vst [vmem:[#allocation2 + $0x98] sm:$0xff] %v7890_v37  ;;  %v3137_v49 = vpack.c.b16 %v3114_v52, %v3113_v63  ;;  %v2688_v52 = vpack.c.bf16 %v6598_v61, %v6598_v61 }
 0x21f   : > { %v1250_v43 = vadd.f32 %v1215_v36, %v8343_v33  ;;  %v1562_v55 = vpop.f32.mrf.mxu3  ;;  %v2422_v33 = vunpack.c.l.b16 %v2341_v47  ;;  %3582 = vst [vmem:[#allocation2 + $0xa0] sm:$0xff] %v7890_v37  ;;  %v2791_v36 = vpack.c.b16 %v2768_v17, %v2767_v0  ;;  %v6678_v47 = vld [vmem:[%s7973_s26 + $0x10a] sm:$0xff]  ;;  %v2689_v0 = vpack.c.bf16 %v6599_v9, %v6599_v9 }
 0x220   : > { %v1910_v12 = vpop.f32.mrf.mxu0  ;;  %3585 = vst [vmem:[#allocation2 + $0xb8] sm:$0xff] %v7890_v37 }
 0x221   : > { %v1597_v39 = vadd.f32 %v1562_v55, %v1250_v43  ;;  %v2445_v41 = vpack.c.b16 %v2422_v33, %v2421_v16  ;;  %3586 = vst [vmem:[#allocation2 + $0xc0] sm:$0xff] %v7890_v37  ;;  %v6518_v43 = vld [vmem:[%s7973_s26 + $0x108] sm:$0xff]  ;;  %v6519_v55 = vld [vmem:[%s7973_s26 + $0x110] sm:$0xff]  ;;  %v3035_v33 = vpack.c.bf16 %v6679_v56, %v6679_v56 }
 0x222   : > { %3589 = vst [vmem:[#allocation2 + $0xd8] sm:$0xff] %v7890_v37  ;;  %v2343_v16 = vpack.c.bf16 %v6519_v55, %v6519_v55 }
 0x223   : > { %v1943_v19 = vadd.f32 %v1908_v59, %v1597_v39  ;;  %3590 = vst [vmem:[#allocation2 + $0xe0] sm:$0xff] %v7890_v37  ;;  %v2342_v39 = vpack.c.bf16 %v6518_v43, %v6518_v43  ;;  %v2770_v43 = vunpack.c.l.b16 %v2689_v0  ;;  %v7270_v0 = vld [vmem:[%s9782_s2 + $0x38] sm:$0xff] }
 0x224   : > { %3593 = vst [vmem:[#allocation2 + $0xf8] sm:$0xff] %v7890_v37  ;;  %3981 = vmatpush.bf16.msrb.mxu2 %v7270_v0 }
 0x225   : > { %v8619_v4 = vadd.f32 %v2254_v5, %v1943_v19  ;;  %3594 = vst [vmem:[#allocation2 + $0x100] sm:$0xff] %v7890_v37  ;;  %v3034_v19 = vpack.c.bf16 %v6678_v47, %v6678_v47 }
 0x226   : > { %v1217_v45 = vpop.f32.mrf.mxu2  ;;  %3597 = vst [vmem:[#allocation2 + $0x118] sm:$0xff] %v7890_v37 }
 0x227   : > { %9794 = vst [vmem:[#allocation9_spill] sm:$0xff] %v8619_v4  ;;  %v1251_v30 = vadd.f32 %v1217_v45, %v8347_v62  ;;  %v1564_v59 = vpop.f32.mrf.mxu3  ;;  %v8646_v45 = vld [vmem:[%s9783_s3] ss:$0 sm:$0xff] }
 0x228   : > { %v3218_v28 = vpop.f32.mrf.mxu0  ;;  %3598 = vst [vmem:[#allocation2 + $0x120] sm:$0xff] %v7890_v37 }
 0x229   : > { %v1598_v15 = vadd.f32 %v1564_v59, %v1251_v30  ;;  %3601 = vst [vmem:[#allocation2 + $0x138] sm:$0xff] %v7890_v37  ;;  %v8653_v59 = vld [vmem:[%s9784_s4] ss:$0 sm:$0xff] }
 0x22a   : > { %3602 = vst [vmem:[#allocation2 + $0x140] sm:$0xff] %v7890_v37 }
 0x22b   : > { %2565 = vmatmul.bf16.gmra.mxu2 %v2445_v41  ;;  %3257 = vmatmul.bf16.gmra.mxu0 %v3137_v49  ;;  %v8628_v62 = vadd.f32 %v1910_v12, %v1598_v15  ;;  %3605 = vst [vmem:[#allocation2 + $0x158] sm:$0xff] %v7890_v37  ;;  %v2424_v41 = vunpack.c.l.b16 %v2343_v16  ;;  %v3115_v49 = vunpack.c.l.b16 %v3034_v19  ;;  %v2769_v15 = vunpack.c.l.b16 %v2688_v52  ;;  %v6520_v19 = vld [vmem:[%s7973_s26 + $0x120] sm:$0xff] }
 0x22c   : > { %2911 = vmatmul.bf16.gmra.mxu3 %v2791_v36  ;;  %3606 = vst [vmem:[#allocation2 + $0x160] sm:$0xff] %v7890_v37  ;;  %v3116_v36 = vunpack.c.l.b16 %v3035_v33  ;;  %v6521_v33 = vld [vmem:[%s7973_s26 + $0x128] sm:$0xff] }
 0x22d   : > { %9795 = vst [vmem:[#allocation10_spill] sm:$0xff] %v8628_v62 }
 0x22e   : > { %v2526_v6 = vpop.f32.mrf.mxu2  ;;  %3609 = vst [vmem:[#allocation2 + $0x178] sm:$0xff] %v7890_v37 }
 0x22f   : > { %v2606_v12 = vadd.f32 %v2526_v6, %v8365_v58  ;;  %v2872_v5 = vpop.f32.mrf.mxu3  ;;  %v2423_v58 = vunpack.c.l.b16 %v2342_v39  ;;  %3610 = vst [vmem:[#allocation2 + $0x180] sm:$0xff] %v7890_v37  ;;  %v3138_v6 = vpack.c.b16 %v3116_v36, %v3115_v49  ;;  %v6600_v49 = vld [vmem:[%s7973_s26 + $0x121] sm:$0xff]  ;;  %v6601_v36 = vld [vmem:[%s7973_s26 + $0x129] sm:$0xff] }
 0x230   : > { %v3220_v63 = vpop.f32.mrf.mxu0  ;;  %3613 = vst [vmem:[#allocation2 + $0x198] sm:$0xff] %v7890_v37 }
 0x231   : > { %v2952_v17 = vadd.f32 %v2872_v5, %v2606_v12  ;;  %3614 = vst [vmem:[#allocation2 + $0x1a0] sm:$0xff] %v7890_v37  ;;  %v2446_v9 = vpack.c.b16 %v2424_v41, %v2423_v58  ;;  %v2792_v12 = vpack.c.b16 %v2770_v43, %v2769_v15  ;;  %v6680_v58 = vld [vmem:[%s7973_s26 + $0x122] sm:$0xff]  ;;  %v2344_v43 = vpack.c.bf16 %v6520_v19, %v6520_v19 }
 0x232   : > { %3617 = vst [vmem:[#allocation2 + $0x1b8] sm:$0xff] %v7890_v37 }
 0x233   : > { %v3298_v30 = vadd.f32 %v3218_v28, %v2952_v17  ;;  %3618 = vst [vmem:[#allocation2 + $0x1c0] sm:$0xff] %v7890_v37  ;;  %v7286_v17 = vld [vmem:[%s9782_s2 + $0xb8] sm:$0xff] }
 0x234   : > { %3621 = vst [vmem:[#allocation2 + $0x1d8] sm:$0xff] %v7890_v37  ;;  %4183 = vmatpush.bf16.msrb.mxu3 %v7286_v17 }
 0x235   : > { %v3334_v55 = vmul.f32 %v8646_v45, %v3298_v30  ;;  %3622 = vst [vmem:[#allocation2 + $0x1e0] sm:$0xff] %v7890_v37  ;;  %v6681_v30 = vld [vmem:[%s7973_s26 + $0x12a] sm:$0xff] }
 0x236   : > { %v2528_v28 = vpop.f32.mrf.mxu2  ;;  %3625 = vst [vmem:[#allocation2 + $0x1f8] sm:$0xff] %v7890_v37 }
 0x237   : > { %v3370_v47 = vadd.f32 %v8653_v59, %v3334_v55  ;;  %v2607_v56 = vadd.f32 %v2528_v28, %v8374_v32  ;;  %v2874_v61 = vpop.f32.mrf.mxu3  ;;  %3626 = vst [vmem:[#allocation2 + $0x200] sm:$0xff] %v7890_v37  ;;  %v2345_v55 = vpack.c.bf16 %v6521_v33, %v6521_v33  ;;  %v3036_v28 = vpack.c.bf16 %v6680_v58, %v6680_v58 }
 0x238   : > { %v3223_v39 = vpop.f32.mrf.mxu0  ;;  %3629 = vst [vmem:[#allocation2 + $0x218] sm:$0xff] %v7890_v37 }
 0x239   : > { %v3402_v5 = vmax.f32 %v3370_v47, 0.0  ;;  %v2953_v16 = vadd.f32 %v2874_v61, %v2607_v56  ;;  %3630 = vst [vmem:[#allocation2 + $0x220] sm:$0xff] %v7890_v37  ;;  %v2426_v0 = vunpack.c.l.b16 %v2345_v55 }
 0x23a   : > { %3631 = vst [vmem:[#allocation2 + $0x228] sm:$0xff] %v7890_v37 }
 0x23b   : > { %v3434_v52 = vmax.f32 %v3402_v5, 0.0  ;;  %v3299_v32 = vadd.f32 %v3220_v63, %v2953_v16  ;;  %2570 = vmatmul.bf16.gmra.mxu2 %v2446_v9  ;;  %3262 = vmatmul.bf16.gmra.mxu0 %v3138_v6  ;;  %v3037_v6 = vpack.c.bf16 %v6681_v30, %v6681_v30  ;;  %v2690_v5 = vpack.c.bf16 %v6600_v49, %v6600_v49 }
 0x23c   : > { %2916 = vmatmul.bf16.gmra.mxu3 %v2792_v12  ;;  %v2691_v16 = vpack.c.bf16 %v6601_v36, %v6601_v36  ;;  %3632 = vst [vmem:[#allocation2 + $0x230] sm:$0xff] %v7890_v37  ;;  %v3117_v30 = vunpack.c.l.b16 %v3036_v28 }
 0x23d   : > { %v3466_v41 = vmin.f32 %v3434_v52, 1.0  ;;  %v3335_v63 = vmul.f32 %v8646_v45, %v3299_v32  ;;  %3633 = vst [vmem:[#allocation2 + $0x238] sm:$0xff] %v7890_v37  ;;  %v2425_v32 = vunpack.c.l.b16 %v2344_v43 }
 0x23e   : > { %v2531_v15 = vpop.f32.mrf.mxu2 }
 0x23f   : > { %v3498_v47 = vmul.f32 15.0, %v3466_v41  ;;  %v3371_v56 = vadd.f32 %v8653_v59, %v3335_v63  ;;  %v2608_v61 = vadd.f32 %v2531_v15, %v8380_v20  ;;  %v2877_v9 = vpop.f32.mrf.mxu3  ;;  %v7294_v20 = vld [vmem:[%s9782_s2 + $0xf8] sm:$0xff]  ;;  %v3118_v41 = vunpack.c.l.b16 %v3037_v6 }
 0x240   : > { %v3225_v12 = vpop.f32.mrf.mxu0  ;;  %v7302_v63 = vld [vmem:[%s9782_s2 + $0x138] sm:$0xff]  ;;  %v2771_v15 = vunpack.c.l.b16 %v2690_v5  ;;  %4417 = vmatpush.bf16.msrb.mxu0 %v7294_v20 }
 0x241   : > { %v7354_v52 = vcvt.f32.s32 %v3498_v47  ;;  %v3403_v19 = vmax.f32 %v3371_v56, 0.0  ;;  %v2954_v33 = vadd.f32 %v2877_v9, %v2608_v61  ;;  %v7352_v49 = vand.u32 2147483647, %v3498_v47  ;;  %4651 = vmatpush.bf16.msrb.mxu1 %v7302_v63 }
 0x242   : > { %v2772_v56 = vunpack.c.l.b16 %v2691_v16  ;;  %v7357_v61 = vand.u32 2147483648, %v3498_v47 }
 0x243   : > { %v7355_v17 = vcvt.s32.f32 %v7354_v52  ;;  %v3435_v58 = vmax.f32 %v3403_v19, 0.0  ;;  %v3300_v36 = vadd.f32 %v3223_v39, %v2954_v33  ;;  %v2447_v52 = vpack.c.b16 %v2426_v0, %v2425_v32  ;;  %v6522_v0 = vld [vmem:[%s7973_s26 + $0x138] sm:$0xff] }
 0x244   : > { %v3139_v39 = vpack.c.b16 %v3118_v41, %v3117_v30  ;;  %vm7353_vm0 = vcmp.lt.f32.partialorder %v7352_v49, 8388608.0  ;;  %v2793_v33 = vpack.c.b16 %v2772_v56, %v2771_v15  ;;  %v6683_v15 = vld [vmem:[%s7973_s26 + $0x142] sm:$0xff] }
 0x245   : > { %v7356_v37 = vand.u32 2147483647, %v7355_v17  ;;  %v3467_v43 = vmin.f32 %v3435_v58, 1.0  ;;  %v3336_v55 = vmul.f32 %v8646_v45, %v3300_v36  ;;  %v6602_v36 = vld [vmem:[%s7973_s26 + $0x139] sm:$0xff] }
 0x246   : > { %v2533_v9 = vpop.f32.mrf.mxu2 }
 0x247   : > { %v7358_v28 = vor.u32 %v7357_v61, %v7356_v37  ;;  %v3499_v6 = vmul.f32 15.0, %v3467_v43  ;;  %v2609_v19 = vadd.f32 %v2533_v9, %v8391_v21  ;;  %v2879_v62 = vpop.f32.mrf.mxu3  ;;  %v3372_v5 = vadd.f32 %v8653_v59, %v3336_v55  ;;  %v6523_v21 = vld [vmem:[%s7973_s26 + $0x140] sm:$0xff] }
 0x248   : > { %v3228_v16 = vpop.f32.mrf.mxu0  ;;  %v6682_v37 = vld [vmem:[%s7973_s26 + $0x13a] sm:$0xff]  ;;  %v2346_v61 = vpack.c.bf16 %v6522_v0, %v6522_v0 }
 0x249   : > { %v7359_v17 = vsel %vm7353_vm0, %v7358_v28, %v3498_v47  ;;  %v7362_v58 = vcvt.f32.s32 %v3499_v6  ;;  %v3404_v20 = vmax.f32 %v3372_v5, 0.0  ;;  %v2955_v32 = vadd.f32 %v2879_v62, %v2609_v19  ;;  %v6603_v43 = vld [vmem:[%s7973_s26 + $0x141] sm:$0xff] }
 0x24a   : > { %3635 = vst [vmem:[#allocation2 + $0x28] sm:$0xff] %v7359_v17  ;;  %v7360_v30 = vand.u32 2147483647, %v3499_v6  ;;  %v7365_v47 = vand.u32 2147483648, %v3499_v6  ;;  %v2347_v28 = vpack.c.bf16 %v6523_v21, %v6523_v21  ;;  %v2692_v19 = vpack.c.bf16 %v6602_v36, %v6602_v36 }
 0x24b   : > { %v7363_v63 = vcvt.s32.f32 %v7362_v58  ;;  %2575 = vmatmul.bf16.gmra.mxu2 %v2447_v52  ;;  %3267 = vmatmul.bf16.gmra.mxu0 %v3139_v39  ;;  %v3436_v41 = vmax.f32 %v3404_v20, 0.0  ;;  %v3301_v49 = vadd.f32 %v3225_v12, %v2955_v32  ;;  %v3038_v58 = vpack.c.bf16 %v6682_v37, %v6682_v37 }
 0x24c   : > { %2921 = vmatmul.bf16.gmra.mxu3 %v2793_v33  ;;  %v3039_v20 = vpack.c.bf16 %v6683_v15, %v6683_v15  ;;  %vm7361_vm1 = vcmp.lt.f32.partialorder %v7360_v30, 8388608.0  ;;  %v2427_v14 = vunpack.c.l.b16 %v2346_v61  ;;  %v2428_v21 = vunpack.c.l.b16 %v2347_v28 }
 0x24d   : > { %v7364_v56 = vand.u32 2147483647, %v7363_v63  ;;  %v3468_v55 = vmin.f32 %v3436_v41, 1.0  ;;  %v3337_v62 = vmul.f32 %v8646_v45, %v3301_v49  ;;  %v2693_v63 = vpack.c.bf16 %v6603_v43, %v6603_v43 }
 0x24e   : > { %v2536_v9 = vpop.f32.mrf.mxu2  ;;  %v2773_v15 = vunpack.c.l.b16 %v2692_v19 }
 0x24f   : > { %v7366_v52 = vor.u32 %v7365_v47, %v7364_v56  ;;  %v2610_v39 = vadd.f32 %v2536_v9, %v8401_v40  ;;  %v2882_v5 = vpop.f32.mrf.mxu3  ;;  %v3500_v12 = vmul.f32 15.0, %v3468_v55  ;;  %v3373_v33 = vadd.f32 %v8653_v59, %v3337_v62 }
 0x250   : > { %v3230_v32 = vpop.f32.mrf.mxu0  ;;  %v3119_v56 = vunpack.c.l.b16 %v3038_v58  ;;  %v3120_v47 = vunpack.c.l.b16 %v3039_v20  ;;  %v2774_v30 = vunpack.c.l.b16 %v2693_v63 }
 0x251   : > { %v7367_v0 = vsel %vm7361_vm1, %v7366_v52, %v3499_v6  ;;  %v2956_v4 = vadd.f32 %v2882_v5, %v2610_v39  ;;  %v7370_v41 = vcvt.f32.s32 %v3500_v12  ;;  %v3405_v49 = vmax.f32 %v3373_v33, 0.0 }
 0x252   : > { %3636 = vst [vmem:[#allocation2 + $0x30] sm:$0xff] %v7367_v0  ;;  %v3764_v40 = vpack.c.bf16 %v7367_v0, %v7359_v17  ;;  %v7368_v55 = vand.u32 2147483647, %v3500_v12  ;;  %v7373_v6 = vand.u32 2147483648, %v3500_v12  ;;  %v2448_v17 = vpack.c.b16 %v2428_v21, %v2427_v14  ;;  %v7269_v14 = vld [vmem:[%s9782_s2 + $0x30] sm:$0xff] }
 0x253   : > { %v3302_v36 = vadd.f32 %v3228_v16, %v2956_v4  ;;  %v7371_v9 = vcvt.s32.f32 %v7370_v41  ;;  %v3437_v37 = vmax.f32 %v3405_v49, 0.0  ;;  %v3140_v28 = vpack.c.b16 %v3120_v47, %v3119_v56  ;;  %v6524_v49 = vld [vmem:[%s7973_s26 + $0x150] sm:$0xff]  ;;  %v6685_v47 = vld [vmem:[%s7973_s26 + $0x15a] sm:$0xff]  ;;  %3982 = vmatpush.bf16.msrb.mxu2 %v7269_v14 }
 0x254   : > { %3857 = vmatmul.bf16.gmra.mxu1 %v3764_v40  ;;  %v2794_v20 = vpack.c.b16 %v2774_v30, %v2773_v15  ;;  %vm7369_vm2 = vcmp.lt.f32.partialorder %v7368_v55, 8388608.0  ;;  %v7285_v21 = vld [vmem:[%s9782_s2 + $0xb0] sm:$0xff]  ;;  %v6605_v55 = vld [vmem:[%s7973_s26 + $0x159] sm:$0xff] }
 0x255   : > { %v3338_v62 = vmul.f32 %v8646_v45, %v3302_v36  ;;  %v7372_v43 = vand.u32 2147483647, %v7371_v9  ;;  %v3469_v52 = vmin.f32 %v3437_v37, 1.0  ;;  %v6525_v36 = vld [vmem:[%s7973_s26 + $0x158] sm:$0xff]  ;;  %4184 = vmatpush.bf16.msrb.mxu3 %v7285_v21 }
 0x256   : > { %v2538_v39 = vpop.f32.mrf.mxu2  ;;  %v6684_v56 = vld [vmem:[%s7973_s26 + $0x152] sm:$0xff] }
 0x257   : > { %v3374_v61 = vadd.f32 %v8653_v59, %v3338_v62  ;;  %v2611_v4 = vadd.f32 %v2538_v39, %v8410_v11  ;;  %v2884_v16 = vpop.f32.mrf.mxu3  ;;  %v7374_v5 = vor.u32 %v7373_v6, %v7372_v43  ;;  %v3501_v19 = vmul.f32 15.0, %v3469_v52  ;;  %v6604_v30 = vld [vmem:[%s7973_s26 + $0x151] sm:$0xff] }
 0x258   : > { %v3233_v58 = vpop.f32.mrf.mxu0  ;;  %v2349_v52 = vpack.c.bf16 %v6525_v36, %v6525_v36  ;;  %v3040_v39 = vpack.c.bf16 %v6684_v56, %v6684_v56 }
 0x259   : > { %v3406_v33 = vmax.f32 %v3374_v61, 0.0  ;;  %v2957_v63 = vadd.f32 %v2884_v16, %v2611_v4  ;;  %v7375_v0 = vsel %vm7369_vm2, %v7374_v5, %v3500_v12  ;;  %v7378_v41 = vcvt.f32.s32 %v3501_v19 }
 0x25a   : > { %3637 = vst [vmem:[#allocation2 + $0x48] sm:$0xff] %v7375_v0  ;;  %v7376_v9 = vand.u32 2147483647, %v3501_v19  ;;  %v7381_v43 = vand.u32 2147483648, %v3501_v19  ;;  %v2430_v21 = vunpack.c.l.b16 %v2349_v52  ;;  %v3121_v36 = vunpack.c.l.b16 %v3040_v39 }
 0x25b   : > { %v3438_v40 = vmax.f32 %v3406_v33, 0.0  ;;  %v3303_v11 = vadd.f32 %v3230_v32, %v2957_v63  ;;  %2580 = vmatmul.bf16.gmra.mxu2 %v2448_v17  ;;  %3272 = vmatmul.bf16.gmra.mxu0 %v3140_v28  ;;  %v7379_v12 = vcvt.s32.f32 %v7378_v41  ;;  %v2348_v32 = vpack.c.bf16 %v6524_v49, %v6524_v49 }
 0x25c   : > { %2926 = vmatmul.bf16.gmra.mxu3 %v2794_v20  ;;  %v3041_v28 = vpack.c.bf16 %v6685_v47, %v6685_v47  ;;  %v2694_v33 = vpack.c.bf16 %v6604_v30, %v6604_v30  ;;  %v2695_v63 = vpack.c.bf16 %v6605_v55, %v6605_v55  ;;  %vm7377_vm3 = vcmp.lt.f32.partialorder %v7376_v9, 8388608.0  ;;  %v7301_v9 = vld [vmem:[%s9782_s2 + $0x130] sm:$0xff] }
 0x25d   : > { %v3470_v37 = vmin.f32 %v3438_v40, 1.0  ;;  %v3339_v15 = vmul.f32 %v8646_v45, %v3303_v11  ;;  %v7380_v62 = vand.u32 2147483647, %v7379_v12  ;;  %v2429_v40 = vunpack.c.l.b16 %v2348_v32  ;;  %4652 = vmatpush.bf16.msrb.mxu1 %v7301_v9 }
 0x25e   : > { %v2541_v6 = vpop.f32.mrf.mxu2  ;;  %v3122_v47 = vunpack.c.l.b16 %v3041_v28  ;;  %v2775_v32 = vunpack.c.l.b16 %v2694_v33 }
 0x25f   : > { %v3502_v61 = vmul.f32 15.0, %v3470_v37  ;;  %v3375_v4 = vadd.f32 %v8653_v59, %v3339_v15  ;;  %v2612_v16 = vadd.f32 %v2541_v6, %v8416_v3  ;;  %v2887_v17 = vpop.f32.mrf.mxu3  ;;  %v7382_v5 = vor.u32 %v7381_v43, %v7380_v62  ;;  %v7293_v3 = vld [vmem:[%s9782_s2 + $0xf0] sm:$0xff] }
 0x260   : > { %v3235_v20 = vpop.f32.mrf.mxu0  ;;  %4418 = vmatpush.bf16.msrb.mxu0 %v7293_v3  ;;  %v2449_v39 = vpack.c.b16 %v2430_v21, %v2429_v40  ;;  %v6606_v21 = vld [vmem:[%s7973_s26 + $0x169] sm:$0xff] }
 0x261   : > { %v7386_v41 = vcvt.f32.s32 %v3502_v61  ;;  %v3407_v49 = vmax.f32 %v3375_v4, 0.0  ;;  %v7383_v11 = vsel %vm7377_vm3, %v7382_v5, %v3501_v19  ;;  %v2958_v14 = vadd.f32 %v2887_v17, %v2612_v16  ;;  %v6686_v3 = vld [vmem:[%s7973_s26 + $0x16a] sm:$0xff] }
 0x262   : > { %3638 = vst [vmem:[#allocation2 + $0x50] sm:$0xff] %v7383_v11  ;;  %v3765_v37 = vpack.c.bf16 %v7383_v11, %v7375_v0  ;;  %v7384_v15 = vand.u32 2147483647, %v3502_v61  ;;  %v2776_v19 = vunpack.c.l.b16 %v2695_v63  ;;  %v7389_v62 = vand.u32 2147483648, %v3502_v61  ;;  %v6526_v11 = vld [vmem:[%s7973_s26 + $0x168] sm:$0xff] }
 0x263   : > { %v7387_v56 = vcvt.s32.f32 %v7386_v41  ;;  %v3439_v12 = vmax.f32 %v3407_v49, 0.0  ;;  %v3304_v30 = vadd.f32 %v3233_v58, %v2958_v14  ;;  %v3141_v58 = vpack.c.b16 %v3122_v47, %v3121_v36  ;;  %v6687_v47 = vld [vmem:[%s7973_s26 + $0x172] sm:$0xff] }
 0x264   : > { %3862 = vmatmul.bf16.gmra.mxu1 %v3765_v37  ;;  %vm7385_vm4 = vcmp.lt.f32.partialorder %v7384_v15, 8388608.0  ;;  %v2795_v33 = vpack.c.b16 %v2776_v19, %v2775_v32  ;;  %v2350_v9 = vpack.c.bf16 %v6526_v11, %v6526_v11  ;;  %v6607_v15 = vld [vmem:[%s7973_s26 + $0x171] sm:$0xff] }
 0x265   : > { %v7388_v55 = vand.u32 2147483647, %v7387_v56  ;;  %v3471_v43 = vmin.f32 %v3439_v12, 1.0  ;;  %v3340_v6 = vmul.f32 %v8646_v45, %v3304_v30 }
 0x266   : > { %v2543_v52 = vpop.f32.mrf.mxu2 }
 0x267   : > { %v7390_v0 = vor.u32 %v7389_v62, %v7388_v55  ;;  %v3503_v4 = vmul.f32 15.0, %v3471_v43  ;;  %v2613_v16 = vadd.f32 %v2543_v52, %v8427_v13  ;;  %v2889_v17 = vpop.f32.mrf.mxu3  ;;  %v3376_v28 = vadd.f32 %v8653_v59, %v3340_v6  ;;  %v6527_v13 = vld [vmem:[%s7973_s26 + $0x170] sm:$0xff] }
 0x268   : > { %v3238_v5 = vpop.f32.mrf.mxu0  ;;  %v2351_v55 = vpack.c.bf16 %v6527_v13, %v6527_v13  ;;  %v2696_v62 = vpack.c.bf16 %v6606_v21, %v6606_v21 }
 0x269   : > { %v7391_v63 = vsel %vm7385_vm4, %v7390_v0, %v3502_v61  ;;  %v7394_v41 = vcvt.f32.s32 %v3503_v4  ;;  %v3408_v49 = vmax.f32 %v3376_v28, 0.0  ;;  %v2959_v40 = vadd.f32 %v2889_v17, %v2613_v16 }
 0x26a   : > { %3639 = vst [vmem:[#allocation2 + $0x68] sm:$0xff] %v7391_v63  ;;  %v7392_v36 = vand.u32 2147483647, %v3503_v4  ;;  %v7397_v61 = vand.u32 2147483648, %v3503_v4  ;;  %v3043_v0 = vpack.c.bf16 %v6687_v47, %v6687_v47  ;;  %v2432_v11 = vunpack.c.l.b16 %v2351_v55 }
 0x26b   : > { %v7395_v14 = vcvt.s32.f32 %v7394_v41  ;;  %2585 = vmatmul.bf16.gmra.mxu2 %v2449_v39  ;;  %3277 = vmatmul.bf16.gmra.mxu0 %v3141_v58  ;;  %v3440_v56 = vmax.f32 %v3408_v49, 0.0  ;;  %v3305_v12 = vadd.f32 %v3235_v20, %v2959_v40  ;;  %v3042_v39 = vpack.c.bf16 %v6686_v3, %v6686_v3 }
 0x26c   : > { %2931 = vmatmul.bf16.gmra.mxu3 %v2795_v33  ;;  %vm7393_vm5 = vcmp.lt.f32.partialorder %v7392_v36, 8388608.0  ;;  %v2697_v58 = vpack.c.bf16 %v6607_v15, %v6607_v15  ;;  %v2431_v40 = vunpack.c.l.b16 %v2350_v9  ;;  %v3124_v21 = vunpack.c.l.b16 %v3043_v0  ;;  %v7268_v36 = vld [vmem:[%s9782_s2 + $0x28] sm:$0xff] }
 0x26d   : > { %v7396_v37 = vand.u32 2147483647, %v7395_v14  ;;  %v3472_v30 = vmin.f32 %v3440_v56, 1.0  ;;  %v3341_v32 = vmul.f32 %v8646_v45, %v3305_v12  ;;  %v3123_v13 = vunpack.c.l.b16 %v3042_v39  ;;  %v7284_v56 = vld [vmem:[%s9782_s2 + $0xa8] sm:$0xff]  ;;  %3983 = vmatpush.bf16.msrb.mxu2 %v7268_v36  ;;  %v7290_v36 = vld [vmem:[%s9782_s2 + $0xd8] sm:$0xff] }
 0x26e   : > { %v2546_v19 = vpop.f32.mrf.mxu2  ;;  %v2777_v47 = vunpack.c.l.b16 %v2696_v62  ;;  %4185 = vmatpush.bf16.msrb.mxu3 %v7284_v56  ;;  %v2450_v62 = vpack.c.b16 %v2432_v11, %v2431_v40  ;;  %v6528_v40 = vld [vmem:[%s7973_s26 + $0x180] sm:$0xff]  ;;  %v6529_v11 = vld [vmem:[%s7973_s26 + $0x188] sm:$0xff] }
 0x26f   : > { %v7398_v43 = vor.u32 %v7397_v61, %v7396_v37  ;;  %v2614_v6 = vadd.f32 %v2546_v19, %v8439_v54  ;;  %v2892_v52 = vpop.f32.mrf.mxu3  ;;  %v3504_v20 = vmul.f32 15.0, %v3472_v30  ;;  %v3377_v16 = vadd.f32 %v8653_v59, %v3341_v32 }
 0x270   : > { %v3240_v17 = vpop.f32.mrf.mxu0  ;;  %v2778_v37 = vunpack.c.l.b16 %v2697_v58 }
 0x271   : > { %v7399_v28 = vsel %vm7393_vm5, %v7398_v43, %v3503_v4  ;;  %v2960_v33 = vadd.f32 %v2892_v52, %v2614_v6  ;;  %v7402_v41 = vcvt.f32.s32 %v3504_v20  ;;  %v3409_v49 = vmax.f32 %v3377_v16, 0.0  ;;  %v7292_v4 = vld [vmem:[%s9782_s2 + $0xe8] sm:$0xff]  ;;  %v7291_v52 = vld [vmem:[%s9782_s2 + $0xe0] sm:$0xff] }
 0x272   : > { %3640 = vst [vmem:[#allocation2 + $0x70] sm:$0xff] %v7399_v28  ;;  %v3766_v54 = vpack.c.bf16 %v7399_v28, %v7391_v63  ;;  %v7400_v63 = vand.u32 2147483647, %v3504_v20  ;;  %v7405_v15 = vand.u32 2147483648, %v3504_v20  ;;  %4419 = vmatpush.bf16.msrb.mxu0 %v7292_v4  ;;  %v3142_v6 = vpack.c.b16 %v3124_v21, %v3123_v13  ;;  %v6689_v4 = vld [vmem:[%s7973_s26 + $0x18a] sm:$0xff] }
 0x273   : > { %v3306_v14 = vadd.f32 %v3238_v5, %v2960_v33  ;;  %v7403_v12 = vcvt.s32.f32 %v7402_v41  ;;  %v3441_v3 = vmax.f32 %v3409_v49, 0.0  ;;  %v2268_v5 = vadd.f32 %v8437_v18, %v8445_v34  ;;  %v7267_v18 = vld [vmem:[%s9782_s2 + $0x20] sm:$0xff] }
 0x274   : > { %3867 = vmatmul.bf16.gmra.mxu1 %v3766_v54  ;;  %v7283_v34 = vld [vmem:[%s9782_s2 + $0xa0] sm:$0xff]  ;;  %v2796_v58 = vpack.c.b16 %v2778_v37, %v2777_v47  ;;  %vm7401_vm6 = vcmp.lt.f32.partialorder %v7400_v63, 8388608.0  ;;  %3984 = vmatpush.bf16.msrb.mxu2 %v7267_v18  ;;  %v7282_v54 = vld [vmem:[%s9782_s2 + $0x98] sm:$0xff]  ;;  %v2352_v47 = vpack.c.bf16 %v6528_v40, %v6528_v40  ;;  %v7281_v18 = vld [vmem:[%s9782_s2 + $0x90] sm:$0xff] }
 0x275   : > { %v3342_v61 = vmul.f32 %v8646_v45, %v3306_v14  ;;  %v7404_v9 = vand.u32 2147483647, %v7403_v12  ;;  %v3473_v30 = vmin.f32 %v3441_v3, 1.0  ;;  %v6688_v14 = vld [vmem:[%s7973_s26 + $0x182] sm:$0xff]  ;;  %4186 = vmatpush.bf16.msrb.mxu3 %v7283_v34  ;;  %v7289_v34 = vld [vmem:[%s9782_s2 + $0xd0] sm:$0xff] }
 0x276   : > { %v2548_v32 = vpop.f32.mrf.mxu2  ;;  %4420 = vmatpush.bf16.msrb.mxu0 %v7291_v52  ;;  %v6608_v37 = vld [vmem:[%s7973_s26 + $0x181] sm:$0xff] }
 0x277   : > { %v3378_v19 = vadd.f32 %v8653_v59, %v3342_v61  ;;  %v2615_v55 = vadd.f32 %v2548_v32, %v2268_v5  ;;  %v2894_v43 = vpop.f32.mrf.mxu3  ;;  %v7406_v39 = vor.u32 %v7405_v15, %v7404_v9  ;;  %v3505_v0 = vmul.f32 15.0, %v3473_v30  ;;  %v6609_v5 = vld [vmem:[%s7973_s26 + $0x189] sm:$0xff] }
 0x278   : > { %v8765_v16 = vpop.f32.mrf.mxu0  ;;  %v2353_v15 = vpack.c.bf16 %v6529_v11, %v6529_v11  ;;  %v3044_v30 = vpack.c.bf16 %v6688_v14, %v6688_v14 }
 0x279   : > { %v3410_v28 = vmax.f32 %v3378_v19, 0.0  ;;  %v2961_v33 = vadd.f32 %v2894_v43, %v2615_v55  ;;  %v8767_v41 = vsel %vm7401_vm6, %v7406_v39, %v3504_v20  ;;  %v7410_v49 = vcvt.f32.s32 %v3505_v0  ;;  %v7266_v20 = vld [vmem:[%s9782_s2 + $0x18] sm:$0xff]  ;;  %4187 = vmatpush.bf16.msrb.mxu3 %v7282_v54 }
 0x27a   : > { %3641 = vst [vmem:[#allocation2 + $0x88] sm:$0xff] %v8767_v41  ;;  %v7408_v12 = vand.u32 2147483647, %v3505_v0  ;;  %3985 = vmatpush.bf16.msrb.mxu2 %v7266_v20  ;;  %v7413_v61 = vand.u32 2147483648, %v3505_v0  ;;  %4421 = vmatpush.bf16.msrb.mxu0 %v7290_v36  ;;  %v2434_v14 = vunpack.c.l.b16 %v2353_v15 }
 0x27b   : > { %v3442_v13 = vmax.f32 %v3410_v28, 0.0  ;;  %v3307_v21 = vadd.f32 %v3240_v17, %v2961_v33  ;;  %2590 = vmatmul.bf16.gmra.mxu2 %v2450_v62  ;;  %3282 = vmatmul.bf16.gmra.mxu0 %v3142_v6  ;;  %v7411_v56 = vcvt.s32.f32 %v7410_v49  ;;  %v3045_v62 = vpack.c.bf16 %v6689_v4, %v6689_v4  ;;  %v7265_v6 = vld [vmem:[%s9782_s2 + $0x10] sm:$0xff]  ;;  %v7264_v4 = vld [vmem:[%s9782_s2 + $0x8] sm:$0xff] }
 0x27c   : > { %2936 = vmatmul.bf16.gmra.mxu3 %v2796_v58  ;;  %v2698_v58 = vpack.c.bf16 %v6608_v37, %v6608_v37  ;;  %v2699_v28 = vpack.c.bf16 %v6609_v5, %v6609_v5  ;;  %vm7409_vm7 = vcmp.lt.f32.partialorder %v7408_v12, 8388608.0  ;;  %v2433_v49 = vunpack.c.l.b16 %v2352_v47 }
 0x27d   : > { %v3474_v3 = vmin.f32 %v3442_v13, 1.0  ;;  %v3343_v17 = vmul.f32 %v8646_v45, %v3307_v21  ;;  %v7412_v63 = vand.u32 2147483647, %v7411_v56  ;;  %v3125_v13 = vunpack.c.l.b16 %v3044_v30  ;;  %4188 = vmatpush.bf16.msrb.mxu3 %v7281_v18  ;;  %v7300_v56 = vld [vmem:[%s9782_s2 + $0x128] sm:$0xff] }
 0x27e   : > { %v2551_v9 = vpop.f32.mrf.mxu2  ;;  %3986 = vmatpush.bf16.msrb.mxu2 %v7265_v6  ;;  %4422 = vmatpush.bf16.msrb.mxu0 %v7289_v34  ;;  %v3126_v54 = vunpack.c.l.b16 %v3045_v62  ;;  %v2780_v47 = vunpack.c.l.b16 %v2699_v28  ;;  %v2270_v37 = vadd.f32 %v8454_v22, %v8459_v24  ;;  %v2451_v30 = vpack.c.b16 %v2434_v14, %v2433_v49  ;;  %v7263_v22 = vld [vmem:[%s9782_s2] sm:$0xff]  ;;  %v6530_v49 = vld [vmem:[%s7973_s26 + $0x198] sm:$0xff] }
 0x27f   : > { %v3506_v32 = vmul.f32 15.0, %v3474_v3  ;;  %v3379_v19 = vadd.f32 %v8653_v59, %v3343_v17  ;;  %v2616_v55 = vadd.f32 %v2551_v9, %v8456_v57  ;;  %v2897_v43 = vpop.f32.mrf.mxu3  ;;  %v7414_v52 = vor.u32 %v7413_v61, %v7412_v63  ;;  %4653 = vmatpush.bf16.msrb.mxu1 %v7300_v56  ;;  %v7279_v24 = vld [vmem:[%s9782_s2 + $0x80] sm:$0xff] }
 0x280   : > { %v8797_v39 = vpop.f32.mrf.mxu0  ;;  %v2779_v17 = vunpack.c.l.b16 %v2698_v58  ;;  %v3143_v62 = vpack.c.b16 %v3126_v54, %v3125_v13  ;;  %v6610_v14 = vld [vmem:[%s7973_s26 + $0x199] sm:$0xff]  ;;  %v6691_v54 = vld [vmem:[%s7973_s26 + $0x1a2] sm:$0xff] }
 0x281   : > { %v7418_v57 = vcvt.f32.s32 %v3506_v32  ;;  %v3411_v33 = vmax.f32 %v3379_v19, 0.0  ;;  %v7415_v40 = vsel %vm7409_vm7, %v7414_v52, %v3505_v0  ;;  %v2962_v11 = vadd.f32 %v2897_v43, %v2616_v55  ;;  %v7280_v0 = vld [vmem:[%s9782_s2 + $0x88] sm:$0xff]  ;;  %v7287_v52 = vld [vmem:[%s9782_s2 + $0xc0] sm:$0xff] }
 0x282   : > { %3642 = vst [vmem:[#allocation2 + $0x90] sm:$0xff] %v7415_v40  ;;  %v3767_v36 = vpack.c.bf16 %v7415_v40, %v8767_v41  ;;  %v7416_v12 = vand.u32 2147483647, %v3506_v32  ;;  %v7288_v41 = vld [vmem:[%s9782_s2 + $0xc8] sm:$0xff]  ;;  %v7421_v63 = vand.u32 2147483648, %v3506_v32  ;;  %3987 = vmatpush.bf16.msrb.mxu2 %v7264_v4  ;;  %4189 = vmatpush.bf16.msrb.mxu3 %v7280_v0  ;;  %v2797_v34 = vpack.c.b16 %v2780_v47, %v2779_v17 }
 0x283   : > { %v7419_v21 = vcvt.s32.f32 %v7418_v57  ;;  %v3443_v20 = vmax.f32 %v3411_v33, 0.0  ;;  %v3308_v3 = vadd.f32 %v8765_v16, %v2962_v11  ;;  %4423 = vmatpush.bf16.msrb.mxu0 %v7288_v41  ;;  %v6531_v11 = vld [vmem:[%s7973_s26 + $0x1a0] sm:$0xff]  ;;  %v2354_v4 = vpack.c.bf16 %v6530_v49, %v6530_v49 }
 0x284   : > { %3872 = vmatmul.bf16.gmra.mxu1 %v3767_v36  ;;  %vm7417_vm8 = vcmp.lt.f32.partialorder %v7416_v12, 8388608.0  ;;  %v6611_v0 = vld [vmem:[%s7973_s26 + $0x1a1] sm:$0xff]  ;;  %v2355_v47 = vpack.c.bf16 %v6531_v11, %v6531_v11  ;;  %v2700_v41 = vpack.c.bf16 %v6610_v14, %v6610_v14  ;;  %v2272_v11 = vadd.f32 %v8471_v53, %v8476_v27 }
 0x285   : > { %v7420_v5 = vand.u32 2147483647, %v7419_v21  ;;  %v3475_v61 = vmin.f32 %v3443_v20, 1.0  ;;  %v3344_v9 = vmul.f32 %v8646_v45, %v3308_v3 }
 0x286   : > { %v2553_v15 = vpop.f32.mrf.mxu2  ;;  %3988 = vmatpush.bf16.msrb.mxu2 %v7263_v22  ;;  %4190 = vmatpush.bf16.msrb.mxu3 %v7279_v24  ;;  %v2435_v24 = vunpack.c.l.b16 %v2354_v4  ;;  %v2781_v49 = vunpack.c.l.b16 %v2700_v41 }
 0x287   : > { %v7422_v16 = vor.u32 %v7421_v63, %v7420_v5  ;;  %v3507_v19 = vmul.f32 15.0, %v3475_v61  ;;  %v2617_v55 = vadd.f32 %v2553_v15, %v2270_v37  ;;  %v2899_v43 = vpop.f32.mrf.mxu3  ;;  %v3380_v6 = vadd.f32 %v8653_v59, %v3344_v9  ;;  %4424 = vmatpush.bf16.msrb.mxu0 %v7287_v52 }
 0x288   : > { %v3248_v18 = vpop.f32.mrf.mxu0 }
 0x289   : > { %v7423_v58 = vsel %vm7417_vm8, %v7422_v16, %v3506_v32  ;;  %v7426_v28 = vcvt.f32.s32 %v3507_v19  ;;  %v3412_v57 = vmax.f32 %v3380_v6, 0.0  ;;  %v2963_v33 = vadd.f32 %v2899_v43, %v2617_v55  ;;  %v6690_v32 = vld [vmem:[%s7973_s26 + $0x19a] sm:$0xff] }
 0x28a   : > { %3643 = vst [vmem:[#allocation2 + $0xa8] sm:$0xff] %v7423_v58  ;;  %v7424_v13 = vand.u32 2147483647, %v3507_v19  ;;  %v7429_v56 = vand.u32 2147483648, %v3507_v19  ;;  %v3046_v61 = vpack.c.bf16 %v6690_v32, %v6690_v32  ;;  %v2701_v16 = vpack.c.bf16 %v6611_v0, %v6611_v0 }
 0x28b   : > { %v7427_v40 = vcvt.s32.f32 %v7426_v28  ;;  %2595 = vmatmul.bf16.gmra.mxu2 %v2451_v30  ;;  %3287 = vmatmul.bf16.gmra.mxu0 %v3143_v62  ;;  %v3444_v21 = vmax.f32 %v3412_v57, 0.0  ;;  %v3309_v20 = vadd.f32 %v8797_v39, %v2963_v33  ;;  %v3047_v39 = vpack.c.bf16 %v6691_v54, %v6691_v54 }
 0x28c   : > { %2941 = vmatmul.bf16.gmra.mxu3 %v2797_v34  ;;  %vm7425_vm9 = vcmp.lt.f32.partialorder %v7424_v13, 8388608.0  ;;  %v2436_v6 = vunpack.c.l.b16 %v2355_v47  ;;  %v3127_v52 = vunpack.c.l.b16 %v3046_v61 }
 0x28d   : > { %v7428_v36 = vand.u32 2147483647, %v7427_v40  ;;  %v3476_v12 = vmin.f32 %v3444_v21, 1.0  ;;  %v3345_v3 = vmul.f32 %v8646_v45, %v3309_v20  ;;  %v3128_v28 = vunpack.c.l.b16 %v3047_v39 }
 0x28e   : > { %v2556_v17 = vpop.f32.mrf.mxu2  ;;  %v2782_v40 = vunpack.c.l.b16 %v2701_v16 }
 0x28f   : > { %v7430_v37 = vor.u32 %v7429_v56, %v7428_v36  ;;  %v2618_v5 = vadd.f32 %v2556_v17, %v8473_v42  ;;  %v2902_v63 = vpop.f32.mrf.mxu3  ;;  %v3508_v9 = vmul.f32 15.0, %v3476_v12  ;;  %v3381_v15 = vadd.f32 %v8653_v59, %v3345_v3 }
 0x290   : > { %v3250_v30 = vpop.f32.mrf.mxu0  ;;  %v3144_v56 = vpack.c.b16 %v3128_v28, %v3127_v52  ;;  %v2798_v3 = vpack.c.b16 %v2782_v40, %v2781_v49  ;;  %v3667_v40 = vld [vmem:[#allocation2 + $0x7] sm:$0xff] }
 0x291   : > { %v7431_v55 = vsel %vm7425_vm9, %v7430_v37, %v3507_v19  ;;  %v2964_v43 = vadd.f32 %v2902_v63, %v2618_v5  ;;  %v7434_v62 = vcvt.f32.s32 %v3508_v9  ;;  %v3413_v22 = vmax.f32 %v3381_v15, 0.0 }
 0x292   : > { %3644 = vst [vmem:[#allocation2 + $0xb0] sm:$0xff] %v7431_v55  ;;  %v3768_v42 = vpack.c.bf16 %v7431_v55, %v7423_v58  ;;  %v7432_v14 = vand.u32 2147483647, %v3508_v9  ;;  %v7437_v21 = vand.u32 2147483648, %v3508_v9  ;;  %v2452_v58 = vpack.c.b16 %v2436_v6, %v2435_v24 }
 0x293   : > { %v3310_v34 = vadd.f32 %v3248_v18, %v2964_v43  ;;  %v7435_v57 = vcvt.s32.f32 %v7434_v62  ;;  %v3445_v33 = vmax.f32 %v3413_v22, 0.0 }
 0x294   : > { %3877 = vmatmul.bf16.gmra.mxu1 %v3768_v42  ;;  %vm7433_vm10 = vcmp.lt.f32.partialorder %v7432_v14, 8388608.0 }
 0x295   : > { %v3346_v19 = vmul.f32 %v8646_v45, %v3310_v34  ;;  %v7436_v13 = vand.u32 2147483647, %v7435_v57  ;;  %v3477_v20 = vmin.f32 %v3445_v33, 1.0  ;;  %v7299_v33 = vld [vmem:[%s9782_s2 + $0x120] sm:$0xff] }
 0x296   : > { %v2558_v32 = vpop.f32.mrf.mxu2  ;;  %4654 = vmatpush.bf16.msrb.mxu1 %v7299_v33 }
 0x297   : > { %v3382_v18 = vadd.f32 %v8653_v59, %v3346_v19  ;;  %v2619_v54 = vadd.f32 %v2558_v32, %v2272_v11  ;;  %v2904_v36 = vpop.f32.mrf.mxu3  ;;  %v7438_v4 = vor.u32 %v7437_v21, %v7436_v13  ;;  %v3509_v0 = vmul.f32 15.0, %v3477_v20  ;;  %v4070_v21 = vld [vmem:[#allocation2 + $0x9] sm:$0xff]  ;;  %v4071_v20 = vld [vmem:[#allocation2 + $0x11] sm:$0xff]  ;;  %v8851_v32 = vld [vmem:[%s9783_s3] ss:$0 sm:$0xff] }
 0x298   : > { %v3253_v12 = vpop.f32.mrf.mxu0  ;;  %v2274_v11 = vadd.f32 %v8485_v46, %v8490_v31 }
 0x299   : > { %v3414_v53 = vmax.f32 %v3382_v18, 0.0  ;;  %v2965_v27 = vadd.f32 %v2904_v36, %v2619_v54  ;;  %v7439_v17 = vsel %vm7433_vm10, %v7438_v4, %v3508_v9  ;;  %v7442_v47 = vcvt.f32.s32 %v3509_v0  ;;  %v4305_v36 = vld [vmem:[#allocation2 + $0x2f] sm:$0xff] }
 0x29a   : > { %3645 = vst [vmem:[#allocation2 + $0xc8] sm:$0xff] %v7439_v17  ;;  %v7440_v63 = vand.u32 2147483647, %v3509_v0  ;;  %v7445_v16 = vand.u32 2147483648, %v3509_v0 }
 0x29b   : > { %v3446_v41 = vmax.f32 %v3414_v53, 0.0  ;;  %v3311_v37 = vadd.f32 %v3250_v30, %v2965_v27  ;;  %2600 = vmatmul.bf16.gmra.mxu2 %v2452_v58  ;;  %3292 = vmatmul.bf16.gmra.mxu0 %v3144_v56  ;;  %v7443_v5 = vcvt.s32.f32 %v7442_v47  ;;  %v4102_v53 = vpack.c.bf16 %v4071_v20, %v4070_v21  ;;  %v4304_v27 = vld [vmem:[#allocation2 + $0x27] sm:$0xff]  ;;  %v4307_v20 = vld [vmem:[#allocation2 + $0x4f] sm:$0xff] }
 0x29c   : > { %2946 = vmatmul.bf16.gmra.mxu3 %v2798_v3  ;;  %vm7441_vm11 = vcmp.lt.f32.partialorder %v7440_v63, 8388608.0 }
 0x29d   : > { %v3478_v61 = vmin.f32 %v3446_v41, 1.0  ;;  %v3347_v39 = vmul.f32 %v8646_v45, %v3311_v37  ;;  %v7444_v15 = vand.u32 2147483647, %v7443_v5  ;;  %v4336_v41 = vpack.c.bf16 %v4305_v36, %v4304_v27 }
 0x29e   : > { %v2561_v55 = vpop.f32.mrf.mxu2 }
 0x29f   : > { %v3510_v43 = vmul.f32 15.0, %v3478_v61  ;;  %v3383_v62 = vadd.f32 %v8653_v59, %v3347_v39  ;;  %v2620_v9 = vadd.f32 %v2561_v55, %v8487_v60  ;;  %v2907_v22 = vpop.f32.mrf.mxu3  ;;  %v7446_v24 = vor.u32 %v7445_v16, %v7444_v15  ;;  %v3668_v60 = vld [vmem:[#allocation2 + $0xf] sm:$0xff] }
 0x2a0   : > { %v3255_v6 = vpop.f32.mrf.mxu0  ;;  %v3699_v31 = vpack.c.bf16 %v3668_v60, %v3667_v40  ;;  %v2276_v60 = vadd.f32 %v8502_v7, %v8507_v48  ;;  %v4306_v48 = vld [vmem:[#allocation2 + $0x47] sm:$0xff] }
 0x2a1   : > { %v7450_v30 = vcvt.f32.s32 %v3510_v43  ;;  %v3415_v34 = vmax.f32 %v3383_v62, 0.0  ;;  %v7447_v52 = vsel %vm7441_vm11, %v7446_v24, %v3509_v0  ;;  %v2966_v28 = vadd.f32 %v2907_v22, %v2620_v9  ;;  %v8857_v0 = vld [vmem:[%s9784_s4] ss:$0 sm:$0xff] }
 0x2a2   : > { %3646 = vst [vmem:[#allocation2 + $0xd0] sm:$0xff] %v7447_v52  ;;  %v3769_v45 = vpack.c.bf16 %v7447_v52, %v7439_v17  ;;  %v7448_v49 = vand.u32 2147483647, %v3510_v43  ;;  %v7453_v19 = vand.u32 2147483648, %v3510_v43 }
 0x2a3   : > { %v7451_v42 = vcvt.s32.f32 %v7450_v30  ;;  %v3447_v57 = vmax.f32 %v3415_v34, 0.0  ;;  %v3312_v59 = vadd.f32 %v3253_v12, %v2966_v28 }
 0x2a4   : > { %3882 = vmatmul.bf16.gmra.mxu1 %v3769_v45  ;;  %vm7449_vm12 = vcmp.lt.f32.partialorder %v7448_v49, 8388608.0 }
 0x2a5   : > { %v7452_v14 = vand.u32 2147483647, %v7451_v42  ;;  %v3479_v13 = vmin.f32 %v3447_v57, 1.0  ;;  %v3348_v18 = vmul.f32 %v8851_v32, %v3312_v59 }
 0x2a6   : > { %v2563_v54 = vpop.f32.mrf.mxu2 }
 0x2a7   : > { %v7454_v58 = vor.u32 %v7453_v19, %v7452_v14  ;;  %v3511_v56 = vmul.f32 15.0, %v3479_v13  ;;  %v2621_v4 = vadd.f32 %v2563_v54, %v2274_v11  ;;  %v2909_v46 = vpop.f32.mrf.mxu3  ;;  %v3384_v12 = vadd.f32 %v8857_v0, %v3348_v18 }
 0x2a8   : > { %v3258_v3 = vpop.f32.mrf.mxu0 }
 0x2a9   : > { %v7455_v17 = vsel %vm7449_vm12, %v7454_v58, %v3510_v43  ;;  %v7458_v47 = vcvt.f32.s32 %v3511_v56  ;;  %v3416_v37 = vmax.f32 %v3384_v12, 0.0  ;;  %v2967_v5 = vadd.f32 %v2909_v46, %v2621_v4  ;;  %v4072_v58 = vld [vmem:[#allocation2 + $0x29] sm:$0xff]  ;;  %v8867_v4 = vpop.f32.mrf.mxu1 }
 0x2aa   : > { %3647 = vst [vmem:[#allocation2 + $0xe8] sm:$0xff] %v7455_v17  ;;  %v7456_v61 = vand.u32 2147483647, %v3511_v56  ;;  %v7461_v55 = vand.u32 2147483648, %v3511_v56 }
 0x2ab   : > { %v7459_v63 = vcvt.s32.f32 %v7458_v47  ;;  %3989 = vmatmul.bf16.vlgmr.msrb.gmra.mxu2 %v3699_v31  ;;  %4425 = vmatmul.bf16.vlgmr.msrb.gmra.mxu0 %v4336_v41  ;;  %v3448_v39 = vmax.f32 %v3416_v37, 0.0  ;;  %v3313_v15 = vadd.f32 %v3255_v6, %v2967_v5 }
 0x2ac   : > { %4191 = vmatmul.bf16.vlgmr.msrb.gmra.mxu3 %v4102_v53  ;;  %vm7457_vm13 = vcmp.lt.f32.partialorder %v7456_v61, 8388608.0  ;;  %v8869_v53 = vpack.c.bf16 %v4307_v20, %v4306_v48 }
 0x2ad   : > { %v7460_v16 = vand.u32 2147483647, %v7459_v63  ;;  %v3480_v62 = vmin.f32 %v3448_v39, 1.0  ;;  %v3349_v9 = vmul.f32 %v8851_v32, %v3313_v15 }
 0x2ae   : > { %v2566_v22 = vpop.f32.mrf.mxu2 }
 0x2af   : > { %v7462_v24 = vor.u32 %v7461_v55, %v7460_v16  ;;  %v2622_v43 = vadd.f32 %v2566_v22, %v8504_v2  ;;  %v2912_v30 = vpop.f32.mrf.mxu3  ;;  %v3512_v34 = vmul.f32 15.0, %v3480_v62  ;;  %v3385_v52 = vadd.f32 %v8857_v0, %v3349_v9 }
 0x2b0   : > { %v3260_v28 = vpop.f32.mrf.mxu0 }
 0x2b1   : > { %v7463_v42 = vsel %vm7457_vm13, %v7462_v24, %v3511_v56  ;;  %v2968_v57 = vadd.f32 %v2912_v30, %v2622_v43  ;;  %v7466_v6 = vcvt.f32.s32 %v3512_v34  ;;  %v3417_v45 = vmax.f32 %v3385_v52, 0.0  ;;  %v4073_v56 = vld [vmem:[#allocation2 + $0x31] sm:$0xff] }
 0x2b2   : > { %3648 = vst [vmem:[#allocation2 + $0xf0] sm:$0xff] %v7463_v42  ;;  %v3770_v49 = vpack.c.bf16 %v7463_v42, %v7455_v17  ;;  %v7464_v11 = vand.u32 2147483647, %v3512_v34  ;;  %v7469_v19 = vand.u32 2147483648, %v3512_v34  ;;  %v4103_v47 = vpack.c.bf16 %v4073_v56, %v4072_v58  ;;  %v4074_v58 = vld [vmem:[#allocation2 + $0x49] sm:$0xff]  ;;  %v4075_v56 = vld [vmem:[#allocation2 + $0x51] sm:$0xff] }
 0x2b3   : > { %v3314_v33 = vadd.f32 %v3258_v3, %v2968_v57  ;;  %v7467_v59 = vcvt.s32.f32 %v7466_v6  ;;  %v3449_v40 = vmax.f32 %v3417_v45, 0.0 }
 0x2b4   : > { %3887 = vmatmul.bf16.gmra.mxu1 %v3770_v49  ;;  %vm7465_vm14 = vcmp.lt.f32.partialorder %v7464_v11, 8388608.0  ;;  %v7298_v49 = vld [vmem:[%s9782_s2 + $0x118] sm:$0xff] }
 0x2b5   : > { %v3350_v2 = vmul.f32 %v8851_v32, %v3314_v33  ;;  %v7468_v14 = vand.u32 2147483647, %v7467_v59  ;;  %v3481_v13 = vmin.f32 %v3449_v40, 1.0  ;;  %v9796_v40 = vld [vmem:[#allocation3_spill] sm:$0xff]  ;;  %4655 = vmatpush.bf16.msrb.mxu1 %v7298_v49 }
 0x2b6   : > { %v2568_v21 = vpop.f32.mrf.mxu2 }
 0x2b7   : > { %v3386_v18 = vadd.f32 %v8857_v0, %v3350_v2  ;;  %v2623_v54 = vadd.f32 %v2568_v21, %v2276_v60  ;;  %v2914_v36 = vpop.f32.mrf.mxu3  ;;  %v7470_v46 = vor.u32 %v7469_v19, %v7468_v14  ;;  %v3513_v31 = vmul.f32 15.0, %v3481_v13  ;;  %v4309_v21 = vld [vmem:[#allocation2 + $0x6f] sm:$0xff] }
 0x2b8   : > { %v3263_v7 = vpop.f32.mrf.mxu0  ;;  %v2278_v60 = vadd.f32 %v9796_v40, %v8521_v25  ;;  %v4308_v25 = vld [vmem:[#allocation2 + $0x67] sm:$0xff] }
 0x2b9   : > { %v3418_v12 = vmax.f32 %v3386_v18, 0.0  ;;  %v2969_v3 = vadd.f32 %v2914_v36, %v2623_v54  ;;  %v7471_v27 = vsel %vm7465_vm14, %v7470_v46, %v3512_v34  ;;  %v7474_v17 = vcvt.f32.s32 %v3513_v31 }
 0x2ba   : > { %3649 = vst [vmem:[#allocation2 + $0x108] sm:$0xff] %v7471_v27  ;;  %v7472_v61 = vand.u32 2147483647, %v3513_v31  ;;  %v7477_v55 = vand.u32 2147483648, %v3513_v31 }
 0x2bb   : > { %v3450_v37 = vmax.f32 %v3418_v12, 0.0  ;;  %v3315_v5 = vadd.f32 %v3260_v28, %v2969_v3  ;;  %3994 = vmatmul.bf16.gmra.mxu2 %v4336_v41  ;;  %4430 = vmatmul.bf16.gmra.mxu0 %v8869_v53  ;;  %v7475_v63 = vcvt.s32.f32 %v7474_v17  ;;  %v8875_v41 = vpop.f32.mrf.mxu1  ;;  %v8884_v12 = vpack.c.bf16 %v4309_v21, %v4308_v25 }
 0x2bc   : > { %4196 = vmatmul.bf16.gmra.mxu3 %v4103_v47  ;;  %vm7473_vm15 = vcmp.lt.f32.partialorder %v7472_v61, 8388608.0  ;;  %v4104_v47 = vpack.c.bf16 %v4075_v56, %v4074_v58  ;;  %v4310_v56 = vld [vmem:[#allocation2 + $0x87] sm:$0xff] }
 0x2bd   : > { %v3482_v39 = vmin.f32 %v3450_v37, 1.0  ;;  %v3351_v15 = vmul.f32 %v8851_v32, %v3315_v5  ;;  %v7476_v16 = vand.u32 2147483647, %v7475_v63 }
 0x2be   : > { %v2571_v62 = vpop.f32.mrf.mxu2 }
 0x2bf   : > { %v3514_v9 = vmul.f32 15.0, %v3482_v39  ;;  %v3387_v22 = vadd.f32 %v8857_v0, %v3351_v15  ;;  %v2624_v24 = vadd.f32 %v2571_v62, %v8518_v26  ;;  %v2917_v43 = vpop.f32.mrf.mxu3  ;;  %v7478_v30 = vor.u32 %v7477_v55, %v7476_v16 }
 0x2c0   : > { %v3265_v34 = vpop.f32.mrf.mxu0 }
 0x2c1   : > { %v7482_v52 = vcvt.f32.s32 %v3514_v9  ;;  %v3419_v28 = vmax.f32 %v3387_v22, 0.0  ;;  %v7479_v42 = vsel %vm7473_vm15, %v7478_v30, %v3513_v31  ;;  %v2970_v57 = vadd.f32 %v2917_v43, %v2624_v24 }
 0x2c2   : > { %3650 = vst [vmem:[#allocation2 + $0x110] sm:$0xff] %v7479_v42  ;;  %v3771_v33 = vpack.c.bf16 %v7479_v42, %v7471_v27  ;;  %v7480_v59 = vand.u32 2147483647, %v3514_v9  ;;  %v7485_v2 = vand.u32 2147483648, %v3514_v9 }
 0x2c3   : > { %v7483_v6 = vcvt.s32.f32 %v7482_v52  ;;  %v3451_v45 = vmax.f32 %v3419_v28, 0.0  ;;  %v3316_v26 = vadd.f32 %v3263_v7, %v2970_v57  ;;  %v8886_v17 = vpop.f32.mrf.mxu1 }
 0x2c4   : > { %3892 = vmatmul.bf16.gmra.mxu1 %v3771_v33  ;;  %vm7481_vm0 = vcmp.lt.f32.partialorder %v7480_v59, 8388608.0 }
 0x2c5   : > { %v7484_v11 = vand.u32 2147483647, %v7483_v6  ;;  %v3483_v14 = vmin.f32 %v3451_v45, 1.0  ;;  %v3352_v19 = vmul.f32 %v8851_v32, %v3316_v26 }
 0x2c6   : > { %v2573_v13 = vpop.f32.mrf.mxu2 }
 0x2c7   : > { %v7486_v20 = vor.u32 %v7485_v2, %v7484_v11  ;;  %v3515_v18 = vmul.f32 15.0, %v3483_v14  ;;  %v2625_v54 = vadd.f32 %v2573_v13, %v2278_v60  ;;  %v2919_v36 = vpop.f32.mrf.mxu3  ;;  %v3388_v46 = vadd.f32 %v8857_v0, %v3352_v19  ;;  %v4311_v14 = vld [vmem:[#allocation2 + $0x8f] sm:$0xff] }
 0x2c8   : > { %v3268_v31 = vpop.f32.mrf.mxu0 }
 0x2c9   : > { %v7487_v7 = vsel %vm7481_vm0, %v7486_v20, %v3514_v9  ;;  %v7490_v48 = vcvt.f32.s32 %v3515_v18  ;;  %v3420_v3 = vmax.f32 %v3388_v46, 0.0  ;;  %v2971_v27 = vadd.f32 %v2919_v36, %v2625_v54  ;;  %v4076_v20 = vld [vmem:[#allocation2 + $0x69] sm:$0xff] }
 0x2ca   : > { %3651 = vst [vmem:[#allocation2 + $0x128] sm:$0xff] %v7487_v7  ;;  %v7488_v5 = vand.u32 2147483647, %v3515_v18  ;;  %v7493_v15 = vand.u32 2147483648, %v3515_v18  ;;  %v8899_v46 = vpack.c.bf16 %v4311_v14, %v4310_v56 }
 0x2cb   : > { %v7491_v37 = vcvt.s32.f32 %v7490_v48  ;;  %3999 = vmatmul.bf16.gmra.mxu2 %v8869_v53  ;;  %4435 = vmatmul.bf16.gmra.mxu0 %v8884_v12  ;;  %v3452_v63 = vmax.f32 %v3420_v3, 0.0  ;;  %v3317_v61 = vadd.f32 %v3265_v34, %v2971_v27 }
 0x2cc   : > { %4201 = vmatmul.bf16.gmra.mxu3 %v4104_v47  ;;  %vm7489_vm1 = vcmp.lt.f32.partialorder %v7488_v5, 8388608.0 }
 0x2cd   : > { %v7492_v39 = vand.u32 2147483647, %v7491_v37  ;;  %v3484_v16 = vmin.f32 %v3452_v63, 1.0  ;;  %v3353_v55 = vmul.f32 %v8851_v32, %v3317_v61 }
 0x2ce   : > { %v2576_v62 = vpop.f32.mrf.mxu2 }
 0x2cf   : > { %v7494_v9 = vor.u32 %v7493_v15, %v7492_v39  ;;  %v2626_v22 = vadd.f32 %v2576_v62, %v8535_v51  ;;  %v2922_v24 = vpop.f32.mrf.mxu3  ;;  %v3516_v43 = vmul.f32 15.0, %v3484_v16  ;;  %v3389_v53 = vadd.f32 %v8857_v0, %v3353_v55 }
 0x2d0   : > { %v3270_v30 = vpop.f32.mrf.mxu0  ;;  %v2280_v51 = vadd.f32 %v8533_v35, %v8538_v44 }
 0x2d1   : > { %v7495_v52 = vsel %vm7489_vm1, %v7494_v9, %v3515_v18  ;;  %v2972_v28 = vadd.f32 %v2922_v24, %v2626_v22  ;;  %v7498_v34 = vcvt.f32.s32 %v3516_v43  ;;  %v3421_v42 = vmax.f32 %v3389_v53, 0.0  ;;  %v8893_v57 = vpop.f32.mrf.mxu1  ;;  %v4077_v18 = vld [vmem:[#allocation2 + $0x71] sm:$0xff] }
 0x2d2   : > { %3652 = vst [vmem:[#allocation2 + $0x130] sm:$0xff] %v7495_v52  ;;  %v3772_v45 = vpack.c.bf16 %v7495_v52, %v7487_v7  ;;  %v7496_v59 = vand.u32 2147483647, %v3516_v43  ;;  %v7501_v60 = vand.u32 2147483648, %v3516_v43  ;;  %v4105_v7 = vpack.c.bf16 %v4077_v18, %v4076_v20  ;;  %v4078_v20 = vld [vmem:[#allocation2 + $0x89] sm:$0xff]  ;;  %v4079_v18 = vld [vmem:[#allocation2 + $0x91] sm:$0xff] }
 0x2d3   : > { %v3318_v6 = vadd.f32 %v3268_v31, %v2972_v28  ;;  %v7499_v33 = vcvt.s32.f32 %v7498_v34  ;;  %v3453_v49 = vmax.f32 %v3421_v42, 0.0 }
 0x2d4   : > { %3897 = vmatmul.bf16.gmra.mxu1 %v3772_v45  ;;  %vm7497_vm2 = vcmp.lt.f32.partialorder %v7496_v59, 8388608.0 }
 0x2d5   : > { %v3354_v26 = vmul.f32 %v8851_v32, %v3318_v6  ;;  %v7500_v40 = vand.u32 2147483647, %v7499_v33  ;;  %v3485_v11 = vmin.f32 %v3453_v49, 1.0  ;;  %v7297_v6 = vld [vmem:[%s9782_s2 + $0x110] sm:$0xff]  ;;  %v9798_v49 = vld [vmem:[#allocation4_spill] sm:$0xff] }
 0x2d6   : > { %v2578_v2 = vpop.f32.mrf.mxu2  ;;  %v9797_v33 = vld [vmem:[#allocation5_spill] sm:$0xff]  ;;  %4656 = vmatpush.bf16.msrb.mxu1 %v7297_v6 }
 0x2d7   : > { %v3390_v19 = vadd.f32 %v8857_v0, %v3354_v26  ;;  %v2627_v13 = vadd.f32 %v2578_v2, %v2280_v51  ;;  %v2924_v21 = vpop.f32.mrf.mxu3  ;;  %v7502_v54 = vor.u32 %v7501_v60, %v7500_v40  ;;  %v3517_v36 = vmul.f32 15.0, %v3485_v11  ;;  %v4313_v2 = vld [vmem:[#allocation2 + $0xaf] sm:$0xff] }
 0x2d8   : > { %v3273_v58 = vpop.f32.mrf.mxu0  ;;  %v2282_v51 = vadd.f32 %v9798_v49, %v9797_v33 }
 0x2d9   : > { %v3422_v35 = vmax.f32 %v3390_v19, 0.0  ;;  %v2973_v44 = vadd.f32 %v2924_v21, %v2627_v13  ;;  %v7503_v31 = vsel %vm7497_vm2, %v7502_v54, %v3516_v43  ;;  %v7506_v25 = vcvt.f32.s32 %v3517_v36  ;;  %v8901_v48 = vpop.f32.mrf.mxu1 }
 0x2da   : > { %3653 = vst [vmem:[#allocation2 + $0x148] sm:$0xff] %v7503_v31  ;;  %v7504_v37 = vand.u32 2147483647, %v3517_v36  ;;  %v7509_v39 = vand.u32 2147483648, %v3517_v36 }
 0x2db   : > { %v3454_v3 = vmax.f32 %v3422_v35, 0.0  ;;  %v3319_v27 = vadd.f32 %v3270_v30, %v2973_v44  ;;  %4004 = vmatmul.bf16.gmra.mxu2 %v8884_v12  ;;  %4440 = vmatmul.bf16.gmra.mxu0 %v8899_v46  ;;  %v7507_v47 = vcvt.s32.f32 %v7506_v25 }
 0x2dc   : > { %4206 = vmatmul.bf16.gmra.mxu3 %v4105_v7  ;;  %vm7505_vm3 = vcmp.lt.f32.partialorder %v7504_v37, 8388608.0  ;;  %v4106_v7 = vpack.c.bf16 %v4079_v18, %v4078_v20  ;;  %v4314_v18 = vld [vmem:[#allocation2 + $0xc7] sm:$0xff] }
 0x2dd   : > { %v3486_v5 = vmin.f32 %v3454_v3, 1.0  ;;  %v3355_v63 = vmul.f32 %v8851_v32, %v3319_v27  ;;  %v7508_v61 = vand.u32 2147483647, %v7507_v47 }
 0x2de   : > { %v2581_v15 = vpop.f32.mrf.mxu2 }
 0x2df   : > { %v3518_v16 = vmul.f32 15.0, %v3486_v5  ;;  %v3391_v55 = vadd.f32 %v8857_v0, %v3355_v63  ;;  %v2628_v62 = vadd.f32 %v2581_v15, %v8549_v8  ;;  %v2927_v9 = vpop.f32.mrf.mxu3  ;;  %v7510_v22 = vor.u32 %v7509_v39, %v7508_v61 }
 0x2e0   : > { %v3275_v24 = vpop.f32.mrf.mxu0 }
 0x2e1   : > { %v7514_v12 = vcvt.f32.s32 %v3518_v16  ;;  %v3423_v43 = vmax.f32 %v3391_v55, 0.0  ;;  %v7511_v53 = vsel %vm7505_vm3, %v7510_v22, %v3517_v36  ;;  %v2974_v30 = vadd.f32 %v2927_v9, %v2628_v62  ;;  %v8908_v52 = vpop.f32.mrf.mxu1 }
 0x2e2   : > { %3654 = vst [vmem:[#allocation2 + $0x150] sm:$0xff] %v7511_v53  ;;  %v3773_v42 = vpack.c.bf16 %v7511_v53, %v7503_v31  ;;  %v7512_v45 = vand.u32 2147483647, %v3518_v16  ;;  %v7517_v26 = vand.u32 2147483648, %v3518_v16 }
 0x2e3   : > { %v7515_v28 = vcvt.s32.f32 %v7514_v12  ;;  %v3455_v34 = vmax.f32 %v3423_v43, 0.0  ;;  %v3320_v8 = vadd.f32 %v3273_v58, %v2974_v30  ;;  %v4312_v58 = vld [vmem:[#allocation2 + $0xa7] sm:$0xff] }
 0x2e4   : > { %3902 = vmatmul.bf16.gmra.mxu1 %v3773_v42  ;;  %vm7513_vm4 = vcmp.lt.f32.partialorder %v7512_v45, 8388608.0  ;;  %v8917_v44 = vpack.c.bf16 %v4313_v2, %v4312_v58 }
 0x2e5   : > { %v7516_v59 = vand.u32 2147483647, %v7515_v28  ;;  %v3487_v40 = vmin.f32 %v3455_v34, 1.0  ;;  %v3356_v60 = vmul.f32 %v8851_v32, %v3320_v8 }
 0x2e6   : > { %v2583_v11 = vpop.f32.mrf.mxu2 }
 0x2e7   : > { %v7518_v14 = vor.u32 %v7517_v26, %v7516_v59  ;;  %v3519_v19 = vmul.f32 15.0, %v3487_v40  ;;  %v2629_v13 = vadd.f32 %v2583_v11, %v2282_v51  ;;  %v2929_v21 = vpop.f32.mrf.mxu3  ;;  %v3392_v54 = vadd.f32 %v8857_v0, %v3356_v60  ;;  %v4315_v40 = vld [vmem:[#allocation2 + $0xcf] sm:$0xff] }
 0x2e8   : > { %v3278_v36 = vpop.f32.mrf.mxu0 }
 0x2e9   : > { %v7519_v56 = vsel %vm7513_vm4, %v7518_v14, %v3518_v16  ;;  %v7522_v35 = vcvt.f32.s32 %v3519_v19  ;;  %v3424_v31 = vmax.f32 %v3392_v54, 0.0  ;;  %v2975_v25 = vadd.f32 %v2929_v21, %v2629_v13  ;;  %v8919_v3 = vpop.f32.mrf.mxu1  ;;  %v4080_v14 = vld [vmem:[#allocation2 + $0xa9] sm:$0xff] }
 0x2ea   : > { %3655 = vst [vmem:[#allocation2 + $0x168] sm:$0xff] %v7519_v56  ;;  %v7520_v47 = vand.u32 2147483647, %v3519_v19  ;;  %v7525_v61 = vand.u32 2147483648, %v3519_v19  ;;  %v8932_v54 = vpack.c.bf16 %v4315_v40, %v4314_v18 }
 0x2eb   : > { %v7523_v27 = vcvt.s32.f32 %v7522_v35  ;;  %4009 = vmatmul.bf16.gmra.mxu2 %v8899_v46  ;;  %4445 = vmatmul.bf16.gmra.mxu0 %v8917_v44  ;;  %v3456_v37 = vmax.f32 %v3424_v31, 0.0  ;;  %v3321_v5 = vadd.f32 %v3275_v24, %v2975_v25 }
 0x2ec   : > { %4211 = vmatmul.bf16.gmra.mxu3 %v4106_v7  ;;  %vm7521_vm5 = vcmp.lt.f32.partialorder %v7520_v47, 8388608.0 }
 0x2ed   : > { %v7524_v63 = vand.u32 2147483647, %v7523_v27  ;;  %v3488_v39 = vmin.f32 %v3456_v37, 1.0  ;;  %v3357_v15 = vmul.f32 %v8851_v32, %v3321_v5 }
 0x2ee   : > { %v2586_v16 = vpop.f32.mrf.mxu2 }
 0x2ef   : > { %v7526_v55 = vor.u32 %v7525_v61, %v7524_v63  ;;  %v2630_v62 = vadd.f32 %v2586_v16, %v8566_v38  ;;  %v2932_v9 = vpop.f32.mrf.mxu3  ;;  %v3520_v22 = vmul.f32 15.0, %v3488_v39  ;;  %v3393_v46 = vadd.f32 %v8857_v0, %v3357_v15 }
 0x2f0   : > { %v3280_v12 = vpop.f32.mrf.mxu0  ;;  %v2284_v38 = vadd.f32 %v8564_v29, %v8569_v10 }
 0x2f1   : > { %v7527_v43 = vsel %vm7521_vm5, %v7526_v55, %v3519_v19  ;;  %v2976_v53 = vadd.f32 %v2932_v9, %v2630_v62  ;;  %v7530_v24 = vcvt.f32.s32 %v3520_v22  ;;  %v3425_v30 = vmax.f32 %v3393_v46, 0.0  ;;  %v8926_v28 = vpop.f32.mrf.mxu1  ;;  %v4081_v19 = vld [vmem:[#allocation2 + $0xb1] sm:$0xff] }
 0x2f2   : > { %3656 = vst [vmem:[#allocation2 + $0x170] sm:$0xff] %v7527_v43  ;;  %v3774_v42 = vpack.c.bf16 %v7527_v43, %v7519_v56  ;;  %v7528_v8 = vand.u32 2147483647, %v3520_v22  ;;  %v7533_v51 = vand.u32 2147483648, %v3520_v22  ;;  %v4107_v56 = vpack.c.bf16 %v4081_v19, %v4080_v14  ;;  %v4082_v14 = vld [vmem:[#allocation2 + $0xc9] sm:$0xff]  ;;  %v4083_v19 = vld [vmem:[#allocation2 + $0xd1] sm:$0xff] }
 0x2f3   : > { %v3322_v34 = vadd.f32 %v3278_v36, %v2976_v53  ;;  %v7531_v6 = vcvt.s32.f32 %v7530_v24  ;;  %v3457_v45 = vmax.f32 %v3425_v30, 0.0 }
 0x2f4   : > { %3907 = vmatmul.bf16.gmra.mxu1 %v3774_v42  ;;  %vm7529_vm6 = vcmp.lt.f32.partialorder %v7528_v8, 8388608.0 }
 0x2f5   : > { %v3358_v33 = vmul.f32 %v8851_v32, %v3322_v34  ;;  %v7532_v49 = vand.u32 2147483647, %v7531_v6  ;;  %v3489_v59 = vmin.f32 %v3457_v45, 1.0  ;;  %v7296_v34 = vld [vmem:[%s9782_s2 + $0x108] sm:$0xff]  ;;  %v9799_v6 = vld [vmem:[#allocation7_spill] sm:$0xff]  ;;  %v9800_v45 = vld [vmem:[#allocation6_spill] sm:$0xff] }
 0x2f6   : > { %v2588_v26 = vpop.f32.mrf.mxu2  ;;  %4657 = vmatpush.bf16.msrb.mxu1 %v7296_v34 }
 0x2f7   : > { %v3394_v60 = vadd.f32 %v8857_v0, %v3358_v33  ;;  %v2631_v11 = vadd.f32 %v2588_v26, %v2284_v38  ;;  %v2934_v2 = vpop.f32.mrf.mxu3  ;;  %v7534_v13 = vor.u32 %v7533_v51, %v7532_v49  ;;  %v3521_v21 = vmul.f32 15.0, %v3489_v59  ;;  %v4317_v26 = vld [vmem:[#allocation2 + $0xef] sm:$0xff] }
 0x2f8   : > { %v3283_v20 = vpop.f32.mrf.mxu0  ;;  %v2286_v38 = vadd.f32 %v9800_v45, %v9799_v6 }
 0x2f9   : > { %v3426_v29 = vmax.f32 %v3394_v60, 0.0  ;;  %v2977_v10 = vadd.f32 %v2934_v2, %v2631_v11  ;;  %v7535_v36 = vsel %vm7529_vm6, %v7534_v13, %v3520_v22  ;;  %v7538_v58 = vcvt.f32.s32 %v3521_v21  ;;  %v8934_v35 = vpop.f32.mrf.mxu1 }
 0x2fa   : > { %3657 = vst [vmem:[#allocation2 + $0x188] sm:$0xff] %v7535_v36  ;;  %v7536_v27 = vand.u32 2147483647, %v3521_v21  ;;  %v7541_v63 = vand.u32 2147483648, %v3521_v21 }
 0x2fb   : > { %v3458_v31 = vmax.f32 %v3426_v29, 0.0  ;;  %v3323_v25 = vadd.f32 %v3280_v12, %v2977_v10  ;;  %4014 = vmatmul.bf16.gmra.mxu2 %v8917_v44  ;;  %4450 = vmatmul.bf16.gmra.mxu0 %v8932_v54  ;;  %v7539_v7 = vcvt.s32.f32 %v7538_v58 }
 0x2fc   : > { %4216 = vmatmul.bf16.gmra.mxu3 %v4107_v56  ;;  %vm7537_vm7 = vcmp.lt.f32.partialorder %v7536_v27, 8388608.0  ;;  %v4108_v56 = vpack.c.bf16 %v4083_v19, %v4082_v14 }
 0x2fd   : > { %v3490_v47 = vmin.f32 %v3458_v31, 1.0  ;;  %v3359_v37 = vmul.f32 %v8851_v32, %v3323_v25  ;;  %v7540_v5 = vand.u32 2147483647, %v7539_v7 }
 0x2fe   : > { %v2591_v61 = vpop.f32.mrf.mxu2 }
 0x2ff   : > { %v3522_v39 = vmul.f32 15.0, %v3490_v47  ;;  %v3395_v15 = vadd.f32 %v8857_v0, %v3359_v37  ;;  %v2632_v16 = vadd.f32 %v2591_v61, %v8580_v1  ;;  %v2937_v55 = vpop.f32.mrf.mxu3  ;;  %v7542_v62 = vor.u32 %v7541_v63, %v7540_v5 }
 0x300   : > { %v3285_v9 = vpop.f32.mrf.mxu0 }
 0x301   : > { %v7546_v44 = vcvt.f32.s32 %v3522_v39  ;;  %v3427_v22 = vmax.f32 %v3395_v15, 0.0  ;;  %v7543_v46 = vsel %vm7537_vm7, %v7542_v62, %v3521_v21  ;;  %v2978_v12 = vadd.f32 %v2937_v55, %v2632_v16  ;;  %v8941_v43 = vpop.f32.mrf.mxu1 }
 0x302   : > { %3658 = vst [vmem:[#allocation2 + $0x190] sm:$0xff] %v7543_v46  ;;  %v3775_v30 = vpack.c.bf16 %v7543_v46, %v7535_v36  ;;  %v7544_v42 = vand.u32 2147483647, %v3522_v39  ;;  %v7549_v33 = vand.u32 2147483648, %v3522_v39 }
 0x303   : > { %v7547_v53 = vcvt.s32.f32 %v7546_v44  ;;  %v3459_v24 = vmax.f32 %v3427_v22, 0.0  ;;  %v3324_v1 = vadd.f32 %v3283_v20, %v2978_v12  ;;  %v4316_v20 = vld [vmem:[#allocation2 + $0xe7] sm:$0xff] }
 0x304   : > { %3912 = vmatmul.bf16.gmra.mxu1 %v3775_v30  ;;  %vm7545_vm8 = vcmp.lt.f32.partialorder %v7544_v42, 8388608.0  ;;  %v8950_v10 = vpack.c.bf16 %v4317_v26, %v4316_v20 }
 0x305   : > { %v7548_v8 = vand.u32 2147483647, %v7547_v53  ;;  %v3491_v49 = vmin.f32 %v3459_v24, 1.0  ;;  %v3360_v51 = vmul.f32 %v8851_v32, %v3324_v1  ;;  %v9801_v1 = vld [vmem:[#allocation8_spill] sm:$0xff] }
 0x306   : > { %v2593_v59 = vpop.f32.mrf.mxu2 }
 0x307   : > { %v7550_v40 = vor.u32 %v7549_v33, %v7548_v8  ;;  %v3523_v60 = vmul.f32 15.0, %v3491_v49  ;;  %v2633_v11 = vadd.f32 %v2593_v59, %v2286_v38  ;;  %v2939_v2 = vpop.f32.mrf.mxu3  ;;  %v3396_v13 = vadd.f32 %v8857_v0, %v3360_v51  ;;  %v4319_v51 = vld [vmem:[#allocation2 + $0x10f] sm:$0xff] }
 0x308   : > { %v3288_v21 = vpop.f32.mrf.mxu0 }
 0x309   : > { %v7551_v18 = vsel %vm7545_vm8, %v7550_v40, %v3522_v39  ;;  %v7554_v29 = vcvt.f32.s32 %v3523_v60  ;;  %v3428_v36 = vmax.f32 %v3396_v13, 0.0  ;;  %v2979_v58 = vadd.f32 %v2939_v2, %v2633_v11  ;;  %v8952_v31 = vpop.f32.mrf.mxu1  ;;  %v4085_v11 = vld [vmem:[#allocation2 + $0xf1] sm:$0xff]  ;;  %v4318_v13 = vld [vmem:[#allocation2 + $0x107] sm:$0xff] }
 0x30a   : > { %3659 = vst [vmem:[#allocation2 + $0x1a8] sm:$0xff] %v7551_v18  ;;  %v7552_v7 = vand.u32 2147483647, %v3523_v60  ;;  %v7557_v5 = vand.u32 2147483648, %v3523_v60  ;;  %v8965_v20 = vpack.c.bf16 %v4319_v51, %v4318_v13  ;;  %v4086_v13 = vld [vmem:[#allocation2 + $0x109] sm:$0xff] }
 0x30b   : > { %v7555_v25 = vcvt.s32.f32 %v7554_v29  ;;  %4019 = vmatmul.bf16.gmra.mxu2 %v8932_v54  ;;  %4455 = vmatmul.bf16.gmra.mxu0 %v8950_v10  ;;  %v3460_v27 = vmax.f32 %v3428_v36, 0.0  ;;  %v3325_v47 = vadd.f32 %v3285_v9, %v2979_v58 }
 0x30c   : > { %4221 = vmatmul.bf16.gmra.mxu3 %v4108_v56  ;;  %vm7553_vm9 = vcmp.lt.f32.partialorder %v7552_v7, 8388608.0 }
 0x30d   : > { %v7556_v37 = vand.u32 2147483647, %v7555_v25  ;;  %v3492_v63 = vmin.f32 %v3460_v27, 1.0  ;;  %v3361_v61 = vmul.f32 %v8851_v32, %v3325_v47 }
 0x30e   : > { %v2596_v39 = vpop.f32.mrf.mxu2 }
 0x30f   : > { %v7558_v15 = vor.u32 %v7557_v5, %v7556_v37  ;;  %v2634_v16 = vadd.f32 %v2596_v39, %v8595_v23  ;;  %v2942_v55 = vpop.f32.mrf.mxu3  ;;  %v3524_v62 = vmul.f32 15.0, %v3492_v63  ;;  %v3397_v54 = vadd.f32 %v8857_v0, %v3361_v61 }
 0x310   : > { %v3290_v44 = vpop.f32.mrf.mxu0  ;;  %v2288_v23 = vadd.f32 %v9801_v1, %v8600_v50  ;;  %v7310_v1 = vld [vmem:[%s9782_s2 + $0x178] sm:$0xff] }
 0x311   : > { %v7559_v22 = vsel %vm7553_vm9, %v7558_v15, %v3523_v60  ;;  %v2980_v46 = vadd.f32 %v2942_v55, %v2634_v16  ;;  %v7562_v9 = vcvt.f32.s32 %v3524_v62  ;;  %v3429_v12 = vmax.f32 %v3397_v54, 0.0  ;;  %v8959_v53 = vpop.f32.mrf.mxu1  ;;  %v4084_v60 = vld [vmem:[#allocation2 + $0xe9] sm:$0xff]  ;;  %4885 = vmatpush.bf16.msra.mxu2 %v7310_v1 }
 0x312   : > { %3660 = vst [vmem:[#allocation2 + $0x1b0] sm:$0xff] %v7559_v22  ;;  %v3776_v30 = vpack.c.bf16 %v7559_v22, %v7551_v18  ;;  %v7560_v6 = vand.u32 2147483647, %v3524_v62  ;;  %v7565_v8 = vand.u32 2147483648, %v3524_v62  ;;  %v4109_v36 = vpack.c.bf16 %v4085_v11, %v4084_v60  ;;  %v9802_v16 = vld [vmem:[#allocation9_spill] sm:$0xff] }
 0x313   : > { %v3326_v24 = vadd.f32 %v3288_v21, %v2980_v46  ;;  %v7563_v34 = vcvt.s32.f32 %v7562_v9  ;;  %v3461_v42 = vmax.f32 %v3429_v12, 0.0 }
 0x314   : > { %3917 = vmatmul.bf16.gmra.mxu1 %v3776_v30  ;;  %vm7561_vm10 = vcmp.lt.f32.partialorder %v7560_v6, 8388608.0 }
 0x315   : > { %v3362_v45 = vmul.f32 %v8851_v32, %v3326_v24  ;;  %v7564_v38 = vand.u32 2147483647, %v7563_v34  ;;  %v3493_v33 = vmin.f32 %v3461_v42, 1.0  ;;  %v7295_v42 = vld [vmem:[%s9782_s2 + $0x100] sm:$0xff] }
 0x316   : > { %v2598_v49 = vpop.f32.mrf.mxu2  ;;  %4658 = vmatpush.bf16.msrb.mxu1 %v7295_v42 }
 0x317   : > { %v3398_v59 = vadd.f32 %v8857_v0, %v3362_v45  ;;  %v2635_v26 = vadd.f32 %v2598_v49, %v2288_v23  ;;  %v2944_v40 = vpop.f32.mrf.mxu3  ;;  %v7566_v2 = vor.u32 %v7565_v8, %v7564_v38  ;;  %v3525_v14 = vmul.f32 15.0, %v3493_v33  ;;  %v7318_v23 = vld [vmem:[%s9782_s2 + $0x1b8] sm:$0xff] }
 0x318   : > { %v3293_v19 = vpop.f32.mrf.mxu0  ;;  %v9803_v38 = vld [vmem:[#allocation10_spill] sm:$0xff]  ;;  %5120 = vmatpush.bf16.msra.mxu3 %v7318_v23 }
 0x319   : > { %v3430_v50 = vmax.f32 %v3398_v59, 0.0  ;;  %v2981_v21 = vadd.f32 %v2944_v40, %v2635_v26  ;;  %v7567_v18 = vsel %vm7561_vm10, %v7566_v2, %v3524_v62  ;;  %v7570_v29 = vcvt.f32.s32 %v3525_v14  ;;  %v8967_v58 = vpop.f32.mrf.mxu1  ;;  %v4321_v40 = vld [vmem:[#allocation2 + $0x12f] sm:$0xff] }
 0x31a   : > { %3661 = vst [vmem:[#allocation2 + $0x1c8] sm:$0xff] %v7567_v18  ;;  %v7568_v27 = vand.u32 2147483647, %v3525_v14  ;;  %v7573_v63 = vand.u32 2147483648, %v3525_v14  ;;  %v2290_v8 = vadd.f32 %v8867_v4, %v9803_v38 }
 0x31b   : > { %v3462_v56 = vmax.f32 %v3430_v50, 0.0  ;;  %v3327_v25 = vadd.f32 %v3290_v44, %v2981_v21  ;;  %4024 = vmatmul.bf16.gmra.mxu2 %v8950_v10  ;;  %4460 = vmatmul.bf16.gmra.mxu0 %v8965_v20  ;;  %v7571_v7 = vcvt.s32.f32 %v7570_v29  ;;  %v4320_v21 = vld [vmem:[#allocation2 + $0x127] sm:$0xff] }
 0x31c   : > { %4226 = vmatmul.bf16.gmra.mxu3 %v4109_v36  ;;  %vm7569_vm11 = vcmp.lt.f32.partialorder %v7568_v27, 8388608.0  ;;  %v4344_v36 = vpack.c.bf16 %v4321_v40, %v4320_v21  ;;  %v4089_v40 = vld [vmem:[#allocation2 + $0x131] sm:$0xff] }
 0x31d   : > { %v3494_v47 = vmin.f32 %v3462_v56, 1.0  ;;  %v3363_v37 = vmul.f32 %v8851_v32, %v3327_v25  ;;  %v7572_v5 = vand.u32 2147483647, %v7571_v7  ;;  %v7326_v56 = vld [vmem:[%s9782_s2 + $0x1f8] sm:$0xff] }
 0x31e   : > { %v2601_v61 = vpop.f32.mrf.mxu2  ;;  %5354 = vmatpush.bf16.msra.mxu0 %v7326_v56 }
 0x31f   : > { %v3526_v39 = vmul.f32 15.0, %v3494_v47  ;;  %v3399_v15 = vadd.f32 %v8857_v0, %v3363_v37  ;;  %v2636_v55 = vadd.f32 %v2601_v61, %v9802_v16  ;;  %v2947_v62 = vpop.f32.mrf.mxu3  ;;  %v7574_v54 = vor.u32 %v7573_v63, %v7572_v5 }
 0x320   : > { %v3295_v44 = vpop.f32.mrf.mxu0 }
 0x321   : > { %v7578_v10 = vcvt.f32.s32 %v3526_v39  ;;  %v3431_v22 = vmax.f32 %v3399_v15, 0.0  ;;  %v7575_v46 = vsel %vm7569_vm11, %v7574_v54, %v3525_v14  ;;  %v2982_v9 = vadd.f32 %v2947_v62, %v2636_v55  ;;  %v8974_v12 = vpop.f32.mrf.mxu1 }
 0x322   : > { %3662 = vst [vmem:[#allocation2 + $0x1d0] sm:$0xff] %v7575_v46  ;;  %v3777_v34 = vpack.c.bf16 %v7575_v46, %v7567_v18  ;;  %v7576_v6 = vand.u32 2147483647, %v3526_v39  ;;  %v7581_v49 = vand.u32 2147483648, %v3526_v39 }
 0x323   : > { %v7579_v24 = vcvt.s32.f32 %v7578_v10  ;;  %v3463_v30 = vmax.f32 %v3431_v22, 0.0  ;;  %v3328_v45 = vadd.f32 %v3293_v19, %v2982_v9  ;;  %v4087_v19 = vld [vmem:[#allocation2 + $0x111] sm:$0xff] }
 0x324   : > { %3922 = vmatmul.bf16.gmra.mxu1 %v3777_v34  ;;  %vm7577_vm12 = vcmp.lt.f32.partialorder %v7576_v6, 8388608.0  ;;  %v4110_v27 = vpack.c.bf16 %v4087_v19, %v4086_v13 }
 0x325   : > { %v7580_v33 = vand.u32 2147483647, %v7579_v24  ;;  %v3495_v51 = vmin.f32 %v3463_v30, 1.0  ;;  %v3364_v59 = vmul.f32 %v8851_v32, %v3328_v45 }
 0x326   : > { %v2603_v26 = vpop.f32.mrf.mxu2 }
 0x327   : > { %v7582_v60 = vor.u32 %v7581_v49, %v7580_v33  ;;  %v3527_v11 = vmul.f32 15.0, %v3495_v51  ;;  %v2637_v2 = vadd.f32 %v2603_v26, %v2290_v8  ;;  %v2949_v14 = vpop.f32.mrf.mxu3  ;;  %v3400_v4 = vadd.f32 %v8857_v0, %v3364_v59  ;;  %v4088_v26 = vld [vmem:[#allocation2 + $0x129] sm:$0xff] }
 0x328   : > { %v4426_v50 = vpop.f32.mrf.mxu0  ;;  %v4111_v21 = vpack.c.bf16 %v4089_v40, %v4088_v26  ;;  %v4540_v40 = vld [vmem:[#allocation2 + $0x48] sm:$0xff] }
 0x329   : > { %v7583_v18 = vsel %vm7577_vm12, %v7582_v60, %v3526_v39  ;;  %v7586_v29 = vcvt.f32.s32 %v3527_v11  ;;  %v3432_v25 = vmax.f32 %v3400_v4, 0.0  ;;  %v2983_v7 = vadd.f32 %v2949_v14, %v2637_v2  ;;  %v8992_v47 = vpop.f32.mrf.mxu1  ;;  %v7334_v39 = vld [vmem:[%s9782_s2 + $0x238] sm:$0xff]  ;;  %v4322_v14 = vld [vmem:[#allocation2 + $0x147] sm:$0xff] }
 0x32a   : > { %3663 = vst [vmem:[#allocation2 + $0x1e8] sm:$0xff] %v7583_v18  ;;  %v7584_v5 = vand.u32 2147483647, %v3527_v11  ;;  %v7589_v16 = vand.u32 2147483648, %v3527_v11  ;;  %5588 = vmatpush.bf16.msra.mxu1 %v7334_v39  ;;  %v4539_v39 = vld [vmem:[#allocation2 + $0x30] sm:$0xff] }
 0x32b   : > { %v7587_v37 = vcvt.s32.f32 %v7586_v29  ;;  %4029 = vmatmul.bf16.gmra.mxu2 %v8965_v20  ;;  %4465 = vmatmul.bf16.gmra.mxu0 %v4344_v36  ;;  %v3464_v63 = vmax.f32 %v3432_v25, 0.0  ;;  %v3329_v61 = vadd.f32 %v3295_v44, %v2983_v7 }
 0x32c   : > { %4231 = vmatmul.bf16.gmra.mxu3 %v4110_v27  ;;  %vm7585_vm13 = vcmp.lt.f32.partialorder %v7584_v5, 8388608.0 }
 0x32d   : > { %v7588_v15 = vand.u32 2147483647, %v7587_v37  ;;  %v3496_v55 = vmin.f32 %v3464_v63, 1.0  ;;  %v3365_v62 = vmul.f32 %v8851_v32, %v3329_v61 }
 0x32e   : > { %v3990_v54 = vpop.f32.mrf.mxu2 }
 0x32f   : > { %v7590_v10 = vor.u32 %v7589_v16, %v7588_v15  ;;  %v3991_v20 = vadd.f32 %v3990_v54, %v8875_v41  ;;  %v4192_v22 = vpop.f32.mrf.mxu3  ;;  %v3528_v46 = vmul.f32 15.0, %v3496_v55  ;;  %v3401_v44 = vadd.f32 %v8857_v0, %v3365_v62  ;;  %v4323_v0 = vld [vmem:[#allocation2 + $0x14f] sm:$0xff] }
 0x330   : > { %v4428_v9 = vpop.f32.mrf.mxu0  ;;  %v4345_v19 = vpack.c.bf16 %v4323_v0, %v4322_v14  ;;  %v7317_v16 = vld [vmem:[%s9782_s2 + $0x1b0] sm:$0xff]  ;;  %v4538_v54 = vld [vmem:[#allocation2 + $0x28] sm:$0xff] }
 0x331   : > { %v7591_v24 = vsel %vm7585_vm13, %v7590_v10, %v3527_v11  ;;  %v4272_v30 = vadd.f32 %v4192_v22, %v3991_v20  ;;  %v7594_v34 = vcvt.f32.s32 %v3528_v46  ;;  %v3433_v42 = vmax.f32 %v3401_v44, 0.0  ;;  %v9001_v1 = vpop.f32.mrf.mxu1  ;;  %5121 = vmatpush.bf16.msra.mxu3 %v7317_v16  ;;  %v4325_v22 = vld [vmem:[#allocation2 + $0x16f] sm:$0xff] }
 0x332   : > { %3664 = vst [vmem:[#allocation2 + $0x1f0] sm:$0xff] %v7591_v24  ;;  %v3778_v23 = vpack.c.bf16 %v7591_v24, %v7583_v18  ;;  %v7592_v38 = vand.u32 2147483647, %v3528_v46  ;;  %v7597_v8 = vand.u32 2147483648, %v3528_v46  ;;  %v4091_v24 = vld [vmem:[#allocation2 + $0x151] sm:$0xff] }
 0x333   : > { %v9003_v32 = vadd.f32 %v4426_v50, %v4272_v30  ;;  %v7595_v6 = vcvt.s32.f32 %v7594_v34  ;;  %v3465_v45 = vmax.f32 %v3433_v42, 0.0  ;;  %v4324_v34 = vld [vmem:[#allocation2 + $0x167] sm:$0xff]  ;;  %v4327_v14 = vld [vmem:[#allocation2 + $0x18f] sm:$0xff] }
 0x334   : > { %3927 = vmatmul.bf16.gmra.mxu1 %v3778_v23  ;;  %vm7593_vm14 = vcmp.lt.f32.partialorder %v7592_v38, 8388608.0  ;;  %v4346_v23 = vpack.c.bf16 %v4325_v22, %v4324_v34 }
 0x335   : > { %v7596_v41 = vand.u32 2147483647, %v7595_v6  ;;  %v3497_v33 = vmin.f32 %v3465_v45, 1.0  ;;  %v7325_v6 = vld [vmem:[%s9782_s2 + $0x1f0] sm:$0xff] }
 0x336   : > { %v3992_v49 = vpop.f32.mrf.mxu2  ;;  %5355 = vmatpush.bf16.msra.mxu0 %v7325_v6 }
 0x337   : > { %v3993_v51 = vadd.f32 %v3992_v49, %v8886_v17  ;;  %v4194_v59 = vpop.f32.mrf.mxu3  ;;  %v7598_v60 = vor.u32 %v7597_v8, %v7596_v41  ;;  %v3529_v11 = vmul.f32 15.0, %v3497_v33 }
 0x338   : > { %v4431_v2 = vpop.f32.mrf.mxu0 }
 0x339   : > { %v4273_v13 = vadd.f32 %v4194_v59, %v3993_v51  ;;  %v7599_v4 = vsel %vm7593_vm14, %v7598_v60, %v3528_v46  ;;  %v7602_v50 = vcvt.f32.s32 %v3529_v11  ;;  %v9006_v18 = vpop.f32.mrf.mxu1  ;;  %v7600_v56 = vand.u32 2147483647, %v3529_v11  ;;  %v4541_v51 = vld [vmem:[#allocation2 + $0x50] sm:$0xff] }
 0x33a   : > { %3665 = vst [vmem:[#allocation2 + $0x208] sm:$0xff] %v7599_v4  ;;  %v7605_v7 = vand.u32 2147483648, %v3529_v11  ;;  %v9035_v60 = vpack.c.bf16 %v4541_v51, %v4540_v40  ;;  %v4092_v4 = vld [vmem:[#allocation2 + $0x169] sm:$0xff] }
 0x33b   : > { %4034 = vmatmul.bf16.gmra.mxu2 %v4344_v36  ;;  %4470 = vmatmul.bf16.gmra.mxu0 %v4345_v19  ;;  %v9008_v29 = vadd.f32 %v4428_v9, %v4273_v13  ;;  %v7603_v17 = vcvt.s32.f32 %v7602_v50  ;;  %vm7601_vm15 = vcmp.lt.f32.partialorder %v7600_v56, 8388608.0  ;;  %v7309_v36 = vld [vmem:[%s9782_s2 + $0x170] sm:$0xff] }
 0x33c   : > { %4236 = vmatmul.bf16.gmra.mxu3 %v4111_v21  ;;  %4886 = vmatpush.bf16.msra.mxu2 %v7309_v36  ;;  %v4090_v9 = vld [vmem:[#allocation2 + $0x149] sm:$0xff] }
 0x33d   : > { %v7604_v25 = vand.u32 2147483647, %v7603_v17  ;;  %v4112_v45 = vpack.c.bf16 %v4091_v24, %v4090_v9  ;;  %v4326_v21 = vld [vmem:[#allocation2 + $0x187] sm:$0xff]  ;;  %v4095_v9 = vld [vmem:[#allocation2 + $0x191] sm:$0xff] }
 0x33e   : > { %v3995_v27 = vpop.f32.mrf.mxu2  ;;  %v4347_v56 = vpack.c.bf16 %v4327_v14, %v4326_v21  ;;  %v7316_v36 = vld [vmem:[%s9782_s2 + $0x1a8] sm:$0xff]  ;;  %v4545_v51 = vld [vmem:[#allocation2 + $0x90] sm:$0xff] }
 0x33f   : > { %v3996_v37 = vadd.f32 %v3995_v27, %v8893_v57  ;;  %v4197_v5 = vpop.f32.mrf.mxu3  ;;  %v7606_v63 = vor.u32 %v7605_v7, %v7604_v25  ;;  %v4570_v57 = vpack.c.bf16 %v4539_v39, %v4538_v54  ;;  %5122 = vmatpush.bf16.msra.mxu3 %v7316_v36  ;;  %v4096_v21 = vld [vmem:[#allocation2 + $0x1a9] sm:$0xff]  ;;  %v7314_v36 = vld [vmem:[%s9782_s2 + $0x198] sm:$0xff] }
 0x340   : > { %v4433_v61 = vpop.f32.mrf.mxu0 }
 0x341   : > { %v4274_v15 = vadd.f32 %v4197_v5, %v3996_v37  ;;  %v7607_v55 = vsel %vm7601_vm15, %v7606_v63, %v3529_v11  ;;  %v9017_v62 = vpop.f32.mrf.mxu1 }
 0x342   : > { %3666 = vst [vmem:[#allocation2 + $0x210] sm:$0xff] %v7607_v55  ;;  %v4542_v55 = vld [vmem:[#allocation2 + $0x68] sm:$0xff] }
 0x343   : > { %v9019_v10 = vadd.f32 %v4431_v2, %v4274_v15  ;;  %v7308_v15 = vld [vmem:[%s9782_s2 + $0x168] sm:$0xff] }
 0x344   : > { %4659 = vmatmul.bf16.vlgmr.msrb.gmra.mxu1 %v4570_v57  ;;  %4887 = vmatpush.bf16.msra.mxu2 %v7308_v15  ;;  %v7306_v15 = vld [vmem:[%s9782_s2 + $0x158] sm:$0xff] }
 0x346   : > { %v3997_v20 = vpop.f32.mrf.mxu2 }
 0x347   : > { %v3998_v46 = vadd.f32 %v3997_v20, %v8901_v48  ;;  %v4199_v44 = vpop.f32.mrf.mxu3  ;;  %v7333_v48 = vld [vmem:[%s9782_s2 + $0x230] sm:$0xff] }
 0x348   : > { %v4436_v30 = vpop.f32.mrf.mxu0  ;;  %5589 = vmatpush.bf16.msra.mxu1 %v7333_v48  ;;  %v4329_v20 = vld [vmem:[#allocation2 + $0x1af] sm:$0xff] }
 0x349   : > { %v4275_v42 = vadd.f32 %v4199_v44, %v3998_v46  ;;  %v9025_v38 = vpop.f32.mrf.mxu1  ;;  %v4094_v44 = vld [vmem:[#allocation2 + $0x189] sm:$0xff] }
 0x34a   : > { %v4114_v6 = vpack.c.bf16 %v4095_v9, %v4094_v44  ;;  %v4547_v44 = vld [vmem:[#allocation2 + $0xb0] sm:$0xff] }
 0x34b   : > { %4039 = vmatmul.bf16.gmra.mxu2 %v4345_v19  ;;  %4475 = vmatmul.bf16.gmra.mxu0 %v4346_v23  ;;  %v9027_v41 = vadd.f32 %v4433_v61, %v4275_v42  ;;  %v4543_v61 = vld [vmem:[#allocation2 + $0x70] sm:$0xff] }
 0x34c   : > { %4241 = vmatmul.bf16.gmra.mxu3 %v4112_v45  ;;  %v9054_v54 = vpack.c.bf16 %v4543_v61, %v4542_v55  ;;  %v7322_v55 = vld [vmem:[%s9782_s2 + $0x1d8] sm:$0xff] }
 0x34e   : > { %v4000_v8 = vpop.f32.mrf.mxu2 }
 0x34f   : > { %v4001_v33 = vadd.f32 %v4000_v8, %v8908_v52  ;;  %v4202_v49 = vpop.f32.mrf.mxu3  ;;  %v4093_v52 = vld [vmem:[#allocation2 + $0x171] sm:$0xff] }
 0x350   : > { %v4438_v0 = vpop.f32.mrf.mxu0  ;;  %v4113_v25 = vpack.c.bf16 %v4093_v52, %v4092_v4  ;;  %v4331_v4 = vld [vmem:[#allocation2 + $0x1cf] sm:$0xff] }
 0x351   : > { %v4276_v59 = vadd.f32 %v4202_v49, %v4001_v33  ;;  %v9033_v26 = vpop.f32.mrf.mxu1 }
 0x353   : > { %v9037_v11 = vadd.f32 %v4436_v30, %v4276_v59  ;;  %v4328_v30 = vld [vmem:[#allocation2 + $0x1a7] sm:$0xff] }
 0x354   : > { %4664 = vmatmul.bf16.gmra.mxu1 %v9035_v60  ;;  %v4348_v42 = vpack.c.bf16 %v4329_v20, %v4328_v30  ;;  %v7313_v30 = vld [vmem:[%s9782_s2 + $0x190] sm:$0xff] }
 0x356   : > { %v4002_v2 = vpop.f32.mrf.mxu2 }
 0x357   : > { %v4003_v13 = vadd.f32 %v4002_v2, %v8919_v3  ;;  %v4204_v19 = vpop.f32.mrf.mxu3  ;;  %v4544_v2 = vld [vmem:[#allocation2 + $0x88] sm:$0xff] }
 0x358   : > { %v4441_v50 = vpop.f32.mrf.mxu0  ;;  %v9073_v14 = vpack.c.bf16 %v4545_v51, %v4544_v2  ;;  %v4098_v2 = vld [vmem:[#allocation2 + $0x1c9] sm:$0xff] }
 0x359   : > { %v4277_v17 = vadd.f32 %v4204_v19, %v4003_v13  ;;  %v9041_v7 = vpop.f32.mrf.mxu1 }
 0x35b   : > { %4044 = vmatmul.bf16.gmra.mxu2 %v4346_v23  ;;  %4480 = vmatmul.bf16.gmra.mxu0 %v4347_v56  ;;  %v9043_v27 = vadd.f32 %v4438_v0, %v4277_v17  ;;  %v7324_v23 = vld [vmem:[%s9782_s2 + $0x1e8] sm:$0xff] }
 0x35c   : > { %4246 = vmatmul.bf16.gmra.mxu3 %v4113_v25  ;;  %5356 = vmatpush.bf16.msra.mxu0 %v7324_v23 }
 0x35e   : > { %v4005_v37 = vpop.f32.mrf.mxu2 }
 0x35f   : > { %v4006_v5 = vadd.f32 %v4005_v37, %v8926_v28  ;;  %v4207_v63 = vpop.f32.mrf.mxu3 }
 0x360   : > { %v4443_v3 = vpop.f32.mrf.mxu0 }
 0x361   : > { %v4278_v39 = vadd.f32 %v4207_v63, %v4006_v5  ;;  %v9052_v16 = vpop.f32.mrf.mxu1  ;;  %v7307_v5 = vld [vmem:[%s9782_s2 + $0x160] sm:$0xff] }
 0x362   : > { %v7315_v63 = vld [vmem:[%s9782_s2 + $0x1a0] sm:$0xff]  ;;  %4888 = vmatpush.bf16.msra.mxu2 %v7307_v5 }
 0x363   : > { %v9056_v28 = vadd.f32 %v4441_v50, %v4278_v39  ;;  %5123 = vmatpush.bf16.msra.mxu3 %v7315_v63  ;;  %v7331_v63 = vld [vmem:[%s9782_s2 + $0x220] sm:$0xff] }
 0x364   : > { %4669 = vmatmul.bf16.gmra.mxu1 %v9054_v54 }
 0x366   : > { %v4007_v57 = vpop.f32.mrf.mxu2  ;;  %4889 = vmatpush.bf16.msra.mxu2 %v7306_v15 }
 0x367   : > { %v4008_v22 = vadd.f32 %v4007_v57, %v8934_v35  ;;  %v4209_v46 = vpop.f32.mrf.mxu3  ;;  %v7332_v35 = vld [vmem:[%s9782_s2 + $0x228] sm:$0xff]  ;;  %5124 = vmatpush.bf16.msra.mxu3 %v7314_v36 }
 0x368   : > { %v4446_v24 = vpop.f32.mrf.mxu0  ;;  %5590 = vmatpush.bf16.msra.mxu1 %v7332_v35  ;;  %v7304_v35 = vld [vmem:[%s9782_s2 + $0x148] sm:$0xff] }
 0x369   : > { %v4279_v34 = vadd.f32 %v4209_v46, %v4008_v22  ;;  %v9063_v45 = vpop.f32.mrf.mxu1 }
 0x36b   : > { %4049 = vmatmul.bf16.gmra.mxu2 %v4347_v56  ;;  %4485 = vmatmul.bf16.gmra.mxu0 %v4348_v42  ;;  %v9065_v48 = vadd.f32 %v4443_v3, %v4279_v34  ;;  %v4330_v56 = vld [vmem:[#allocation2 + $0x1c7] sm:$0xff] }
 0x36c   : > { %4251 = vmatmul.bf16.gmra.mxu3 %v4114_v6  ;;  %v4349_v37 = vpack.c.bf16 %v4331_v4, %v4330_v56  ;;  %v7323_v3 = vld [vmem:[%s9782_s2 + $0x1e0] sm:$0xff]  ;;  %5591 = vmatpush.bf16.msra.mxu1 %v7331_v63  ;;  %v4773_v63 = vld [vmem:[#allocation2 + $0x31] sm:$0xff] }
 0x36d   : > { %5357 = vmatpush.bf16.msra.mxu0 %v7323_v3  ;;  %5125 = vmatpush.bf16.msra.mxu3 %v7313_v30 }
 0x36e   : > { %v4010_v8 = vpop.f32.mrf.mxu2 }
 0x36f   : > { %v4011_v33 = vadd.f32 %v4010_v8, %v8941_v43  ;;  %v4212_v49 = vpop.f32.mrf.mxu3  ;;  %v4097_v43 = vld [vmem:[#allocation2 + $0x1b1] sm:$0xff]  ;;  %v7312_v8 = vld [vmem:[%s9782_s2 + $0x188] sm:$0xff] }
 0x370   : > { %v4448_v0 = vpop.f32.mrf.mxu0 }
 0x371   : > { %v4280_v59 = vadd.f32 %v4212_v49, %v4011_v33  ;;  %v9071_v40 = vpop.f32.mrf.mxu1  ;;  %5358 = vmatpush.bf16.msra.mxu0 %v7322_v55  ;;  %v4333_v49 = vld [vmem:[#allocation2 + $0x1ef] sm:$0xff]  ;;  %5126 = vmatpush.bf16.msra.mxu3 %v7312_v8 }
 0x372   : > { %v4549_v55 = vld [vmem:[#allocation2 + $0xd0] sm:$0xff] }
 0x373   : > { %v9075_v13 = vadd.f32 %v4446_v24, %v4280_v59  ;;  %v7305_v24 = vld [vmem:[%s9782_s2 + $0x150] sm:$0xff] }
 0x374   : > { %4674 = vmatmul.bf16.gmra.mxu1 %v9073_v14  ;;  %4890 = vmatpush.bf16.msra.mxu2 %v7305_v24 }
 0x376   : > { %v4012_v19 = vpop.f32.mrf.mxu2 }
 0x377   : > { %v4013_v52 = vadd.f32 %v4012_v19, %v8952_v31  ;;  %v4214_v50 = vpop.f32.mrf.mxu3  ;;  %v4115_v31 = vpack.c.bf16 %v4097_v43, %v4096_v21  ;;  %v4099_v19 = vld [vmem:[#allocation2 + $0x1d1] sm:$0xff]  ;;  %v7303_v43 = vld [vmem:[%s9782_s2 + $0x140] sm:$0xff] }
 0x378   : > { %v4451_v17 = vpop.f32.mrf.mxu0  ;;  %4891 = vmatpush.bf16.msra.mxu2 %v7304_v35  ;;  %v4116_v56 = vpack.c.bf16 %v4099_v19, %v4098_v2  ;;  %v4334_v35 = vld [vmem:[#allocation2 + $0x207] sm:$0xff] }
 0x379   : > { %v4281_v25 = vadd.f32 %v4214_v50, %v4013_v52  ;;  %v9088_v61 = vpop.f32.mrf.mxu1  ;;  %v4332_v52 = vld [vmem:[#allocation2 + $0x1e7] sm:$0xff] }
 0x37a   : > { %v4350_v21 = vpack.c.bf16 %v4333_v49, %v4332_v52 }
 0x37b   : > { %4054 = vmatmul.bf16.gmra.mxu2 %v4348_v42  ;;  %4490 = vmatmul.bf16.gmra.mxu0 %v4349_v37  ;;  %v9090_v39 = vadd.f32 %v4448_v0, %v4281_v25  ;;  %v4546_v42 = vld [vmem:[#allocation2 + $0xa8] sm:$0xff] }
 0x37c   : > { %4256 = vmatmul.bf16.gmra.mxu3 %v4115_v31  ;;  %v9113_v23 = vpack.c.bf16 %v4547_v44, %v4546_v42  ;;  %v7320_v0 = vld [vmem:[%s9782_s2 + $0x1c8] sm:$0xff]  ;;  %4892 = vmatpush.bf16.msra.mxu2 %v7303_v43 }
 0x37d   : > { %v4100_v42 = vld [vmem:[#allocation2 + $0x1e9] sm:$0xff] }
 0x37e   : > { %v4015_v57 = vpop.f32.mrf.mxu2  ;;  %v4550_v43 = vld [vmem:[#allocation2 + $0xe8] sm:$0xff] }
 0x37f   : > { %v4016_v20 = vadd.f32 %v4015_v57, %v8959_v53  ;;  %v4217_v22 = vpop.f32.mrf.mxu3  ;;  %v7321_v53 = vld [vmem:[%s9782_s2 + $0x1d0] sm:$0xff] }
 0x380   : > { %v4453_v46 = vpop.f32.mrf.mxu0  ;;  %5359 = vmatpush.bf16.msra.mxu0 %v7321_v53 }
 0x381   : > { %v4282_v9 = vadd.f32 %v4217_v22, %v4016_v20  ;;  %v9108_v34 = vpop.f32.mrf.mxu1  ;;  %v4548_v20 = vld [vmem:[#allocation2 + $0xc8] sm:$0xff] }
 0x382   : > { %v9147_v22 = vpack.c.bf16 %v4549_v55, %v4548_v20 }
 0x383   : > { %v9115_v6 = vadd.f32 %v4451_v17, %v4282_v9  ;;  %v7311_v17 = vld [vmem:[%s9782_s2 + $0x180] sm:$0xff]  ;;  %v4335_v9 = vld [vmem:[#allocation2 + $0x20f] sm:$0xff] }
 0x384   : > { %4679 = vmatmul.bf16.gmra.mxu1 %v9113_v23  ;;  %5360 = vmatpush.bf16.msra.mxu0 %v7320_v0 }
 0x385   : > { %5127 = vmatpush.bf16.msra.mxu3 %v7311_v17 }
 0x386   : > { %v4017_v33 = vpop.f32.mrf.mxu2 }
 0x387   : > { %v4018_v51 = vadd.f32 %v4017_v33, %v8967_v58  ;;  %v4219_v59 = vpop.f32.mrf.mxu3  ;;  %v7319_v58 = vld [vmem:[%s9782_s2 + $0x1c0] sm:$0xff]  ;;  %v4351_v33 = vpack.c.bf16 %v4335_v9, %v4334_v35 }
 0x388   : > { %v4456_v4 = vpop.f32.mrf.mxu0  ;;  %5361 = vmatpush.bf16.msra.mxu0 %v7319_v58  ;;  %v4772_v58 = vld [vmem:[#allocation2 + $0x29] sm:$0xff] }
 0x389   : > { %v4283_v50 = vadd.f32 %v4219_v59, %v4018_v51  ;;  %v9134_v25 = vpop.f32.mrf.mxu1  ;;  %v4804_v55 = vpack.c.bf16 %v4773_v63, %v4772_v58  ;;  %v5009_v58 = vld [vmem:[#allocation2 + $0x67] sm:$0xff] }
 0x38b   : > { %4059 = vmatmul.bf16.gmra.mxu2 %v4349_v37  ;;  %4495 = vmatmul.bf16.gmra.mxu0 %v4350_v21  ;;  %v9139_v5 = vadd.f32 %v4453_v46, %v4283_v50 }
 0x38c   : > { %4261 = vmatmul.bf16.gmra.mxu3 %v4116_v56 }
 0x38e   : > { %v4020_v3 = vpop.f32.mrf.mxu2 }
 0x38f   : > { %v4021_v31 = vadd.f32 %v4020_v3, %v8974_v12  ;;  %v4222_v15 = vpop.f32.mrf.mxu3  ;;  %v4101_v12 = vld [vmem:[#allocation2 + $0x1f1] sm:$0xff] }
 0x390   : > { %v4458_v36 = vpop.f32.mrf.mxu0  ;;  %v4117_v49 = vpack.c.bf16 %v4101_v12, %v4100_v42 }
 0x391   : > { %v4284_v57 = vadd.f32 %v4222_v15, %v4021_v31  ;;  %v9145_v37 = vpop.f32.mrf.mxu1 }
 0x393   : > { %v9149_v46 = vadd.f32 %v4456_v4, %v4284_v57  ;;  %v4551_v4 = vld [vmem:[#allocation2 + $0xf0] sm:$0xff]  ;;  %v5007_v57 = vld [vmem:[#allocation2 + $0x47] sm:$0xff] }
 0x394   : > { %4684 = vmatmul.bf16.gmra.mxu1 %v9147_v22  ;;  %v9160_v17 = vpack.c.bf16 %v4551_v4, %v4550_v43 }
 0x396   : > { %v4022_v44 = vpop.f32.mrf.mxu2 }
 0x397   : > { %v4023_v24 = vadd.f32 %v4022_v44, %v8992_v47  ;;  %v4224_v30 = vpop.f32.mrf.mxu3 }
 0x398   : > { %v4461_v53 = vpop.f32.mrf.mxu0 }
 0x399   : > { %v4285_v8 = vadd.f32 %v4224_v30, %v4023_v24  ;;  %v9153_v0 = vpop.f32.mrf.mxu1  ;;  %v7330_v24 = vld [vmem:[%s9782_s2 + $0x218] sm:$0xff] }
 0x39a   : > { %5592 = vmatpush.bf16.msra.mxu1 %v7330_v24  ;;  %v4554_v24 = vld [vmem:[#allocation2 + $0x128] sm:$0xff] }
 0x39b   : > { %4064 = vmatmul.bf16.gmra.mxu2 %v4350_v21  ;;  %4500 = vmatmul.bf16.gmra.mxu0 %v4351_v33  ;;  %v9155_v51 = vadd.f32 %v4458_v36, %v4285_v8  ;;  %v4552_v33 = vld [vmem:[#allocation2 + $0x108] sm:$0xff] }
 0x39c   : > { %4266 = vmatmul.bf16.gmra.mxu3 %v4117_v49 }
 0x39e   : > { %v4025_v59 = vpop.f32.mrf.mxu2 }
 0x39f   : > { %v4026_v2 = vadd.f32 %v4025_v59, %v9001_v1  ;;  %v4227_v19 = vpop.f32.mrf.mxu3  ;;  %v5008_v1 = vld [vmem:[#allocation2 + $0x4f] sm:$0xff] }
 0x3a0   : > { %v4463_v47 = vpop.f32.mrf.mxu0  ;;  %v5039_v20 = vpack.c.bf16 %v5008_v1, %v5007_v57 }
 0x3a1   : > { %v4286_v52 = vadd.f32 %v4227_v19, %v4026_v2  ;;  %v9158_v50 = vpop.f32.mrf.mxu1  ;;  %v4774_v2 = vld [vmem:[#allocation2 + $0x49] sm:$0xff]  ;;  %v4775_v19 = vld [vmem:[#allocation2 + $0x51] sm:$0xff] }
 0x3a3   : > { %v9162_v56 = vadd.f32 %v4461_v53, %v4286_v52  ;;  %v4553_v53 = vld [vmem:[#allocation2 + $0x110] sm:$0xff] }
 0x3a4   : > { %4689 = vmatmul.bf16.gmra.mxu1 %v9160_v17  ;;  %v9177_v49 = vpack.c.bf16 %v4553_v53, %v4552_v33  ;;  %v4777_v53 = vld [vmem:[#allocation2 + $0x71] sm:$0xff] }
 0x3a5   : > { %v5012_v33 = vld [vmem:[#allocation2 + $0x8f] sm:$0xff] }
 0x3a6   : > { %v4027_v21 = vpop.f32.mrf.mxu2 }
 0x3a7   : > { %v4028_v3 = vadd.f32 %v4027_v21, %v9006_v18  ;;  %v4229_v31 = vpop.f32.mrf.mxu3  ;;  %v9183_v21 = vpack.c.bf16 %v4775_v19, %v4774_v2 }
 0x3a8   : > { %v4466_v15 = vpop.f32.mrf.mxu0 }
 0x3a9   : > { %v4287_v36 = vadd.f32 %v4229_v31, %v4028_v3  ;;  %v9166_v44 = vpop.f32.mrf.mxu1 }
 0x3ab   : > { %4893 = vmatmul.bf16.vlgmr.msra.gmra.mxu2 %v4804_v55  ;;  %5362 = vmatmul.bf16.vlgmr.msra.gmra.mxu0 %v9035_v60  ;;  %v9169_v9 = vadd.f32 %v4463_v47, %v4287_v36  ;;  %v4555_v55 = vld [vmem:[#allocation2 + $0x130] sm:$0xff] }
 0x3ac   : > { %5128 = vmatmul.bf16.vlgmr.msra.gmra.mxu3 %v5039_v20 }
 0x3ae   : > { %v4030_v18 = vpop.f32.mrf.mxu2 }
 0x3af   : > { %v4031_v30 = vadd.f32 %v4030_v18, %v9017_v62  ;;  %v4232_v42 = vpop.f32.mrf.mxu3  ;;  %v5010_v62 = vld [vmem:[#allocation2 + $0x6f] sm:$0xff] }
 0x3b0   : > { %v4468_v12 = vpop.f32.mrf.mxu0  ;;  %v5040_v63 = vpack.c.bf16 %v5010_v62, %v5009_v58 }
 0x3b1   : > { %v4288_v35 = vadd.f32 %v4232_v42, %v4031_v30  ;;  %v9175_v8 = vpop.f32.mrf.mxu1  ;;  %v9195_v30 = vpack.c.bf16 %v4555_v55, %v4554_v24  ;;  %v4778_v24 = vld [vmem:[#allocation2 + $0x89] sm:$0xff] }
 0x3b3   : > { %v9179_v60 = vadd.f32 %v4466_v15, %v4288_v35 }
 0x3b4   : > { %4694 = vmatmul.bf16.gmra.mxu1 %v9177_v49 }
 0x3b6   : > { %v4032_v59 = vpop.f32.mrf.mxu2 }
 0x3b7   : > { %v4033_v47 = vadd.f32 %v4032_v59, %v9025_v38  ;;  %v4234_v4 = vpop.f32.mrf.mxu3 }
 0x3b8   : > { %v4471_v52 = vpop.f32.mrf.mxu0 }
 0x3b9   : > { %v4289_v43 = vadd.f32 %v4234_v4, %v4033_v47  ;;  %v9185_v3 = vpop.f32.mrf.mxu1  ;;  %v5011_v47 = vld [vmem:[#allocation2 + $0x87] sm:$0xff] }
 0x3bb   : > { %4898 = vmatmul.bf16.gmra.mxu2 %v9183_v21  ;;  %5367 = vmatmul.bf16.gmra.mxu0 %v9054_v54  ;;  %v9189_v31 = vadd.f32 %v4468_v12, %v4289_v43  ;;  %v4776_v12 = vld [vmem:[#allocation2 + $0x69] sm:$0xff] }
 0x3bc   : > { %5133 = vmatmul.bf16.gmra.mxu3 %v5040_v63  ;;  %v9201_v19 = vpack.c.bf16 %v4777_v53, %v4776_v12  ;;  %v5014_v53 = vld [vmem:[#allocation2 + $0xaf] sm:$0xff] }
 0x3be   : > { %v4035_v1 = vpop.f32.mrf.mxu2 }
 0x3bf   : > { %v4036_v38 = vadd.f32 %v4035_v1, %v9033_v26  ;;  %v4237_v15 = vpop.f32.mrf.mxu3 }
 0x3c0   : > { %v4473_v36 = vpop.f32.mrf.mxu0 }
 0x3c1   : > { %v4290_v57 = vadd.f32 %v4237_v15, %v4036_v38  ;;  %v4660_v20 = vpop.f32.mrf.mxu1  ;;  %v4557_v38 = vld [vmem:[#allocation2 + $0x150] sm:$0xff] }
 0x3c2   : > { %v9193_v18 = vadd.f32 %v4660_v20, %v9003_v32  ;;  %v5041_v32 = vpack.c.bf16 %v5012_v33, %v5011_v47 }
 0x3c3   : > { %v9197_v42 = vadd.f32 %v4471_v52, %v4290_v57 }
 0x3c4   : > { %4699 = vmatmul.bf16.gmra.mxu1 %v9195_v30 }
 0x3c6   : > { %v4037_v54 = vpop.f32.mrf.mxu2 }
 0x3c7   : > { %v4038_v26 = vadd.f32 %v4037_v54, %v9041_v7  ;;  %v4239_v35 = vpop.f32.mrf.mxu3  ;;  %v7329_v7 = vld [vmem:[%s9782_s2 + $0x210] sm:$0xff] }
 0x3c8   : > { %v4476_v59 = vpop.f32.mrf.mxu0  ;;  %5593 = vmatpush.bf16.msra.mxu1 %v7329_v7  ;;  %v4779_v54 = vld [vmem:[#allocation2 + $0x91] sm:$0xff] }
 0x3c9   : > { %v4291_v2 = vadd.f32 %v4239_v35, %v4038_v26  ;;  %v4662_v4 = vpop.f32.mrf.mxu1  ;;  %v9223_v33 = vpack.c.bf16 %v4779_v54, %v4778_v24  ;;  %v5016_v54 = vld [vmem:[#allocation2 + $0xcf] sm:$0xff] }
 0x3ca   : > { %v9206_v62 = vadd.f32 %v4662_v4, %v9008_v29 }
 0x3cb   : > { %4903 = vmatmul.bf16.gmra.mxu2 %v9201_v19  ;;  %5372 = vmatmul.bf16.gmra.mxu0 %v9073_v14  ;;  %v9208_v52 = vadd.f32 %v4473_v36, %v4291_v2  ;;  %v4556_v14 = vld [vmem:[#allocation2 + $0x148] sm:$0xff] }
 0x3cc   : > { %5138 = vmatmul.bf16.gmra.mxu3 %v5041_v32  ;;  %v9217_v36 = vpack.c.bf16 %v4557_v38, %v4556_v14  ;;  %v5013_v2 = vld [vmem:[#allocation2 + $0xa7] sm:$0xff] }
 0x3ce   : > { %v4040_v43 = vpop.f32.mrf.mxu2 }
 0x3cf   : > { %v4041_v58 = vadd.f32 %v4040_v43, %v9052_v16  ;;  %v4242_v63 = vpop.f32.mrf.mxu3 }
 0x3d0   : > { %v4478_v1 = vpop.f32.mrf.mxu0 }
 0x3d1   : > { %v4292_v15 = vadd.f32 %v4242_v63, %v4041_v58  ;;  %v4665_v55 = vpop.f32.mrf.mxu1  ;;  %v4559_v58 = vld [vmem:[#allocation2 + $0x170] sm:$0xff] }
 0x3d2   : > { %v9215_v29 = vadd.f32 %v4665_v55, %v9019_v10  ;;  %v5042_v10 = vpack.c.bf16 %v5014_v53, %v5013_v2 }
 0x3d3   : > { %v9219_v57 = vadd.f32 %v4476_v59, %v4292_v15  ;;  %v4558_v15 = vld [vmem:[#allocation2 + $0x168] sm:$0xff] }
 0x3d4   : > { %4704 = vmatmul.bf16.gmra.mxu1 %v9217_v36  ;;  %v9236_v14 = vpack.c.bf16 %v4559_v58, %v4558_v15  ;;  %v4561_v58 = vld [vmem:[#allocation2 + $0x190] sm:$0xff] }
 0x3d6   : > { %v4042_v20 = vpop.f32.mrf.mxu2 }
 0x3d7   : > { %v4043_v16 = vadd.f32 %v4042_v20, %v9063_v45  ;;  %v4244_v12 = vpop.f32.mrf.mxu3  ;;  %v4781_v20 = vld [vmem:[#allocation2 + $0xb1] sm:$0xff] }
 0x3d8   : > { %v4481_v26 = vpop.f32.mrf.mxu0 }
 0x3d9   : > { %v4293_v35 = vadd.f32 %v4244_v12, %v4043_v16  ;;  %v4667_v47 = vpop.f32.mrf.mxu1 }
 0x3da   : > { %v9228_v59 = vadd.f32 %v4667_v47, %v9027_v41 }
 0x3db   : > { %4908 = vmatmul.bf16.gmra.mxu2 %v9223_v33  ;;  %5377 = vmatmul.bf16.gmra.mxu0 %v9113_v23  ;;  %v9230_v32 = vadd.f32 %v4478_v1, %v4293_v35  ;;  %v4780_v1 = vld [vmem:[#allocation2 + $0xa9] sm:$0xff] }
 0x3dc   : > { %5143 = vmatmul.bf16.gmra.mxu3 %v5042_v10  ;;  %v9242_v53 = vpack.c.bf16 %v4781_v20, %v4780_v1  ;;  %v5015_v35 = vld [vmem:[#allocation2 + $0xc7] sm:$0xff]  ;;  %v4783_v20 = vld [vmem:[#allocation2 + $0xd1] sm:$0xff] }
 0x3dd   : > { %v4782_v1 = vld [vmem:[#allocation2 + $0xc9] sm:$0xff] }
 0x3de   : > { %v4045_v45 = vpop.f32.mrf.mxu2 }
 0x3df   : > { %v4046_v4 = vadd.f32 %v4045_v45, %v9071_v40  ;;  %v4247_v7 = vpop.f32.mrf.mxu3 }
 0x3e0   : > { %v4483_v43 = vpop.f32.mrf.mxu0 }
 0x3e1   : > { %v4294_v63 = vadd.f32 %v4247_v7, %v4046_v4  ;;  %v4670_v38 = vpop.f32.mrf.mxu1 }
 0x3e2   : > { %v9234_v55 = vadd.f32 %v4670_v38, %v9037_v11  ;;  %v5043_v11 = vpack.c.bf16 %v5016_v54, %v5015_v35  ;;  %v9264_v35 = vpack.c.bf16 %v4783_v20, %v4782_v1  ;;  %v4785_v20 = vld [vmem:[#allocation2 + $0xf1] sm:$0xff] }
 0x3e3   : > { %v9238_v23 = vadd.f32 %v4481_v26, %v4294_v63 }
 0x3e4   : > { %4709 = vmatmul.bf16.gmra.mxu1 %v9236_v14 }
 0x3e6   : > { %v4047_v41 = vpop.f32.mrf.mxu2 }
 0x3e7   : > { %v4048_v40 = vadd.f32 %v4047_v41, %v9088_v61  ;;  %v4249_v24 = vpop.f32.mrf.mxu3  ;;  %v7328_v61 = vld [vmem:[%s9782_s2 + $0x208] sm:$0xff] }
 0x3e8   : > { %v4486_v16 = vpop.f32.mrf.mxu0  ;;  %5594 = vmatpush.bf16.msra.mxu1 %v7328_v61 }
 0x3e9   : > { %v4295_v12 = vadd.f32 %v4249_v24, %v4048_v40  ;;  %v4672_v2 = vpop.f32.mrf.mxu1  ;;  %v5018_v24 = vld [vmem:[#allocation2 + $0xef] sm:$0xff] }
 0x3ea   : > { %v9247_v26 = vadd.f32 %v4672_v2, %v9043_v27 }
 0x3eb   : > { %4913 = vmatmul.bf16.gmra.mxu2 %v9242_v53  ;;  %5382 = vmatmul.bf16.gmra.mxu0 %v9147_v22  ;;  %v9249_v10 = vadd.f32 %v4483_v43, %v4295_v12  ;;  %v4560_v22 = vld [vmem:[#allocation2 + $0x188] sm:$0xff] }
 0x3ec   : > { %5148 = vmatmul.bf16.gmra.mxu3 %v5043_v11  ;;  %v9258_v43 = vpack.c.bf16 %v4561_v58, %v4560_v22  ;;  %v5017_v11 = vld [vmem:[#allocation2 + $0xe7] sm:$0xff]  ;;  %v4563_v58 = vld [vmem:[#allocation2 + $0x1b0] sm:$0xff] }
 0x3ed   : > { %v4562_v22 = vld [vmem:[#allocation2 + $0x1a8] sm:$0xff] }
 0x3ee   : > { %v4050_v47 = vpop.f32.mrf.mxu2  ;;  %v9277_v1 = vpack.c.bf16 %v4563_v58, %v4562_v22 }
 0x3ef   : > { %v4051_v45 = vadd.f32 %v4050_v47, %v9108_v34  ;;  %v4252_v4 = vpop.f32.mrf.mxu3 }
 0x3f0   : > { %v4488_v7 = vpop.f32.mrf.mxu0 }
 0x3f1   : > { %v4296_v63 = vadd.f32 %v4252_v4, %v4051_v45  ;;  %v4675_v38 = vpop.f32.mrf.mxu1 }
 0x3f2   : > { %v9256_v27 = vadd.f32 %v4675_v38, %v9056_v28  ;;  %v5044_v28 = vpack.c.bf16 %v5018_v24, %v5017_v11 }
 0x3f3   : > { %v9260_v15 = vadd.f32 %v4486_v16, %v4296_v63 }
 0x3f4   : > { %4714 = vmatmul.bf16.gmra.mxu1 %v9258_v43 }
 0x3f6   : > { %v4052_v41 = vpop.f32.mrf.mxu2 }
 0x3f7   : > { %v4053_v34 = vadd.f32 %v4052_v41, %v9134_v25  ;;  %v4254_v40 = vpop.f32.mrf.mxu3 }
 0x3f8   : > { %v4491_v54 = vpop.f32.mrf.mxu0 }
 0x3f9   : > { %v4297_v12 = vadd.f32 %v4254_v40, %v4053_v34  ;;  %v4677_v2 = vpop.f32.mrf.mxu1  ;;  %v5020_v40 = vld [vmem:[#allocation2 + $0x10f] sm:$0xff] }
 0x3fa   : > { %v9269_v16 = vadd.f32 %v4677_v2, %v9065_v48 }
 0x3fb   : > { %4918 = vmatmul.bf16.gmra.mxu2 %v9264_v35  ;;  %5387 = vmatmul.bf16.gmra.mxu0 %v9160_v17  ;;  %v9271_v61 = vadd.f32 %v4488_v7, %v4297_v12  ;;  %v4784_v7 = vld [vmem:[#allocation2 + $0xe9] sm:$0xff] }
 0x3fc   : > { %5153 = vmatmul.bf16.gmra.mxu3 %v5044_v28  ;;  %v9283_v11 = vpack.c.bf16 %v4785_v20, %v4784_v7  ;;  %v5019_v28 = vld [vmem:[#allocation2 + $0x107] sm:$0xff] }
 0x3fe   : > { %v4055_v25 = vpop.f32.mrf.mxu2 }
 0x3ff   : > { %v4056_v47 = vadd.f32 %v4055_v25, %v9145_v37  ;;  %v4257_v45 = vpop.f32.mrf.mxu3 }
 0x400   : > { %v4493_v4 = vpop.f32.mrf.mxu0 }
 0x401   : > { %v4298_v63 = vadd.f32 %v4257_v45, %v4056_v47  ;;  %v4680_v38 = vpop.f32.mrf.mxu1 }
 0x402   : > { %v9275_v41 = vadd.f32 %v4680_v38, %v9075_v13  ;;  %v5045_v13 = vpack.c.bf16 %v5020_v40, %v5019_v28  ;;  %v4565_v38 = vld [vmem:[#allocation2 + $0x1d0] sm:$0xff] }
 0x403   : > { %v9279_v17 = vadd.f32 %v4491_v54, %v4298_v63 }
 0x404   : > { %4719 = vmatmul.bf16.gmra.mxu1 %v9277_v1 }
 0x406   : > { %v4057_v48 = vpop.f32.mrf.mxu2 }
 0x407   : > { %v4058_v37 = vadd.f32 %v4057_v48, %v9153_v0  ;;  %v4259_v34 = vpop.f32.mrf.mxu3  ;;  %v7327_v0 = vld [vmem:[%s9782_s2 + $0x200] sm:$0xff] }
 0x408   : > { %v4496_v24 = vpop.f32.mrf.mxu0  ;;  %5595 = vmatpush.bf16.msra.mxu1 %v7327_v0  ;;  %v5021_v0 = vld [vmem:[#allocation2 + $0x127] sm:$0xff] }
 0x409   : > { %v4299_v12 = vadd.f32 %v4259_v34, %v4058_v37  ;;  %v4682_v2 = vpop.f32.mrf.mxu1  ;;  %v4786_v37 = vld [vmem:[#allocation2 + $0x109] sm:$0xff]  ;;  %v4787_v34 = vld [vmem:[#allocation2 + $0x111] sm:$0xff] }
 0x40a   : > { %v9288_v54 = vadd.f32 %v4682_v2, %v9090_v39  ;;  %v9305_v2 = vpack.c.bf16 %v4787_v34, %v4786_v37  ;;  %v4566_v37 = vld [vmem:[#allocation2 + $0x1e8] sm:$0xff] }
 0x40b   : > { %4923 = vmatmul.bf16.gmra.mxu2 %v9283_v11  ;;  %5392 = vmatmul.bf16.gmra.mxu0 %v9177_v49  ;;  %v9290_v25 = vadd.f32 %v4493_v4, %v4299_v12  ;;  %v4564_v49 = vld [vmem:[#allocation2 + $0x1c8] sm:$0xff] }
 0x40c   : > { %5158 = vmatmul.bf16.gmra.mxu3 %v5045_v13  ;;  %v9299_v4 = vpack.c.bf16 %v4565_v38, %v4564_v49  ;;  %v5022_v12 = vld [vmem:[#allocation2 + $0x12f] sm:$0xff] }
 0x40e   : > { %v4060_v47 = vpop.f32.mrf.mxu2 }
 0x40f   : > { %v4061_v45 = vadd.f32 %v4060_v47, %v9158_v50  ;;  %v4262_v58 = vpop.f32.mrf.mxu3 }
 0x410   : > { %v4498_v63 = vpop.f32.mrf.mxu0 }
 0x411   : > { %v4300_v22 = vadd.f32 %v4262_v58, %v4061_v45  ;;  %v4685_v48 = vpop.f32.mrf.mxu1 }
 0x412   : > { %v9297_v39 = vadd.f32 %v4685_v48, %v9115_v6  ;;  %v5046_v6 = vpack.c.bf16 %v5022_v12, %v5021_v0  ;;  %v4567_v48 = vld [vmem:[#allocation2 + $0x1f0] sm:$0xff] }
 0x413   : > { %v9301_v7 = vadd.f32 %v4496_v24, %v4300_v22 }
 0x414   : > { %4724 = vmatmul.bf16.gmra.mxu1 %v9299_v4 }
 0x416   : > { %v4062_v20 = vpop.f32.mrf.mxu2 }
 0x417   : > { %v4063_v50 = vadd.f32 %v4062_v20, %v9166_v44  ;;  %v4264_v40 = vpop.f32.mrf.mxu3 }
 0x418   : > { %v4501_v28 = vpop.f32.mrf.mxu0 }
 0x419   : > { %v4301_v13 = vadd.f32 %v4264_v40, %v4063_v50  ;;  %v4687_v47 = vpop.f32.mrf.mxu1  ;;  %v9318_v50 = vpack.c.bf16 %v4567_v48, %v4566_v37  ;;  %v4789_v40 = vld [vmem:[#allocation2 + $0x131] sm:$0xff] }
 0x41a   : > { %v9310_v24 = vadd.f32 %v4687_v47, %v9139_v5  ;;  %v4569_v37 = vld [vmem:[#allocation2 + $0x210] sm:$0xff] }
 0x41b   : > { %4928 = vmatmul.bf16.gmra.mxu2 %v9305_v2  ;;  %5397 = vmatmul.bf16.gmra.mxu0 %v9195_v30  ;;  %v9312_v45 = vadd.f32 %v4498_v63, %v4301_v13  ;;  %v4788_v63 = vld [vmem:[#allocation2 + $0x129] sm:$0xff] }
 0x41c   : > { %5163 = vmatmul.bf16.gmra.mxu3 %v5046_v6  ;;  %v5024_v13 = vld [vmem:[#allocation2 + $0x14f] sm:$0xff]  ;;  %v9324_v47 = vpack.c.bf16 %v4789_v40, %v4788_v63 }
 0x41d   : > { %v4568_v40 = vld [vmem:[#allocation2 + $0x208] sm:$0xff] }
 0x41e   : > { %v4065_v44 = vpop.f32.mrf.mxu2 }
 0x41f   : > { %v4066_v58 = vadd.f32 %v4065_v44, %v9175_v8  ;;  %v4267_v38 = vpop.f32.mrf.mxu3  ;;  %v5023_v44 = vld [vmem:[#allocation2 + $0x147] sm:$0xff] }
 0x420   : > { %v4503_v22 = vpop.f32.mrf.mxu0 }
 0x421   : > { %v4302_v49 = vadd.f32 %v4267_v38, %v4066_v58  ;;  %v4690_v20 = vpop.f32.mrf.mxu1 }
 0x422   : > { %v9316_v34 = vadd.f32 %v4690_v20, %v9149_v46  ;;  %v5047_v46 = vpack.c.bf16 %v5024_v13, %v5023_v44  ;;  %v4791_v13 = vld [vmem:[#allocation2 + $0x151] sm:$0xff] }
 0x423   : > { %v9320_v30 = vadd.f32 %v4501_v28, %v4302_v49  ;;  %v5026_v44 = vld [vmem:[#allocation2 + $0x16f] sm:$0xff] }
 0x424   : > { %4729 = vmatmul.bf16.gmra.mxu1 %v9318_v50 }
 0x426   : > { %v4067_v5 = vpop.f32.mrf.mxu2 }
 0x427   : > { %v4068_v8 = vadd.f32 %v4067_v5, %v9185_v3  ;;  %v4269_v12 = vpop.f32.mrf.mxu3 }
 0x428   : > { %v5363_v0 = vpop.f32.mrf.mxu0 }
 0x429   : > { %v4303_v6 = vadd.f32 %v4269_v12, %v4068_v8  ;;  %v4692_v58 = vpop.f32.mrf.mxu1  ;;  %v9337_v12 = vpack.c.bf16 %v4569_v37, %v4568_v40 }
 0x42a   : > { %v9329_v28 = vadd.f32 %v4692_v58, %v9155_v51 }
 0x42b   : > { %4933 = vmatmul.bf16.gmra.mxu2 %v9324_v47  ;;  %5402 = vmatmul.bf16.gmra.mxu0 %v9217_v36  ;;  %v9331_v38 = vadd.f32 %v4503_v22, %v4303_v6  ;;  %v4790_v22 = vld [vmem:[#allocation2 + $0x149] sm:$0xff] }
 0x42c   : > { %5168 = vmatmul.bf16.gmra.mxu3 %v5047_v46 }
 0x42e   : > { %v4894_v3 = vpop.f32.mrf.mxu2 }
 0x42f   : > { %v4974_v48 = vadd.f32 %v4894_v3, %v9193_v18  ;;  %v5129_v49 = vpop.f32.mrf.mxu3  ;;  %v9343_v3 = vpack.c.bf16 %v4791_v13, %v4790_v22 }
 0x430   : > { %v5365_v20 = vpop.f32.mrf.mxu0 }
 0x431   : > { %v5209_v5 = vadd.f32 %v5129_v49, %v4974_v48  ;;  %v4695_v63 = vpop.f32.mrf.mxu1  ;;  %v5025_v48 = vld [vmem:[#allocation2 + $0x167] sm:$0xff] }
 0x432   : > { %v9335_v8 = vadd.f32 %v4695_v63, %v9162_v56  ;;  %v5048_v56 = vpack.c.bf16 %v5026_v44, %v5025_v48 }
 0x433   : > { %v9339_v36 = vadd.f32 %v5363_v0, %v5209_v5 }
 0x434   : > { %4734 = vmatmul.bf16.gmra.mxu1 %v9337_v12 }
 0x436   : > { %v4896_v51 = vpop.f32.mrf.mxu2 }
 0x437   : > { %v4975_v18 = vadd.f32 %v4896_v51, %v9206_v62  ;;  %v5131_v6 = vpop.f32.mrf.mxu3 }
 0x438   : > { %v5368_v46 = vpop.f32.mrf.mxu0 }
 0x439   : > { %v5210_v58 = vadd.f32 %v5131_v6, %v4975_v18  ;;  %v4697_v49 = vpop.f32.mrf.mxu1  ;;  %v4793_v6 = vld [vmem:[#allocation2 + $0x171] sm:$0xff] }
 0x43a   : > { %v9348_v0 = vadd.f32 %v4697_v49, %v9169_v9  ;;  %v4792_v9 = vld [vmem:[#allocation2 + $0x169] sm:$0xff] }
 0x43b   : > { %4938 = vmatmul.bf16.gmra.mxu2 %v9343_v3  ;;  %5407 = vmatmul.bf16.gmra.mxu0 %v9236_v14  ;;  %v9350_v37 = vadd.f32 %v5365_v20, %v5210_v58  ;;  %v5028_v58 = vld [vmem:[#allocation2 + $0x18f] sm:$0xff] }
 0x43c   : > { %5173 = vmatmul.bf16.gmra.mxu3 %v5048_v56  ;;  %v5027_v56 = vld [vmem:[#allocation2 + $0x187] sm:$0xff] }
 0x43d   : > { %v5049_v49 = vpack.c.bf16 %v5028_v58, %v5027_v56  ;;  %v5030_v58 = vld [vmem:[#allocation2 + $0x1af] sm:$0xff]  ;;  %v5029_v56 = vld [vmem:[#allocation2 + $0x1a7] sm:$0xff] }
 0x43e   : > { %v4899_v62 = vpop.f32.mrf.mxu2 }
 0x43f   : > { %v4976_v5 = vadd.f32 %v4899_v62, %v9215_v29  ;;  %v5134_v63 = vpop.f32.mrf.mxu3  ;;  %v9360_v29 = vpack.c.bf16 %v4793_v6, %v4792_v9  ;;  %v4794_v6 = vld [vmem:[#allocation2 + $0x189] sm:$0xff] }
 0x440   : > { %v5370_v51 = vpop.f32.mrf.mxu0 }
 0x441   : > { %v5211_v40 = vadd.f32 %v5134_v63, %v4976_v5  ;;  %v4700_v22 = vpop.f32.mrf.mxu1 }
 0x442   : > { %v9354_v13 = vadd.f32 %v4700_v22, %v9179_v60 }
 0x443   : > { %v9356_v18 = vadd.f32 %v5368_v46, %v5211_v40 }
 0x444   : > { %5596 = vmatmul.bf16.vlgmr.msra.gmra.mxu1 %v9183_v21 }
 0x446   : > { %v4901_v14 = vpop.f32.mrf.mxu2 }
 0x447   : > { %v4977_v20 = vadd.f32 %v4901_v14, %v9228_v59  ;;  %v5136_v44 = vpop.f32.mrf.mxu3 }
 0x448   : > { %v5373_v46 = vpop.f32.mrf.mxu0 }
 0x449   : > { %v5212_v48 = vadd.f32 %v5136_v44, %v4977_v20  ;;  %v4702_v62 = vpop.f32.mrf.mxu1 }
 0x44a   : > { %v9365_v60 = vadd.f32 %v4702_v62, %v9189_v31 }
 0x44b   : > { %4943 = vmatmul.bf16.gmra.mxu2 %v9360_v29  ;;  %5412 = vmatmul.bf16.gmra.mxu0 %v9258_v43  ;;  %v9367_v21 = vadd.f32 %v5370_v51, %v5212_v48  ;;  %v4795_v51 = vld [vmem:[#allocation2 + $0x191] sm:$0xff] }
 0x44c   : > { %5178 = vmatmul.bf16.gmra.mxu3 %v5049_v49  ;;  %v5050_v49 = vpack.c.bf16 %v5030_v58, %v5029_v56  ;;  %v5031_v58 = vld [vmem:[#allocation2 + $0x1c7] sm:$0xff] }
 0x44e   : > { %v4904_v59 = vpop.f32.mrf.mxu2 }
 0x44f   : > { %v4978_v5 = vadd.f32 %v4904_v59, %v9234_v55  ;;  %v5139_v63 = vpop.f32.mrf.mxu3  ;;  %v9377_v55 = vpack.c.bf16 %v4795_v51, %v4794_v6  ;;  %v4797_v6 = vld [vmem:[#allocation2 + $0x1b1] sm:$0xff] }
 0x450   : > { %v5375_v43 = vpop.f32.mrf.mxu0  ;;  %v5032_v51 = vld [vmem:[#allocation2 + $0x1cf] sm:$0xff] }
 0x451   : > { %v5213_v40 = vadd.f32 %v5139_v63, %v4978_v5  ;;  %v4705_v22 = vpop.f32.mrf.mxu1  ;;  %v5051_v56 = vpack.c.bf16 %v5032_v51, %v5031_v58  ;;  %v5035_v51 = vld [vmem:[#allocation2 + $0x207] sm:$0xff]  ;;  %v5038_v58 = vld [vmem:[#allocation2 + $0x22f] sm:$0xff] }
 0x452   : > { %v9371_v14 = vadd.f32 %v4705_v22, %v9197_v42 }
 0x453   : > { %v9373_v9 = vadd.f32 %v5373_v46, %v5213_v40 }
 0x454   : > { %5601 = vmatmul.bf16.gmra.mxu1 %v9201_v19 }
 0x456   : > { %v4906_v31 = vpop.f32.mrf.mxu2 }
 0x457   : > { %v4979_v20 = vadd.f32 %v4906_v31, %v9247_v26  ;;  %v5141_v44 = vpop.f32.mrf.mxu3 }
 0x458   : > { %v5378_v5 = vpop.f32.mrf.mxu0 }
 0x459   : > { %v5214_v48 = vadd.f32 %v5141_v44, %v4979_v20  ;;  %v4707_v62 = vpop.f32.mrf.mxu1 }
 0x45a   : > { %v9382_v42 = vadd.f32 %v4707_v62, %v9208_v52  ;;  %v4796_v52 = vld [vmem:[#allocation2 + $0x1a9] sm:$0xff] }
 0x45b   : > { %4948 = vmatmul.bf16.gmra.mxu2 %v9377_v55  ;;  %5417 = vmatmul.bf16.gmra.mxu0 %v9277_v1  ;;  %v9384_v19 = vadd.f32 %v5375_v43, %v5214_v48 }
 0x45c   : > { %5183 = vmatmul.bf16.gmra.mxu3 %v5050_v49 }
 0x45e   : > { %v4909_v46 = vpop.f32.mrf.mxu2 }
 0x45f   : > { %v4980_v26 = vadd.f32 %v4909_v46, %v9256_v27  ;;  %v5144_v59 = vpop.f32.mrf.mxu3  ;;  %v9394_v27 = vpack.c.bf16 %v4797_v6, %v4796_v52  ;;  %v4798_v46 = vld [vmem:[#allocation2 + $0x1c9] sm:$0xff]  ;;  %v4801_v52 = vld [vmem:[#allocation2 + $0x1f1] sm:$0xff] }
 0x460   : > { %v5380_v48 = vpop.f32.mrf.mxu0  ;;  %v5036_v6 = vld [vmem:[#allocation2 + $0x20f] sm:$0xff] }
 0x461   : > { %v5215_v63 = vadd.f32 %v5144_v59, %v4980_v26  ;;  %v4710_v40 = vpop.f32.mrf.mxu1  ;;  %v4799_v26 = vld [vmem:[#allocation2 + $0x1d1] sm:$0xff] }
 0x462   : > { %v9388_v22 = vadd.f32 %v4710_v40, %v9219_v57  ;;  %v5034_v59 = vld [vmem:[#allocation2 + $0x1ef] sm:$0xff] }
 0x463   : > { %v9390_v31 = vadd.f32 %v5378_v5, %v5215_v63  ;;  %v9407_v5 = vpack.c.bf16 %v4799_v26, %v4798_v46  ;;  %v5033_v63 = vld [vmem:[#allocation2 + $0x1e7] sm:$0xff] }
 0x464   : > { %5606 = vmatmul.bf16.gmra.mxu1 %v9223_v33  ;;  %v5052_v40 = vpack.c.bf16 %v5034_v59, %v5033_v63 }
 0x466   : > { %v4911_v1 = vpop.f32.mrf.mxu2 }
 0x467   : > { %v4981_v43 = vadd.f32 %v4911_v1, %v9269_v16  ;;  %v5146_v20 = vpop.f32.mrf.mxu3 }
 0x469   : > { %v5216_v44 = vadd.f32 %v5146_v20, %v4981_v43  ;;  %v4712_v49 = vpop.f32.mrf.mxu1  ;;  %v5053_v20 = vpack.c.bf16 %v5036_v6, %v5035_v51 }
 0x46a   : > { %v9399_v57 = vadd.f32 %v4712_v49, %v9230_v32  ;;  %v7879_v49 = vld [vmem:[#allocation2] sm:$0xff] }
 0x46b   : > { %4953 = vmatmul.bf16.gmra.mxu2 %v9394_v27  ;;  %5422 = vmatmul.bf16.gmra.mxu0 %v9299_v4  ;;  %v9401_v33 = vadd.f32 %v5380_v48, %v5216_v44  ;;  %v4802_v48 = vld [vmem:[#allocation2 + $0x209] sm:$0xff] }
 0x46c   : > { %5188 = vmatmul.bf16.gmra.mxu3 %v5051_v56  ;;  %v4803_v56 = vld [vmem:[#allocation2 + $0x211] sm:$0xff] }
 0x46d   : > { %v9429_v26 = vpack.c.bf16 %v4803_v56, %v4802_v48  ;;  %v9470_v48 = vpop.f32.mrf.mxu0 }
 0x471   : > { %v4715_v16 = vpop.f32.mrf.mxu1 }
 0x472   : > { %v9404_v62 = vadd.f32 %v4715_v16, %v9238_v23  ;;  %v5288_v16 = vpack.c.bf16 %v7879_v49, %v7879_v49 }
 0x474   : > { %5611 = vmatmul.bf16.gmra.mxu1 %v9242_v53  ;;  %v4800_v53 = vld [vmem:[#allocation2 + $0x1e9] sm:$0xff] }
 0x475   : > { %v9418_v43 = vpack.c.bf16 %v4801_v52, %v4800_v53 }
 0x479   : > { %v4717_v4 = vpop.f32.mrf.mxu1 }
 0x47a   : > { %v9412_v32 = vadd.f32 %v4717_v4, %v9249_v10 }
 0x47b   : > { %4958 = vmatmul.bf16.gmra.mxu2 %v9407_v5  ;;  %5427 = vmatmul.bf16.gmra.mxu0 %v9318_v50 }
 0x47c   : > { %5193 = vmatmul.bf16.gmra.mxu3 %v5052_v40 }
 0x481   : > { %v4720_v23 = vpop.f32.mrf.mxu1 }
 0x482   : > { %v9415_v1 = vadd.f32 %v4720_v23, %v9260_v15 }
 0x484   : > { %5616 = vmatmul.bf16.gmra.mxu1 %v9264_v35  ;;  %v5037_v35 = vld [vmem:[#allocation2 + $0x227] sm:$0xff] }
 0x485   : > { %v5054_v46 = vpack.c.bf16 %v5038_v58, %v5037_v35 }
 0x489   : > { %v4722_v44 = vpop.f32.mrf.mxu1 }
 0x48a   : > { %v9423_v10 = vadd.f32 %v4722_v44, %v9271_v61 }
 0x48b   : > { %4963 = vmatmul.bf16.gmra.mxu2 %v9418_v43  ;;  %5432 = vmatmul.bf16.gmra.mxu0 %v9337_v12 }
 0x48c   : > { %5198 = vmatmul.bf16.gmra.mxu3 %v5053_v20 }
 0x491   : > { %v4725_v15 = vpop.f32.mrf.mxu1 }
 0x492   : > { %v9426_v50 = vadd.f32 %v4725_v15, %v9279_v17  ;;  %v9467_v15 = vpop.f32.mrf.mxu3 }
 0x494   : > { %5621 = vmatmul.bf16.gmra.mxu1 %v9283_v11 }
 0x499   : > { %v4727_v12 = vpop.f32.mrf.mxu1 }
 0x49a   : > { %v9433_v61 = vadd.f32 %v4727_v12, %v9290_v25 }
 0x49b   : > { %4968 = vmatmul.bf16.gmra.mxu2 %v9429_v26  ;;  %5437 = vmatmul.bf16.gmra.mxu0 %v5288_v16 }
 0x49c   : > { %5203 = vmatmul.bf16.gmra.mxu3 %v5054_v46 }
 0x4a1   : > { %v4730_v17 = vpop.f32.mrf.mxu1 }
 0x4a2   : > { %v9436_v11 = vadd.f32 %v4730_v17, %v9301_v7  ;;  %v9452_v7 = vld [vmem:[%s9785_s5] ss:$0 sm:$0xff] }
 0x4a4   : > { %5626 = vmatmul.bf16.gmra.mxu1 %v9305_v2 }
 0x4a9   : > { %v4732_v59 = vpop.f32.mrf.mxu1 }
 0x4aa   : > { %v9440_v63 = vadd.f32 %v4732_v59, %v9312_v45  ;;  %v9458_v45 = vld [vmem:[%s9786_s6] ss:$0 sm:$0xff] }
 0x4b1   : > { %v4735_v40 = vpop.f32.mrf.mxu1 }
 0x4b2   : > { %v9443_v4 = vadd.f32 %v4735_v40, %v9320_v30 }
 0x4b4   : > { %5631 = vmatmul.bf16.gmra.mxu1 %v9324_v47 }
 0x4b9   : > { %v4737_v25 = vpop.f32.mrf.mxu1 }
 0x4ba   : > { %v9447_v23 = vadd.f32 %v4737_v25, %v9331_v38  ;;  %v9463_v38 = vpop.f32.mrf.mxu2 }
 0x4bc   : > { %9804 = vst [vmem:[#allocation3_spill] sm:$0xff] %v9447_v23 }
 0x4c1   : > { %v5597_v2 = vpop.f32.mrf.mxu1 }
 0x4c2   : > { %v5677_v53 = vadd.f32 %v5597_v2, %v9339_v36  ;;  %v9472_v56 = vpop.f32.mrf.mxu2 }
 0x4c4   : > { %v5713_v30 = vmul.f32 %v9452_v7, %v5677_v53  ;;  %5636 = vmatmul.bf16.gmra.mxu1 %v9343_v3 }
 0x4c6   : > { %v5749_v47 = vadd.f32 %v9458_v45, %v5713_v30  ;;  %v7156_v30 = vld [vmem:[%s7973_s26 + $0x19] sm:$0xff] }
 0x4c8   : > { %v5781_v52 = vmax.f32 %v5749_v47, 0.0 }
 0x4c9   : > { %v5599_v6 = vpop.f32.mrf.mxu1 }
 0x4ca   : > { %v5813_v51 = vmin.f32 %v5781_v52, 1.0  ;;  %v5678_v20 = vadd.f32 %v5599_v6, %v9350_v37  ;;  %v9479_v52 = vpop.f32.mrf.mxu3 }
 0x4cc   : > { %v5845_v44 = vmul.f32 15.0, %v5813_v51  ;;  %v5714_v36 = vmul.f32 %v9452_v7, %v5678_v20 }
 0x4ce   : > { %v7610_v35 = vcvt.f32.s32 %v5845_v44  ;;  %v5750_v58 = vadd.f32 %v9458_v45, %v5714_v36  ;;  %v7608_v49 = vand.u32 2147483647, %v5845_v44  ;;  %v7613_v37 = vand.u32 2147483648, %v5845_v44 }
 0x4d0   : > { %v7611_v3 = vcvt.s32.f32 %v7610_v35  ;;  %v5782_v16 = vmax.f32 %v5750_v58, 0.0  ;;  %vm7609_vm0 = vcmp.lt.f32.partialorder %v7608_v49, 8388608.0  ;;  %v9482_v58 = vpop.f32.mrf.mxu0  ;;  %v9490_v49 = vpop.f32.mrf.mxu2 }
 0x4d1   : > { %v5602_v46 = vpop.f32.mrf.mxu1 }
 0x4d2   : > { %v7612_v12 = vand.u32 2147483647, %v7611_v3  ;;  %v5679_v17 = vadd.f32 %v5602_v46, %v9356_v18  ;;  %v5814_v59 = vmin.f32 %v5782_v16, 1.0 }
 0x4d4   : > { %v7614_v40 = vor.u32 %v7613_v37, %v7612_v12  ;;  %v5715_v25 = vmul.f32 %v9452_v7, %v5679_v17  ;;  %5641 = vmatmul.bf16.gmra.mxu1 %v9360_v29  ;;  %v5846_v2 = vmul.f32 15.0, %v5814_v59 }
 0x4d6   : > { %v7615_v53 = vsel %vm7609_vm0, %v7614_v40, %v5845_v44  ;;  %v5751_v47 = vadd.f32 %v9458_v45, %v5715_v25  ;;  %v7618_v51 = vcvt.f32.s32 %v5846_v2  ;;  %v7616_v29 = vand.u32 2147483647, %v5846_v2 }
 0x4d7   : > { %v5909_v6 = vmul.f32 0.06666667, %v7615_v53  ;;  %v7621_v12 = vand.u32 2147483648, %v5846_v2  ;;  %v7157_v53 = vld [vmem:[%s7973_s26 + $0x21] sm:$0xff] }
 0x4d8   : > { %v5783_v20 = vmax.f32 %v5751_v47, 0.0  ;;  %v7619_v18 = vcvt.s32.f32 %v7618_v51  ;;  %vm7617_vm1 = vcmp.lt.f32.partialorder %v7616_v29, 8388608.0  ;;  %v9496_v51 = vpop.f32.mrf.mxu3 }
 0x4d9   : > { %v5973_v36 = vadd.f32 %v7156_v30, %v5909_v6  ;;  %v5604_v35 = vpop.f32.mrf.mxu1 }
 0x4da   : > { %v5815_v44 = vmin.f32 %v5783_v20, 1.0  ;;  %v5680_v3 = vadd.f32 %v5604_v35, %v9367_v21  ;;  %v7620_v46 = vand.u32 2147483647, %v7619_v18 }
 0x4db   : > { %v6005_v16 = vmax.f32 %v5973_v36, 0.0 }
 0x4dc   : > { %v5847_v37 = vmul.f32 15.0, %v5815_v44  ;;  %v5716_v17 = vmul.f32 %v9452_v7, %v5680_v3  ;;  %v7622_v59 = vor.u32 %v7621_v12, %v7620_v46 }
 0x4dd   : > { %6037 = vst [vmem:[%s9487_s9] sm:$0xff] %v6005_v16  ;;  %v9499_v16 = vpop.f32.mrf.mxu0 }
 0x4de   : > { %v7626_v40 = vcvt.f32.s32 %v5847_v37  ;;  %v7623_v25 = vsel %vm7617_vm1, %v7622_v59, %v5846_v2  ;;  %v5752_v30 = vadd.f32 %v9458_v45, %v5716_v17  ;;  %v7624_v21 = vand.u32 2147483647, %v5847_v37  ;;  %v9503_v17 = vpop.f32.mrf.mxu2 }
 0x4df   : > { %v5910_v47 = vmul.f32 0.06666667, %v7623_v25  ;;  %v7629_v44 = vand.u32 2147483648, %v5847_v37  ;;  %v7158_v25 = vld [vmem:[%s7973_s26 + $0x31] sm:$0xff] }
 0x4e0   : > { %v7627_v6 = vcvt.s32.f32 %v7626_v40  ;;  %v5784_v20 = vmax.f32 %v5752_v30, 0.0  ;;  %vm7625_vm2 = vcmp.lt.f32.partialorder %v7624_v21, 8388608.0 }
 0x4e1   : > { %v5607_v36 = vpop.f32.mrf.mxu1  ;;  %v5974_v18 = vadd.f32 %v7157_v53, %v5910_v47 }
 0x4e2   : > { %v7628_v35 = vand.u32 2147483647, %v7627_v6  ;;  %v5681_v3 = vadd.f32 %v5607_v36, %v9373_v9  ;;  %v5816_v29 = vmin.f32 %v5784_v20, 1.0 }
 0x4e3   : > { %v6006_v2 = vmax.f32 %v5974_v18, 0.0 }
 0x4e4   : > { %v7630_v46 = vor.u32 %v7629_v44, %v7628_v35  ;;  %v5717_v12 = vmul.f32 %v9452_v7, %v5681_v3  ;;  %5646 = vmatmul.bf16.gmra.mxu1 %v9377_v55  ;;  %v5848_v59 = vmul.f32 15.0, %v5816_v29  ;;  %v9509_v44 = vpop.f32.mrf.mxu3 }
 0x4e5   : > { %6038 = vst [vmem:[%s9487_s9 + $0x8] sm:$0xff] %v6006_v2 }
 0x4e6   : > { %v7631_v40 = vsel %vm7625_vm2, %v7630_v46, %v5847_v37  ;;  %v5753_v53 = vadd.f32 %v9458_v45, %v5717_v12  ;;  %v7634_v30 = vcvt.f32.s32 %v5848_v59  ;;  %v7632_v18 = vand.u32 2147483647, %v5848_v59  ;;  %v9513_v12 = vpop.f32.mrf.mxu0 }
 0x4e7   : > { %v5911_v9 = vmul.f32 0.06666667, %v7631_v40  ;;  %v7637_v37 = vand.u32 2147483648, %v5848_v59 }
 0x4e8   : > { %v5785_v47 = vmax.f32 %v5753_v53, 0.0  ;;  %v7635_v20 = vcvt.s32.f32 %v7634_v30  ;;  %vm7633_vm3 = vcmp.lt.f32.partialorder %v7632_v18, 8388608.0 }
 0x4e9   : > { %v5975_v6 = vadd.f32 %v7158_v25, %v5911_v9  ;;  %v5609_v36 = vpop.f32.mrf.mxu1  ;;  %v9515_v25 = vpop.f32.mrf.mxu2  ;;  %v7159_v9 = vld [vmem:[%s7973_s26 + $0x39] sm:$0xff] }
 0x4ea   : > { %v5817_v35 = vmin.f32 %v5785_v47, 1.0  ;;  %v5682_v55 = vadd.f32 %v5609_v36, %v9384_v19  ;;  %v7636_v3 = vand.u32 2147483647, %v7635_v20 }
 0x4eb   : > { %v6007_v21 = vmax.f32 %v5975_v6, 0.0 }
 0x4ec   : > { %v5849_v29 = vmul.f32 15.0, %v5817_v35  ;;  %v5718_v2 = vmul.f32 %v9452_v7, %v5682_v55  ;;  %v7638_v46 = vor.u32 %v7637_v37, %v7636_v3 }
 0x4ed   : > { %6039 = vst [vmem:[%s9487_s9 + $0x10] sm:$0xff] %v6007_v21 }
 0x4ee   : > { %v7642_v40 = vcvt.f32.s32 %v5849_v29  ;;  %v7639_v53 = vsel %vm7633_vm3, %v7638_v46, %v5848_v59  ;;  %v5754_v19 = vadd.f32 %v9458_v45, %v5718_v2  ;;  %v7640_v6 = vand.u32 2147483647, %v5849_v29  ;;  %v9522_v2 = vpop.f32.mrf.mxu3 }
 0x4ef   : > { %v5912_v30 = vmul.f32 0.06666667, %v7639_v53  ;;  %v7645_v21 = vand.u32 2147483648, %v5849_v29  ;;  %v7160_v53 = vld [vmem:[%s7973_s26 + $0x49] sm:$0xff] }
 0x4f0   : > { %v7643_v47 = vcvt.s32.f32 %v7642_v40  ;;  %v5786_v20 = vmax.f32 %v5754_v19, 0.0  ;;  %vm7641_vm4 = vcmp.lt.f32.partialorder %v7640_v6, 8388608.0 }
 0x4f1   : > { %v5612_v36 = vpop.f32.mrf.mxu1  ;;  %v5976_v35 = vadd.f32 %v7159_v9, %v5912_v30 }
 0x4f2   : > { %v7644_v55 = vand.u32 2147483647, %v7643_v47  ;;  %v5683_v3 = vadd.f32 %v5612_v36, %v9390_v31  ;;  %v5818_v18 = vmin.f32 %v5786_v20, 1.0  ;;  %v4982_v31 = vadd.f32 %v9463_v38, %v9275_v41  ;;  %v9529_v47 = vpop.f32.mrf.mxu0  ;;  %v9531_v36 = vpop.f32.mrf.mxu2 }
 0x4f3   : > { %v6008_v37 = vmax.f32 %v5976_v35, 0.0 }
 0x4f4   : > { %v7646_v23 = vor.u32 %v7645_v21, %v7644_v55  ;;  %v5719_v59 = vmul.f32 %v9452_v7, %v5683_v3  ;;  %5651 = vmatmul.bf16.gmra.mxu1 %v9394_v27  ;;  %v5850_v46 = vmul.f32 15.0, %v5818_v18 }
 0x4f5   : > { %6040 = vst [vmem:[%s9487_s9 + $0x18] sm:$0xff] %v6008_v37  ;;  %v5217_v37 = vadd.f32 %v9467_v15, %v4982_v31 }
 0x4f6   : > { %v7647_v40 = vsel %vm7641_vm4, %v7646_v23, %v5849_v29  ;;  %v5755_v9 = vadd.f32 %v9458_v45, %v5719_v59  ;;  %v7650_v30 = vcvt.f32.s32 %v5850_v46  ;;  %v7648_v55 = vand.u32 2147483647, %v5850_v46 }
 0x4f7   : > { %v5913_v19 = vmul.f32 0.06666667, %v7647_v40  ;;  %v7653_v18 = vand.u32 2147483648, %v5850_v46  ;;  %v5451_v15 = vadd.f32 %v9470_v48, %v5217_v37 }
 0x4f8   : > { %v5787_v20 = vmax.f32 %v5755_v9, 0.0  ;;  %v7651_v35 = vcvt.s32.f32 %v7650_v30  ;;  %vm7649_vm5 = vcmp.lt.f32.partialorder %v7648_v55, 8388608.0 }
 0x4f9   : > { %v5977_v27 = vadd.f32 %v7160_v53, %v5913_v19  ;;  %v5614_v6 = vpop.f32.mrf.mxu1  ;;  %v9537_v53 = vpop.f32.mrf.mxu3  ;;  %v7161_v19 = vld [vmem:[%s7973_s26 + $0x51] sm:$0xff] }
 0x4fa   : > { %v5819_v23 = vmin.f32 %v5787_v20, 1.0  ;;  %v5684_v29 = vadd.f32 %v5614_v6, %v9401_v33  ;;  %v7652_v3 = vand.u32 2147483647, %v7651_v35  ;;  %v4983_v33 = vadd.f32 %v9472_v56, %v9288_v54 }
 0x4fb   : > { %v6009_v21 = vmax.f32 %v5977_v27, 0.0 }
 0x4fc   : > { %v5851_v41 = vmul.f32 15.0, %v5819_v23  ;;  %v5720_v38 = vmul.f32 %v9452_v7, %v5684_v29  ;;  %v7654_v59 = vor.u32 %v7653_v18, %v7652_v3  ;;  %v9544_v23 = vpop.f32.mrf.mxu0  ;;  %v9546_v3 = vpop.f32.mrf.mxu2  ;;  %v5218_v54 = vadd.f32 %v9479_v52, %v4983_v33 }
 0x4fd   : > { %6041 = vst [vmem:[%s9487_s9 + $0x20] sm:$0xff] %v6009_v21 }
 0x4fe   : > { %v7658_v40 = vcvt.f32.s32 %v5851_v41  ;;  %v7655_v9 = vsel %vm7649_vm5, %v7654_v59, %v5850_v46  ;;  %v5756_v30 = vadd.f32 %v9458_v45, %v5720_v38  ;;  %v7656_v31 = vand.u32 2147483647, %v5851_v41 }
 0x4ff   : > { %v5914_v20 = vmul.f32 0.06666667, %v7655_v9  ;;  %v7661_v46 = vand.u32 2147483648, %v5851_v41  ;;  %v5452_v52 = vadd.f32 %v9482_v58, %v5218_v54 }
 0x500   : > { %v7659_v27 = vcvt.s32.f32 %v7658_v40  ;;  %v5788_v35 = vmax.f32 %v5756_v30, 0.0  ;;  %vm7657_vm6 = vcmp.lt.f32.partialorder %v7656_v31, 8388608.0  ;;  %v7162_v40 = vld [vmem:[%s7973_s26 + $0x61] sm:$0xff] }
 0x501   : > { %v5617_v6 = vpop.f32.mrf.mxu1  ;;  %v5978_v55 = vadd.f32 %v7161_v19, %v5914_v20  ;;  %v4984_v20 = vadd.f32 %v9490_v49, %v9297_v39  ;;  %v9557_v33 = vpop.f32.mrf.mxu3 }
 0x502   : > { %v7660_v29 = vand.u32 2147483647, %v7659_v27  ;;  %v5685_v21 = vadd.f32 %v5617_v6, %v5451_v15  ;;  %v5820_v18 = vmin.f32 %v5788_v35, 1.0 }
 0x503   : > { %v6010_v56 = vmax.f32 %v5978_v55, 0.0 }
 0x504   : > { %v7662_v38 = vor.u32 %v7661_v46, %v7660_v29  ;;  %v5721_v48 = vmul.f32 %v9452_v7, %v5685_v21  ;;  %5656 = vmatmul.bf16.gmra.mxu1 %v9407_v5  ;;  %v5852_v37 = vmul.f32 15.0, %v5820_v18  ;;  %v5219_v21 = vadd.f32 %v9496_v51, %v4984_v20  ;;  %v9560_v18 = vpop.f32.mrf.mxu0  ;;  %v9563_v49 = vpop.f32.mrf.mxu2 }
 0x505   : > { %6042 = vst [vmem:[%s9487_s9 + $0x28] sm:$0xff] %v6010_v56 }
 0x506   : > { %v7663_v59 = vsel %vm7657_vm6, %v7662_v38, %v5851_v41  ;;  %v5757_v9 = vadd.f32 %v9458_v45, %v5721_v48  ;;  %v7666_v30 = vcvt.f32.s32 %v5852_v37  ;;  %v7664_v35 = vand.u32 2147483647, %v5852_v37  ;;  %v7163_v48 = vld [vmem:[%s7973_s26 + $0x69] sm:$0xff] }
 0x507   : > { %v5915_v19 = vmul.f32 0.06666667, %v7663_v59  ;;  %v7669_v46 = vand.u32 2147483648, %v5852_v37 }
 0x508   : > { %v5789_v27 = vmax.f32 %v5757_v9, 0.0  ;;  %v7667_v5 = vcvt.s32.f32 %v7666_v30  ;;  %vm7665_vm7 = vcmp.lt.f32.partialorder %v7664_v35, 8388608.0 }
 0x509   : > { %v5979_v15 = vadd.f32 %v7162_v40, %v5915_v19  ;;  %v5619_v31 = vpop.f32.mrf.mxu1  ;;  %v4985_v40 = vadd.f32 %v9503_v17, %v9310_v24  ;;  %v5453_v19 = vadd.f32 %v9499_v16, %v5219_v21 }
 0x50a   : > { %v5821_v41 = vmin.f32 %v5789_v27, 1.0  ;;  %v5686_v6 = vadd.f32 %v5619_v31, %v5452_v52  ;;  %v7668_v29 = vand.u32 2147483647, %v7667_v5 }
 0x50b   : > { %v6011_v55 = vmax.f32 %v5979_v15, 0.0 }
 0x50c   : > { %v5853_v39 = vmul.f32 15.0, %v5821_v41  ;;  %v5722_v58 = vmul.f32 %v9452_v7, %v5686_v6  ;;  %v7670_v54 = vor.u32 %v7669_v46, %v7668_v29  ;;  %v5220_v41 = vadd.f32 %v9509_v44, %v4985_v40  ;;  %v7164_v46 = vld [vmem:[%s7973_s26 + $0x79] sm:$0xff] }
 0x50d   : > { %6043 = vst [vmem:[%s9487_s9 + $0x30] sm:$0xff] %v6011_v55  ;;  %v9576_v55 = vpop.f32.mrf.mxu0  ;;  %v4986_v44 = vadd.f32 %v9515_v25, %v9316_v34 }
 0x50e   : > { %v7674_v56 = vcvt.f32.s32 %v5853_v39  ;;  %v7671_v38 = vsel %vm7665_vm7, %v7670_v54, %v5852_v37  ;;  %v5758_v59 = vadd.f32 %v9458_v45, %v5722_v58  ;;  %v7672_v30 = vand.u32 2147483647, %v5853_v39  ;;  %v9571_v37 = vpop.f32.mrf.mxu3  ;;  %v9581_v58 = vpop.f32.mrf.mxu2 }
 0x50f   : > { %v5916_v9 = vmul.f32 0.06666667, %v7671_v38  ;;  %v7677_v5 = vand.u32 2147483648, %v5853_v39 }
 0x510   : > { %v7675_v51 = vcvt.s32.f32 %v7674_v56  ;;  %v5790_v20 = vmax.f32 %v5758_v59, 0.0  ;;  %vm7673_vm8 = vcmp.lt.f32.partialorder %v7672_v30, 8388608.0 }
 0x511   : > { %v5622_v27 = vpop.f32.mrf.mxu1  ;;  %v5980_v52 = vadd.f32 %v7163_v48, %v5916_v9 }
 0x512   : > { %v7676_v15 = vand.u32 2147483647, %v7675_v51  ;;  %v5687_v31 = vadd.f32 %v5622_v27, %v5453_v19  ;;  %v5822_v35 = vmin.f32 %v5790_v20, 1.0  ;;  %v5221_v27 = vadd.f32 %v9522_v2, %v4986_v44 }
 0x513   : > { %v6012_v6 = vmax.f32 %v5980_v52, 0.0 }
 0x514   : > { %v7678_v24 = vor.u32 %v7677_v5, %v7676_v15  ;;  %v5723_v17 = vmul.f32 %v9452_v7, %v5687_v31  ;;  %5661 = vmatmul.bf16.gmra.mxu1 %v9418_v43  ;;  %v5854_v16 = vmul.f32 15.0, %v5822_v35  ;;  %v5454_v43 = vadd.f32 %v9513_v12, %v5220_v41  ;;  %v7165_v31 = vld [vmem:[%s7973_s26 + $0x81] sm:$0xff] }
 0x515   : > { %6044 = vst [vmem:[%s9487_s9 + $0x38] sm:$0xff] %v6012_v6  ;;  %v4987_v41 = vadd.f32 %v9531_v36, %v9329_v28  ;;  %v9595_v6 = vpop.f32.mrf.mxu0 }
 0x516   : > { %v7679_v29 = vsel %vm7673_vm8, %v7678_v24, %v5853_v39  ;;  %v5759_v21 = vadd.f32 %v9458_v45, %v5723_v17  ;;  %v7682_v56 = vcvt.f32.s32 %v5854_v16  ;;  %v7680_v9 = vand.u32 2147483647, %v5854_v16  ;;  %v9588_v34 = vpop.f32.mrf.mxu3 }
 0x517   : > { %v5917_v54 = vmul.f32 0.06666667, %v7679_v29  ;;  %v7685_v20 = vand.u32 2147483648, %v5854_v16  ;;  %v5455_v17 = vadd.f32 %v9529_v47, %v5221_v27  ;;  %v9598_v29 = vpop.f32.mrf.mxu2  ;;  %v5222_v28 = vadd.f32 %v9537_v53, %v4987_v41 }
 0x518   : > { %v5791_v38 = vmax.f32 %v5759_v21, 0.0  ;;  %v7683_v59 = vcvt.s32.f32 %v7682_v56  ;;  %vm7681_vm9 = vcmp.lt.f32.partialorder %v7680_v9, 8388608.0  ;;  %v7166_v9 = vld [vmem:[%s7973_s26 + $0x91] sm:$0xff] }
 0x519   : > { %v5981_v48 = vadd.f32 %v7164_v46, %v5917_v54  ;;  %v5624_v40 = vpop.f32.mrf.mxu1  ;;  %v5456_v27 = vadd.f32 %v9544_v23, %v5222_v28 }
 0x51a   : > { %v5823_v39 = vmin.f32 %v5791_v38, 1.0  ;;  %v5688_v51 = vadd.f32 %v5624_v40, %v5454_v43  ;;  %v7684_v30 = vand.u32 2147483647, %v7683_v59 }
 0x51b   : > { %v6013_v19 = vmax.f32 %v5981_v48, 0.0 }
 0x51c   : > { %v5855_v52 = vmul.f32 15.0, %v5823_v39  ;;  %v5724_v15 = vmul.f32 %v9452_v7, %v5688_v51  ;;  %v7686_v25 = vor.u32 %v7685_v20, %v7684_v30  ;;  %v4988_v51 = vadd.f32 %v9546_v3, %v9335_v8 }
 0x51d   : > { %6045 = vst [vmem:[%s9487_s9 + $0x40] sm:$0xff] %v6013_v19 }
 0x51e   : > { %v7690_v12 = vcvt.f32.s32 %v5855_v52  ;;  %v7687_v5 = vsel %vm7681_vm9, %v7686_v25, %v5854_v16  ;;  %v5760_v35 = vadd.f32 %v9458_v45, %v5724_v15  ;;  %v7688_v46 = vand.u32 2147483647, %v5855_v52  ;;  %v9608_v19 = vpop.f32.mrf.mxu3 }
 0x51f   : > { %v5918_v24 = vmul.f32 0.06666667, %v7687_v5  ;;  %v7693_v44 = vand.u32 2147483648, %v5855_v52  ;;  %v9614_v8 = vpop.f32.mrf.mxu2 }
 0x520   : > { %v7691_v2 = vcvt.s32.f32 %v7690_v12  ;;  %v5792_v21 = vmax.f32 %v5760_v35, 0.0  ;;  %vm7689_vm10 = vcmp.lt.f32.partialorder %v7688_v46, 8388608.0  ;;  %v9611_v12 = vpop.f32.mrf.mxu0  ;;  %v5223_v35 = vadd.f32 %v9557_v33, %v4988_v51  ;;  %v5505_v46 = vld [vmem:[#allocation2 + $0x229] sm:$0xff] }
 0x521   : > { %v5627_v54 = vpop.f32.mrf.mxu1  ;;  %v5982_v16 = vadd.f32 %v7165_v31, %v5918_v24  ;;  %v4989_v33 = vadd.f32 %v9563_v49, %v9348_v0 }
 0x522   : > { %v7692_v56 = vand.u32 2147483647, %v7691_v2  ;;  %v5689_v38 = vadd.f32 %v5627_v54, %v5455_v17  ;;  %v5824_v43 = vmin.f32 %v5792_v21, 1.0  ;;  %v5506_v21 = vld [vmem:[#allocation2 + $0x231] sm:$0xff] }
 0x523   : > { %v6014_v36 = vmax.f32 %v5982_v16, 0.0  ;;  %v5224_v0 = vadd.f32 %v9571_v37, %v4989_v33  ;;  %v4990_v37 = vadd.f32 %v9581_v58, %v9354_v13 }
 0x524   : > { %v7694_v48 = vor.u32 %v7693_v44, %v7692_v56  ;;  %v5725_v59 = vmul.f32 %v9452_v7, %v5689_v38  ;;  %5666 = vmatmul.bf16.gmra.mxu1 %v9429_v26  ;;  %v5856_v47 = vmul.f32 15.0, %v5824_v43  ;;  %v7167_v44 = vld [vmem:[%s7973_s26 + $0x99] sm:$0xff]  ;;  %v5457_v38 = vadd.f32 %v9560_v18, %v5223_v35 }
 0x525   : > { %6046 = vst [vmem:[%s9487_s9 + $0x48] sm:$0xff] %v6014_v36 }
 0x526   : > { %v7695_v40 = vsel %vm7689_vm10, %v7694_v48, %v5855_v52  ;;  %v5761_v39 = vadd.f32 %v9458_v45, %v5725_v59  ;;  %v7698_v53 = vcvt.f32.s32 %v5856_v47  ;;  %v7696_v52 = vand.u32 2147483647, %v5856_v47  ;;  %v9623_v59 = vpop.f32.mrf.mxu3 }
 0x527   : > { %v5919_v30 = vmul.f32 0.06666667, %v7695_v40  ;;  %v7701_v24 = vand.u32 2147483648, %v5856_v47  ;;  %v5522_v48 = vpack.c.bf16 %v5506_v21, %v5505_v46 }
 0x528   : > { %v5793_v20 = vmax.f32 %v5761_v39, 0.0  ;;  %v7699_v26 = vcvt.s32.f32 %v7698_v53  ;;  %vm7697_vm11 = vcmp.lt.f32.partialorder %v7696_v52, 8388608.0  ;;  %v9626_v49 = vpop.f32.mrf.mxu0  ;;  %v7168_v52 = vld [vmem:[%s7973_s26 + $0xa9] sm:$0xff] }
 0x529   : > { %v5983_v15 = vadd.f32 %v7166_v9, %v5919_v30  ;;  %v5629_v25 = vpop.f32.mrf.mxu1 }
 0x52a   : > { %v5825_v5 = vmin.f32 %v5793_v20, 1.0  ;;  %v5690_v31 = vadd.f32 %v5629_v25, %v5456_v27  ;;  %v7700_v41 = vand.u32 2147483647, %v7699_v26  ;;  %v9629_v26 = vpop.f32.mrf.mxu2 }
 0x52b   : > { %v6015_v3 = vmax.f32 %v5983_v15, 0.0 }
 0x52c   : > { %v5857_v2 = vmul.f32 15.0, %v5825_v5  ;;  %v5726_v17 = vmul.f32 %v9452_v7, %v5690_v31  ;;  %v7702_v23 = vor.u32 %v7701_v24, %v7700_v41  ;;  %v5458_v41 = vadd.f32 %v9576_v55, %v5224_v0 }
 0x52d   : > { %6047 = vst [vmem:[%s9487_s9 + $0x50] sm:$0xff] %v6015_v3 }
 0x52e   : > { %v7706_v54 = vcvt.f32.s32 %v5857_v2  ;;  %v5762_v16 = vadd.f32 %v9458_v45, %v5726_v17  ;;  %v7703_v56 = vsel %vm7697_vm11, %v7702_v23, %v5856_v47  ;;  %v7704_v40 = vand.u32 2147483647, %v5857_v2 }
 0x52f   : > { %v5920_v43 = vmul.f32 0.06666667, %v7703_v56  ;;  %v7709_v9 = vand.u32 2147483648, %v5857_v2 }
 0x530   : > { %v7707_v28 = vcvt.s32.f32 %v7706_v54  ;;  %v5794_v36 = vmax.f32 %v5762_v16, 0.0  ;;  %vm7705_vm12 = vcmp.lt.f32.partialorder %v7704_v40, 8388608.0  ;;  %v9637_v16 = vpop.f32.mrf.mxu3  ;;  %v9642_v58 = vpop.f32.mrf.mxu0 }
 0x531   : > { %v5632_v39 = vpop.f32.mrf.mxu1  ;;  %v5984_v51 = vadd.f32 %v7167_v44, %v5920_v43  ;;  %v5225_v44 = vadd.f32 %v9588_v34, %v4990_v37  ;;  %v4992_v37 = vadd.f32 %v9614_v8, %v9371_v14 }
 0x532   : > { %v7708_v30 = vand.u32 2147483647, %v7707_v28  ;;  %v5826_v53 = vmin.f32 %v5794_v36, 1.0  ;;  %v5691_v20 = vadd.f32 %v5632_v39, %v5457_v38  ;;  %v7169_v28 = vld [vmem:[%s7973_s26 + $0xb1] sm:$0xff]  ;;  %v4991_v39 = vadd.f32 %v9598_v29, %v9365_v60 }
 0x533   : > { %v6016_v18 = vmax.f32 %v5984_v51, 0.0  ;;  %v5459_v51 = vadd.f32 %v9595_v6, %v5225_v44  ;;  %v5227_v8 = vadd.f32 %v9623_v59, %v4992_v37 }
 0x534   : > { %v7710_v47 = vor.u32 %v7709_v9, %v7708_v30  ;;  %v5858_v27 = vmul.f32 15.0, %v5826_v53  ;;  %v5727_v15 = vmul.f32 %v9452_v7, %v5691_v20  ;;  %5671 = vmatmul.bf16.gmra.mxu1 %v5522_v48  ;;  %v9646_v48 = vpop.f32.mrf.mxu2 }
 0x535   : > { %6048 = vst [vmem:[%s9487_s9 + $0x58] sm:$0xff] %v6016_v18  ;;  %v5461_v59 = vadd.f32 %v9626_v49, %v5227_v8 }
 0x536   : > { %v7711_v25 = vsel %vm7705_vm12, %v7710_v47, %v5857_v2  ;;  %v7714_v5 = vcvt.f32.s32 %v5858_v27  ;;  %v5763_v35 = vadd.f32 %v9458_v45, %v5727_v15  ;;  %v7712_v17 = vand.u32 2147483647, %v5858_v27 }
 0x537   : > { %v5921_v31 = vmul.f32 0.06666667, %v7711_v25  ;;  %v7717_v54 = vand.u32 2147483648, %v5858_v27 }
 0x538   : > { %v7715_v3 = vcvt.s32.f32 %v7714_v5  ;;  %v5795_v23 = vmax.f32 %v5763_v35, 0.0  ;;  %vm7713_vm13 = vcmp.lt.f32.partialorder %v7712_v17, 8388608.0  ;;  %v9653_v60 = vpop.f32.mrf.mxu3 }
 0x539   : > { %v5985_v24 = vadd.f32 %v7168_v52, %v5921_v31  ;;  %v5634_v46 = vpop.f32.mrf.mxu1  ;;  %v5226_v52 = vadd.f32 %v9608_v19, %v4991_v39 }
 0x53a   : > { %v7716_v21 = vand.u32 2147483647, %v7715_v3  ;;  %v5692_v2 = vadd.f32 %v5634_v46, %v5458_v41  ;;  %v5827_v56 = vmin.f32 %v5795_v23, 1.0  ;;  %v7170_v41 = vld [vmem:[%s7973_s26 + $0xc1] sm:$0xff] }
 0x53b   : > { %v6017_v33 = vmax.f32 %v5985_v24, 0.0  ;;  %v9660_v24 = vpop.f32.mrf.mxu0  ;;  %v5460_v46 = vadd.f32 %v9611_v12, %v5226_v52 }
 0x53c   : > { %v7718_v38 = vor.u32 %v7717_v54, %v7716_v21  ;;  %v5728_v13 = vmul.f32 %v9452_v7, %v5692_v2  ;;  %v5859_v55 = vmul.f32 15.0, %v5827_v56  ;;  %v9663_v21 = vpop.f32.mrf.mxu2 }
 0x53d   : > { %6049 = vst [vmem:[%s9487_s9 + $0x60] sm:$0xff] %v6017_v33 }
 0x53e   : > { %v7719_v43 = vsel %vm7713_vm13, %v7718_v38, %v5858_v27  ;;  %v5764_v36 = vadd.f32 %v9458_v45, %v5728_v13  ;;  %v7722_v9 = vcvt.f32.s32 %v5859_v55  ;;  %v7720_v0 = vand.u32 2147483647, %v5859_v55 }
 0x53f   : > { %v5922_v40 = vmul.f32 0.06666667, %v7719_v43  ;;  %v7725_v25 = vand.u32 2147483648, %v5859_v55 }
 0x540   : > { %v5796_v34 = vmax.f32 %v5764_v36, 0.0  ;;  %v7723_v53 = vcvt.s32.f32 %v7722_v9  ;;  %vm7721_vm14 = vcmp.lt.f32.partialorder %v7720_v0, 8388608.0  ;;  %v7171_v36 = vld [vmem:[%s7973_s26 + $0xc9] sm:$0xff]  ;;  %v9669_v9 = vpop.f32.mrf.mxu3 }
 0x541   : > { %v5986_v30 = vadd.f32 %v7169_v28, %v5922_v40  ;;  %v5637_v20 = vpop.f32.mrf.mxu1 }
 0x542   : > { %v5828_v18 = vmin.f32 %v5796_v34, 1.0  ;;  %v5693_v47 = vadd.f32 %v5637_v20, %v5459_v51  ;;  %v7724_v15 = vand.u32 2147483647, %v7723_v53  ;;  %v4993_v51 = vadd.f32 %v9629_v26, %v9382_v42 }
 0x543   : > { %v6018_v27 = vmax.f32 %v5986_v30, 0.0 }
 0x544   : > { %v5860_v5 = vmul.f32 15.0, %v5828_v18  ;;  %v5729_v31 = vmul.f32 %v9452_v7, %v5693_v47  ;;  %v7726_v29 = vor.u32 %v7725_v25, %v7724_v15  ;;  %v9675_v47 = vpop.f32.mrf.mxu0  ;;  %v9677_v52 = vpop.f32.mrf.mxu2  ;;  %v5228_v42 = vadd.f32 %v9637_v16, %v4993_v51 }
 0x545   : > { %6050 = vst [vmem:[%s9487_s9 + $0x68] sm:$0xff] %v6018_v27 }
 0x546   : > { %v7730_v6 = vcvt.f32.s32 %v5860_v5  ;;  %v5765_v35 = vadd.f32 %v9458_v45, %v5729_v31  ;;  %v7727_v3 = vsel %vm7721_vm14, %v7726_v29, %v5859_v55  ;;  %v7728_v54 = vand.u32 2147483647, %v5860_v5 }
 0x547   : > { %v5923_v17 = vmul.f32 0.06666667, %v7727_v3  ;;  %v7733_v2 = vand.u32 2147483648, %v5860_v5 }
 0x548   : > { %v7731_v19 = vcvt.s32.f32 %v7730_v6  ;;  %v5797_v23 = vmax.f32 %v5765_v35, 0.0  ;;  %vm7729_vm15 = vcmp.lt.f32.partialorder %v7728_v54, 8388608.0  ;;  %v7172_v35 = vld [vmem:[%s7973_s26 + $0xd9] sm:$0xff]  ;;  %v5184_v16 = vpop.f32.mrf.mxu3 }
 0x549   : > { %v5639_v33 = vpop.f32.mrf.mxu1  ;;  %v5987_v56 = vadd.f32 %v7170_v41, %v5923_v17  ;;  %v4994_v17 = vadd.f32 %v9646_v48, %v9388_v22 }
 0x54a   : > { %v7732_v44 = vand.u32 2147483647, %v7731_v19  ;;  %v5829_v38 = vmin.f32 %v5797_v23, 1.0  ;;  %v5694_v14 = vadd.f32 %v5639_v33, %v5460_v46  ;;  %v5462_v23 = vadd.f32 %v9642_v58, %v5228_v42 }
 0x54b   : > { %v6019_v13 = vmax.f32 %v5987_v56, 0.0 }
 0x54c   : > { %v7734_v55 = vor.u32 %v7733_v2, %v7732_v44  ;;  %v5861_v43 = vmul.f32 15.0, %v5829_v38  ;;  %v5730_v28 = vmul.f32 %v9452_v7, %v5694_v14  ;;  %v4951_v58 = vpop.f32.mrf.mxu2 }
 0x54d   : > { %6051 = vst [vmem:[%s9487_s9 + $0x70] sm:$0xff] %v6019_v13  ;;  %v5229_v13 = vadd.f32 %v9653_v60, %v4994_v17 }
 0x54e   : > { %v7735_v12 = vsel %vm7729_vm15, %v7734_v55, %v5860_v5  ;;  %v7738_v40 = vcvt.f32.s32 %v5861_v43  ;;  %v5766_v34 = vadd.f32 %v9458_v45, %v5730_v28  ;;  %v7736_v20 = vand.u32 2147483647, %v5861_v43  ;;  %v9688_v55 = vpop.f32.mrf.mxu0 }
 0x54f   : > { %v5924_v39 = vmul.f32 0.06666667, %v7735_v12  ;;  %v7741_v15 = vand.u32 2147483648, %v5861_v43 }
 0x550   : > { %v7739_v30 = vcvt.s32.f32 %v7738_v40  ;;  %v5798_v0 = vmax.f32 %v5766_v34, 0.0  ;;  %vm7737_vm0 = vcmp.lt.f32.partialorder %v7736_v20, 8388608.0 }
 0x551   : > { %v5988_v53 = vadd.f32 %v7171_v36, %v5924_v39  ;;  %v5642_v18 = vpop.f32.mrf.mxu1  ;;  %v4995_v36 = vadd.f32 %v9663_v21, %v9399_v57  ;;  %v7173_v39 = vld [vmem:[%s7973_s26 + $0xe1] sm:$0xff] }
 0x552   : > { %v7740_v27 = vand.u32 2147483647, %v7739_v30  ;;  %v5695_v25 = vadd.f32 %v5642_v18, %v5461_v59  ;;  %v5830_v31 = vmin.f32 %v5798_v0, 1.0  ;;  %v5463_v30 = vadd.f32 %v9660_v24, %v5229_v13  ;;  %v9713_v13 = vld [vmem:[%s9786_s6] ss:$0 sm:$0xff] }
 0x553   : > { %v6020_v5 = vmax.f32 %v5988_v53, 0.0 }
 0x554   : > { %v7742_v26 = vor.u32 %v7741_v15, %v7740_v27  ;;  %v5731_v29 = vmul.f32 %v9452_v7, %v5695_v25  ;;  %v5862_v49 = vmul.f32 15.0, %v5830_v31  ;;  %v5230_v25 = vadd.f32 %v9669_v9, %v4995_v36 }
 0x555   : > { %6052 = vst [vmem:[%s9487_s9 + $0x78] sm:$0xff] %v6020_v5  ;;  %v5186_v5 = vpop.f32.mrf.mxu3  ;;  %v4996_v9 = vadd.f32 %v9677_v52, %v9404_v62 }
 0x556   : > { %v7743_v6 = vsel %vm7737_vm0, %v7742_v26, %v5861_v43  ;;  %v5767_v37 = vadd.f32 %v9458_v45, %v5731_v29  ;;  %v7746_v41 = vcvt.f32.s32 %v5862_v49  ;;  %v7744_v33 = vand.u32 2147483647, %v5862_v49  ;;  %v9699_v26 = vpop.f32.mrf.mxu0  ;;  %v7174_v29 = vld [vmem:[%s7973_s26 + $0xf1] sm:$0xff] }
 0x557   : > { %v5925_v3 = vmul.f32 0.06666667, %v7743_v6  ;;  %v7749_v8 = vand.u32 2147483648, %v5862_v49  ;;  %v4954_v6 = vpop.f32.mrf.mxu2 }
 0x558   : > { %v5799_v19 = vmax.f32 %v5767_v37, 0.0  ;;  %v7747_v54 = vcvt.s32.f32 %v7746_v41  ;;  %vm7745_vm1 = vcmp.lt.f32.partialorder %v7744_v33, 8388608.0  ;;  %v5464_v41 = vadd.f32 %v9675_v47, %v5230_v25  ;;  %v7175_v47 = vld [vmem:[%s7973_s26 + $0xf9] sm:$0xff] }
 0x559   : > { %v5989_v46 = vadd.f32 %v7172_v35, %v5925_v3  ;;  %v5644_v2 = vpop.f32.mrf.mxu1  ;;  %v4998_v25 = vadd.f32 %v4954_v6, %v9415_v1 }
 0x55a   : > { %v5831_v56 = vmin.f32 %v5799_v19, 1.0  ;;  %v5696_v44 = vadd.f32 %v5644_v2, %v5462_v23  ;;  %v7748_v14 = vand.u32 2147483647, %v7747_v54 }
 0x55b   : > { %v6021_v38 = vmax.f32 %v5989_v46, 0.0 }
 0x55c   : > { %v5863_v22 = vmul.f32 15.0, %v5831_v56  ;;  %v5732_v48 = vmul.f32 %v9452_v7, %v5696_v44  ;;  %v7750_v43 = vor.u32 %v7749_v8, %v7748_v14 }
 0x55d   : > { %6053 = vst [vmem:[%s9487_s9 + $0x80] sm:$0xff] %v6021_v38  ;;  %v5231_v38 = vadd.f32 %v5184_v16, %v4996_v9  ;;  %v5189_v8 = vpop.f32.mrf.mxu3  ;;  %v4997_v16 = vadd.f32 %v4951_v58, %v9412_v32  ;;  %v9721_v32 = vld [vmem:[%s9785_s5] ss:$0 sm:$0xff] }
 0x55e   : > { %v7754_v28 = vcvt.f32.s32 %v5863_v22  ;;  %v5768_v12 = vadd.f32 %v9458_v45, %v5732_v48  ;;  %v7751_v40 = vsel %vm7745_vm1, %v7750_v43, %v5862_v49  ;;  %v7752_v59 = vand.u32 2147483647, %v5863_v22 }
 0x55f   : > { %v5926_v34 = vmul.f32 0.06666667, %v7751_v40  ;;  %v7757_v53 = vand.u32 2147483648, %v5863_v22  ;;  %v4956_v36 = vpop.f32.mrf.mxu2 }
 0x560   : > { %v7755_v51 = vcvt.s32.f32 %v7754_v28  ;;  %v5800_v60 = vmax.f32 %v5768_v12, 0.0  ;;  %vm7753_vm2 = vcmp.lt.f32.partialorder %v7752_v59, 8388608.0  ;;  %v5423_v28 = vpop.f32.mrf.mxu0 }
 0x561   : > { %v5647_v20 = vpop.f32.mrf.mxu1  ;;  %v5990_v0 = vadd.f32 %v7173_v39, %v5926_v34 }
 0x562   : > { %v7756_v18 = vand.u32 2147483647, %v7755_v51  ;;  %v5832_v27 = vmin.f32 %v5800_v60, 1.0  ;;  %v5697_v15 = vadd.f32 %v5647_v20, %v5463_v30 }
 0x563   : > { %v6022_v57 = vmax.f32 %v5990_v0, 0.0  ;;  %v5232_v0 = vadd.f32 %v5186_v5, %v4997_v16 }
 0x564   : > { %v7758_v21 = vor.u32 %v7757_v53, %v7756_v18  ;;  %v5864_v31 = vmul.f32 15.0, %v5832_v27  ;;  %v5733_v42 = vmul.f32 %v9452_v7, %v5697_v15 }
 0x565   : > { %6054 = vst [vmem:[%s9487_s9 + $0x88] sm:$0xff] %v6022_v57  ;;  %v5191_v57 = vpop.f32.mrf.mxu3 }
 0x566   : > { %v7759_v24 = vsel %vm7753_vm2, %v7758_v21, %v5863_v22  ;;  %v7762_v49 = vcvt.f32.s32 %v5864_v31  ;;  %v5769_v37 = vadd.f32 %v9458_v45, %v5733_v42  ;;  %v7760_v19 = vand.u32 2147483647, %v5864_v31 }
 0x567   : > { %v5927_v35 = vmul.f32 0.06666667, %v7759_v24  ;;  %v7765_v2 = vand.u32 2147483648, %v5864_v31  ;;  %v4959_v1 = vpop.f32.mrf.mxu2 }
 0x568   : > { %v7763_v3 = vcvt.s32.f32 %v7762_v49  ;;  %v5801_v23 = vmax.f32 %v5769_v37, 0.0  ;;  %vm7761_vm3 = vcmp.lt.f32.partialorder %v7760_v19, 8388608.0  ;;  %v5425_v9 = vpop.f32.mrf.mxu0 }
 0x569   : > { %v5991_v17 = vadd.f32 %v7174_v29, %v5927_v35  ;;  %v5649_v46 = vpop.f32.mrf.mxu1  ;;  %v5466_v29 = vadd.f32 %v9699_v26, %v5232_v0  ;;  %v5000_v0 = vadd.f32 %v4959_v1, %v9426_v50 }
 0x56a   : > { %v7764_v54 = vand.u32 2147483647, %v7763_v3  ;;  %v5698_v33 = vadd.f32 %v5649_v46, %v5464_v41  ;;  %v5833_v44 = vmin.f32 %v5801_v23, 1.0  ;;  %v5233_v23 = vadd.f32 %v5189_v8, %v4998_v25 }
 0x56b   : > { %v6023_v56 = vmax.f32 %v5991_v17, 0.0 }
 0x56c   : > { %v7766_v14 = vor.u32 %v7765_v2, %v7764_v54  ;;  %v5734_v45 = vmul.f32 %v9452_v7, %v5698_v33  ;;  %v5865_v62 = vmul.f32 15.0, %v5833_v44  ;;  %v5465_v7 = vadd.f32 %v9688_v55, %v5231_v38  ;;  %v7177_v33 = vld [vmem:[%s7973_s26 + $0x111] sm:$0xff] }
 0x56d   : > { %6055 = vst [vmem:[%s9487_s9 + $0x90] sm:$0xff] %v6023_v56  ;;  %v5194_v8 = vpop.f32.mrf.mxu3 }
 0x56e   : > { %v7767_v52 = vsel %vm7761_vm3, %v7766_v14, %v5864_v31  ;;  %v5770_v22 = vadd.f32 %v9713_v13, %v5734_v45  ;;  %v7770_v43 = vcvt.f32.s32 %v5865_v62  ;;  %v7768_v51 = vand.u32 2147483647, %v5865_v62  ;;  %v7176_v31 = vld [vmem:[%s7973_s26 + $0x109] sm:$0xff] }
 0x56f   : > { %v5928_v48 = vmul.f32 0.06666667, %v7767_v52  ;;  %v7773_v20 = vand.u32 2147483648, %v5865_v62  ;;  %v4999_v14 = vadd.f32 %v4956_v36, %v9423_v10  ;;  %v4961_v10 = vpop.f32.mrf.mxu2 }
 0x570   : > { %v5802_v12 = vmax.f32 %v5770_v22, 0.0  ;;  %v7771_v39 = vcvt.s32.f32 %v7770_v43  ;;  %vm7769_vm4 = vcmp.lt.f32.partialorder %v7768_v51, 8388608.0 }
 0x571   : > { %v5992_v40 = vadd.f32 %v7175_v47, %v5928_v48  ;;  %v5652_v34 = vpop.f32.mrf.mxu1 }
 0x572   : > { %v5834_v60 = vmin.f32 %v5802_v12, 1.0  ;;  %v5699_v30 = vadd.f32 %v5652_v34, %v5465_v7  ;;  %v7772_v53 = vand.u32 2147483647, %v7771_v39  ;;  %v5234_v39 = vadd.f32 %v5191_v57, %v4999_v14  ;;  %v5428_v34 = vpop.f32.mrf.mxu0 }
 0x573   : > { %v6024_v59 = vmax.f32 %v5992_v40, 0.0 }
 0x574   : > { %v5866_v18 = vmul.f32 15.0, %v5834_v60  ;;  %v5735_v55 = vmul.f32 %v9721_v32, %v5699_v30  ;;  %v7774_v58 = vor.u32 %v7773_v20, %v7772_v53  ;;  %v7178_v30 = vld [vmem:[%s7973_s26 + $0x121] sm:$0xff] }
 0x575   : > { %6056 = vst [vmem:[%s9487_s9 + $0x98] sm:$0xff] %v6024_v59 }
 0x576   : > { %v7778_v27 = vcvt.f32.s32 %v5866_v18  ;;  %v5771_v15 = vadd.f32 %v9713_v13, %v5735_v55  ;;  %v7775_v21 = vsel %vm7769_vm4, %v7774_v58, %v5865_v62  ;;  %v7776_v49 = vand.u32 2147483647, %v5866_v18 }
 0x577   : > { %v5929_v5 = vmul.f32 0.06666667, %v7775_v21  ;;  %v7781_v35 = vand.u32 2147483648, %v5866_v18  ;;  %v5467_v62 = vadd.f32 %v5423_v28, %v5233_v23  ;;  %v5468_v55 = vadd.f32 %v5425_v9, %v5234_v39  ;;  %v7179_v23 = vld [vmem:[%s7973_s26 + $0x129] sm:$0xff] }
 0x578   : > { %v7779_v42 = vcvt.s32.f32 %v7778_v27  ;;  %v5803_v24 = vmax.f32 %v5771_v15, 0.0  ;;  %vm7777_vm5 = vcmp.lt.f32.partialorder %v7776_v49, 8388608.0 }
 0x579   : > { %v5654_v37 = vpop.f32.mrf.mxu1  ;;  %v5993_v3 = vadd.f32 %v7176_v31, %v5929_v5  ;;  %v5196_v31 = vpop.f32.mrf.mxu3 }
 0x57a   : > { %v7780_v41 = vand.u32 2147483647, %v7779_v42  ;;  %v5835_v17 = vmin.f32 %v5803_v24, 1.0  ;;  %v5700_v19 = vadd.f32 %v5654_v37, %v5466_v29  ;;  %v5235_v29 = vadd.f32 %v5194_v8, %v5000_v0  ;;  %v5430_v37 = vpop.f32.mrf.mxu0 }
 0x57b   : > { %v6025_v6 = vmax.f32 %v5993_v3, 0.0 }
 0x57c   : > { %v7782_v46 = vor.u32 %v7781_v35, %v7780_v41  ;;  %v5867_v54 = vmul.f32 15.0, %v5835_v17  ;;  %v5736_v2 = vmul.f32 %v9721_v32, %v5700_v19  ;;  %v5001_v41 = vadd.f32 %v4961_v10, %v9433_v61  ;;  %v4964_v17 = vpop.f32.mrf.mxu2 }
 0x57d   : > { %6057 = vst [vmem:[%s9487_s9 + $0xa0] sm:$0xff] %v6025_v6 }
 0x57e   : > { %v7783_v26 = vsel %vm7777_vm5, %v7782_v46, %v5866_v18  ;;  %v7786_v56 = vcvt.f32.s32 %v5867_v54  ;;  %v5772_v38 = vadd.f32 %v9713_v13, %v5736_v2  ;;  %v7784_v47 = vand.u32 2147483647, %v5867_v54 }
 0x57f   : > { %v5930_v44 = vmul.f32 0.06666667, %v7783_v26  ;;  %v7789_v16 = vand.u32 2147483648, %v5867_v54 }
 0x580   : > { %v7787_v45 = vcvt.s32.f32 %v7786_v56  ;;  %v5804_v22 = vmax.f32 %v5772_v38, 0.0  ;;  %vm7785_vm6 = vcmp.lt.f32.partialorder %v7784_v47, 8388608.0 }
 0x581   : > { %v5994_v52 = vadd.f32 %v7177_v33, %v5930_v44  ;;  %v5657_v48 = vpop.f32.mrf.mxu1  ;;  %v5199_v47 = vpop.f32.mrf.mxu3 }
 0x582   : > { %v7788_v43 = vand.u32 2147483647, %v7787_v45  ;;  %v5701_v12 = vadd.f32 %v5657_v48, %v5467_v62  ;;  %v5836_v40 = vmin.f32 %v5804_v22, 1.0  ;;  %v5236_v45 = vadd.f32 %v5196_v31, %v5001_v41  ;;  %v7180_v48 = vld [vmem:[%s7973_s26 + $0x139] sm:$0xff] }
 0x583   : > { %v6026_v7 = vmax.f32 %v5994_v52, 0.0 }
 0x584   : > { %v7790_v51 = vor.u32 %v7789_v16, %v7788_v43  ;;  %v5737_v60 = vmul.f32 %v9721_v32, %v5701_v12  ;;  %v5868_v28 = vmul.f32 15.0, %v5836_v40  ;;  %v5002_v40 = vadd.f32 %v4964_v17, %v9436_v11 }
 0x585   : > { %6058 = vst [vmem:[%s9487_s9 + $0xa8] sm:$0xff] %v6026_v7  ;;  %v5433_v7 = vpop.f32.mrf.mxu0 }
 0x586   : > { %v7791_v36 = vsel %vm7785_vm6, %v7790_v51, %v5867_v54  ;;  %v5773_v59 = vadd.f32 %v9713_v13, %v5737_v60  ;;  %v7794_v20 = vcvt.f32.s32 %v5868_v28  ;;  %v7792_v25 = vand.u32 2147483647, %v5868_v28  ;;  %v4966_v51 = vpop.f32.mrf.mxu2 }
 0x587   : > { %v5931_v53 = vmul.f32 0.06666667, %v7791_v36  ;;  %v7797_v24 = vand.u32 2147483648, %v5868_v28  ;;  %v5469_v54 = vadd.f32 %v5428_v34, %v5235_v29  ;;  %v5470_v34 = vadd.f32 %v5430_v37, %v5236_v45 }
 0x588   : > { %v5805_v18 = vmax.f32 %v5773_v59, 0.0  ;;  %v7795_v27 = vcvt.s32.f32 %v7794_v20  ;;  %vm7793_vm7 = vcmp.lt.f32.partialorder %v7792_v25, 8388608.0 }
 0x589   : > { %v5995_v58 = vadd.f32 %v7178_v30, %v5931_v53  ;;  %v5659_v15 = vpop.f32.mrf.mxu1 }
 0x58a   : > { %v5837_v57 = vmin.f32 %v5805_v18, 1.0  ;;  %v5702_v21 = vadd.f32 %v5659_v15, %v5468_v55  ;;  %v7796_v42 = vand.u32 2147483647, %v7795_v27  ;;  %v5237_v18 = vadd.f32 %v5199_v47, %v5002_v40  ;;  %v7181_v15 = vld [vmem:[%s7973_s26 + $0x141] sm:$0xff] }
 0x58b   : > { %v6027_v5 = vmax.f32 %v5995_v58, 0.0 }
 0x58c   : > { %v5869_v49 = vmul.f32 15.0, %v5837_v57  ;;  %v5738_v35 = vmul.f32 %v9721_v32, %v5702_v21  ;;  %v7798_v50 = vor.u32 %v7797_v24, %v7796_v42  ;;  %v5201_v57 = vpop.f32.mrf.mxu3  ;;  %v5471_v24 = vadd.f32 %v5433_v7, %v5237_v18 }
 0x58d   : > { %6059 = vst [vmem:[%s9487_s9 + $0xb0] sm:$0xff] %v6027_v5  ;;  %v5003_v5 = vadd.f32 %v4966_v51, %v9440_v63 }
 0x58e   : > { %v7802_v9 = vcvt.f32.s32 %v5869_v49  ;;  %v5774_v3 = vadd.f32 %v9713_v13, %v5738_v35  ;;  %v7799_v19 = vsel %vm7793_vm7, %v7798_v50, %v5868_v28  ;;  %v7800_v2 = vand.u32 2147483647, %v5869_v49  ;;  %v4969_v41 = vpop.f32.mrf.mxu2 }
 0x58f   : > { %v5932_v1 = vmul.f32 0.06666667, %v7799_v19  ;;  %v7805_v26 = vand.u32 2147483648, %v5869_v49 }
 0x590   : > { %v7803_v6 = vcvt.s32.f32 %v7802_v9  ;;  %v5806_v46 = vmax.f32 %v5774_v3, 0.0  ;;  %vm7801_vm8 = vcmp.lt.f32.partialorder %v7800_v2, 8388608.0  ;;  %v5435_v3 = vpop.f32.mrf.mxu0 }
 0x591   : > { %v5662_v33 = vpop.f32.mrf.mxu1  ;;  %v5996_v56 = vadd.f32 %v7179_v23, %v5932_v1  ;;  %v5238_v1 = vadd.f32 %v5201_v57, %v5003_v5 }
 0x592   : > { %v7804_v44 = vand.u32 2147483647, %v7803_v6  ;;  %v5838_v38 = vmin.f32 %v5806_v46, 1.0  ;;  %v5703_v14 = vadd.f32 %v5662_v33, %v5469_v54 }
 0x593   : > { %v6028_v62 = vmax.f32 %v5996_v56, 0.0 }
 0x594   : > { %v7806_v8 = vor.u32 %v7805_v26, %v7804_v44  ;;  %v5870_v61 = vmul.f32 15.0, %v5838_v38  ;;  %v5739_v52 = vmul.f32 %v9721_v32, %v5703_v14  ;;  %v5004_v26 = vadd.f32 %v4969_v41, %v9443_v4  ;;  %v5204_v33 = vpop.f32.mrf.mxu3  ;;  %v7182_v44 = vld [vmem:[%s7973_s26 + $0x151] sm:$0xff] }
 0x595   : > { %6060 = vst [vmem:[%s9487_s9 + $0xb8] sm:$0xff] %v6028_v62  ;;  %v5472_v62 = vadd.f32 %v5435_v3, %v5238_v1 }
 0x596   : > { %v7807_v22 = vsel %vm7801_vm8, %v7806_v8, %v5869_v49  ;;  %v7810_v43 = vcvt.f32.s32 %v5870_v61  ;;  %v5775_v12 = vadd.f32 %v9713_v13, %v5739_v52  ;;  %v7808_v10 = vand.u32 2147483647, %v5870_v61 }
 0x597   : > { %v5933_v16 = vmul.f32 0.06666667, %v7807_v22  ;;  %v7813_v59 = vand.u32 2147483648, %v5870_v61 }
 0x598   : > { %v7811_v39 = vcvt.s32.f32 %v7810_v43  ;;  %v5807_v28 = vmax.f32 %v5775_v12, 0.0  ;;  %vm7809_vm9 = vcmp.lt.f32.partialorder %v7808_v10, 8388608.0  ;;  %v5438_v12 = vpop.f32.mrf.mxu0 }
 0x599   : > { %v5997_v60 = vadd.f32 %v7180_v48, %v5933_v16  ;;  %v5664_v36 = vpop.f32.mrf.mxu1  ;;  %v5239_v16 = vadd.f32 %v5204_v33, %v5004_v26 }
 0x59a   : > { %v7812_v30 = vand.u32 2147483647, %v7811_v39  ;;  %v5704_v53 = vadd.f32 %v5664_v36, %v5470_v34  ;;  %v5839_v0 = vmin.f32 %v5807_v28, 1.0  ;;  %v4971_v34 = vpop.f32.mrf.mxu2 }
 0x59b   : > { %v6029_v20 = vmax.f32 %v5997_v60, 0.0  ;;  %v7183_v60 = vld [vmem:[%s7973_s26 + $0x159] sm:$0xff] }
 0x59c   : > { %v7814_v55 = vor.u32 %v7813_v59, %v7812_v30  ;;  %v5740_v58 = vmul.f32 %v9721_v32, %v5704_v53  ;;  %v5871_v11 = vmul.f32 15.0, %v5839_v0  ;;  %v5473_v30 = vadd.f32 %v5438_v12, %v5239_v16  ;;  %v9805_v59 = vld [vmem:[#allocation3_spill] sm:$0xff]  ;;  %v5206_v0 = vpop.f32.mrf.mxu3 }
 0x59d   : > { %6061 = vst [vmem:[%s9487_s9 + $0xc0] sm:$0xff] %v6029_v20  ;;  %v5005_v53 = vadd.f32 %v4971_v34, %v9805_v59  ;;  %v7187_v59 = vld [vmem:[%s7973_s26 + $0x189] sm:$0xff] }
 0x59e   : > { %v7815_v27 = vsel %vm7809_vm9, %v7814_v55, %v5870_v61  ;;  %v5776_v25 = vadd.f32 %v9713_v13, %v5740_v58  ;;  %v7818_v31 = vcvt.f32.s32 %v5871_v11  ;;  %v7816_v50 = vand.u32 2147483647, %v5871_v11 }
 0x59f   : > { %v5934_v21 = vmul.f32 0.06666667, %v7815_v27  ;;  %v7821_v23 = vand.u32 2147483648, %v5871_v11 }
 0x5a0   : > { %v5808_v42 = vmax.f32 %v5776_v25, 0.0  ;;  %v7819_v49 = vcvt.s32.f32 %v7818_v31  ;;  %vm7817_vm10 = vcmp.lt.f32.partialorder %v7816_v50, 8388608.0  ;;  %v5240_v31 = vadd.f32 %v5206_v0, %v5005_v53 }
 0x5a1   : > { %v5998_v29 = vadd.f32 %v7181_v15, %v5934_v21  ;;  %v5667_v35 = vpop.f32.mrf.mxu1 }
 0x5a2   : > { %v5840_v37 = vmin.f32 %v5808_v42, 1.0  ;;  %v5705_v9 = vadd.f32 %v5667_v35, %v5471_v24  ;;  %v7820_v19 = vand.u32 2147483647, %v7819_v49  ;;  %v5440_v24 = vpop.f32.mrf.mxu0  ;;  %v7184_v35 = vld [vmem:[%s7973_s26 + $0x169] sm:$0xff] }
 0x5a3   : > { %v6030_v17 = vmax.f32 %v5998_v29, 0.0  ;;  %v5474_v3 = vadd.f32 %v5440_v24, %v5240_v31 }
 0x5a4   : > { %v5872_v6 = vmul.f32 15.0, %v5840_v37  ;;  %v5741_v46 = vmul.f32 %v9721_v32, %v5705_v9  ;;  %v7822_v63 = vor.u32 %v7821_v23, %v7820_v19 }
 0x5a5   : > { %6062 = vst [vmem:[%s9487_s9 + $0xc8] sm:$0xff] %v6030_v17 }
 0x5a6   : > { %v7826_v54 = vcvt.f32.s32 %v5872_v6  ;;  %v5777_v2 = vadd.f32 %v9713_v13, %v5741_v46  ;;  %v7823_v56 = vsel %vm7817_vm10, %v7822_v63, %v5871_v11  ;;  %v7824_v8 = vand.u32 2147483647, %v5872_v6 }
 0x5a7   : > { %v5935_v38 = vmul.f32 0.06666667, %v7823_v56  ;;  %v7829_v61 = vand.u32 2147483648, %v5872_v6 }
 0x5a8   : > { %v7827_v14 = vcvt.s32.f32 %v7826_v54  ;;  %v5809_v45 = vmax.f32 %v5777_v2, 0.0  ;;  %vm7825_vm11 = vcmp.lt.f32.partialorder %v7824_v8, 8388608.0 }
 0x5a9   : > { %v5669_v52 = vpop.f32.mrf.mxu1  ;;  %v5999_v47 = vadd.f32 %v7182_v44, %v5935_v38 }
 0x5aa   : > { %v7828_v22 = vand.u32 2147483647, %v7827_v14  ;;  %v5841_v48 = vmin.f32 %v5809_v45, 1.0  ;;  %v5706_v43 = vadd.f32 %v5669_v52, %v5472_v62  ;;  %v7185_v45 = vld [vmem:[%s7973_s26 + $0x171] sm:$0xff] }
 0x5ab   : > { %v6031_v7 = vmax.f32 %v5999_v47, 0.0 }
 0x5ac   : > { %v7830_v4 = vor.u32 %v7829_v61, %v7828_v22  ;;  %v5873_v40 = vmul.f32 15.0, %v5841_v48  ;;  %v5742_v39 = vmul.f32 %v9721_v32, %v5706_v43 }
 0x5ad   : > { %6063 = vst [vmem:[%s9487_s9 + $0xd0] sm:$0xff] %v6031_v7 }
 0x5ae   : > { %v7831_v51 = vsel %vm7825_vm11, %v7830_v4, %v5872_v6  ;;  %v7834_v10 = vcvt.f32.s32 %v5873_v40  ;;  %v5778_v36 = vadd.f32 %v9713_v13, %v5742_v39  ;;  %v7832_v55 = vand.u32 2147483647, %v5873_v40 }
 0x5af   : > { %v5936_v28 = vmul.f32 0.06666667, %v7831_v51  ;;  %v7837_v15 = vand.u32 2147483648, %v5873_v40 }
 0x5b0   : > { %v7835_v20 = vcvt.s32.f32 %v7834_v10  ;;  %v5810_v58 = vmax.f32 %v5778_v36, 0.0  ;;  %vm7833_vm12 = vcmp.lt.f32.partialorder %v7832_v55, 8388608.0 }
 0x5b1   : > { %v6000_v18 = vadd.f32 %v7183_v60, %v5936_v28  ;;  %v5672_v11 = vpop.f32.mrf.mxu1 }
 0x5b2   : > { %v7836_v27 = vand.u32 2147483647, %v7835_v20  ;;  %v5707_v25 = vadd.f32 %v5672_v11, %v5473_v30  ;;  %v5842_v21 = vmin.f32 %v5810_v58, 1.0 }
 0x5b3   : > { %v6032_v57 = vmax.f32 %v6000_v18, 0.0 }
 0x5b4   : > { %v7838_v5 = vor.u32 %v7837_v15, %v7836_v27  ;;  %v5743_v42 = vmul.f32 %v9721_v32, %v5707_v25  ;;  %v5874_v29 = vmul.f32 15.0, %v5842_v21 }
 0x5b5   : > { %6064 = vst [vmem:[%s9487_s9 + $0xd8] sm:$0xff] %v6032_v57 }
 0x5b6   : > { %v7839_v49 = vsel %vm7833_vm12, %v7838_v5, %v5873_v40  ;;  %v5779_v50 = vadd.f32 %v9713_v13, %v5743_v42  ;;  %v7842_v9 = vcvt.f32.s32 %v5874_v29  ;;  %v7840_v1 = vand.u32 2147483647, %v5874_v29 }
 0x5b7   : > { %v5937_v37 = vmul.f32 0.06666667, %v7839_v49  ;;  %v7845_v2 = vand.u32 2147483648, %v5874_v29 }
 0x5b8   : > { %v5811_v41 = vmax.f32 %v5779_v50, 0.0  ;;  %v7843_v19 = vcvt.s32.f32 %v7842_v9  ;;  %vm7841_vm13 = vcmp.lt.f32.partialorder %v7840_v1, 8388608.0 }
 0x5b9   : > { %v6001_v17 = vadd.f32 %v7184_v35, %v5937_v37  ;;  %v5674_v23 = vpop.f32.mrf.mxu1 }
 0x5ba   : > { %v5843_v6 = vmin.f32 %v5811_v41, 1.0  ;;  %v5708_v46 = vadd.f32 %v5674_v23, %v5474_v3  ;;  %v7844_v54 = vand.u32 2147483647, %v7843_v19 }
 0x5bb   : > { %v6033_v63 = vmax.f32 %v6001_v17, 0.0 }
 0x5bc   : > { %v5875_v26 = vmul.f32 15.0, %v5843_v6  ;;  %v5744_v33 = vmul.f32 %v9721_v32, %v5708_v46  ;;  %v7846_v56 = vor.u32 %v7845_v2, %v7844_v54 }
 0x5bd   : > { %6065 = vst [vmem:[%s9487_s9 + $0xe0] sm:$0xff] %v6033_v63 }
 0x5be   : > { %v7850_v44 = vcvt.f32.s32 %v5875_v26  ;;  %v5780_v38 = vadd.f32 %v9713_v13, %v5744_v33  ;;  %v7847_v14 = vsel %vm7841_vm13, %v7846_v56, %v5874_v29  ;;  %v7848_v52 = vand.u32 2147483647, %v5875_v26  ;;  %v7186_v13 = vld [vmem:[%s7973_s26 + $0x181] sm:$0xff] }
 0x5bf   : > { %v5938_v62 = vmul.f32 0.06666667, %v7847_v14  ;;  %v7853_v48 = vand.u32 2147483648, %v5875_v26 }
 0x5c0   : > { %v7851_v8 = vcvt.s32.f32 %v7850_v44  ;;  %v5812_v61 = vmax.f32 %v5780_v38, 0.0  ;;  %vm7849_vm14 = vcmp.lt.f32.partialorder %v7848_v52, 8388608.0 }
 0x5c1   : > { %v6002_v47 = vadd.f32 %v7185_v45, %v5938_v62 }
 0x5c2   : > { %v7852_v22 = vand.u32 2147483647, %v7851_v8  ;;  %v5844_v43 = vmin.f32 %v5812_v61, 1.0 }
 0x5c3   : > { %v6034_v16 = vmax.f32 %v6002_v47, 0.0 }
 0x5c4   : > { %v7854_v32 = vor.u32 %v7853_v48, %v7852_v22  ;;  %v5876_v12 = vmul.f32 15.0, %v5844_v43 }
 0x5c5   : > { %6066 = vst [vmem:[%s9487_s9 + $0xe8] sm:$0xff] %v6034_v16 }
 0x5c6   : > { %v7855_v7 = vsel %vm7849_vm14, %v7854_v32, %v5875_v26  ;;  %v7858_v4 = vcvt.f32.s32 %v5876_v12  ;;  %v7856_v51 = vand.u32 2147483647, %v5876_v12  ;;  %v7861_v10 = vand.u32 2147483648, %v5876_v12 }
 0x5c7   : > { %v5939_v40 = vmul.f32 0.06666667, %v7855_v7 }
 0x5c8   : > { %v7859_v39 = vcvt.s32.f32 %v7858_v4  ;;  %vm7857_vm15 = vcmp.lt.f32.partialorder %v7856_v51, 8388608.0 }
 0x5c9   : > { %v6003_v34 = vadd.f32 %v7186_v13, %v5939_v40 }
 0x5ca   : > { %v7860_v60 = vand.u32 2147483647, %v7859_v39 }
 0x5cb   : > { %v6035_v28 = vmax.f32 %v6003_v34, 0.0 }
 0x5cc   : > { %v7862_v36 = vor.u32 %v7861_v10, %v7860_v60 }
 0x5cd   : > { %6067 = vst [vmem:[%s9487_s9 + $0xf0] sm:$0xff] %v6035_v28 }
 0x5ce   : > { %v7863_v30 = vsel %vm7857_vm15, %v7862_v36, %v5876_v12 }
 0x5cf   : > { %v5940_v53 = vmul.f32 0.06666667, %v7863_v30 }
 0x5d1   : > { %v6004_v20 = vadd.f32 %v7187_v59, %v5940_v53 }
 0x5d3   : > { %v6036_v0 = vmax.f32 %v6004_v20, 0.0 }
 0x5d5   : > { %6068 = vst [vmem:[%s9487_s9 + $0xf8] sm:$0xff] %v6036_v0 }
 0x5d6 PF: > { %s17_s24 = sadd.s32 1, %s7888_s24  }
 0x5d7   : > { %p14_p4 = scmp.ge.s32.totalorder %s17_s24, 4  }
 0x5d9   :  { %16 = sbr.rel (!%p14_p4) target bundleno = 1 (0x1), region = 98 }

</bundles_post_ra>
